<compile_context>
chip_gen: v7x
topology: tpu7x:2x2x1
jax: 0.10.0
libtpu: 0.0.40
codegen_flags: <defaults>
</compile_context>

<pallas_src>
import functools

import jax
import jax.numpy as jnp
from jax.experimental import pallas as pl
from jax.experimental.pallas import tpu as pltpu


def _cls_head_kernel(x_ref, w1_ref, b1_ref, w2_ref, b2_ref,
                     w3_ref, b3_ref, w4_ref, b4_ref, out_ref, acc_ref,
                     *, inv_seq_len):
    s = pl.program_id(1)

    @pl.when(s == 0)
    def _():
        acc_ref[...] = jnp.zeros_like(acc_ref)

    # Partial sum of this (Bt, St, H) seq tile into the f32 accumulator.
    # (Cross-sublane reduce; hidden under the x DMA per the roofline.
    # TODO(synk): only restructure to a (Bt, 8, H) elementwise accumulator if a
    # trace ever shows this reduce on the critical path.)
    acc_ref[...] += jnp.sum(x_ref[...].astype(jnp.float32), axis=1)

    @pl.when(s == pl.num_programs(1) - 1)
    def _():
        # model_output = last_hidden_state.mean(dim=1).  Zero-padded seq rows
        # contribute nothing and inv_seq_len uses the true S, so this is exact.
        pooled = acc_ref[...] * inv_seq_len
        cdt = w1_ref.dtype  # f32 weights -> all-f32 MLP, f32 accumulation

        # fc1 + (dropout == identity in eval) + relu
        h = jnp.dot(pooled.astype(cdt), w1_ref[...],
                    preferred_element_type=jnp.float32) + b1_ref[...]
        h = jnp.maximum(h, 0.0)
        # fc2 + relu
        h = jnp.dot(h.astype(cdt), w2_ref[...],
                    preferred_element_type=jnp.float32) + b2_ref[...]
        h = jnp.maximum(h, 0.0)
        # fc3 + relu
        h = jnp.dot(h.astype(cdt), w3_ref[...],
                    preferred_element_type=jnp.float32) + b3_ref[...]
        h = jnp.maximum(h, 0.0)
        # fc4 -> logits (Bt, num_classes)
        logits = jnp.dot(h.astype(cdt), w4_ref[...],
                         preferred_element_type=jnp.float32) + b4_ref[...]

        # log_softmax over classes (dim=1), numerically stable.  C=3 is written
        # once per batch tile -- not worth padding to a lane-dense 128.
        m = jnp.max(logits, axis=-1, keepdims=True)
        z = logits - m
        lse = jnp.log(jnp.sum(jnp.exp(z), axis=-1, keepdims=True))
        out_ref[...] = (z - lse).astype(out_ref.dtype)


def _round_up(n, m):
    return ((n + m - 1) // m) * m


def _pick_divisor_tile(n, target):
    """Largest multiple-of-8 divisor of n that is <= target (or n itself when
    n <= target).  Returns None when no aligned divisor exists; the caller
    zero-pads instead of falling back to a pathological full-dimension tile."""
    if n <= target:
        return n
    for t in range(target - target % 8, 7, -8):
        if n % t == 0:
            return t
    return None


def _tpu_vmem_capacity_bytes():
    """Physical per-core VMEM; conservative 64 MiB (v7x-sized) fallback."""
    try:
        return int(pltpu.get_tpu_info().vmem_capacity_bytes)
    except Exception:
        return 64 << 20


def _probe_pipeline_mode():
    """True iff this JAX build supports BlockSpec(pipeline_mode=pl.Buffered)."""
    try:
        pl.BlockSpec((8, 128), lambda i: (0, 0), pipeline_mode=pl.Buffered(1))
        return True
    except Exception:
        return False


_HAS_PIPELINE_MODE = _probe_pipeline_mode()


def _weight_spec(arr, single_buffer):
    """Resident weight/bias: constant index_map -> DMA'd once, stays in VMEM.
    When supported, single-buffer it (pl.Buffered(1)) so no dead double-buffer
    VMEM is held for an array that is never re-fetched."""
    idx = lambda i, s, _nd=arr.ndim: (0,) * _nd
    if single_buffer:
        return pl.BlockSpec(arr.shape, idx, pipeline_mode=pl.Buffered(1))
    return pl.BlockSpec(arr.shape, idx)


@functools.partial(jax.jit, static_argnames=("batch_tile", "seq_tile",
                                             "single_buffer_weights"))
def _simple_cls_forward(last_hidden_state, w1, b1, w2, b2, w3, b3, w4, b4, *,
                        batch_tile, seq_tile, single_buffer_weights):
    B, S, H = last_hidden_state.shape
    C = w4.shape[1]
    x = last_hidden_state
    x_bytes = x.dtype.itemsize
    params = (w1, b1, w2, b2, w3, b3, w4, b4)
    param_bytes = sum(int(a.size) * a.dtype.itemsize for a in params)

    single_buffer = bool(single_buffer_weights) and _HAS_PIPELINE_MODE
    resident_param_bytes = param_bytes if single_buffer else 2 * param_bytes

    vmem_cap = _tpu_vmem_capacity_bytes()
    big_vmem = vmem_cap >= (100 << 20)   # v5e / v6e: 128 MiB physical VMEM
    headroom = 8 << 20                   # always leave >= 8 MiB under the cap

    # --- batch tile (grown last: bigger Bt only multiplies strided DMA runs).
    batch_target = batch_tile
    if not big_vmem and 8 < B <= 2 * batch_tile:
        # Small-VMEM / dual-TensorCore chips (v7x): give the "parallel" batch
        # axis >= 2 grid steps so both cores get work.
        batch_target = min(batch_tile, _round_up(pl.cdiv(B, 2), 8))
    Bt = _pick_divisor_tile(B, batch_target)
    B_pad = B
    if Bt is None:
        Bt = 8                           # minimal aligned tile; pad remainder
        B_pad = _round_up(B, Bt)

    # --- seq tile (grown first: each +8 of St adds a contiguous St*H*itemsize
    # run per batch row to every DMA descriptor).  Budget = VMEM capacity minus
    # headroom, resident params, accumulator/output blocks and slack.
    misc_bytes = Bt * H * 4 + 2 * Bt * max(C, 128) * 4 + (2 << 20)
    x_budget = vmem_cap - headroom - resident_param_bytes - misc_bytes
    st_budget = max(8, (x_budget // (2 * Bt * H * x_bytes)) // 8 * 8)
    st_cap = 256 if big_vmem else seq_tile   # v5e/v6e: big tiles; v7x: safe 64
    seq_target = int(max(8, min(st_cap, st_budget)))
    St = _pick_divisor_tile(S, seq_target)
    S_pad = S
    if St is None:
        St = max(8, seq_target - seq_target % 8)
        S_pad = _round_up(S, St)         # zero-pad seq: exact for the mean

    if (B_pad, S_pad) != (B, S):
        x = jnp.pad(x, ((0, B_pad - B), (0, S_pad - S), (0, 0)))

    grid = (B_pad // Bt, S_pad // St)

    vmem_need = 2 * Bt * St * H * x_bytes + resident_param_bytes + misc_bytes
    vmem_limit = int(min(max(vmem_need, 32 << 20), vmem_cap - headroom))

    cost = pl.CostEstimate(
        flops=2 * B * (H * 1024 + 1024 * 512 + 512 * 256 + 256 * C)
              + B_pad * S_pad * H,
        transcendentals=B * C,
        bytes_accessed=B_pad * S_pad * H * x_bytes + param_bytes + B_pad * C * 4,
    )

    kernel = functools.partial(_cls_head_kernel, inv_seq_len=1.0 / S)

    out = pl.pallas_call(
        kernel,
        out_shape=jax.ShapeDtypeStruct((B_pad, C), jnp.float32),
        grid_spec=pltpu.PrefetchScalarGridSpec(
            num_scalar_prefetch=0,
            grid=grid,
            in_specs=[
                # Streaming x: default double-buffering.  (Only raise to
                # pl.Buffered(3) if a trace shows DMA gaps at batch-tile
                # boundaries -- the finalize MLP is far shorter than one tile
                # DMA, so 2 buffers should already hide it.)
                pl.BlockSpec((Bt, St, H), lambda i, s: (i, s, 0)),
            ] + [_weight_spec(a, single_buffer) for a in params],
            out_specs=pl.BlockSpec((Bt, C), lambda i, s: (i, 0)),
            scratch_shapes=[pltpu.VMEM((Bt, H), jnp.float32)],
        ),
        compiler_params=pltpu.CompilerParams(
            # TODO(synk): on v7x, pltpu.CORE_PARALLEL on the batch axis may
            # shard the two TensorCores more aggressively than "parallel";
            # kept as "parallel" until verified on hardware.
            dimension_semantics=("parallel", "arbitrary"),
            vmem_limit_bytes=vmem_limit,
        ),
        cost_estimate=cost,
    )(x, *params)

    return out[:B] if B_pad != B else out


def simple_cls_forward(last_hidden_state, *params, batch_tile=128, seq_tile=64):
    """Pallas forward of the SimpleCLSModel head (distilbert mean-pool branch).

    Tries single-buffered resident weights first; falls back to the default
    double-buffered specs if this JAX/Mosaic build rejects pl.Buffered(1)."""
    if _HAS_PIPELINE_MODE:
        try:
            return _simple_cls_forward(last_hidden_state, *params,
                                       batch_tile=batch_tile, seq_tile=seq_tile,
                                       single_buffer_weights=True)
        except Exception:
            pass
    return _simple_cls_forward(last_hidden_state, *params,
                               batch_tile=batch_tile, seq_tile=seq_tile,
                               single_buffer_weights=False)


def init_params(key, hidden_size=768, num_classes=3):
    """PyTorch-nn.Linear-style init (uniform +/- 1/sqrt(fan_in)), f32 weights.

    Weights are stored (in, out) -- the transpose of torch's (out, in) -- so
    the kernel computes y = x @ W + b; biases are stored (1, out)."""
    dims = [(hidden_size, 1024), (1024, 512), (512, 256), (256, num_classes)]
    params = []
    for fan_in, fan_out in dims:
        key, kw, kb = jax.random.split(key, 3)
        bound = 1.0 / jnp.sqrt(jnp.float32(fan_in))
        w = jax.random.uniform(kw, (fan_in, fan_out), jnp.float32, -bound, bound)
        b = jax.random.uniform(kb, (1, fan_out), jnp.float32, -bound, bound)
        params += [w, b]
    return params


def reference_forward(x, w1, b1, w2, b2, w3, b3, w4, b4):
    """Plain-JAX reference mirroring the kernel's numerics."""
    pooled = jnp.mean(x.astype(jnp.float32), axis=1)
    cdt = w1.dtype
    h = jnp.maximum(jnp.dot(pooled.astype(cdt), w1,
                            preferred_element_type=jnp.float32) + b1, 0.0)
    h = jnp.maximum(jnp.dot(h.astype(cdt), w2,
                            preferred_element_type=jnp.float32) + b2, 0.0)
    h = jnp.maximum(jnp.dot(h.astype(cdt), w3,
                            preferred_element_type=jnp.float32) + b3, 0.0)
    logits = jnp.dot(h.astype(cdt), w4,
                     preferred_element_type=jnp.float32) + b4
    return jax.nn.log_softmax(logits, axis=1)


if __name__ == "__main__":
    B, S, H, NUM_CLASSES = 2, 8, 768, 3   # distilbert hidden size = 768

    key = jax.random.PRNGKey(0)
    key, kx = jax.random.split(key)
    # Synthetic backbone output (last_hidden_state), layout (B, S, H).  bf16
    # streaming halves the dominant HBM traffic; f32 inputs also work.
    x = jax.random.normal(kx, (B, S, H), jnp.float32).astype(jnp.bfloat16)

    params = init_params(key, hidden_size=H, num_classes=NUM_CLASSES)

    out = simple_cls_forward(x, *params)
    out = jax.block_until_ready(out)

    ref = reference_forward(x, *params)
    assert out.shape == (B, NUM_CLASSES), out.shape
    assert jnp.allclose(out, ref, atol=1e-4, rtol=1e-4), "mismatch vs reference"
    # log_softmax rows should (approximately) exp-sum to 1
    assert jnp.allclose(jnp.sum(jnp.exp(out), axis=1), 1.0, atol=1e-4)

    print("KERNEL_OK")
</pallas_src>

<mosaic_0001>
module attributes {stable_mosaic.version = 11 : i64} {
  func.func @_cls_head_kernel(%arg0: i32, %arg1: i32, %arg2: memref<2x8x768xbf16, #tpu.memory_space<vmem>>, %arg3: memref<768x1024xf32, #tpu.memory_space<vmem>>, %arg4: memref<1x1024xf32, #tpu.memory_space<vmem>>, %arg5: memref<1024x512xf32, #tpu.memory_space<vmem>>, %arg6: memref<1x512xf32, #tpu.memory_space<vmem>>, %arg7: memref<512x256xf32, #tpu.memory_space<vmem>>, %arg8: memref<1x256xf32, #tpu.memory_space<vmem>>, %arg9: memref<256x3xf32, #tpu.memory_space<vmem>>, %arg10: memref<1x3xf32, #tpu.memory_space<vmem>>, %arg11: memref<2x3xf32, #tpu.memory_space<vmem>>, %arg12: memref<2x768xf32, #tpu.memory_space<vmem>>) attributes {dimension_semantics = [#tpu.dimension_semantics<parallel>, #tpu.dimension_semantics<arbitrary>], iteration_bounds = array<i64: 1, 1>, scalar_prefetch = 0 : i64, scratch_operands = 1 : i64, tpu.core_type = #tpu.core_type<tc>, window_params = [{transform_indices = @transform_0, window_bounds = array<i64: 2, 8, 768>}, {pipeline_mode = #tpu.pipeline_mode<synchronous>, transform_indices = @transform_1, window_bounds = array<i64: 768, 1024>}, {pipeline_mode = #tpu.pipeline_mode<synchronous>, transform_indices = @transform_2, window_bounds = array<i64: 1, 1024>}, {pipeline_mode = #tpu.pipeline_mode<synchronous>, transform_indices = @transform_3, window_bounds = array<i64: 1024, 512>}, {pipeline_mode = #tpu.pipeline_mode<synchronous>, transform_indices = @transform_4, window_bounds = array<i64: 1, 512>}, {pipeline_mode = #tpu.pipeline_mode<synchronous>, transform_indices = @transform_5, window_bounds = array<i64: 512, 256>}, {pipeline_mode = #tpu.pipeline_mode<synchronous>, transform_indices = @transform_6, window_bounds = array<i64: 1, 256>}, {pipeline_mode = #tpu.pipeline_mode<synchronous>, transform_indices = @transform_7, window_bounds = array<i64: 256, 3>}, {pipeline_mode = #tpu.pipeline_mode<synchronous>, transform_indices = @transform_8, window_bounds = array<i64: 1, 3>}, {transform_indices = @transform_9, window_bounds = array<i64: 2, 3>}]} {
    %c0_i32 = arith.constant 0 : i32
    %0 = arith.cmpi eq, %arg1, %c0_i32 : i32
    %1 = arith.extui %0 : i1 to i32
    %c0_i32_0 = arith.constant 0 : i32
    %2 = arith.cmpi ne, %1, %c0_i32_0 : i32
    scf.if %2 {
      %cst_9 = arith.constant 0.000000e+00 : f32
      %12 = vector.broadcast %cst_9 : f32 to vector<2x768xf32>
      %c0_10 = arith.constant 0 : index
      %c0_11 = arith.constant 0 : index
      %13 = vector.load %arg12[%c0_10, %c0_11] : memref<2x768xf32, #tpu.memory_space<vmem>>, vector<2x768xf32>
      tpu.vector_store %arg12[%c0_10, %c0_11], %12 {strides = array<i32>} : memref<2x768xf32, #tpu.memory_space<vmem>>, vector<2x768xf32>,
    } else {
    }
    %c0 = arith.constant 0 : index
    %c0_1 = arith.constant 0 : index
    %3 = vector.load %arg12[%c0, %c0_1] : memref<2x768xf32, #tpu.memory_space<vmem>>, vector<2x768xf32>
    %c0_2 = arith.constant 0 : index
    %c0_3 = arith.constant 0 : index
    %c0_4 = arith.constant 0 : index
    %4 = vector.load %arg2[%c0_2, %c0_3, %c0_4] : memref<2x8x768xbf16, #tpu.memory_space<vmem>>, vector<2x8x768xbf16>
    %5 = arith.extf %4 : vector<2x8x768xbf16> to vector<2x8x768xf32>
    %cst = arith.constant dense<0.000000e+00> : vector<2x768xf32>
    %6 = vector.multi_reduction <add>, %5, %cst [1] : vector<2x8x768xf32> to vector<2x768xf32>
    %7 = arith.addf %3, %6 : vector<2x768xf32>
    %c0_5 = arith.constant 0 : index
    %c0_6 = arith.constant 0 : index
    %8 = vector.load %arg12[%c0_5, %c0_6] : memref<2x768xf32, #tpu.memory_space<vmem>>, vector<2x768xf32>
    tpu.vector_store %arg12[%c0_5, %c0_6], %7 {strides = array<i32>} : memref<2x768xf32, #tpu.memory_space<vmem>>, vector<2x768xf32>,
    %c0_i32_7 = arith.constant 0 : i32
    %9 = arith.cmpi eq, %arg1, %c0_i32_7 : i32
    %10 = arith.extui %9 : i1 to i32
    %c0_i32_8 = arith.constant 0 : i32
    %11 = arith.cmpi ne, %10, %c0_i32_8 : i32
    scf.if %11 {
      %c0_9 = arith.constant 0 : index
      %c0_10 = arith.constant 0 : index
      %12 = vector.load %arg12[%c0_9, %c0_10] : memref<2x768xf32, #tpu.memory_space<vmem>>, vector<2x768xf32>
      %cst_11 = arith.constant 1.250000e-01 : f32
      %13 = vector.broadcast %cst_11 : f32 to vector<2x768xf32>
      %14 = arith.mulf %12, %13 : vector<2x768xf32>
      %c0_12 = arith.constant 0 : index
      %c0_13 = arith.constant 0 : index
      %15 = vector.load %arg3[%c0_12, %c0_13] : memref<768x1024xf32, #tpu.memory_space<vmem>>, vector<768x1024xf32>
      %cst_14 = arith.constant dense<0.000000e+00> : vector<2x1024xf32>
      %16 = tpu.matmul %14, %15, %cst_14 {dimension_numbers = #tpu.dot_dimension_numbers<[1], [0], [0], [1], [0, 0, 1, 1], [], []>} : vector<2x768xf32>, vector<768x1024xf32>, vector<2x1024xf32> -> vector<2x1024xf32>
      %c0_15 = arith.constant 0 : index
      %c0_16 = arith.constant 0 : index
      %17 = vector.load %arg4[%c0_15, %c0_16] : memref<1x1024xf32, #tpu.memory_space<vmem>>, vector<1x1024xf32>
      %18 = vector.broadcast %17 : vector<1x1024xf32> to vector<2x1024xf32>
      %19 = arith.addf %16, %18 : vector<2x1024xf32>
      %cst_17 = arith.constant 0.000000e+00 : f32
      %20 = vector.broadcast %cst_17 : f32 to vector<2x1024xf32>
      %21 = arith.maximumf %19, %20 : vector<2x1024xf32>
      %c0_18 = arith.constant 0 : index
      %c0_19 = arith.constant 0 : index
      %22 = vector.load %arg5[%c0_18, %c0_19] : memref<1024x512xf32, #tpu.memory_space<vmem>>, vector<1024x512xf32>
      %cst_20 = arith.constant dense<0.000000e+00> : vector<2x512xf32>
      %23 = tpu.matmul %21, %22, %cst_20 {dimension_numbers = #tpu.dot_dimension_numbers<[1], [0], [0], [1], [0, 0, 1, 1], [], []>} : vector<2x1024xf32>, vector<1024x512xf32>, vector<2x512xf32> -> vector<2x512xf32>
      %c0_21 = arith.constant 0 : index
      %c0_22 = arith.constant 0 : index
      %24 = vector.load %arg6[%c0_21, %c0_22] : memref<1x512xf32, #tpu.memory_space<vmem>>, vector<1x512xf32>
      %25 = vector.broadcast %24 : vector<1x512xf32> to vector<2x512xf32>
      %26 = arith.addf %23, %25 : vector<2x512xf32>
      %cst_23 = arith.constant 0.000000e+00 : f32
      %27 = vector.broadcast %cst_23 : f32 to vector<2x512xf32>
      %28 = arith.maximumf %26, %27 : vector<2x512xf32>
      %c0_24 = arith.constant 0 : index
      %c0_25 = arith.constant 0 : index
      %29 = vector.load %arg7[%c0_24, %c0_25] : memref<512x256xf32, #tpu.memory_space<vmem>>, vector<512x256xf32>
      %cst_26 = arith.constant dense<0.000000e+00> : vector<2x256xf32>
      %30 = tpu.matmul %28, %29, %cst_26 {dimension_numbers = #tpu.dot_dimension_numbers<[1], [0], [0], [1], [0, 0, 1, 1], [], []>} : vector<2x512xf32>, vector<512x256xf32>, vector<2x256xf32> -> vector<2x256xf32>
      %c0_27 = arith.constant 0 : index
      %c0_28 = arith.constant 0 : index
      %31 = vector.load %arg8[%c0_27, %c0_28] : memref<1x256xf32, #tpu.memory_space<vmem>>, vector<1x256xf32>
      %32 = vector.broadcast %31 : vector<1x256xf32> to vector<2x256xf32>
      %33 = arith.addf %30, %32 : vector<2x256xf32>
      %cst_29 = arith.constant 0.000000e+00 : f32
      %34 = vector.broadcast %cst_29 : f32 to vector<2x256xf32>
      %35 = arith.maximumf %33, %34 : vector<2x256xf32>
      %c0_30 = arith.constant 0 : index
      %c0_31 = arith.constant 0 : index
      %36 = vector.load %arg9[%c0_30, %c0_31] : memref<256x3xf32, #tpu.memory_space<vmem>>, vector<256x3xf32>
      %cst_32 = arith.constant dense<0.000000e+00> : vector<2x3xf32>
      %37 = tpu.matmul %35, %36, %cst_32 {dimension_numbers = #tpu.dot_dimension_numbers<[1], [0], [0], [1], [0, 0, 1, 1], [], []>} : vector<2x256xf32>, vector<256x3xf32>, vector<2x3xf32> -> vector<2x3xf32>
      %c0_33 = arith.constant 0 : index
      %c0_34 = arith.constant 0 : index
      %38 = vector.load %arg10[%c0_33, %c0_34] : memref<1x3xf32, #tpu.memory_space<vmem>>, vector<1x3xf32>
      %39 = vector.broadcast %38 : vector<1x3xf32> to vector<2x3xf32>
      %40 = arith.addf %37, %39 : vector<2x3xf32>
      %cst_35 = arith.constant dense<0xFF800000> : vector<2xf32>
      %41 = vector.multi_reduction <maximumf>, %40, %cst_35 [1] : vector<2x3xf32> to vector<2xf32>
      %42 = vector.shape_cast %41 : vector<2xf32> to vector<2x1xf32>
      %43 = vector.broadcast %42 : vector<2x1xf32> to vector<2x3xf32>
      %44 = arith.subf %40, %43 : vector<2x3xf32>
      %45 = math.exp %44 : vector<2x3xf32>
      %cst_36 = arith.constant dense<0.000000e+00> : vector<2xf32>
      %46 = vector.multi_reduction <add>, %45, %cst_36 [1] : vector<2x3xf32> to vector<2xf32>
      %47 = vector.shape_cast %46 : vector<2xf32> to vector<2x1xf32>
      %48 = math.log %47 : vector<2x1xf32>
      %49 = vector.broadcast %48 : vector<2x1xf32> to vector<2x3xf32>
      %50 = arith.subf %44, %49 : vector<2x3xf32>
      %c0_37 = arith.constant 0 : index
      %c0_38 = arith.constant 0 : index
      %51 = vector.load %arg11[%c0_37, %c0_38] : memref<2x3xf32, #tpu.memory_space<vmem>>, vector<2x3xf32>
      tpu.vector_store %arg11[%c0_37, %c0_38], %50 {strides = array<i32>} : memref<2x3xf32, #tpu.memory_space<vmem>>, vector<2x3xf32>,
    } else {
    }
    return
  }
  func.func @transform_0(%arg0: i32, %arg1: i32) -> (i32, i32, i32) {
    %c0_i32 = arith.constant 0 : i32
    %c0_i32_0 = arith.constant 0 : i32
    return %arg0, %arg1, %c0_i32 : i32, i32, i32
  }
  func.func @transform_1(%arg0: i32, %arg1: i32) -> (i32, i32) {
    %c0_i32 = arith.constant 0 : i32
    %c0_i32_0 = arith.constant 0 : i32
    %c0_i32_1 = arith.constant 0 : i32
    return %c0_i32, %c0_i32_0 : i32, i32
  }
  func.func @transform_2(%arg0: i32, %arg1: i32) -> (i32, i32) {
    %c0_i32 = arith.constant 0 : i32
    %c0_i32_0 = arith.constant 0 : i32
    %c0_i32_1 = arith.constant 0 : i32
    return %c0_i32, %c0_i32_0 : i32, i32
  }
  func.func @transform_3(%arg0: i32, %arg1: i32) -> (i32, i32) {
    %c0_i32 = arith.constant 0 : i32
    %c0_i32_0 = arith.constant 0 : i32
    %c0_i32_1 = arith.constant 0 : i32
    return %c0_i32, %c0_i32_0 : i32, i32
  }
  func.func @transform_4(%arg0: i32, %arg1: i32) -> (i32, i32) {
    %c0_i32 = arith.constant 0 : i32
    %c0_i32_0 = arith.constant 0 : i32
    %c0_i32_1 = arith.constant 0 : i32
    return %c0_i32, %c0_i32_0 : i32, i32
  }
  func.func @transform_5(%arg0: i32, %arg1: i32) -> (i32, i32) {
    %c0_i32 = arith.constant 0 : i32
    %c0_i32_0 = arith.constant 0 : i32
    %c0_i32_1 = arith.constant 0 : i32
    return %c0_i32, %c0_i32_0 : i32, i32
  }
  func.func @transform_6(%arg0: i32, %arg1: i32) -> (i32, i32) {
    %c0_i32 = arith.constant 0 : i32
    %c0_i32_0 = arith.constant 0 : i32
    %c0_i32_1 = arith.constant 0 : i32
    return %c0_i32, %c0_i32_0 : i32, i32
  }
  func.func @transform_7(%arg0: i32, %arg1: i32) -> (i32, i32) {
    %c0_i32 = arith.constant 0 : i32
    %c0_i32_0 = arith.constant 0 : i32
    %c0_i32_1 = arith.constant 0 : i32
    return %c0_i32, %c0_i32_0 : i32, i32
  }
  func.func @transform_8(%arg0: i32, %arg1: i32) -> (i32, i32) {
    %c0_i32 = arith.constant 0 : i32
    %c0_i32_0 = arith.constant 0 : i32
    %c0_i32_1 = arith.constant 0 : i32
    return %c0_i32, %c0_i32_0 : i32, i32
  }
  func.func @transform_9(%arg0: i32, %arg1: i32) -> (i32, i32) {
    %c0_i32 = arith.constant 0 : i32
    %c0_i32_0 = arith.constant 0 : i32
    return %arg0, %c0_i32 : i32, i32
  }
}

module attributes {stable_mosaic.version = 11 : i64} {
  func.func @_cls_head_kernel(%arg0: i32, %arg1: i32, %arg2: memref<2x8x768xbf16, #tpu.memory_space<vmem>>, %arg3: memref<768x1024xf32, #tpu.memory_space<vmem>>, %arg4: memref<1x1024xf32, #tpu.memory_space<vmem>>, %arg5: memref<1024x512xf32, #tpu.memory_space<vmem>>, %arg6: memref<1x512xf32, #tpu.memory_space<vmem>>, %arg7: memref<512x256xf32, #tpu.memory_space<vmem>>, %arg8: memref<1x256xf32, #tpu.memory_space<vmem>>, %arg9: memref<256x3xf32, #tpu.memory_space<vmem>>, %arg10: memref<1x3xf32, #tpu.memory_space<vmem>>, %arg11: memref<2x3xf32, #tpu.memory_space<vmem>>, %arg12: memref<2x768xf32, #tpu.memory_space<vmem>>) attributes {dimension_semantics = [#tpu.dimension_semantics<parallel>, #tpu.dimension_semantics<arbitrary>], iteration_bounds = array<i64: 1, 1>, scalar_prefetch = 0 : i64, scratch_operands = 1 : i64, tpu.core_type = #tpu.core_type<tc>, window_params = [{transform_indices = @transform_0, window_bounds = array<i64: 2, 8, 768>}, {pipeline_mode = #tpu.pipeline_mode<synchronous>, transform_indices = @transform_1, window_bounds = array<i64: 768, 1024>}, {pipeline_mode = #tpu.pipeline_mode<synchronous>, transform_indices = @transform_2, window_bounds = array<i64: 1, 1024>}, {pipeline_mode = #tpu.pipeline_mode<synchronous>, transform_indices = @transform_3, window_bounds = array<i64: 1024, 512>}, {pipeline_mode = #tpu.pipeline_mode<synchronous>, transform_indices = @transform_4, window_bounds = array<i64: 1, 512>}, {pipeline_mode = #tpu.pipeline_mode<synchronous>, transform_indices = @transform_5, window_bounds = array<i64: 512, 256>}, {pipeline_mode = #tpu.pipeline_mode<synchronous>, transform_indices = @transform_6, window_bounds = array<i64: 1, 256>}, {pipeline_mode = #tpu.pipeline_mode<synchronous>, transform_indices = @transform_7, window_bounds = array<i64: 256, 3>}, {pipeline_mode = #tpu.pipeline_mode<synchronous>, transform_indices = @transform_8, window_bounds = array<i64: 1, 3>}, {transform_indices = @transform_9, window_bounds = array<i64: 2, 3>}]} {
    %c0_i32 = arith.constant 0 : i32
    %0 = arith.cmpi eq, %arg1, %c0_i32 : i32
    %1 = arith.extui %0 : i1 to i32
    %c0_i32_0 = arith.constant 0 : i32
    %2 = arith.cmpi ne, %1, %c0_i32_0 : i32
    scf.if %2 {
      %cst_9 = arith.constant 0.000000e+00 : f32
      %12 = vector.broadcast %cst_9 : f32 to vector<2x768xf32>
      %c0_10 = arith.constant 0 : index
      %c0_11 = arith.constant 0 : index
      %13 = vector.load %arg12[%c0_10, %c0_11] : memref<2x768xf32, #tpu.memory_space<vmem>>, vector<2x768xf32>
      tpu.vector_store %arg12[%c0_10, %c0_11], %12 {strides = array<i32>} : memref<2x768xf32, #tpu.memory_space<vmem>>, vector<2x768xf32>,
    } else {
    }
    %c0 = arith.constant 0 : index
    %c0_1 = arith.constant 0 : index
    %3 = vector.load %arg12[%c0, %c0_1] : memref<2x768xf32, #tpu.memory_space<vmem>>, vector<2x768xf32>
    %c0_2 = arith.constant 0 : index
    %c0_3 = arith.constant 0 : index
    %c0_4 = arith.constant 0 : index
    %4 = vector.load %arg2[%c0_2, %c0_3, %c0_4] : memref<2x8x768xbf16, #tpu.memory_space<vmem>>, vector<2x8x768xbf16>
    %5 = arith.extf %4 : vector<2x8x768xbf16> to vector<2x8x768xf32>
    %cst = arith.constant dense<0.000000e+00> : vector<2x768xf32>
    %6 = vector.multi_reduction <add>, %5, %cst [1] : vector<2x8x768xf32> to vector<2x768xf32>
    %7 = arith.addf %3, %6 : vector<2x768xf32>
    %c0_5 = arith.constant 0 : index
    %c0_6 = arith.constant 0 : index
    %8 = vector.load %arg12[%c0_5, %c0_6] : memref<2x768xf32, #tpu.memory_space<vmem>>, vector<2x768xf32>
    tpu.vector_store %arg12[%c0_5, %c0_6], %7 {strides = array<i32>} : memref<2x768xf32, #tpu.memory_space<vmem>>, vector<2x768xf32>,
    %c0_i32_7 = arith.constant 0 : i32
    %9 = arith.cmpi eq, %arg1, %c0_i32_7 : i32
    %10 = arith.extui %9 : i1 to i32
    %c0_i32_8 = arith.constant 0 : i32
    %11 = arith.cmpi ne, %10, %c0_i32_8 : i32
    scf.if %11 {
      %c0_9 = arith.constant 0 : index
      %c0_10 = arith.constant 0 : index
      %12 = vector.load %arg12[%c0_9, %c0_10] : memref<2x768xf32, #tpu.memory_space<vmem>>, vector<2x768xf32>
      %cst_11 = arith.constant 1.250000e-01 : f32
      %13 = vector.broadcast %cst_11 : f32 to vector<2x768xf32>
      %14 = arith.mulf %12, %13 : vector<2x768xf32>
      %c0_12 = arith.constant 0 : index
      %c0_13 = arith.constant 0 : index
      %15 = vector.load %arg3[%c0_12, %c0_13] : memref<768x1024xf32, #tpu.memory_space<vmem>>, vector<768x1024xf32>
      %cst_14 = arith.constant dense<0.000000e+00> : vector<2x1024xf32>
      %16 = tpu.matmul %14, %15, %cst_14 {dimension_numbers = #tpu.dot_dimension_numbers<[1], [0], [0], [1], [0, 0, 1, 1], [], []>} : vector<2x768xf32>, vector<768x1024xf32>, vector<2x1024xf32> -> vector<2x1024xf32>
      %c0_15 = arith.constant 0 : index
      %c0_16 = arith.constant 0 : index
      %17 = vector.load %arg4[%c0_15, %c0_16] : memref<1x1024xf32, #tpu.memory_space<vmem>>, vector<1x1024xf32>
      %18 = vector.broadcast %17 : vector<1x1024xf32> to vector<2x1024xf32>
      %19 = arith.addf %16, %18 : vector<2x1024xf32>
      %cst_17 = arith.constant 0.000000e+00 : f32
      %20 = vector.broadcast %cst_17 : f32 to vector<2x1024xf32>
      %21 = arith.maximumf %19, %20 : vector<2x1024xf32>
      %c0_18 = arith.constant 0 : index
      %c0_19 = arith.constant 0 : index
      %22 = vector.load %arg5[%c0_18, %c0_19] : memref<1024x512xf32, #tpu.memory_space<vmem>>, vector<1024x512xf32>
      %cst_20 = arith.constant dense<0.000000e+00> : vector<2x512xf32>
      %23 = tpu.matmul %21, %22, %cst_20 {dimension_numbers = #tpu.dot_dimension_numbers<[1], [0], [0], [1], [0, 0, 1, 1], [], []>} : vector<2x1024xf32>, vector<1024x512xf32>, vector<2x512xf32> -> vector<2x512xf32>
      %c0_21 = arith.constant 0 : index
      %c0_22 = arith.constant 0 : index
      %24 = vector.load %arg6[%c0_21, %c0_22] : memref<1x512xf32, #tpu.memory_space<vmem>>, vector<1x512xf32>
      %25 = vector.broadcast %24 : vector<1x512xf32> to vector<2x512xf32>
      %26 = arith.addf %23, %25 : vector<2x512xf32>
      %cst_23 = arith.constant 0.000000e+00 : f32
      %27 = vector.broadcast %cst_23 : f32 to vector<2x512xf32>
      %28 = arith.maximumf %26, %27 : vector<2x512xf32>
      %c0_24 = arith.constant 0 : index
      %c0_25 = arith.constant 0 : index
      %29 = vector.load %arg7[%c0_24, %c0_25] : memref<512x256xf32, #tpu.memory_space<vmem>>, vector<512x256xf32>
      %cst_26 = arith.constant dense<0.000000e+00> : vector<2x256xf32>
      %30 = tpu.matmul %28, %29, %cst_26 {dimension_numbers = #tpu.dot_dimension_numbers<[1], [0], [0], [1], [0, 0, 1, 1], [], []>} : vector<2x512xf32>, vector<512x256xf32>, vector<2x256xf32> -> vector<2x256xf32>
      %c0_27 = arith.constant 0 : index
      %c0_28 = arith.constant 0 : index
      %31 = vector.load %arg8[%c0_27, %c0_28] : memref<1x256xf32, #tpu.memory_space<vmem>>, vector<1x256xf32>
      %32 = vector.broadcast %31 : vector<1x256xf32> to vector<2x256xf32>
      %33 = arith.addf %30, %32 : vector<2x256xf32>
      %cst_29 = arith.constant 0.000000e+00 : f32
      %34 = vector.broadcast %cst_29 : f32 to vector<2x256xf32>
      %35 = arith.maximumf %33, %34 : vector<2x256xf32>
      %c0_30 = arith.constant 0 : index
      %c0_31 = arith.constant 0 : index
      %36 = vector.load %arg9[%c0_30, %c0_31] : memref<256x3xf32, #tpu.memory_space<vmem>>, vector<256x3xf32>
      %cst_32 = arith.constant dense<0.000000e+00> : vector<2x3xf32>
      %37 = tpu.matmul %35, %36, %cst_32 {dimension_numbers = #tpu.dot_dimension_numbers<[1], [0], [0], [1], [0, 0, 1, 1], [], []>} : vector<2x256xf32>, vector<256x3xf32>, vector<2x3xf32> -> vector<2x3xf32>
      %c0_33 = arith.constant 0 : index
      %c0_34 = arith.constant 0 : index
      %38 = vector.load %arg10[%c0_33, %c0_34] : memref<1x3xf32, #tpu.memory_space<vmem>>, vector<1x3xf32>
      %39 = vector.broadcast %38 : vector<1x3xf32> to vector<2x3xf32>
      %40 = arith.addf %37, %39 : vector<2x3xf32>
      %cst_35 = arith.constant dense<0xFF800000> : vector<2xf32>
      %41 = vector.multi_reduction <maximumf>, %40, %cst_35 [1] : vector<2x3xf32> to vector<2xf32>
      %42 = vector.shape_cast %41 : vector<2xf32> to vector<2x1xf32>
      %43 = vector.broadcast %42 : vector<2x1xf32> to vector<2x3xf32>
      %44 = arith.subf %40, %43 : vector<2x3xf32>
      %45 = math.exp %44 : vector<2x3xf32>
      %cst_36 = arith.constant dense<0.000000e+00> : vector<2xf32>
      %46 = vector.multi_reduction <add>, %45, %cst_36 [1] : vector<2x3xf32> to vector<2xf32>
      %47 = vector.shape_cast %46 : vector<2xf32> to vector<2x1xf32>
      %48 = math.log %47 : vector<2x1xf32>
      %49 = vector.broadcast %48 : vector<2x1xf32> to vector<2x3xf32>
      %50 = arith.subf %44, %49 : vector<2x3xf32>
      %c0_37 = arith.constant 0 : index
      %c0_38 = arith.constant 0 : index
      %51 = vector.load %arg11[%c0_37, %c0_38] : memref<2x3xf32, #tpu.memory_space<vmem>>, vector<2x3xf32>
      tpu.vector_store %arg11[%c0_37, %c0_38], %50 {strides = array<i32>} : memref<2x3xf32, #tpu.memory_space<vmem>>, vector<2x3xf32>,
    } else {
    }
    return
  }
  func.func @transform_0(%arg0: i32, %arg1: i32) -> (i32, i32, i32) {
    %c0_i32 = arith.constant 0 : i32
    %c0_i32_0 = arith.constant 0 : i32
    return %arg0, %arg1, %c0_i32 : i32, i32, i32
  }
  func.func @transform_1(%arg0: i32, %arg1: i32) -> (i32, i32) {
    %c0_i32 = arith.constant 0 : i32
    %c0_i32_0 = arith.constant 0 : i32
    %c0_i32_1 = arith.constant 0 : i32
    return %c0_i32, %c0_i32_0 : i32, i32
  }
  func.func @transform_2(%arg0: i32, %arg1: i32) -> (i32, i32) {
    %c0_i32 = arith.constant 0 : i32
    %c0_i32_0 = arith.constant 0 : i32
    %c0_i32_1 = arith.constant 0 : i32
    return %c0_i32, %c0_i32_0 : i32, i32
  }
  func.func @transform_3(%arg0: i32, %arg1: i32) -> (i32, i32) {
    %c0_i32 = arith.constant 0 : i32
    %c0_i32_0 = arith.constant 0 : i32
    %c0_i32_1 = arith.constant 0 : i32
    return %c0_i32, %c0_i32_0 : i32, i32
  }
  func.func @transform_4(%arg0: i32, %arg1: i32) -> (i32, i32) {
    %c0_i32 = arith.constant 0 : i32
    %c0_i32_0 = arith.constant 0 : i32
    %c0_i32_1 = arith.constant 0 : i32
    return %c0_i32, %c0_i32_0 : i32, i32
  }
  func.func @transform_5(%arg0: i32, %arg1: i32) -> (i32, i32) {
    %c0_i32 = arith.constant 0 : i32
    %c0_i32_0 = arith.constant 0 : i32
    %c0_i32_1 = arith.constant 0 : i32
    return %c0_i32, %c0_i32_0 : i32, i32
  }
  func.func @transform_6(%arg0: i32, %arg1: i32) -> (i32, i32) {
    %c0_i32 = arith.constant 0 : i32
    %c0_i32_0 = arith.constant 0 : i32
    %c0_i32_1 = arith.constant 0 : i32
    return %c0_i32, %c0_i32_0 : i32, i32
  }
  func.func @transform_7(%arg0: i32, %arg1: i32) -> (i32, i32) {
    %c0_i32 = arith.constant 0 : i32
    %c0_i32_0 = arith.constant 0 : i32
    %c0_i32_1 = arith.constant 0 : i32
    return %c0_i32, %c0_i32_0 : i32, i32
  }
  func.func @transform_8(%arg0: i32, %arg1: i32) -> (i32, i32) {
    %c0_i32 = arith.constant 0 : i32
    %c0_i32_0 = arith.constant 0 : i32
    %c0_i32_1 = arith.constant 0 : i32
    return %c0_i32, %c0_i32_0 : i32, i32
  }
  func.func @transform_9(%arg0: i32, %arg1: i32) -> (i32, i32) {
    %c0_i32 = arith.constant 0 : i32
    %c0_i32_0 = arith.constant 0 : i32
    return %arg0, %c0_i32 : i32, i32
  }
}

</mosaic_0001>

<bundles_post_ra>
// kernel: _simple_cls_forward.1
= control target key start
LH: loop header
LB: loop body
LE: loop exit
PB: predicated region body
PF: predicated region fallthrough
CT: control target
= control target key end

     0   :  { %14 = vsyncpa [#allocation4], 0  ;;  %s5923_s0 = inlined_call_operand.hbm [shape: bf16[2,8,768], index: 0, kind: input, shape index: {}]   ;;  %s5924_s1 = inlined_call_operand.hbm [shape: f32[768,1024], index: 1, kind: input, shape index: {}]   ;;  %s5925_s2 = inlined_call_operand.hbm [shape: f32[1,1024], index: 2, kind: input, shape index: {}]   ;;  %s5926_s3 = inlined_call_operand.hbm [shape: f32[1024,512], index: 3, kind: input, shape index: {}]   ;;  %s5927_s4 = inlined_call_operand.hbm [shape: f32[1,512], index: 4, kind: input, shape index: {}]   ;;  %s5928_s5 = inlined_call_operand.hbm [shape: f32[512,256], index: 5, kind: input, shape index: {}]   ;;  %s5929_s6 = inlined_call_operand.hbm [shape: f32[1,256], index: 6, kind: input, shape index: {}]   ;;  %s5930_s7 = inlined_call_operand.vmem [shape: f32[256,3], index: 7, kind: input, shape index: {}]   ;;  %s5931_s8 = inlined_call_operand.hbm [shape: f32[1,3], index: 8, kind: input, shape index: {}]   ;;  %s5932_s9 = inlined_call_operand.hbm [shape: f32[2,3], index: 9, kind: output, shape index: {}]  }
   0x1   :  { %15 = vsyncpa [#allocation7], 0 }
   0x2   :  { %16 = vsyncpa [#allocation10], 0 }
   0x3   :  { %17 = vsyncpa [#allocation13], 0 }
   0x4   :  { %18 = vsyncpa [#allocation16], 0 }
   0x5   :  { %19 = vsyncpa [#allocation5], 0  ;;  %s5316_s30 = smov [#allocation6]   ;;  %s5106_s13 = scalar_lea.hbm %s5924_s1, 98304 }
   0x6   :  { %s37_s10 = sshll.u32 %s5316_s30, 4  ;;  %p5107_p0 = scmp.ne.s32.totalorder %s5924_s1, %s5106_s13  ;;  %s38_s10 = int_to_ptr.vmem [resolvable:$true] %s37_s10 }
   0x7   :  { %p5110_p1 = scmp.lt.u32.totalorder %s5106_s13, %s5924_s1 }
   0x9   :  { %p5112_p2 = pnand %p5110_p1, %p5107_p0 }
   0xb   :  { %5115 = shalt.err (!%p5112_p2)
}
   0xc   :  { %s5116_s18 = scalar_lea.vmem %s38_s10, 98304  ;;  %p5121_p4 = scmp.lt.s32.totalorder %s38_s10, %s38_s10 }
   0xd   :  { %p5117_p3 = scmp.ne.s32.totalorder %s38_s10, %s5116_s18  ;;  %p5122_p5 = scmp.lt.s32.totalorder %s5116_s18, %s5116_s18 }
   0xf   :  { %p5123_p6 = por %p5122_p5, %p5121_p4 }
  0x11   :  { %p5124_p7 = pnand %p5123_p6, %p5117_p3 }
  0x13   :  { %5127 = shalt.err (!%p5124_p7)
}
  0x14   :  { %s5317_s19 = smov 1024   ;;  %s5318_s20 = smov 64  }
  0x15   :  { %43 = dma.hbm_to_vmem [thread:$0]  %s5924_s1, 98304, %s38_s10, [#allocation7], %s5317_s19, %s5317_s19, %s5318_s20  }
  0x16   :  { %s5319_s23 = smov [#allocation9]   ;;  %s5128_s27 = scalar_lea.hbm %s5926_s3, 65536 }
  0x17   :  { %s59_s24 = sshll.u32 %s5319_s23, 4  ;;  %p5129_p8 = scmp.ne.s32.totalorder %s5926_s3, %s5128_s27  ;;  %s60_s24 = int_to_ptr.vmem [resolvable:$true] %s59_s24 }
  0x18   :  { %p5132_p9 = scmp.lt.u32.totalorder %s5128_s27, %s5926_s3 }
  0x1a   :  { %p5134_p10 = pnand %p5132_p9, %p5129_p8 }
  0x1c   :  { %5137 = shalt.err (!%p5134_p10)
}
  0x1d   :  { %s5138_s12 = scalar_lea.vmem %s60_s24, 65536  ;;  %p5143_p12 = scmp.lt.s32.totalorder %s60_s24, %s60_s24 }
  0x1e   :  { %p5139_p11 = scmp.ne.s32.totalorder %s60_s24, %s5138_s12  ;;  %p5144_p13 = scmp.lt.s32.totalorder %s5138_s12, %s5138_s12 }
  0x20   :  { %p5145_p0 = por %p5144_p13, %p5143_p12 }
  0x22   :  { %p5146_p1 = pnand %p5145_p0, %p5139_p11 }
  0x24   :  { %5149 = shalt.err (!%p5146_p1)
}
  0x25   :  { %s5320_s1 = smov 512   ;;  %s5321_s10 = smov 32  }
  0x26   :  { %65 = dma.hbm_to_vmem [thread:$0]  %s5926_s3, 65536, %s60_s24, [#allocation10], %s5320_s1, %s5320_s1, %s5321_s10  }
  0x27   :  { %s5322_s15 = smov [#allocation12]   ;;  %s5150_s19 = scalar_lea.hbm %s5928_s5, 16384 }
  0x28   :  { %s81_s16 = sshll.u32 %s5322_s15, 4  ;;  %p5151_p2 = scmp.ne.s32.totalorder %s5928_s5, %s5150_s19  ;;  %s82_s16 = int_to_ptr.vmem [resolvable:$true] %s81_s16 }
  0x29   :  { %p5154_p3 = scmp.lt.u32.totalorder %s5150_s19, %s5928_s5 }
  0x2b   :  { %p5156_p4 = pnand %p5154_p3, %p5151_p2 }
  0x2d   :  { %5159 = shalt.err (!%p5156_p4)
}
  0x2e   :  { %s5160_s25 = scalar_lea.vmem %s82_s16, 16384  ;;  %p5165_p6 = scmp.lt.s32.totalorder %s82_s16, %s82_s16 }
  0x2f   :  { %p5161_p5 = scmp.ne.s32.totalorder %s82_s16, %s5160_s25  ;;  %p5166_p7 = scmp.lt.s32.totalorder %s5160_s25, %s5160_s25 }
  0x31   :  { %p5167_p8 = por %p5166_p7, %p5165_p6 }
  0x33   :  { %p5168_p9 = pnand %p5167_p8, %p5161_p5 }
  0x35   :  { %5171 = shalt.err (!%p5168_p9)
}
  0x36   :  { %s5323_s3 = smov 256   ;;  %s5324_s24 = smov 16  }
  0x37   :  { %87 = dma.hbm_to_vmem [thread:$0]  %s5928_s5, 16384, %s82_s16, [#allocation13], %s5323_s3, %s5323_s3, %s5324_s24  }
  0x38   :  { %s5325_s28 = smov [#allocation3]   ;;  %s5172_s12 = scalar_lea.hbm %s5923_s0, 768 }
  0x39   :  { %s25_s29 = sshll.u32 %s5325_s28, 4  ;;  %p5173_p10 = scmp.ne.s32.totalorder %s5923_s0, %s5172_s12  ;;  %s26_s29 = int_to_ptr.vmem [resolvable:$true] %s25_s29 }
  0x3a   :  { %p5176_p11 = scmp.lt.u32.totalorder %s5172_s12, %s5923_s0 }
  0x3c   :  { %p5178_p12 = pnand %p5176_p11, %p5173_p10 }
  0x3e   :  { %5181 = shalt.err (!%p5178_p12)
}
  0x3f   :  { %s5182_s15 = scalar_lea.vmem %s26_s29, 768  ;;  %p5187_p0 = scmp.lt.s32.totalorder %s26_s29, %s26_s29 }
  0x40   :  { %p5183_p13 = scmp.ne.s32.totalorder %s26_s29, %s5182_s15  ;;  %p5188_p1 = scmp.lt.s32.totalorder %s5182_s15, %s5182_s15 }
  0x42   :  { %p5189_p2 = por %p5188_p1, %p5187_p0 }
  0x44   :  { %p5190_p3 = pnand %p5189_p2, %p5183_p13 }
  0x46   :  { %5193 = shalt.err (!%p5190_p3)
}
  0x47   :  { %s5326_s5 = smov 384   ;;  %s5327_s16 = smov 24  }
  0x48   :  { %31 = dma.hbm_to_vmem [thread:$0]  %s5923_s0, 768, %s26_s29, [#allocation4], %s5326_s5, %s5326_s5, %s5327_s16  }
  0x49   :  { %s5328_s19 = smov [#allocation8]   ;;  %s5329_s21 = smov [#allocation11]  }
  0x4a   :  { %s50_s20 = sshll.u32 %s5328_s19, 4  ;;  %s72_s22 = sshll.u32 %s5329_s21, 4  ;;  %s51_s20 = int_to_ptr.vmem [resolvable:$true] %s50_s20  ;;  %s73_s22 = int_to_ptr.vmem [resolvable:$true] %s72_s22 }
  0x4b   :  { %s5194_s3 = scalar_lea.hbm %s5925_s2, 128 }
  0x4c   :  { %p5195_p4 = scmp.ne.s32.totalorder %s5925_s2, %s5194_s3  ;;  %p5198_p5 = scmp.lt.u32.totalorder %s5194_s3, %s5925_s2 }
  0x4e   :  { %p5200_p6 = pnand %p5198_p5, %p5195_p4 }
  0x50   :  { %5203 = shalt.err (!%p5200_p6)
}
  0x51   :  { %s5204_s0 = scalar_lea.vmem %s51_s20, 128  ;;  %p5209_p8 = scmp.lt.s32.totalorder %s51_s20, %s51_s20 }
  0x52   :  { %p5205_p7 = scmp.ne.s32.totalorder %s51_s20, %s5204_s0  ;;  %p5210_p9 = scmp.lt.s32.totalorder %s5204_s0, %s5204_s0 }
  0x54   :  { %p5211_p10 = por %p5210_p9, %p5209_p8 }
  0x56   :  { %p5212_p11 = pnand %p5211_p10, %p5205_p7 }
  0x58   :  { %5215 = shalt.err (!%p5212_p11)
}
  0x59   :  { %53 = dma.hbm_to_vmem [thread:$0]  %s5925_s2, 128, %s51_s20, [#allocation7]  }
  0x5a   :  { %s5216_s1 = scalar_lea.hbm %s5927_s4, 64 }
  0x5b   :  { %p5217_p12 = scmp.ne.s32.totalorder %s5927_s4, %s5216_s1  ;;  %p5220_p13 = scmp.lt.u32.totalorder %s5216_s1, %s5927_s4 }
  0x5d   :  { %p5222_p0 = pnand %p5220_p13, %p5217_p12 }
  0x5f   :  { %5225 = shalt.err (!%p5222_p0)
}
  0x60   :  { %s5226_s5 = scalar_lea.vmem %s73_s22, 64  ;;  %p5231_p2 = scmp.lt.s32.totalorder %s73_s22, %s73_s22 }
  0x61   :  { %p5227_p1 = scmp.ne.s32.totalorder %s73_s22, %s5226_s5  ;;  %p5232_p3 = scmp.lt.s32.totalorder %s5226_s5, %s5226_s5 }
  0x63   :  { %p5233_p4 = por %p5232_p3, %p5231_p2 }
  0x65   :  { %p5234_p5 = pnand %p5233_p4, %p5227_p1 }
  0x67   :  { %5237 = shalt.err (!%p5234_p5)
}
  0x68   :  { %75 = dma.hbm_to_vmem [thread:$0]  %s5927_s4, 64, %s73_s22, [#allocation10]  }
  0x69   :  { %s5330_s17 = smov [#allocation14]   ;;  %s5331_s19 = smov [#allocation15]  }
  0x6a   :  { %s94_s18 = sshll.u32 %s5330_s17, 4  ;;  %s106_s20 = sshll.u32 %s5331_s19, 4  ;;  %s95_s18 = int_to_ptr.vmem [resolvable:$true] %s94_s18  ;;  %s107_s20 = int_to_ptr.vmem [resolvable:$true] %s106_s20 }
  0x6b   :  { %s5238_s25 = scalar_lea.hbm %s5929_s6, 32 }
  0x6c   :  { %p5239_p6 = scmp.ne.s32.totalorder %s5929_s6, %s5238_s25  ;;  %p5242_p7 = scmp.lt.u32.totalorder %s5238_s25, %s5929_s6 }
  0x6e   :  { %p5244_p8 = pnand %p5242_p7, %p5239_p6 }
  0x70   :  { %5247 = shalt.err (!%p5244_p8)
}
  0x71   :  { %s5248_s4 = scalar_lea.vmem %s95_s18, 32  ;;  %p5253_p10 = scmp.lt.s32.totalorder %s95_s18, %s95_s18 }
  0x72   :  { %p5249_p9 = scmp.ne.s32.totalorder %s95_s18, %s5248_s4  ;;  %p5254_p11 = scmp.lt.s32.totalorder %s5248_s4, %s5248_s4 }
  0x74   :  { %p5255_p12 = por %p5254_p11, %p5253_p10 }
  0x76   :  { %p5256_p13 = pnand %p5255_p12, %p5249_p9 }
  0x78   :  { %5259 = shalt.err (!%p5256_p13)
}
  0x79   :  { %97 = dma.hbm_to_vmem [thread:$0]  %s5929_s6, 32, %s95_s18, [#allocation13]  }
  0x7a   :  { %s5260_s30 = scalar_lea.hbm %s5931_s8, 16 }
  0x7b   :  { %p5261_p0 = scmp.ne.s32.totalorder %s5931_s8, %s5260_s30  ;;  %p5264_p1 = scmp.lt.u32.totalorder %s5260_s30, %s5931_s8 }
  0x7d   :  { %p5266_p2 = pnand %p5264_p1, %p5261_p0 }
  0x7f   :  { %5269 = shalt.err (!%p5266_p2)
}
  0x80   :  { %s5270_s13 = scalar_lea.vmem %s107_s20, 16  ;;  %s5274_s14 = scalar_lea.vmem %s107_s20, 32 }
  0x81   :  { %p5271_p3 = scmp.ne.s32.totalorder %s107_s20, %s5270_s13  ;;  %p5275_p4 = scmp.lt.s32.totalorder %s107_s20, %s107_s20 }
  0x82   :  { %p5276_p5 = scmp.lt.s32.totalorder %s5274_s14, %s5270_s13 }
  0x84   :  { %p5277_p6 = por %p5276_p5, %p5275_p4 }
  0x86   :  { %p5278_p7 = pnand %p5277_p6, %p5271_p3 }
  0x88   :  { %5281 = shalt.err (!%p5278_p7)
}
  0x89   :  { %109 = dma.hbm_to_vmem [thread:$0]  %s5931_s8, 16, %s107_s20, [#allocation16]  }
  0x8a   :  { %5304 = dma.done.wait [#allocation4], 768  }
  0x8b   :  { %5305 = vsyncadd [#allocation4], 4294966528 }
  0x8c   :  { %5306 = dma.done.wait [#allocation7], 98432  }
  0x8d   :  { %5307 = vsyncadd [#allocation7], 4294868864 }
  0x8e   :  { %5308 = dma.done.wait [#allocation10], 65600  }
  0x8f   :  { %5309 = vsyncadd [#allocation10], 4294901696 }
  0x90   :  { %5310 = dma.done.wait [#allocation13], 16416  }
  0x91   :  { %5311 = vsyncadd [#allocation13], 4294950880 }
  0x92   :  { %5312 = dma.done.wait [#allocation16], 16  }
  0x93   :  { %5313 = vsyncadd [#allocation16], 4294967280  ;;  %v5332_v0 = vmov 0.0   ;;  %v328_v1 = vld [vmem:[#allocation6 + $0x8] sm:$0xff]  ;;  %v327_v6 = vld [vmem:[#allocation6] sm:$0xff]  ;;  %vm299_vm0 = vcmask 1041409  }
  0x94   :  { %139 = vst [vmem:[#allocation2 + $0x8] sm:$0xf] %v5332_v0  ;;  %v336_v2 = vld [vmem:[#allocation6 + $0x48] sm:$0xff]  ;;  %v335_v7 = vld [vmem:[#allocation6 + $0x40] sm:$0xff]  ;;  %vm301_vm1 = vcmask 1043459   ;;  %vm303_vm2 = vcmask 1045509  }
  0x95   :  { %v584_v3 = vld [vmem:[#allocation6 + $0x808] sm:$0xff]  ;;  %v3598_v4 = vpack.c.bf16 %v336_v2, %v328_v1  ;;  %v3600_v9 = vpack.c.bf16 %v335_v7, %v327_v6  ;;  %v583_v10 = vld [vmem:[#allocation6 + $0x800] sm:$0xff]  ;;  %vm305_vm3 = vcmask 1047559   ;;  %vm3529_vm4 = vcmask 17408  }
  0x96   :  { %v592_v5 = vld [vmem:[#allocation6 + $0x848] sm:$0xff]  ;;  %v591_v11 = vld [vmem:[#allocation6 + $0x840] sm:$0xff] }
  0x97   :  { %v3662_v8 = vpack.c.bf16 %v592_v5, %v584_v3  ;;  %v344_v12 = vld [vmem:[#allocation6 + $0x88] sm:$0xff]  ;;  %3599 = vmatprep.subr.bf16.mxu1 %v3598_v4  ;;  %v3664_v13 = vpack.c.bf16 %v591_v11, %v583_v10  ;;  %v343_v19 = vld [vmem:[#allocation6 + $0x80] sm:$0xff] }
  0x98   :  { %v352_v14 = vld [vmem:[#allocation6 + $0xc8] sm:$0xff]  ;;  %3601 = vmatpush1.bf16.msra.mxu1 %v3600_v9  ;;  %v351_v20 = vld [vmem:[#allocation6 + $0xc0] sm:$0xff] }
  0x99   :  { %v600_v15 = vld [vmem:[#allocation6 + $0x888] sm:$0xff]  ;;  %3663 = vmatprep.subr.bf16.mxu0 %v3662_v8  ;;  %v3602_v17 = vpack.c.bf16 %v352_v14, %v344_v12  ;;  %v599_v21 = vld [vmem:[#allocation6 + $0x880] sm:$0xff]  ;;  %v3604_v22 = vpack.c.bf16 %v351_v20, %v343_v19 }
  0x9a   :  { %v608_v16 = vld [vmem:[#allocation6 + $0x8c8] sm:$0xff]  ;;  %3665 = vmatpush1.bf16.msra.mxu0 %v3664_v13  ;;  %v607_v23 = vld [vmem:[#allocation6 + $0x8c0] sm:$0xff] }
  0x9b   :  { %v3666_v18 = vpack.c.bf16 %v608_v16, %v600_v15  ;;  %v360_v24 = vld [vmem:[#allocation6 + $0x108] sm:$0xff]  ;;  %3603 = vmatprep.subr.bf16.mxu1 %v3602_v17  ;;  %v3668_v26 = vpack.c.bf16 %v607_v23, %v599_v21  ;;  %v359_v30 = vld [vmem:[#allocation6 + $0x100] sm:$0xff] }
  0x9c   :  { %v368_v25 = vld [vmem:[#allocation6 + $0x148] sm:$0xff]  ;;  %v367_v32 = vld [vmem:[#allocation6 + $0x140] sm:$0xff]  ;;  %3605 = vmatpush1.bf16.msra.mxu1 %v3604_v22 }
  0x9d   :  { %3667 = vmatprep.subr.bf16.mxu0 %v3666_v18  ;;  %v3606_v27 = vpack.c.bf16 %v368_v25, %v360_v24  ;;  %v616_v28 = vld [vmem:[#allocation6 + $0x908] sm:$0xff]  ;;  %v615_v33 = vld [vmem:[#allocation6 + $0x900] sm:$0xff]  ;;  %v3608_v35 = vpack.c.bf16 %v367_v32, %v359_v30 }
  0x9e   :  { %v624_v29 = vld [vmem:[#allocation6 + $0x948] sm:$0xff]  ;;  %v623_v34 = vld [vmem:[#allocation6 + $0x940] sm:$0xff]  ;;  %3669 = vmatpush1.bf16.msra.mxu0 %v3668_v26 }
  0x9f   :  { %v3670_v31 = vpack.c.bf16 %v624_v29, %v616_v28  ;;  %v376_v36 = vld [vmem:[#allocation6 + $0x188] sm:$0xff]  ;;  %3607 = vmatprep.subr.bf16.mxu1 %v3606_v27  ;;  %v3672_v39 = vpack.c.bf16 %v623_v34, %v615_v33  ;;  %v375_v42 = vld [vmem:[#allocation6 + $0x180] sm:$0xff] }
  0xa0   :  { %v384_v37 = vld [vmem:[#allocation6 + $0x1c8] sm:$0xff]  ;;  %v383_v43 = vld [vmem:[#allocation6 + $0x1c0] sm:$0xff]  ;;  %3609 = vmatpush1.bf16.msra.mxu1 %v3608_v35 }
  0xa1   :  { %v632_v38 = vld [vmem:[#allocation6 + $0x988] sm:$0xff]  ;;  %v3610_v40 = vpack.c.bf16 %v384_v37, %v376_v36  ;;  %3671 = vmatprep.subr.bf16.mxu0 %v3670_v31  ;;  %v631_v45 = vld [vmem:[#allocation6 + $0x980] sm:$0xff]  ;;  %v3612_v51 = vpack.c.bf16 %v383_v43, %v375_v42 }
  0xa2   :  { %v640_v41 = vld [vmem:[#allocation6 + $0x9c8] sm:$0xff]  ;;  %v639_v46 = vld [vmem:[#allocation6 + $0x9c0] sm:$0xff]  ;;  %3673 = vmatpush1.bf16.msra.mxu0 %v3672_v39 }
  0xa3   :  { %v3674_v44 = vpack.c.bf16 %v640_v41, %v632_v38  ;;  %v392_v47 = vld [vmem:[#allocation6 + $0x208] sm:$0xff]  ;;  %3611 = vmatprep.subr.bf16.mxu1 %v3610_v40  ;;  %v3676_v52 = vpack.c.bf16 %v639_v46, %v631_v45  ;;  %v391_v54 = vld [vmem:[#allocation6 + $0x200] sm:$0xff]  ;;  %v5333_v46 = vmov 1983009808  }
  0xa4   :  { %v400_v48 = vld [vmem:[#allocation6 + $0x248] sm:$0xff]  ;;  %v399_v55 = vld [vmem:[#allocation6 + $0x240] sm:$0xff]  ;;  %3613 = vmatpush1.bf16.msra.mxu1 %v3612_v51 }
  0xa5   :  { %v648_v49 = vld [vmem:[#allocation6 + $0xa08] sm:$0xff]  ;;  %v3614_v53 = vpack.c.bf16 %v400_v48, %v392_v47  ;;  %v647_v56 = vld [vmem:[#allocation6 + $0xa00] sm:$0xff]  ;;  %3675 = vmatprep.subr.bf16.mxu0 %v3674_v44  ;;  %v3616_v63 = vpack.c.bf16 %v399_v55, %v391_v54  ;;  %v5481_v47 = vunpack.c.l.s4 %v5333_v46  ;;  %v249_v48 = vlaneseq }
  0xa6   :  { %v656_v50 = vld [vmem:[#allocation6 + $0xa48] sm:$0xff]  ;;  %v655_v58 = vld [vmem:[#allocation6 + $0xa40] sm:$0xff]  ;;  %3677 = vmatpush1.bf16.msra.mxu0 %v3676_v52 }
  0xa7   :  { %v3678_v57 = vpack.c.bf16 %v656_v50, %v648_v49  ;;  %v408_v59 = vld [vmem:[#allocation6 + $0x288] sm:$0xff]  ;;  %3615 = vmatprep.subr.bf16.mxu1 %v3614_v53  ;;  %v3680_v0 = vpack.c.bf16 %v655_v58, %v647_v56  ;;  %v407_v2 = vld [vmem:[#allocation6 + $0x280] sm:$0xff] }
  0xa8   :  { %v416_v60 = vld [vmem:[#allocation6 + $0x2c8] sm:$0xff]  ;;  %v415_v3 = vld [vmem:[#allocation6 + $0x2c0] sm:$0xff]  ;;  %3617 = vmatpush1.bf16.msra.mxu1 %v3616_v63 }
  0xa9   :  { %v664_v61 = vld [vmem:[#allocation6 + $0xa88] sm:$0xff]  ;;  %v3618_v1 = vpack.c.bf16 %v416_v60, %v408_v59  ;;  %v663_v4 = vld [vmem:[#allocation6 + $0xa80] sm:$0xff]  ;;  %3679 = vmatprep.subr.bf16.mxu0 %v3678_v57  ;;  %v3620_v11 = vpack.c.bf16 %v415_v3, %v407_v2 }
  0xaa   :  { %v672_v62 = vld [vmem:[#allocation6 + $0xac8] sm:$0xff]  ;;  %v671_v6 = vld [vmem:[#allocation6 + $0xac0] sm:$0xff]  ;;  %3681 = vmatpush1.bf16.msra.mxu0 %v3680_v0 }
  0xab   :  { %v3682_v5 = vpack.c.bf16 %v672_v62, %v664_v61  ;;  %v424_v7 = vld [vmem:[#allocation6 + $0x308] sm:$0xff]  ;;  %3619 = vmatprep.subr.bf16.mxu1 %v3618_v1  ;;  %v3684_v12 = vpack.c.bf16 %v671_v6, %v663_v4  ;;  %v423_v14 = vld [vmem:[#allocation6 + $0x300] sm:$0xff] }
  0xac   :  { %v432_v8 = vld [vmem:[#allocation6 + $0x348] sm:$0xff]  ;;  %v431_v15 = vld [vmem:[#allocation6 + $0x340] sm:$0xff]  ;;  %3621 = vmatpush1.bf16.msra.mxu1 %v3620_v11  ;;  %v5524_v11 = vshrl.u32 %v249_v48, 7 }
  0xad   :  { %v680_v9 = vld [vmem:[#allocation6 + $0xb08] sm:$0xff]  ;;  %v3622_v13 = vpack.c.bf16 %v432_v8, %v424_v7  ;;  %v679_v16 = vld [vmem:[#allocation6 + $0xb00] sm:$0xff]  ;;  %3683 = vmatprep.subr.bf16.mxu0 %v3682_v5  ;;  %v3624_v23 = vpack.c.bf16 %v431_v15, %v423_v14 }
  0xae   :  { %v688_v10 = vld [vmem:[#allocation6 + $0xb48] sm:$0xff]  ;;  %v687_v18 = vld [vmem:[#allocation6 + $0xb40] sm:$0xff]  ;;  %3685 = vmatpush1.bf16.msra.mxu0 %v3684_v12 }
  0xaf   :  { %v3686_v17 = vpack.c.bf16 %v688_v10, %v680_v9  ;;  %v440_v19 = vld [vmem:[#allocation6 + $0x388] sm:$0xff]  ;;  %3623 = vmatprep.subr.bf16.mxu1 %v3622_v13  ;;  %v3688_v24 = vpack.c.bf16 %v687_v18, %v679_v16  ;;  %v439_v26 = vld [vmem:[#allocation6 + $0x380] sm:$0xff]  ;;  %v248_v10 = vunpack.c.0.s8 %v5481_v47 }
  0xb0   :  { %v448_v20 = vld [vmem:[#allocation6 + $0x3c8] sm:$0xff]  ;;  %v447_v27 = vld [vmem:[#allocation6 + $0x3c0] sm:$0xff]  ;;  %3625 = vmatpush1.bf16.msra.mxu1 %v3624_v23 }
  0xb1   :  { %v696_v21 = vld [vmem:[#allocation6 + $0xb88] sm:$0xff]  ;;  %v3626_v25 = vpack.c.bf16 %v448_v20, %v440_v19  ;;  %v695_v28 = vld [vmem:[#allocation6 + $0xb80] sm:$0xff]  ;;  %3687 = vmatprep.subr.bf16.mxu0 %v3686_v17  ;;  %v3628_v35 = vpack.c.bf16 %v447_v27, %v439_v26 }
  0xb2   :  { %v704_v22 = vld [vmem:[#allocation6 + $0xbc8] sm:$0xff]  ;;  %v703_v30 = vld [vmem:[#allocation6 + $0xbc0] sm:$0xff]  ;;  %3689 = vmatpush1.bf16.msra.mxu0 %v3688_v24 }
  0xb3   :  { %v3690_v29 = vpack.c.bf16 %v704_v22, %v696_v21  ;;  %v456_v31 = vld [vmem:[#allocation6 + $0x408] sm:$0xff]  ;;  %v455_v36 = vld [vmem:[#allocation6 + $0x400] sm:$0xff]  ;;  %3627 = vmatprep.subr.bf16.mxu1 %v3626_v25  ;;  %v3692_v37 = vpack.c.bf16 %v703_v30, %v695_v28 }
  0xb4   :  { %v464_v32 = vld [vmem:[#allocation6 + $0x448] sm:$0xff]  ;;  %v463_v39 = vld [vmem:[#allocation6 + $0x440] sm:$0xff]  ;;  %3629 = vmatpush1.bf16.msra.mxu1 %v3628_v35 }
  0xb5   :  { %v712_v33 = vld [vmem:[#allocation6 + $0xc08] sm:$0xff]  ;;  %v3630_v38 = vpack.c.bf16 %v464_v32, %v456_v31  ;;  %v711_v40 = vld [vmem:[#allocation6 + $0xc00] sm:$0xff]  ;;  %3691 = vmatprep.subr.bf16.mxu0 %v3690_v29  ;;  %v3632_v52 = vpack.c.bf16 %v463_v39, %v455_v36 }
  0xb6   :  { %v720_v34 = vld [vmem:[#allocation6 + $0xc48] sm:$0xff]  ;;  %v719_v41 = vld [vmem:[#allocation6 + $0xc40] sm:$0xff]  ;;  %3693 = vmatpush1.bf16.msra.mxu0 %v3692_v37 }
  0xb7   :  { %v3694_v42 = vpack.c.bf16 %v720_v34, %v712_v33  ;;  %v472_v43 = vld [vmem:[#allocation6 + $0x488] sm:$0xff]  ;;  %v5483_v50 = vld [vmem:[#allocation6 + $0x480] sm:$0xff]  ;;  %3631 = vmatprep.subr.bf16.mxu1 %v3630_v38  ;;  %v3696_v57 = vpack.c.bf16 %v719_v41, %v711_v40  ;;  %v5579_v38 = vsub.s32 %v248_v10, %v5524_v11 }
  0xb8   :  { %v480_v44 = vld [vmem:[#allocation6 + $0x4c8] sm:$0xff]  ;;  %v5485_v51 = vld [vmem:[#allocation6 + $0x4c0] sm:$0xff]  ;;  %3633 = vmatpush1.bf16.msra.mxu1 %v3632_v52 }
  0xb9   :  { %v728_v45 = vld [vmem:[#allocation6 + $0xc88] sm:$0xff]  ;;  %v5487_v53 = vld [vmem:[#allocation6 + $0xc80] sm:$0xff]  ;;  %v3634_v58 = vpack.c.bf16 %v480_v44, %v472_v43  ;;  %3695 = vmatprep.subr.bf16.mxu0 %v3694_v42  ;;  %v3636_v20 = vpack.c.bf16 %v5485_v51, %v5483_v50 }
  0xba   :  { %v736_v49 = vld [vmem:[#allocation6 + $0xcc8] sm:$0xff]  ;;  %v5489_v54 = vld [vmem:[#allocation6 + $0xcc0] sm:$0xff]  ;;  %3697 = vmatpush1.bf16.msra.mxu0 %v3696_v57 }
  0xbb   :  { %v5491_v55 = vld [vmem:[#allocation6 + $0x508] sm:$0xff]  ;;  %v5499_v61 = vld [vmem:[#allocation6 + $0x500] sm:$0xff]  ;;  %v3698_v1 = vpack.c.bf16 %v736_v49, %v728_v45  ;;  %3635 = vmatprep.subr.bf16.mxu1 %v3634_v58  ;;  %v3700_v27 = vpack.c.bf16 %v5489_v54, %v5487_v53 }
  0xbc   :  { %v5493_v56 = vld [vmem:[#allocation6 + $0x548] sm:$0xff]  ;;  %v5501_v62 = vld [vmem:[#allocation6 + $0x540] sm:$0xff]  ;;  %3637 = vmatpush1.bf16.msra.mxu1 %v3636_v20 }
  0xbd   :  { %v5495_v59 = vld [vmem:[#allocation6 + $0xd08] sm:$0xff]  ;;  %v5503_v63 = vld [vmem:[#allocation6 + $0xd00] sm:$0xff]  ;;  %v3638_v28 = vpack.c.bf16 %v5493_v56, %v5491_v55  ;;  %3699 = vmatprep.subr.bf16.mxu0 %v3698_v1  ;;  %v3640_v33 = vpack.c.bf16 %v5501_v62, %v5499_v61  ;;  %v146_v1 = vld [vmem:[#allocation3 + $0x20] sm:$0xff] }
  0xbe   :  { %v5497_v60 = vld [vmem:[#allocation6 + $0xd48] sm:$0xff]  ;;  %v5505_v0 = vld [vmem:[#allocation6 + $0xd40] sm:$0xff]  ;;  %3701 = vmatpush1.bf16.msra.mxu0 %v3700_v27 }
  0xbf   :  { %v5507_v2 = vld [vmem:[#allocation6 + $0x588] sm:$0xff]  ;;  %v5515_v6 = vld [vmem:[#allocation6 + $0x580] sm:$0xff]  ;;  %v3702_v32 = vpack.c.bf16 %v5497_v60, %v5495_v59  ;;  %v3704_v34 = vpack.c.bf16 %v5505_v0, %v5503_v63  ;;  %3639 = vmatprep.subr.bf16.mxu1 %v3638_v28  ;;  %v142_v60 = vld [vmem:[#allocation3] sm:$0xff] }
  0xc0   :  { %v5509_v3 = vld [vmem:[#allocation6 + $0x5c8] sm:$0xff]  ;;  %v5517_v7 = vld [vmem:[#allocation6 + $0x5c0] sm:$0xff]  ;;  %v143_v63 = vld [vmem:[#allocation3 + $0x8] sm:$0xff]  ;;  %3641 = vmatpush1.bf16.msra.mxu1 %v3640_v33 }
  0xc1   :  { %v5511_v4 = vld [vmem:[#allocation6 + $0xd88] sm:$0xff]  ;;  %v5519_v8 = vld [vmem:[#allocation6 + $0xd80] sm:$0xff]  ;;  %v3642_v39 = vpack.c.bf16 %v5509_v3, %v5507_v2  ;;  %v3644_v41 = vpack.c.bf16 %v5517_v7, %v5515_v6  ;;  %3703 = vmatprep.subr.bf16.mxu0 %v3702_v32  ;;  %v148_v2 = vunpack.c.l.bf16 %v142_v60  ;;  %v149_v3 = vunpack.c.h.bf16 %v142_v60 }
  0xc2   :  { %v5513_v5 = vld [vmem:[#allocation6 + $0xdc8] sm:$0xff]  ;;  %v5521_v9 = vld [vmem:[#allocation6 + $0xdc0] sm:$0xff]  ;;  %3705 = vmatpush1.bf16.msra.mxu0 %v3704_v34 }
  0xc3   :  { %v5526_v12 = vld [vmem:[#allocation6 + $0x608] sm:$0xff]  ;;  %v5534_v16 = vld [vmem:[#allocation6 + $0x600] sm:$0xff]  ;;  %v3706_v40 = vpack.c.bf16 %v5513_v5, %v5511_v4  ;;  %v3708_v42 = vpack.c.bf16 %v5521_v9, %v5519_v8  ;;  %v150_v4 = vunpack.c.l.bf16 %v143_v63  ;;  %v151_v5 = vunpack.c.h.bf16 %v143_v63  ;;  %3643 = vmatprep.subr.bf16.mxu1 %v3642_v39 }
  0xc4   :  { %v5528_v13 = vld [vmem:[#allocation6 + $0x648] sm:$0xff]  ;;  %v5536_v17 = vld [vmem:[#allocation6 + $0x640] sm:$0xff]  ;;  %v156_v8 = vunpack.c.l.bf16 %v146_v1  ;;  %v157_v9 = vunpack.c.h.bf16 %v146_v1  ;;  %v160_v10 = vrot.slane %v148_v2, 4  ;;  %3645 = vmatpush1.bf16.msra.mxu1 %v3644_v41 }
  0xc5   :  { %v5530_v14 = vld [vmem:[#allocation6 + $0xe08] sm:$0xff]  ;;  %v5538_v18 = vld [vmem:[#allocation6 + $0xe00] sm:$0xff]  ;;  %v3646_v46 = vpack.c.bf16 %v5528_v13, %v5526_v12  ;;  %v3648_v48 = vpack.c.bf16 %v5536_v17, %v5534_v16  ;;  %v166_v12 = vrot.slane %v149_v3, 4  ;;  %3707 = vmatprep.subr.bf16.mxu0 %v3706_v40  ;;  %v172_v13 = vrot.slane %v150_v4, 4 }
  0xc6   :  { %v5532_v15 = vld [vmem:[#allocation6 + $0xe48] sm:$0xff]  ;;  %v5540_v19 = vld [vmem:[#allocation6 + $0xe40] sm:$0xff]  ;;  %v161_v17 = vadd.f32 %v160_v10, %v148_v2  ;;  %3709 = vmatpush1.bf16.msra.mxu0 %v3708_v42 }
  0xc7   :  { %v5544_v21 = vld [vmem:[#allocation6 + $0x688] sm:$0xff]  ;;  %v5552_v25 = vld [vmem:[#allocation6 + $0x680] sm:$0xff]  ;;  %v3710_v47 = vpack.c.bf16 %v5532_v15, %v5530_v14  ;;  %v3712_v49 = vpack.c.bf16 %v5540_v19, %v5538_v18  ;;  %v178_v14 = vrot.slane %v151_v5, 4  ;;  %v167_v20 = vadd.f32 %v166_v12, %v149_v3  ;;  %3647 = vmatprep.subr.bf16.mxu1 %v3646_v46 }
  0xc8   :  { %v5546_v22 = vld [vmem:[#allocation6 + $0x6c8] sm:$0xff]  ;;  %v5554_v26 = vld [vmem:[#allocation6 + $0x6c0] sm:$0xff]  ;;  %v173_v27 = vadd.f32 %v172_v13, %v150_v4  ;;  %v162_v34 = vrot.slane %v161_v17, 2  ;;  %3649 = vmatpush1.bf16.msra.mxu1 %v3648_v48 }
  0xc9   :  { %v5548_v23 = vld [vmem:[#allocation6 + $0xe88] sm:$0xff]  ;;  %v5560_v29 = vld [vmem:[#allocation6 + $0xe80] sm:$0xff]  ;;  %v3650_v53 = vpack.c.bf16 %v5546_v22, %v5544_v21  ;;  %v3652_v55 = vpack.c.bf16 %v5554_v26, %v5552_v25  ;;  %v208_v21 = vrot.slane %v156_v8, 4  ;;  %v214_v22 = vrot.slane %v157_v9, 4  ;;  %3711 = vmatprep.subr.bf16.mxu0 %v3710_v47 }
  0xca   :  { %v5550_v24 = vld [vmem:[#allocation6 + $0xec8] sm:$0xff]  ;;  %v5562_v30 = vld [vmem:[#allocation6 + $0xec0] sm:$0xff]  ;;  %v179_v28 = vadd.f32 %v178_v14, %v151_v5  ;;  %v168_v39 = vrot.slane %v167_v20, 2  ;;  %v174_v40 = vrot.slane %v173_v27, 2  ;;  %v163_v2 = vadd.f32 %v162_v34, %v161_v17  ;;  %3713 = vmatpush1.bf16.msra.mxu0 %v3712_v49 }
  0xcb   :  { %v5564_v31 = vld [vmem:[#allocation6 + $0x708] sm:$0xff]  ;;  %v5589_v43 = vld [vmem:[#allocation6 + $0x700] sm:$0xff]  ;;  %v3714_v54 = vpack.c.bf16 %v5550_v24, %v5548_v23  ;;  %v3716_v56 = vpack.c.bf16 %v5562_v30, %v5560_v29  ;;  %v209_v60 = vadd.f32 %v208_v21, %v156_v8  ;;  %v215_v63 = vadd.f32 %v214_v22, %v157_v9  ;;  %3651 = vmatprep.subr.bf16.mxu1 %v3650_v53  ;;  %v330_v29 = vld [vmem:[#allocation6 + $0x18] sm:$0xff] }
  0xcc   :  { %v5572_v35 = vld [vmem:[#allocation6 + $0x748] sm:$0xff]  ;;  %v5591_v44 = vld [vmem:[#allocation6 + $0x740] sm:$0xff]  ;;  %v169_v3 = vadd.f32 %v168_v39, %v167_v20  ;;  %v175_v41 = vadd.f32 %v174_v40, %v173_v27  ;;  %v164_v42 = vrot.slane %v163_v2, 1  ;;  %3653 = vmatpush1.bf16.msra.mxu1 %v3652_v55  ;;  %v338_v30 = vld [vmem:[#allocation6 + $0x58] sm:$0xff] }
  0xcd   :  { %v5574_v36 = vld [vmem:[#allocation6 + $0xf08] sm:$0xff]  ;;  %v5593_v45 = vld [vmem:[#allocation6 + $0xf00] sm:$0xff]  ;;  %v3654_v57 = vpack.c.bf16 %v5572_v35, %v5564_v31  ;;  %v3656_v59 = vpack.c.bf16 %v5591_v44, %v5589_v43  ;;  %v210_v10 = vrot.slane %v209_v60, 2  ;;  %v216_v12 = vrot.slane %v215_v63, 2  ;;  %3715 = vmatprep.subr.bf16.mxu0 %v3714_v54  ;;  %v337_v40 = vld [vmem:[#allocation6 + $0x50] sm:$0xff] }
  0xce   :  { %v5576_v37 = vld [vmem:[#allocation6 + $0xf48] sm:$0xff]  ;;  %v5603_v50 = vld [vmem:[#allocation6 + $0xf40] sm:$0xff]  ;;  %v170_v46 = vrot.slane %v169_v3, 1  ;;  %v176_v8 = vrot.slane %v175_v41, 1  ;;  %3717 = vmatpush1.bf16.msra.mxu0 %v3716_v56  ;;  %v3790_v39 = vpack.c.bf16 %v338_v30, %v330_v29 }
  0xcf   :  { %v5605_v51 = vld [vmem:[#allocation6 + $0x788] sm:$0xff]  ;;  %v3718_v58 = vpack.c.bf16 %v5576_v37, %v5574_v36  ;;  %v3720_v61 = vpack.c.bf16 %v5603_v50, %v5593_v45  ;;  %v211_v47 = vadd.f32 %v210_v10, %v209_v60  ;;  %3655 = vmatprep.subr.bf16.mxu1 %v3654_v57  ;;  %v567_v23 = vld [vmem:[#allocation6 + $0x780] sm:$0xff] }
  0xd0   :  { %v5607_v52 = vld [vmem:[#allocation6 + $0x7c8] sm:$0xff]  ;;  %v177_v19 = vadd.f32 %v176_v8, %v175_v41  ;;  %v575_v24 = vld [vmem:[#allocation6 + $0x7c0] sm:$0xff]  ;;  %3657 = vmatpush1.bf16.msra.mxu1 %v3656_v59 }
  0xd1   :  { %v145_v0 = vld [vmem:[#allocation3 + $0x18] sm:$0xff]  ;;  %v212_v17 = vrot.slane %v211_v47, 1  ;;  %v823_v54 = vld [vmem:[#allocation6 + $0xf80] sm:$0xff]  ;;  %3719 = vmatprep.subr.bf16.mxu0 %v3718_v58  ;;  %v5933_v37 = vpack.c.bf16 %v5607_v52, %v5605_v51 }
  0xd2   :  { %v154_v6 = vunpack.c.l.bf16 %v145_v0  ;;  %v155_v7 = vunpack.c.h.bf16 %v145_v0  ;;  %v180_v0 = vrot.slane %v179_v28, 2  ;;  %v824_v14 = vld [vmem:[#allocation6 + $0xf88] sm:$0xff]  ;;  %v831_v26 = vld [vmem:[#allocation6 + $0xfc0] sm:$0xff]  ;;  %3721 = vmatpush1.bf16.msra.mxu0 %v3720_v61 }
  0xd3   :  { %v213_v21 = vadd.f32 %v212_v17, %v211_v47  ;;  %v840_v35 = vld [vmem:[#allocation6 + $0x1008] sm:$0xff]  ;;  %3659 = vmatprep.subr.bf16.mxu1 %v5933_v37  ;;  %v3724_v58 = vpack.c.bf16 %v831_v26, %v823_v54  ;;  %v839_v10 = vld [vmem:[#allocation6 + $0x1000] sm:$0xff]  ;;  %v345_v47 = vld [vmem:[#allocation6 + $0x90] sm:$0xff] }
  0xd4   :  { %v196_v15 = vrot.slane %v154_v6, 4  ;;  %v202_v16 = vrot.slane %v155_v7, 4  ;;  %v181_v4 = vadd.f32 %v180_v0, %v179_v28  ;;  %v848_v57 = vld [vmem:[#allocation6 + $0x1048] sm:$0xff]  ;;  %v887_v30 = vld [vmem:[#allocation6 + $0x1180] sm:$0xff] }
  0xd5   :  { %v3726_v43 = vpack.c.bf16 %v848_v57, %v840_v35  ;;  %v872_v17 = vld [vmem:[#allocation6 + $0x1108] sm:$0xff]  ;;  %v394_v35 = vld [vmem:[#allocation6 + $0x218] sm:$0xff]  ;;  %v144_v37 = vld [vmem:[#allocation3 + $0x10] sm:$0xff] }
  0xd6   :  { %v197_v32 = vadd.f32 %v196_v15, %v154_v6  ;;  %v203_v33 = vadd.f32 %v202_v16, %v155_v7  ;;  %v217_v7 = vadd.f32 %v216_v12, %v215_v63  ;;  %v182_v9 = vrot.slane %v181_v4, 1  ;;  %v832_v15 = vld [vmem:[#allocation6 + $0xfc8] sm:$0xff]  ;;  %v329_v63 = vld [vmem:[#allocation6 + $0x10] sm:$0xff]  ;;  %v847_v12 = vld [vmem:[#allocation6 + $0x1040] sm:$0xff] }
  0xd7   :  { %v171_v16 = vadd.f32 %v170_v46, %v169_v3  ;;  %v3722_v25 = vpack.c.bf16 %v832_v15, %v824_v14  ;;  %v354_v3 = vld [vmem:[#allocation6 + $0xd8] sm:$0xff]  ;;  %v855_v15 = vld [vmem:[#allocation6 + $0x1080] sm:$0xff]  ;;  %v896_v26 = vld [vmem:[#allocation6 + $0x11c8] sm:$0xff] }
  0xd8   :  { %v198_v1 = vrot.slane %v197_v32, 2  ;;  %v204_v62 = vrot.slane %v203_v33, 2  ;;  %v218_v18 = vrot.slane %v217_v7, 1  ;;  %v183_v49 = vadd.f32 %v182_v9, %v181_v4  ;;  %v402_v57 = vld [vmem:[#allocation6 + $0x258] sm:$0xff] }
  0xd9   :  { %3723 = vmatprep.subr.bf16.mxu0 %v3722_v25  ;;  %v3728_v9 = vpack.c.bf16 %v847_v12, %v839_v10 }
  0xda   :  { %v199_v5 = vadd.f32 %v198_v1, %v197_v32  ;;  %v205_v6 = vadd.f32 %v204_v62, %v203_v33  ;;  %v165_v62 = vadd.f32 %v164_v42, %v163_v2  ;;  %v219_v22 = vadd.f32 %v218_v18, %v217_v7  ;;  %3725 = vmatpush1.bf16.msra.mxu0 %v3724_v58  ;;  %v346_v2 = vld [vmem:[#allocation6 + $0x98] sm:$0xff]  ;;  %v864_v42 = vld [vmem:[#allocation6 + $0x10c8] sm:$0xff]  ;;  %v353_v7 = vld [vmem:[#allocation6 + $0xd0] sm:$0xff] }
  0xdb   :  { %v245_v55 = vcombine.low %v177_v19, %v183_v49  ;;  %v3660_v32 = vpack.c.bf16 %v575_v24, %v567_v23  ;;  %3727 = vmatprep.subr.bf16.mxu0 %v3726_v43  ;;  %v3794_v46 = vpack.c.bf16 %v354_v3, %v346_v2  ;;  %v880_v18 = vld [vmem:[#allocation6 + $0x1148] sm:$0xff]  ;;  %v361_v49 = vld [vmem:[#allocation6 + $0x110] sm:$0xff]  ;;  %v378_v23 = vld [vmem:[#allocation6 + $0x198] sm:$0xff] }
  0xdc   :  { %v200_v48 = vrot.slane %v199_v5, 1  ;;  %v206_v13 = vrot.slane %v205_v6, 1  ;;  %v244_v27 = vcombine.low %v165_v62, %v171_v16  ;;  %v270_v31 = vcombine.low %v213_v21, %v219_v22  ;;  %v863_v62 = vld [vmem:[#allocation6 + $0x10c0] sm:$0xff]  ;;  %v386_v24 = vld [vmem:[#allocation6 + $0x1d8] sm:$0xff]  ;;  %v401_v43 = vld [vmem:[#allocation6 + $0x250] sm:$0xff] }
  0xdd   :  { %v259_v33 = vrot.slane %v245_v55, %v5579_v38  ;;  %3661 = vmatpush1.bf16.msra.mxu1 %v3660_v32  ;;  %v3796_v16 = vpack.c.bf16 %v353_v7, %v345_v47  ;;  %v3734_v54 = vpack.c.bf16 %v880_v18, %v872_v17  ;;  %v871_v21 = vld [vmem:[#allocation6 + $0x1100] sm:$0xff]  ;;  %v377_v55 = vld [vmem:[#allocation6 + $0x190] sm:$0xff]  ;;  %v3802_v29 = vpack.c.bf16 %v386_v24, %v378_v23  ;;  %v147_v58 = vld [vmem:[#allocation3 + $0x28] sm:$0xff] }
  0xde   :  { %v201_v53 = vadd.f32 %v200_v48, %v199_v5  ;;  %v207_v20 = vadd.f32 %v206_v13, %v205_v6  ;;  %v252_v56 = vrot.slane %v244_v27, %v5579_v38  ;;  %v284_v34 = vrot.slane %v270_v31, %v5579_v38  ;;  %3791 = vmatprep.subr.bf16.mxu1 %v3790_v39  ;;  %v856_v6 = vld [vmem:[#allocation6 + $0x1088] sm:$0xff]  ;;  %v362_v48 = vld [vmem:[#allocation6 + $0x118] sm:$0xff]  ;;  %v879_v22 = vld [vmem:[#allocation6 + $0x1140] sm:$0xff] }
  0xdf   :  { %v3792_v5 = vpack.c.bf16 %v337_v40, %v329_v63  ;;  %v370_v13 = vld [vmem:[#allocation6 + $0x158] sm:$0xff]  ;;  %v3730_v14 = vpack.c.bf16 %v864_v42, %v856_v6  ;;  %v888_v27 = vld [vmem:[#allocation6 + $0x1188] sm:$0xff]  ;;  %v895_v31 = vld [vmem:[#allocation6 + $0x11c0] sm:$0xff] }
  0xe0   :  { %v269_v28 = vcombine.low %v201_v53, %v207_v20  ;;  %v260_v44 = vcombine.low %v252_v56, %v259_v33  ;;  %v3798_v19 = vpack.c.bf16 %v370_v13, %v362_v48  ;;  %v369_v53 = vld [vmem:[#allocation6 + $0x150] sm:$0xff]  ;;  %v3732_v20 = vpack.c.bf16 %v863_v62, %v855_v15  ;;  %v410_v63 = vld [vmem:[#allocation6 + $0x298] sm:$0xff]  ;;  %v920_v6 = vld [vmem:[#allocation6 + $0x1288] sm:$0xff] }
  0xe1   :  { %v3800_v25 = vpack.c.bf16 %v369_v53, %v361_v49  ;;  %v3736_v56 = vpack.c.bf16 %v879_v22, %v871_v21  ;;  %v3738_v32 = vpack.c.bf16 %v896_v26, %v888_v27  ;;  %v393_v39 = vld [vmem:[#allocation6 + $0x210] sm:$0xff]  ;;  %v418_v40 = vld [vmem:[#allocation6 + $0x2d8] sm:$0xff]  ;;  %v928_v42 = vld [vmem:[#allocation6 + $0x12c8] sm:$0xff] }
  0xe2   :  { %v277_v36 = vrot.slane %v269_v28, %v5579_v38  ;;  %v385_v28 = vld [vmem:[#allocation6 + $0x1d0] sm:$0xff]  ;;  %v3810_v15 = vpack.c.bf16 %v418_v40, %v410_v63  ;;  %v919_v62 = vld [vmem:[#allocation6 + $0x1280] sm:$0xff]  ;;  %v426_v17 = vld [vmem:[#allocation6 + $0x318] sm:$0xff]  ;;  %v3746_v23 = vpack.c.bf16 %v928_v42, %v920_v6 }
  0xe3   :  { %v3804_v33 = vpack.c.bf16 %v385_v28, %v377_v55  ;;  %v417_v47 = vld [vmem:[#allocation6 + $0x2d0] sm:$0xff]  ;;  %v434_v18 = vld [vmem:[#allocation6 + $0x358] sm:$0xff]  ;;  %v944_v21 = vld [vmem:[#allocation6 + $0x1348] sm:$0xff] }
  0xe4   :  { %v285_v59 = vcombine.low %v277_v36, %v284_v34  ;;  %v904_v36 = vld [vmem:[#allocation6 + $0x1208] sm:$0xff]  ;;  %v425_v22 = vld [vmem:[#allocation6 + $0x310] sm:$0xff]  ;;  %v458_v63 = vld [vmem:[#allocation6 + $0x418] sm:$0xff] }
  0xe5   :  { %v912_v34 = vld [vmem:[#allocation6 + $0x1248] sm:$0xff]  ;;  %v433_v27 = vld [vmem:[#allocation6 + $0x350] sm:$0xff]  ;;  %v466_v40 = vld [vmem:[#allocation6 + $0x458] sm:$0xff] }
  0xe6   :  { %v298_v60 = vrot.slane %v285_v59, 7  ;;  %v153_v59 = vunpack.c.h.bf16 %v144_v37  ;;  %v3742_v12 = vpack.c.bf16 %v912_v34, %v904_v36  ;;  %v3816_v34 = vpack.c.bf16 %v433_v27, %v425_v22  ;;  %v968_v6 = vld [vmem:[#allocation6 + $0x1408] sm:$0xff] }
  0xe7   :  { %v976_v42 = vld [vmem:[#allocation6 + $0x1448] sm:$0xff] }
  0xe8   :  { %v300_v45 = vsel %vm299_vm0, %v298_v60, %v260_v44  ;;  %v152_v44 = vunpack.c.l.bf16 %v144_v37  ;;  %v190_v2 = vrot.slane %v153_v59, 4  ;;  %v935_v37 = vld [vmem:[#allocation6 + $0x1300] sm:$0xff] }
  0xe9   :  { %v302_v50 = vsel %vm301_vm1, %v298_v60, %v300_v45  ;;  %v159_v45 = vunpack.c.h.bf16 %v147_v58 }
  0xea   :  { %v304_v51 = vsel %vm303_vm2, %v298_v60, %v302_v50  ;;  %v3740_v50 = vpack.c.bf16 %v895_v31, %v887_v30  ;;  %v3814_v30 = vpack.c.bf16 %v434_v18, %v426_v17  ;;  %v450_v31 = vld [vmem:[#allocation6 + $0x3d8] sm:$0xff]  ;;  %v967_v17 = vld [vmem:[#allocation6 + $0x1400] sm:$0xff] }
  0xeb   :  { %v306_v52 = vsel %vm305_vm3, %v298_v60, %v304_v51  ;;  %v158_v60 = vunpack.c.l.bf16 %v147_v58  ;;  %v3806_v51 = vpack.c.bf16 %v402_v57, %v394_v35  ;;  %v226_v10 = vrot.slane %v159_v45, 4  ;;  %v943_v58 = vld [vmem:[#allocation6 + $0x1340] sm:$0xff] }
  0xec   :  { %v325_v61 = vmul.f32 0.125, %v306_v52  ;;  %v903_v52 = vld [vmem:[#allocation6 + $0x1200] sm:$0xff] }
  0xed   :  { %v220_v3 = vrot.slane %v158_v60, 4  ;;  %v227_v13 = vadd.f32 %v226_v10, %v159_v45  ;;  %v951_v10 = vld [vmem:[#allocation6 + $0x1380] sm:$0xff] }
  0xee   :  { %v5663_v0 = vrot.slane %v325_v61, %v5579_v38  ;;  %v1139_v1 = vcombine.high %v325_v61, %v325_v61  ;;  %v911_v61 = vld [vmem:[#allocation6 + $0x1240] sm:$0xff] }
  0xef   :  { %v221_v48 = vadd.f32 %v220_v3, %v158_v60  ;;  %v975_v18 = vld [vmem:[#allocation6 + $0x1440] sm:$0xff] }
  0xf0   :  { %v5667_v41 = vcombine.high %v5663_v0, %v5663_v0  ;;  %v5670_v4 = vrot.slane %v1139_v1, %v5579_v38  ;;  %v184_v1 = vrot.slane %v152_v44, 4  ;;  %v3760_v27 = vpack.c.bf16 %v975_v18, %v967_v17  ;;  %v1048_v18 = vld [vmem:[#allocation6 + $0x1688] sm:$0xff] }
  0xf1   :  { %v222_v53 = vrot.slane %v221_v48, 2 }
  0xf2   :  { %1234 = vmatprep.mubr.f32.mxu1 %v5667_v41  ;;  %v5675_v8 = vcombine.high %v5670_v4, %v5670_v4  ;;  %v185_v7 = vadd.f32 %v184_v1, %v152_v44 }
  0xf3   :  { %1235 = vmatmul.mubr.f32.vlgmr.msra.gmra.mrb[0].mxu1 %v5663_v0  ;;  %v223_v55 = vadd.f32 %v222_v53, %v221_v48  ;;  %v465_v48 = vld [vmem:[#allocation6 + $0x450] sm:$0xff]  ;;  %v992_v53 = vld [vmem:[#allocation6 + $0x14c8] sm:$0xff] }
  0xf4   :  { %1305 = vmatprep.mubr.f32.mxu0 %v5675_v8  ;;  %3793 = vmatpush1.bf16.msra.mxu1 %v3792_v5  ;;  %v3808_v5 = vpack.c.bf16 %v401_v43, %v393_v39  ;;  %v952_v39 = vld [vmem:[#allocation6 + $0x1388] sm:$0xff] }
  0xf5   :  { %1306 = vmatmul.mubr.f32.vlgmr.msra.gmra.mrb[0].mxu0 %v5670_v4  ;;  %3795 = vmatprep.subr.bf16.mxu1 %v3794_v46  ;;  %v409_v46 = vld [vmem:[#allocation6 + $0x290] sm:$0xff]  ;;  %v960_v43 = vld [vmem:[#allocation6 + $0x13c8] sm:$0xff] }
  0xf6   :  { %3729 = vmatpush1.bf16.msra.mxu0 %v3728_v9  ;;  %1447 = vmatprep.mubr.f32.mxu1 %v5667_v41  ;;  %v191_v9 = vadd.f32 %v190_v2, %v153_v59  ;;  %v3812_v24 = vpack.c.bf16 %v417_v47, %v409_v46  ;;  %v3754_v3 = vpack.c.bf16 %v960_v43, %v952_v39  ;;  %v514_v39 = vld [vmem:[#allocation6 + $0x5d8] sm:$0xff] }
  0xf7   :  { %3731 = vmatprep.subr.bf16.mxu0 %v3730_v14  ;;  %v3744_v14 = vpack.c.bf16 %v911_v61, %v903_v52  ;;  %v449_v52 = vld [vmem:[#allocation6 + $0x3d0] sm:$0xff]  ;;  %v3752_v61 = vpack.c.bf16 %v943_v58, %v935_v37 }
  0xf8   :  { %3797 = vmatpush1.bf16.msra.mxu1 %v3796_v16  ;;  %v927_v16 = vld [vmem:[#allocation6 + $0x12c0] sm:$0xff]  ;;  %v192_v49 = vrot.slane %v191_v9, 2  ;;  %v497_v37 = vld [vmem:[#allocation6 + $0x550] sm:$0xff] }
  0xf9   :  { %3799 = vmatprep.subr.bf16.mxu1 %v3798_v19  ;;  %v186_v19 = vrot.slane %v185_v7, 2 }
  0xfa   :  { %3733 = vmatpush1.bf16.msra.mxu0 %v3732_v20  ;;  %v228_v20 = vrot.slane %v227_v13, 2  ;;  %v193_v26 = vadd.f32 %v192_v49, %v191_v9  ;;  %v457_v9 = vld [vmem:[#allocation6 + $0x410] sm:$0xff]  ;;  %v984_v49 = vld [vmem:[#allocation6 + $0x1488] sm:$0xff] }
  0xfb   :  { %3735 = vmatprep.subr.bf16.mxu0 %v3734_v54  ;;  %v936_v54 = vld [vmem:[#allocation6 + $0x1308] sm:$0xff] }
  0xfc   :  { %3801 = vmatpush1.bf16.msra.mxu1 %v3800_v25  ;;  %v187_v25 = vadd.f32 %v186_v19, %v185_v7  ;;  %v229_v28 = vadd.f32 %v228_v20, %v227_v13  ;;  %v194_v57 = vrot.slane %v193_v26, 1  ;;  %v3750_v36 = vpack.c.bf16 %v944_v21, %v936_v54  ;;  %v481_v54 = vld [vmem:[#allocation6 + $0x4d0] sm:$0xff]  ;;  %v141_v21 = vld [vmem:[#allocation2 + $0x8] sm:$0xf] }
  0xfd   :  { %3803 = vmatprep.subr.bf16.mxu1 %v3802_v29  ;;  %v3748_v29 = vpack.c.bf16 %v927_v16, %v919_v62  ;;  %v3822_v7 = vpack.c.bf16 %v466_v40, %v458_v63  ;;  %v3758_v16 = vpack.c.bf16 %v976_v42, %v968_v6  ;;  %v3824_v19 = vpack.c.bf16 %v465_v48, %v457_v9  ;;  %v522_v40 = vld [vmem:[#allocation6 + $0x618] sm:$0xff]  ;;  %v1040_v6 = vld [vmem:[#allocation6 + $0x1648] sm:$0xff] }
  0xfe   :  { %3737 = vmatpush1.bf16.msra.mxu0 %v3736_v56  ;;  %v442_v56 = vld [vmem:[#allocation6 + $0x398] sm:$0xff]  ;;  %v188_v35 = vrot.slane %v187_v25, 1  ;;  %v195_v59 = vadd.f32 %v194_v57, %v193_v26  ;;  %v1008_v57 = vld [vmem:[#allocation6 + $0x1548] sm:$0xff] }
  0xff   :  { %3739 = vmatprep.subr.bf16.mxu0 %v3738_v32  ;;  %v224_v32 = vrot.slane %v223_v55, 1  ;;  %v498_v26 = vld [vmem:[#allocation6 + $0x558] sm:$0xff] }
 0x100   :  { %3805 = vmatpush1.bf16.msra.mxu1 %v3804_v33  ;;  %v230_v33 = vrot.slane %v229_v28, 1  ;;  %v189_v44 = vadd.f32 %v188_v35, %v187_v25  ;;  %v490_v25 = vld [vmem:[#allocation6 + $0x518] sm:$0xff]  ;;  %v1000_v35 = vld [vmem:[#allocation6 + $0x1508] sm:$0xff] }
 0x101   :  { %3807 = vmatprep.subr.bf16.mxu1 %v3806_v51  ;;  %v225_v60 = vadd.f32 %v224_v32, %v223_v55  ;;  %v441_v51 = vld [vmem:[#allocation6 + $0x390] sm:$0xff]  ;;  %v3766_v43 = vpack.c.bf16 %v1008_v57, %v1000_v35  ;;  %v538_v48 = vld [vmem:[#allocation6 + $0x698] sm:$0xff] }
 0x102   :  { %3741 = vmatpush1.bf16.msra.mxu0 %v3740_v50  ;;  %v231_v45 = vadd.f32 %v230_v33, %v229_v28  ;;  %v3818_v50 = vpack.c.bf16 %v450_v31, %v442_v56  ;;  %v261_v1 = vcombine.low %v189_v44, %v195_v59  ;;  %v3762_v28 = vpack.c.bf16 %v992_v53, %v984_v49  ;;  %v999_v44 = vld [vmem:[#allocation6 + $0x1500] sm:$0xff]  ;;  %v570_v35 = vld [vmem:[#allocation6 + $0x798] sm:$0xff] }
 0x103   :  { %3743 = vmatprep.subr.bf16.mxu0 %v3742_v12  ;;  %v959_v12 = vld [vmem:[#allocation6 + $0x13c0] sm:$0xff]  ;;  %v3830_v33 = vpack.c.bf16 %v498_v26, %v490_v25  ;;  %v578_v57 = vld [vmem:[#allocation6 + $0x7d8] sm:$0xff] }
 0x104   :  { %3809 = vmatpush1.bf16.msra.mxu1 %v3808_v5  ;;  %v286_v2 = vcombine.low %v225_v60, %v231_v45  ;;  %v3820_v5 = vpack.c.bf16 %v449_v52, %v441_v51  ;;  %v268_v46 = vrot.slane %v261_v1, %v5579_v38  ;;  %v3756_v13 = vpack.c.bf16 %v959_v12, %v951_v10  ;;  %v1007_v59 = vld [vmem:[#allocation6 + $0x1540] sm:$0xff]  ;;  %v1016_v45 = vld [vmem:[#allocation6 + $0x1588] sm:$0xff]  ;;  %v505_v52 = vld [vmem:[#allocation6 + $0x590] sm:$0xff] }
 0x105   :  { %3811 = vmatprep.subr.bf16.mxu1 %v3810_v15  ;;  %v482_v15 = vld [vmem:[#allocation6 + $0x4d8] sm:$0xff]  ;;  %v3768_v63 = vpack.c.bf16 %v1007_v59, %v999_v44  ;;  %v1023_v10 = vld [vmem:[#allocation6 + $0x15c0] sm:$0xff]  ;;  %v577_v44 = vld [vmem:[#allocation6 + $0x7d0] sm:$0xff] }
 0x106   :  { %3745 = vmatpush1.bf16.msra.mxu0 %v3744_v14  ;;  %v293_v47 = vrot.slane %v286_v2, %v5579_v38  ;;  %v474_v14 = vld [vmem:[#allocation6 + $0x498] sm:$0xff]  ;;  %v1047_v25 = vld [vmem:[#allocation6 + $0x1680] sm:$0xff] }
 0x107   :  { %3747 = vmatprep.subr.bf16.mxu0 %v3746_v23  ;;  %v3826_v23 = vpack.c.bf16 %v482_v15, %v474_v14  ;;  %v530_v1 = vld [vmem:[#allocation6 + $0x658] sm:$0xff]  ;;  %v1055_v26 = vld [vmem:[#allocation6 + $0x16c0] sm:$0xff] }
 0x108   :  { %3813 = vmatpush1.bf16.msra.mxu1 %v3812_v24  ;;  %v309_v62 = vrot.slane %v293_v47, 7  ;;  %v473_v24 = vld [vmem:[#allocation6 + $0x490] sm:$0xff]  ;;  %v3838_v42 = vpack.c.bf16 %v530_v1, %v522_v40  ;;  %v340_v40 = vld [vmem:[#allocation6 + $0x68] sm:$0xff] }
 0x109   :  { %3815 = vmatprep.subr.bf16.mxu1 %v3814_v30  ;;  %v991_v30 = vld [vmem:[#allocation6 + $0x14c0] sm:$0xff]  ;;  %v3828_v31 = vpack.c.bf16 %v481_v54, %v473_v24  ;;  %v529_v47 = vld [vmem:[#allocation6 + $0x650] sm:$0xff]  ;;  %v554_v54 = vld [vmem:[#allocation6 + $0x718] sm:$0xff] }
 0x10a   :  { %3749 = vmatpush1.bf16.msra.mxu0 %v3748_v29  ;;  %v310_v20 = vsel %vm299_vm0, %v309_v62, %v268_v46  ;;  %v983_v29 = vld [vmem:[#allocation6 + $0x1480] sm:$0xff]  ;;  %v521_v46 = vld [vmem:[#allocation6 + $0x610] sm:$0xff] }
 0x10b   :  { %3751 = vmatprep.subr.bf16.mxu0 %v3750_v36  ;;  %v311_v22 = vsel %vm301_vm1, %v309_v62, %v310_v20  ;;  %v489_v36 = vld [vmem:[#allocation6 + $0x510] sm:$0xff]  ;;  %v3764_v58 = vpack.c.bf16 %v991_v30, %v983_v29  ;;  %v3840_v17 = vpack.c.bf16 %v529_v47, %v521_v46  ;;  %v339_v46 = vld [vmem:[#allocation6 + $0x60] sm:$0xff] }
 0x10c   :  { %3817 = vmatpush1.bf16.msra.mxu1 %v3816_v34  ;;  %v312_v55 = vsel %vm303_vm2, %v309_v62, %v311_v22  ;;  %v506_v34 = vld [vmem:[#allocation6 + $0x598] sm:$0xff]  ;;  %v3832_v60 = vpack.c.bf16 %v497_v37, %v489_v36  ;;  %v537_v20 = vld [vmem:[#allocation6 + $0x690] sm:$0xff]  ;;  %v1071_v36 = vld [vmem:[#allocation6 + $0x1740] sm:$0xff] }
 0x10d   :  { %3819 = vmatprep.subr.bf16.mxu1 %v3818_v50  ;;  %v313_v56 = vsel %vm305_vm3, %v309_v62, %v312_v55  ;;  %v1024_v50 = vld [vmem:[#allocation6 + $0x15c8] sm:$0xff]  ;;  %v3834_v51 = vpack.c.bf16 %v514_v39, %v506_v34  ;;  %v1031_v62 = vld [vmem:[#allocation6 + $0x1600] sm:$0xff]  ;;  %v553_v30 = vld [vmem:[#allocation6 + $0x710] sm:$0xff]  ;;  %v3850_v39 = vpack.c.bf16 %v578_v57, %v570_v35 }
 0x10e   :  { %3753 = vmatpush1.bf16.msra.mxu0 %v3752_v61  ;;  %v317_v32 = vadd.f32 %v313_v56, %v141_v21  ;;  %v513_v61 = vld [vmem:[#allocation6 + $0x5d0] sm:$0xff]  ;;  %v3770_v2 = vpack.c.bf16 %v1024_v50, %v1016_v45  ;;  %v562_v21 = vld [vmem:[#allocation6 + $0x758] sm:$0xff]  ;;  %v1088_v34 = vld [vmem:[#allocation6 + $0x17c8] sm:$0xff] }
 0x10f   :  { %3755 = vmatprep.subr.bf16.mxu0 %v3754_v3  ;;  %v1015_v3 = vld [vmem:[#allocation6 + $0x1580] sm:$0xff]  ;;  %v3836_v12 = vpack.c.bf16 %v513_v61, %v505_v52  ;;  %v3846_v29 = vpack.c.bf16 %v562_v21, %v554_v54  ;;  %v561_v56 = vld [vmem:[#allocation6 + $0x750] sm:$0xff]  ;;  %v594_v45 = vld [vmem:[#allocation6 + $0x858] sm:$0xff] }
 0x110   :  { %3821 = vmatpush1.bf16.msra.mxu1 %v3820_v5  ;;  %319 = vst [vmem:[#allocation2 + $0x8] sm:$0xf] %v317_v32  ;;  %v1032_v5 = vld [vmem:[#allocation6 + $0x1608] sm:$0xff]  ;;  %v3772_v9 = vpack.c.bf16 %v1023_v10, %v1015_v3  ;;  %v3848_v37 = vpack.c.bf16 %v561_v56, %v553_v30  ;;  %v1087_v52 = vld [vmem:[#allocation6 + $0x17c0] sm:$0xff]  ;;  %v593_v3 = vld [vmem:[#allocation6 + $0x850] sm:$0xff] }
 0x111   :  { %3823 = vmatprep.subr.bf16.mxu1 %v3822_v7  ;;  %v3774_v15 = vpack.c.bf16 %v1040_v6, %v1032_v5  ;;  %v610_v5 = vld [vmem:[#allocation6 + $0x8d8] sm:$0xff]  ;;  %v617_v54 = vld [vmem:[#allocation6 + $0x910] sm:$0xff]  ;;  %v380_v30 = vld [vmem:[#allocation6 + $0x1a8] sm:$0xff] }
 0x112   :  { %3757 = vmatpush1.bf16.msra.mxu0 %v3756_v13  ;;  %v546_v13 = vld [vmem:[#allocation6 + $0x6d8] sm:$0xff]  ;;  %v625_v21 = vld [vmem:[#allocation6 + $0x950] sm:$0xff]  ;;  %v388_v56 = vld [vmem:[#allocation6 + $0x1e8] sm:$0xff] }
 0x113   :  { %3759 = vmatprep.subr.bf16.mxu0 %v3758_v16  ;;  %v1039_v16 = vld [vmem:[#allocation6 + $0x1640] sm:$0xff]  ;;  %v3842_v53 = vpack.c.bf16 %v546_v13, %v538_v48  ;;  %v601_v13 = vld [vmem:[#allocation6 + $0x890] sm:$0xff] }
 0x114   :  { %3825 = vmatpush1.bf16.msra.mxu1 %v3824_v19  ;;  %v1056_v19 = vld [vmem:[#allocation6 + $0x16c8] sm:$0xff]  ;;  %v3776_v24 = vpack.c.bf16 %v1039_v16, %v1031_v62  ;;  %v618_v62 = vld [vmem:[#allocation6 + $0x918] sm:$0xff]  ;;  %v633_v35 = vld [vmem:[#allocation6 + $0x990] sm:$0xff] }
 0x115   :  { %3827 = vmatprep.subr.bf16.mxu1 %v3826_v23  ;;  %v545_v23 = vld [vmem:[#allocation6 + $0x6d0] sm:$0xff]  ;;  %v626_v16 = vld [vmem:[#allocation6 + $0x958] sm:$0xff] }
 0x116   :  { %3761 = vmatpush1.bf16.msra.mxu0 %v3760_v27  ;;  %v3778_v27 = vpack.c.bf16 %v1056_v19, %v1048_v18  ;;  %v3844_v55 = vpack.c.bf16 %v545_v23, %v537_v20  ;;  %v347_v18 = vld [vmem:[#allocation6 + $0xa0] sm:$0xff]  ;;  %v364_v20 = vld [vmem:[#allocation6 + $0x128] sm:$0xff]  ;;  %v641_v57 = vld [vmem:[#allocation6 + $0x9d0] sm:$0xff] }
 0x117   :  { %3763 = vmatprep.subr.bf16.mxu0 %v3762_v28  ;;  %v324_v7 = vld [vmem:[#allocation2 + $0x8] sm:$0xf]  ;;  %v355_v19 = vld [vmem:[#allocation6 + $0xe0] sm:$0xff] }
 0x118   :  { %3829 = vmatpush1.bf16.msra.mxu1 %v3828_v31  ;;  %v326_v14 = vmul.f32 0.125, %v324_v7  ;;  %v1072_v28 = vld [vmem:[#allocation6 + $0x1748] sm:$0xff]  ;;  %v3780_v31 = vpack.c.bf16 %v1055_v26, %v1047_v25  ;;  %v634_v25 = vld [vmem:[#allocation6 + $0x998] sm:$0xff] }
 0x119   :  { %3831 = vmatprep.subr.bf16.mxu1 %v3830_v33  ;;  %v1063_v33 = vld [vmem:[#allocation6 + $0x1700] sm:$0xff]  ;;  %v348_v7 = vld [vmem:[#allocation6 + $0xa8] sm:$0xff]  ;;  %v642_v26 = vld [vmem:[#allocation6 + $0x9d8] sm:$0xff] }
 0x11a   :  { %3765 = vmatpush1.bf16.msra.mxu0 %v3764_v58  ;;  %v5688_v49 = vrot.slane %v326_v14, %v5579_v38  ;;  %v1064_v38 = vld [vmem:[#allocation6 + $0x1708] sm:$0xff]  ;;  %v3784_v59 = vpack.c.bf16 %v1071_v36, %v1063_v33  ;;  %v609_v14 = vld [vmem:[#allocation6 + $0x8d0] sm:$0xff]  ;;  %v650_v33 = vld [vmem:[#allocation6 + $0xa18] sm:$0xff] }
 0x11b   :  { %3767 = vmatprep.subr.bf16.mxu0 %v3766_v43  ;;  %v3782_v32 = vpack.c.bf16 %v1072_v28, %v1064_v38  ;;  %v1080_v58 = vld [vmem:[#allocation6 + $0x1788] sm:$0xff]  ;;  %v569_v43 = vld [vmem:[#allocation6 + $0x790] sm:$0xff]  ;;  %v363_v38 = vld [vmem:[#allocation6 + $0x120] sm:$0xff] }
 0x11c   :  { %3833 = vmatpush1.bf16.msra.mxu1 %v3832_v60  ;;  %v5692_v22 = vcombine.high %v5688_v49, %v5688_v49  ;;  %v586_v60 = vld [vmem:[#allocation6 + $0x818] sm:$0xff]  ;;  %v3786_v50 = vpack.c.bf16 %v1088_v34, %v1080_v58  ;;  %v3852_v61 = vpack.c.bf16 %v577_v44, %v569_v43  ;;  %v372_v23 = vld [vmem:[#allocation6 + $0x168] sm:$0xff]  ;;  %v371_v28 = vld [vmem:[#allocation6 + $0x160] sm:$0xff] }
 0x11d   :  { %3835 = vmatprep.subr.bf16.mxu1 %v3834_v51  ;;  %v1079_v51 = vld [vmem:[#allocation6 + $0x1780] sm:$0xff]  ;;  %v3854_v1 = vpack.c.bf16 %v594_v45, %v586_v60  ;;  %v658_v36 = vld [vmem:[#allocation6 + $0xa58] sm:$0xff]  ;;  %v396_v43 = vld [vmem:[#allocation6 + $0x228] sm:$0xff] }
 0x11e   :  { %3769 = vmatpush1.bf16.msra.mxu0 %v3768_v63  ;;  %1376 = vmatprep.mubr.f32.mxu0 %v5692_v22  ;;  %v332_v63 = vld [vmem:[#allocation6 + $0x28] sm:$0xff]  ;;  %v3788_v10 = vpack.c.bf16 %v1087_v52, %v1079_v51  ;;  %v379_v58 = vld [vmem:[#allocation6 + $0x1a0] sm:$0xff]  ;;  %v649_v60 = vld [vmem:[#allocation6 + $0xa10] sm:$0xff] }
 0x11f   :  { %3771 = vmatprep.subr.bf16.mxu0 %v3770_v2  ;;  %v585_v2 = vld [vmem:[#allocation6 + $0x810] sm:$0xff]  ;;  %v3982_v6 = vpack.c.bf16 %v340_v40, %v332_v63  ;;  %v387_v34 = vld [vmem:[#allocation6 + $0x1e0] sm:$0xff]  ;;  %v404_v44 = vld [vmem:[#allocation6 + $0x268] sm:$0xff] }
 0x120   :  { %3837 = vmatpush1.bf16.msra.mxu1 %v3836_v12  ;;  %v602_v12 = vld [vmem:[#allocation6 + $0x898] sm:$0xff]  ;;  %v3856_v47 = vpack.c.bf16 %v593_v3, %v585_v2  ;;  %v657_v45 = vld [vmem:[#allocation6 + $0xa50] sm:$0xff]  ;;  %v395_v63 = vld [vmem:[#allocation6 + $0x220] sm:$0xff] }
 0x121   :  { %3839 = vmatprep.subr.bf16.mxu1 %v3838_v42  ;;  %v331_v42 = vld [vmem:[#allocation6 + $0x20] sm:$0xff]  ;;  %v3858_v48 = vpack.c.bf16 %v610_v5, %v602_v12  ;;  %v666_v51 = vld [vmem:[#allocation6 + $0xa98] sm:$0xff]  ;;  %v412_v2 = vld [vmem:[#allocation6 + $0x2a8] sm:$0xff] }
 0x122   :  { %3773 = vmatpush1.bf16.msra.mxu0 %v3772_v9  ;;  %v356_v9 = vld [vmem:[#allocation6 + $0xe8] sm:$0xff]  ;;  %v674_v52 = vld [vmem:[#allocation6 + $0xad8] sm:$0xff]  ;;  %v403_v40 = vld [vmem:[#allocation6 + $0x260] sm:$0xff] }
 0x123   :  { %3775 = vmatprep.subr.bf16.mxu0 %v3774_v15  ;;  %v3984_v15 = vpack.c.bf16 %v339_v46, %v331_v42  ;;  %v420_v3 = vld [vmem:[#allocation6 + $0x2e8] sm:$0xff]  ;;  %v665_v12 = vld [vmem:[#allocation6 + $0xa90] sm:$0xff]  ;;  %v682_v42 = vld [vmem:[#allocation6 + $0xb18] sm:$0xff] }
 0x124   :  { %3841 = vmatpush1.bf16.msra.mxu1 %v3840_v17  ;;  %v3986_v17 = vpack.c.bf16 %v356_v9, %v348_v7  ;;  %v673_v5 = vld [vmem:[#allocation6 + $0xad0] sm:$0xff]  ;;  %v690_v46 = vld [vmem:[#allocation6 + $0xb58] sm:$0xff]  ;;  %v411_v7 = vld [vmem:[#allocation6 + $0x2a0] sm:$0xff] }
 0x125   :  { %3843 = vmatprep.subr.bf16.mxu1 %v3842_v53  ;;  %v3860_v53 = vpack.c.bf16 %v609_v14, %v601_v13  ;;  %v419_v9 = vld [vmem:[#allocation6 + $0x2e0] sm:$0xff]  ;;  %v428_v13 = vld [vmem:[#allocation6 + $0x328] sm:$0xff] }
 0x126   :  { %3777 = vmatpush1.bf16.msra.mxu0 %v3776_v24  ;;  %v3862_v24 = vpack.c.bf16 %v626_v16, %v618_v62  ;;  %v436_v14 = vld [vmem:[#allocation6 + $0x368] sm:$0xff]  ;;  %v681_v62 = vld [vmem:[#allocation6 + $0xb10] sm:$0xff] }
 0x127   :  { %3779 = vmatprep.subr.bf16.mxu0 %v3778_v27  ;;  %v3988_v27 = vpack.c.bf16 %v355_v19, %v347_v18  ;;  %v689_v16 = vld [vmem:[#allocation6 + $0xb50] sm:$0xff]  ;;  %v698_v18 = vld [vmem:[#allocation6 + $0xb98] sm:$0xff] }
 0x128   :  { %3845 = vmatpush1.bf16.msra.mxu1 %v3844_v55  ;;  %v3990_v55 = vpack.c.bf16 %v372_v23, %v364_v20  ;;  %v706_v19 = vld [vmem:[#allocation6 + $0xbd8] sm:$0xff]  ;;  %v427_v20 = vld [vmem:[#allocation6 + $0x320] sm:$0xff] }
 0x129   :  { %3847 = vmatprep.subr.bf16.mxu1 %v3846_v29  ;;  %v3864_v29 = vpack.c.bf16 %v625_v21, %v617_v54  ;;  %v435_v23 = vld [vmem:[#allocation6 + $0x360] sm:$0xff]  ;;  %v444_v54 = vld [vmem:[#allocation6 + $0x3a8] sm:$0xff] }
 0x12a   :  { %3781 = vmatpush1.bf16.msra.mxu0 %v3780_v31  ;;  %v3866_v31 = vpack.c.bf16 %v642_v26, %v634_v25  ;;  %v452_v21 = vld [vmem:[#allocation6 + $0x3e8] sm:$0xff]  ;;  %v697_v25 = vld [vmem:[#allocation6 + $0xb90] sm:$0xff] }
 0x12b   :  { %3783 = vmatprep.subr.bf16.mxu0 %v3782_v32  ;;  %v3992_v32 = vpack.c.bf16 %v371_v28, %v363_v38  ;;  %v705_v26 = vld [vmem:[#allocation6 + $0xbd0] sm:$0xff]  ;;  %v714_v38 = vld [vmem:[#allocation6 + $0xc18] sm:$0xff] }
 0x12c   :  { %3849 = vmatpush1.bf16.msra.mxu1 %v3848_v37  ;;  %v3994_v37 = vpack.c.bf16 %v388_v56, %v380_v30  ;;  %v722_v28 = vld [vmem:[#allocation6 + $0xc58] sm:$0xff]  ;;  %v443_v30 = vld [vmem:[#allocation6 + $0x3a0] sm:$0xff] }
 0x12d   :  { %3851 = vmatprep.subr.bf16.mxu1 %v3850_v39  ;;  %v3868_v39 = vpack.c.bf16 %v641_v57, %v633_v35  ;;  %v451_v56 = vld [vmem:[#allocation6 + $0x3e0] sm:$0xff]  ;;  %v460_v35 = vld [vmem:[#allocation6 + $0x428] sm:$0xff] }
 0x12e   :  { %3785 = vmatpush1.bf16.msra.mxu0 %v3784_v59  ;;  %v3870_v59 = vpack.c.bf16 %v658_v36, %v650_v33  ;;  %v468_v57 = vld [vmem:[#allocation6 + $0x468] sm:$0xff]  ;;  %v713_v33 = vld [vmem:[#allocation6 + $0xc10] sm:$0xff] }
 0x12f   :  { %3787 = vmatprep.subr.bf16.mxu0 %v3786_v50  ;;  %v3996_v50 = vpack.c.bf16 %v387_v34, %v379_v58  ;;  %v721_v36 = vld [vmem:[#allocation6 + $0xc50] sm:$0xff]  ;;  %v730_v58 = vld [vmem:[#allocation6 + $0xc98] sm:$0xff] }
 0x130   :  { %3853 = vmatpush1.bf16.msra.mxu1 %v3852_v61  ;;  %v3998_v61 = vpack.c.bf16 %v404_v44, %v396_v43  ;;  %v738_v34 = vld [vmem:[#allocation6 + $0xcd8] sm:$0xff]  ;;  %v459_v43 = vld [vmem:[#allocation6 + $0x420] sm:$0xff] }
 0x131   :  { %3855 = vmatprep.subr.bf16.mxu1 %v3854_v1  ;;  %v3872_v1 = vpack.c.bf16 %v657_v45, %v649_v60  ;;  %v467_v44 = vld [vmem:[#allocation6 + $0x460] sm:$0xff]  ;;  %v476_v60 = vld [vmem:[#allocation6 + $0x4a8] sm:$0xff] }
 0x132   :  { %3789 = vmatpush1.bf16.msra.mxu0 %v3788_v10  ;;  %v3874_v10 = vpack.c.bf16 %v674_v52, %v666_v51  ;;  %v484_v45 = vld [vmem:[#allocation6 + $0x4e8] sm:$0xff]  ;;  %v729_v51 = vld [vmem:[#allocation6 + $0xc90] sm:$0xff] }
 0x133   :  { %3983 = vmatprep.subr.bf16.mxu0 %v3982_v6  ;;  %1448 = vmatmul.mubr.f32.vlgmr.msra.gmra.mrb[2].mxu1 %v5663_v0  ;;  %v4000_v6 = vpack.c.bf16 %v403_v40, %v395_v63  ;;  %v737_v52 = vld [vmem:[#allocation6 + $0xcd0] sm:$0xff]  ;;  %v746_v63 = vld [vmem:[#allocation6 + $0xd18] sm:$0xff] }
 0x134   :  { %3857 = vmatpush1.bf16.msra.mxu1 %v3856_v47  ;;  %1518 = vmatprep.mubr.f32.mxu1 %v5675_v8  ;;  %v4002_v47 = vpack.c.bf16 %v420_v3, %v412_v2  ;;  %v754_v40 = vld [vmem:[#allocation6 + $0xd58] sm:$0xff]  ;;  %v475_v2 = vld [vmem:[#allocation6 + $0x4a0] sm:$0xff] }
 0x135   :  { %1377 = vmatmul.mubr.f32.vlgmr.msra.gmra.mrb[0].mxu0 %v5688_v49  ;;  %3859 = vmatprep.subr.bf16.mxu1 %v3858_v48  ;;  %v3876_v48 = vpack.c.bf16 %v673_v5, %v665_v12  ;;  %v483_v3 = vld [vmem:[#allocation6 + $0x4e0] sm:$0xff]  ;;  %v492_v12 = vld [vmem:[#allocation6 + $0x528] sm:$0xff] }
 0x136   :  { %3985 = vmatpush1.bf16.msra.mxu0 %v3984_v15  ;;  %1660 = vmatprep.mubr.f32.mxu0 %v5667_v41  ;;  %v3878_v15 = vpack.c.bf16 %v690_v46, %v682_v42  ;;  %v500_v5 = vld [vmem:[#allocation6 + $0x568] sm:$0xff]  ;;  %v745_v42 = vld [vmem:[#allocation6 + $0xd10] sm:$0xff] }
 0x137   :  { %3987 = vmatprep.subr.bf16.mxu0 %v3986_v17  ;;  %v4004_v17 = vpack.c.bf16 %v419_v9, %v411_v7  ;;  %v753_v46 = vld [vmem:[#allocation6 + $0xd50] sm:$0xff]  ;;  %v762_v7 = vld [vmem:[#allocation6 + $0xd98] sm:$0xff] }
 0x138   :  { %3861 = vmatpush1.bf16.msra.mxu1 %v3860_v53  ;;  %v4006_v53 = vpack.c.bf16 %v436_v14, %v428_v13  ;;  %v770_v9 = vld [vmem:[#allocation6 + $0xdd8] sm:$0xff]  ;;  %v491_v13 = vld [vmem:[#allocation6 + $0x520] sm:$0xff] }
 0x139   :  { %3863 = vmatprep.subr.bf16.mxu1 %v3862_v24  ;;  %v3880_v24 = vpack.c.bf16 %v689_v16, %v681_v62  ;;  %v499_v14 = vld [vmem:[#allocation6 + $0x560] sm:$0xff]  ;;  %v508_v62 = vld [vmem:[#allocation6 + $0x5a8] sm:$0xff] }
 0x13a   :  { %3989 = vmatpush1.bf16.msra.mxu0 %v3988_v27  ;;  %v3882_v27 = vpack.c.bf16 %v706_v19, %v698_v18  ;;  %v516_v16 = vld [vmem:[#allocation6 + $0x5e8] sm:$0xff]  ;;  %v761_v18 = vld [vmem:[#allocation6 + $0xd90] sm:$0xff] }
 0x13b   :  { %3991 = vmatprep.subr.bf16.mxu0 %v3990_v55  ;;  %v4008_v55 = vpack.c.bf16 %v435_v23, %v427_v20  ;;  %v769_v19 = vld [vmem:[#allocation6 + $0xdd0] sm:$0xff]  ;;  %v778_v20 = vld [vmem:[#allocation6 + $0xe18] sm:$0xff] }
 0x13c   :  { %3865 = vmatpush1.bf16.msra.mxu1 %v3864_v29  ;;  %v4010_v29 = vpack.c.bf16 %v452_v21, %v444_v54  ;;  %v786_v23 = vld [vmem:[#allocation6 + $0xe58] sm:$0xff]  ;;  %v507_v54 = vld [vmem:[#allocation6 + $0x5a0] sm:$0xff] }
 0x13d   :  { %3867 = vmatprep.subr.bf16.mxu1 %v3866_v31  ;;  %v3884_v31 = vpack.c.bf16 %v705_v26, %v697_v25  ;;  %v515_v21 = vld [vmem:[#allocation6 + $0x5e0] sm:$0xff]  ;;  %v524_v25 = vld [vmem:[#allocation6 + $0x628] sm:$0xff] }
 0x13e   :  { %3993 = vmatpush1.bf16.msra.mxu0 %v3992_v32  ;;  %v3886_v32 = vpack.c.bf16 %v722_v28, %v714_v38  ;;  %v532_v26 = vld [vmem:[#allocation6 + $0x668] sm:$0xff]  ;;  %v777_v38 = vld [vmem:[#allocation6 + $0xe10] sm:$0xff] }
 0x13f   :  { %3995 = vmatprep.subr.bf16.mxu0 %v3994_v37  ;;  %v4012_v37 = vpack.c.bf16 %v451_v56, %v443_v30  ;;  %v785_v28 = vld [vmem:[#allocation6 + $0xe50] sm:$0xff]  ;;  %v794_v30 = vld [vmem:[#allocation6 + $0xe98] sm:$0xff] }
 0x140   :  { %3869 = vmatpush1.bf16.msra.mxu1 %v3868_v39  ;;  %v4014_v39 = vpack.c.bf16 %v468_v57, %v460_v35  ;;  %v802_v56 = vld [vmem:[#allocation6 + $0xed8] sm:$0xff]  ;;  %v523_v35 = vld [vmem:[#allocation6 + $0x620] sm:$0xff] }
 0x141   :  { %3871 = vmatprep.subr.bf16.mxu1 %v3870_v59  ;;  %v3888_v59 = vpack.c.bf16 %v721_v36, %v713_v33  ;;  %v531_v57 = vld [vmem:[#allocation6 + $0x660] sm:$0xff]  ;;  %v540_v33 = vld [vmem:[#allocation6 + $0x6a8] sm:$0xff] }
 0x142   :  { %3997 = vmatpush1.bf16.msra.mxu0 %v3996_v50  ;;  %v3890_v50 = vpack.c.bf16 %v738_v34, %v730_v58  ;;  %v548_v36 = vld [vmem:[#allocation6 + $0x6e8] sm:$0xff]  ;;  %v793_v58 = vld [vmem:[#allocation6 + $0xe90] sm:$0xff] }
 0x143   :  { %3999 = vmatprep.subr.bf16.mxu0 %v3998_v61  ;;  %v4016_v61 = vpack.c.bf16 %v467_v44, %v459_v43  ;;  %v801_v34 = vld [vmem:[#allocation6 + $0xed0] sm:$0xff]  ;;  %v810_v43 = vld [vmem:[#allocation6 + $0xf18] sm:$0xff] }
 0x144   :  { %3873 = vmatpush1.bf16.msra.mxu1 %v3872_v1  ;;  %v4018_v1 = vpack.c.bf16 %v484_v45, %v476_v60  ;;  %v818_v44 = vld [vmem:[#allocation6 + $0xf58] sm:$0xff]  ;;  %v539_v60 = vld [vmem:[#allocation6 + $0x6a0] sm:$0xff] }
 0x145   :  { %3875 = vmatprep.subr.bf16.mxu1 %v3874_v10  ;;  %v3892_v10 = vpack.c.bf16 %v737_v52, %v729_v51  ;;  %v547_v45 = vld [vmem:[#allocation6 + $0x6e0] sm:$0xff]  ;;  %v556_v51 = vld [vmem:[#allocation6 + $0x728] sm:$0xff] }
 0x146   :  { %4001 = vmatpush1.bf16.msra.mxu0 %v4000_v6  ;;  %v3894_v6 = vpack.c.bf16 %v754_v40, %v746_v63  ;;  %v564_v52 = vld [vmem:[#allocation6 + $0x768] sm:$0xff]  ;;  %v809_v63 = vld [vmem:[#allocation6 + $0xf10] sm:$0xff] }
 0x147   :  { %4003 = vmatprep.subr.bf16.mxu0 %v4002_v47  ;;  %v4020_v47 = vpack.c.bf16 %v483_v3, %v475_v2  ;;  %v817_v40 = vld [vmem:[#allocation6 + $0xf50] sm:$0xff]  ;;  %v826_v2 = vld [vmem:[#allocation6 + $0xf98] sm:$0xff] }
 0x148   :  { %3877 = vmatpush1.bf16.msra.mxu1 %v3876_v48  ;;  %v4022_v48 = vpack.c.bf16 %v500_v5, %v492_v12  ;;  %v834_v3 = vld [vmem:[#allocation6 + $0xfd8] sm:$0xff]  ;;  %v555_v12 = vld [vmem:[#allocation6 + $0x720] sm:$0xff] }
 0x149   :  { %3879 = vmatprep.subr.bf16.mxu1 %v3878_v15  ;;  %v3896_v15 = vpack.c.bf16 %v753_v46, %v745_v42  ;;  %v563_v5 = vld [vmem:[#allocation6 + $0x760] sm:$0xff]  ;;  %v572_v42 = vld [vmem:[#allocation6 + $0x7a8] sm:$0xff] }
 0x14a   :  { %4005 = vmatpush1.bf16.msra.mxu0 %v4004_v17  ;;  %v3898_v17 = vpack.c.bf16 %v770_v9, %v762_v7  ;;  %v580_v46 = vld [vmem:[#allocation6 + $0x7e8] sm:$0xff]  ;;  %v825_v7 = vld [vmem:[#allocation6 + $0xf90] sm:$0xff] }
 0x14b   :  { %4007 = vmatprep.subr.bf16.mxu0 %v4006_v53  ;;  %v4024_v53 = vpack.c.bf16 %v499_v14, %v491_v13  ;;  %v833_v9 = vld [vmem:[#allocation6 + $0xfd0] sm:$0xff]  ;;  %v842_v13 = vld [vmem:[#allocation6 + $0x1018] sm:$0xff] }
 0x14c   :  { %3881 = vmatpush1.bf16.msra.mxu1 %v3880_v24  ;;  %v4026_v24 = vpack.c.bf16 %v516_v16, %v508_v62  ;;  %v850_v14 = vld [vmem:[#allocation6 + $0x1058] sm:$0xff]  ;;  %v571_v62 = vld [vmem:[#allocation6 + $0x7a0] sm:$0xff] }
 0x14d   :  { %3883 = vmatprep.subr.bf16.mxu1 %v3882_v27  ;;  %v3900_v27 = vpack.c.bf16 %v769_v19, %v761_v18  ;;  %v579_v16 = vld [vmem:[#allocation6 + $0x7e0] sm:$0xff]  ;;  %v588_v18 = vld [vmem:[#allocation6 + $0x828] sm:$0xff] }
 0x14e   :  { %4009 = vmatpush1.bf16.msra.mxu0 %v4008_v55  ;;  %v3902_v55 = vpack.c.bf16 %v786_v23, %v778_v20  ;;  %v596_v19 = vld [vmem:[#allocation6 + $0x868] sm:$0xff]  ;;  %v841_v20 = vld [vmem:[#allocation6 + $0x1010] sm:$0xff] }
 0x14f   :  { %4011 = vmatprep.subr.bf16.mxu0 %v4010_v29  ;;  %v4028_v29 = vpack.c.bf16 %v515_v21, %v507_v54  ;;  %v849_v23 = vld [vmem:[#allocation6 + $0x1050] sm:$0xff]  ;;  %v858_v54 = vld [vmem:[#allocation6 + $0x1098] sm:$0xff] }
 0x150   :  { %3885 = vmatpush1.bf16.msra.mxu1 %v3884_v31  ;;  %v4030_v31 = vpack.c.bf16 %v532_v26, %v524_v25  ;;  %v866_v21 = vld [vmem:[#allocation6 + $0x10d8] sm:$0xff]  ;;  %v587_v25 = vld [vmem:[#allocation6 + $0x820] sm:$0xff] }
 0x151   :  { %3887 = vmatprep.subr.bf16.mxu1 %v3886_v32  ;;  %v3904_v32 = vpack.c.bf16 %v785_v28, %v777_v38  ;;  %v595_v26 = vld [vmem:[#allocation6 + $0x860] sm:$0xff]  ;;  %v604_v38 = vld [vmem:[#allocation6 + $0x8a8] sm:$0xff] }
 0x152   :  { %4013 = vmatpush1.bf16.msra.mxu0 %v4012_v37  ;;  %v3906_v37 = vpack.c.bf16 %v802_v56, %v794_v30  ;;  %v612_v28 = vld [vmem:[#allocation6 + $0x8e8] sm:$0xff]  ;;  %v857_v30 = vld [vmem:[#allocation6 + $0x1090] sm:$0xff] }
 0x153   :  { %4015 = vmatprep.subr.bf16.mxu0 %v4014_v39  ;;  %v4032_v39 = vpack.c.bf16 %v531_v57, %v523_v35  ;;  %v865_v56 = vld [vmem:[#allocation6 + $0x10d0] sm:$0xff]  ;;  %v874_v35 = vld [vmem:[#allocation6 + $0x1118] sm:$0xff] }
 0x154   :  { %3889 = vmatpush1.bf16.msra.mxu1 %v3888_v59  ;;  %v4034_v59 = vpack.c.bf16 %v548_v36, %v540_v33  ;;  %v882_v57 = vld [vmem:[#allocation6 + $0x1158] sm:$0xff]  ;;  %v603_v33 = vld [vmem:[#allocation6 + $0x8a0] sm:$0xff] }
 0x155   :  { %3891 = vmatprep.subr.bf16.mxu1 %v3890_v50  ;;  %v3908_v50 = vpack.c.bf16 %v801_v34, %v793_v58  ;;  %v611_v36 = vld [vmem:[#allocation6 + $0x8e0] sm:$0xff]  ;;  %v620_v58 = vld [vmem:[#allocation6 + $0x928] sm:$0xff] }
 0x156   :  { %4017 = vmatpush1.bf16.msra.mxu0 %v4016_v61  ;;  %v3910_v61 = vpack.c.bf16 %v818_v44, %v810_v43  ;;  %v628_v34 = vld [vmem:[#allocation6 + $0x968] sm:$0xff]  ;;  %v873_v43 = vld [vmem:[#allocation6 + $0x1110] sm:$0xff] }
 0x157   :  { %4019 = vmatprep.subr.bf16.mxu0 %v4018_v1  ;;  %v4036_v1 = vpack.c.bf16 %v547_v45, %v539_v60  ;;  %v881_v44 = vld [vmem:[#allocation6 + $0x1150] sm:$0xff]  ;;  %v890_v60 = vld [vmem:[#allocation6 + $0x1198] sm:$0xff] }
 0x158   :  { %3893 = vmatpush1.bf16.msra.mxu1 %v3892_v10  ;;  %v4038_v10 = vpack.c.bf16 %v564_v52, %v556_v51  ;;  %v898_v45 = vld [vmem:[#allocation6 + $0x11d8] sm:$0xff]  ;;  %v619_v51 = vld [vmem:[#allocation6 + $0x920] sm:$0xff] }
 0x159   :  { %3895 = vmatprep.subr.bf16.mxu1 %v3894_v6  ;;  %v3912_v6 = vpack.c.bf16 %v817_v40, %v809_v63  ;;  %v627_v52 = vld [vmem:[#allocation6 + $0x960] sm:$0xff]  ;;  %v636_v63 = vld [vmem:[#allocation6 + $0x9a8] sm:$0xff] }
 0x15a   :  { %4021 = vmatpush1.bf16.msra.mxu0 %v4020_v47  ;;  %v3914_v47 = vpack.c.bf16 %v834_v3, %v826_v2  ;;  %v644_v40 = vld [vmem:[#allocation6 + $0x9e8] sm:$0xff]  ;;  %v889_v2 = vld [vmem:[#allocation6 + $0x1190] sm:$0xff] }
 0x15b   :  { %4023 = vmatprep.subr.bf16.mxu0 %v4022_v48  ;;  %v4040_v48 = vpack.c.bf16 %v563_v5, %v555_v12  ;;  %v897_v3 = vld [vmem:[#allocation6 + $0x11d0] sm:$0xff]  ;;  %v906_v12 = vld [vmem:[#allocation6 + $0x1218] sm:$0xff] }
 0x15c   :  { %3897 = vmatpush1.bf16.msra.mxu1 %v3896_v15  ;;  %v4042_v15 = vpack.c.bf16 %v580_v46, %v572_v42  ;;  %v914_v5 = vld [vmem:[#allocation6 + $0x1258] sm:$0xff]  ;;  %v635_v42 = vld [vmem:[#allocation6 + $0x9a0] sm:$0xff] }
 0x15d   :  { %3899 = vmatprep.subr.bf16.mxu1 %v3898_v17  ;;  %v3916_v17 = vpack.c.bf16 %v833_v9, %v825_v7  ;;  %v643_v46 = vld [vmem:[#allocation6 + $0x9e0] sm:$0xff]  ;;  %v652_v7 = vld [vmem:[#allocation6 + $0xa28] sm:$0xff] }
 0x15e   :  { %4025 = vmatpush1.bf16.msra.mxu0 %v4024_v53  ;;  %v3918_v53 = vpack.c.bf16 %v850_v14, %v842_v13  ;;  %v660_v9 = vld [vmem:[#allocation6 + $0xa68] sm:$0xff]  ;;  %v905_v13 = vld [vmem:[#allocation6 + $0x1210] sm:$0xff] }
 0x15f   :  { %4027 = vmatprep.subr.bf16.mxu0 %v4026_v24  ;;  %v4044_v24 = vpack.c.bf16 %v579_v16, %v571_v62  ;;  %v913_v14 = vld [vmem:[#allocation6 + $0x1250] sm:$0xff]  ;;  %v922_v62 = vld [vmem:[#allocation6 + $0x1298] sm:$0xff] }
 0x160   :  { %3901 = vmatpush1.bf16.msra.mxu1 %v3900_v27  ;;  %v4046_v27 = vpack.c.bf16 %v596_v19, %v588_v18  ;;  %v930_v16 = vld [vmem:[#allocation6 + $0x12d8] sm:$0xff]  ;;  %v651_v18 = vld [vmem:[#allocation6 + $0xa20] sm:$0xff] }
 0x161   :  { %3903 = vmatprep.subr.bf16.mxu1 %v3902_v55  ;;  %v3920_v55 = vpack.c.bf16 %v849_v23, %v841_v20  ;;  %v659_v19 = vld [vmem:[#allocation6 + $0xa60] sm:$0xff]  ;;  %v668_v20 = vld [vmem:[#allocation6 + $0xaa8] sm:$0xff] }
 0x162   :  { %4029 = vmatpush1.bf16.msra.mxu0 %v4028_v29  ;;  %v3922_v29 = vpack.c.bf16 %v866_v21, %v858_v54  ;;  %v676_v23 = vld [vmem:[#allocation6 + $0xae8] sm:$0xff]  ;;  %v921_v54 = vld [vmem:[#allocation6 + $0x1290] sm:$0xff] }
 0x163   :  { %4031 = vmatprep.subr.bf16.mxu0 %v4030_v31  ;;  %v4048_v31 = vpack.c.bf16 %v595_v26, %v587_v25  ;;  %v929_v21 = vld [vmem:[#allocation6 + $0x12d0] sm:$0xff]  ;;  %v938_v25 = vld [vmem:[#allocation6 + $0x1318] sm:$0xff] }
 0x164   :  { %3905 = vmatpush1.bf16.msra.mxu1 %v3904_v32  ;;  %v4050_v32 = vpack.c.bf16 %v612_v28, %v604_v38  ;;  %v946_v26 = vld [vmem:[#allocation6 + $0x1358] sm:$0xff]  ;;  %v667_v38 = vld [vmem:[#allocation6 + $0xaa0] sm:$0xff] }
 0x165   :  { %3907 = vmatprep.subr.bf16.mxu1 %v3906_v37  ;;  %v3924_v37 = vpack.c.bf16 %v865_v56, %v857_v30  ;;  %v675_v28 = vld [vmem:[#allocation6 + $0xae0] sm:$0xff]  ;;  %v684_v30 = vld [vmem:[#allocation6 + $0xb28] sm:$0xff] }
 0x166   :  { %4033 = vmatpush1.bf16.msra.mxu0 %v4032_v39  ;;  %v3926_v39 = vpack.c.bf16 %v882_v57, %v874_v35  ;;  %v692_v56 = vld [vmem:[#allocation6 + $0xb68] sm:$0xff]  ;;  %v937_v35 = vld [vmem:[#allocation6 + $0x1310] sm:$0xff] }
 0x167   :  { %4035 = vmatprep.subr.bf16.mxu0 %v4034_v59  ;;  %v4052_v59 = vpack.c.bf16 %v611_v36, %v603_v33  ;;  %v945_v57 = vld [vmem:[#allocation6 + $0x1350] sm:$0xff]  ;;  %v954_v33 = vld [vmem:[#allocation6 + $0x1398] sm:$0xff] }
 0x168   :  { %3909 = vmatpush1.bf16.msra.mxu1 %v3908_v50  ;;  %v4054_v50 = vpack.c.bf16 %v628_v34, %v620_v58  ;;  %v962_v36 = vld [vmem:[#allocation6 + $0x13d8] sm:$0xff]  ;;  %v683_v58 = vld [vmem:[#allocation6 + $0xb20] sm:$0xff] }
 0x169   :  { %3911 = vmatprep.subr.bf16.mxu1 %v3910_v61  ;;  %v3928_v61 = vpack.c.bf16 %v881_v44, %v873_v43  ;;  %v691_v34 = vld [vmem:[#allocation6 + $0xb60] sm:$0xff]  ;;  %v700_v43 = vld [vmem:[#allocation6 + $0xba8] sm:$0xff] }
 0x16a   :  { %4037 = vmatpush1.bf16.msra.mxu0 %v4036_v1  ;;  %v3930_v1 = vpack.c.bf16 %v898_v45, %v890_v60  ;;  %v708_v44 = vld [vmem:[#allocation6 + $0xbe8] sm:$0xff]  ;;  %v953_v60 = vld [vmem:[#allocation6 + $0x1390] sm:$0xff] }
 0x16b   :  { %4039 = vmatprep.subr.bf16.mxu0 %v4038_v10  ;;  %v4056_v10 = vpack.c.bf16 %v627_v52, %v619_v51  ;;  %v961_v45 = vld [vmem:[#allocation6 + $0x13d0] sm:$0xff]  ;;  %v970_v51 = vld [vmem:[#allocation6 + $0x1418] sm:$0xff] }
 0x16c   :  { %3913 = vmatpush1.bf16.msra.mxu1 %v3912_v6  ;;  %v4058_v6 = vpack.c.bf16 %v644_v40, %v636_v63  ;;  %v978_v52 = vld [vmem:[#allocation6 + $0x1458] sm:$0xff]  ;;  %v699_v63 = vld [vmem:[#allocation6 + $0xba0] sm:$0xff] }
 0x16d   :  { %3915 = vmatprep.subr.bf16.mxu1 %v3914_v47  ;;  %v3932_v47 = vpack.c.bf16 %v897_v3, %v889_v2  ;;  %v707_v40 = vld [vmem:[#allocation6 + $0xbe0] sm:$0xff]  ;;  %v716_v2 = vld [vmem:[#allocation6 + $0xc28] sm:$0xff] }
 0x16e   :  { %4041 = vmatpush1.bf16.msra.mxu0 %v4040_v48  ;;  %v3934_v48 = vpack.c.bf16 %v914_v5, %v906_v12  ;;  %v724_v3 = vld [vmem:[#allocation6 + $0xc68] sm:$0xff]  ;;  %v969_v12 = vld [vmem:[#allocation6 + $0x1410] sm:$0xff] }
 0x16f   :  { %4043 = vmatprep.subr.bf16.mxu0 %v4042_v15  ;;  %v4060_v15 = vpack.c.bf16 %v643_v46, %v635_v42  ;;  %v977_v5 = vld [vmem:[#allocation6 + $0x1450] sm:$0xff]  ;;  %v986_v42 = vld [vmem:[#allocation6 + $0x1498] sm:$0xff] }
 0x170   :  { %3917 = vmatpush1.bf16.msra.mxu1 %v3916_v17  ;;  %v4062_v17 = vpack.c.bf16 %v660_v9, %v652_v7  ;;  %v994_v46 = vld [vmem:[#allocation6 + $0x14d8] sm:$0xff]  ;;  %v715_v7 = vld [vmem:[#allocation6 + $0xc20] sm:$0xff] }
 0x171   :  { %3919 = vmatprep.subr.bf16.mxu1 %v3918_v53  ;;  %v3936_v53 = vpack.c.bf16 %v913_v14, %v905_v13  ;;  %v723_v9 = vld [vmem:[#allocation6 + $0xc60] sm:$0xff]  ;;  %v732_v13 = vld [vmem:[#allocation6 + $0xca8] sm:$0xff] }
 0x172   :  { %4045 = vmatpush1.bf16.msra.mxu0 %v4044_v24  ;;  %v3938_v24 = vpack.c.bf16 %v930_v16, %v922_v62  ;;  %v740_v14 = vld [vmem:[#allocation6 + $0xce8] sm:$0xff]  ;;  %v985_v62 = vld [vmem:[#allocation6 + $0x1490] sm:$0xff] }
 0x173   :  { %4047 = vmatprep.subr.bf16.mxu0 %v4046_v27  ;;  %1519 = vmatmul.mubr.f32.vlgmr.msra.gmra.mrb[2].mxu1 %v5670_v4  ;;  %v4064_v27 = vpack.c.bf16 %v659_v19, %v651_v18  ;;  %v993_v16 = vld [vmem:[#allocation6 + $0x14d0] sm:$0xff]  ;;  %v1002_v18 = vld [vmem:[#allocation6 + $0x1518] sm:$0xff] }
 0x174   :  { %3921 = vmatpush1.bf16.msra.mxu1 %v3920_v55  ;;  %1589 = vmatprep.mubr.f32.mxu1 %v5692_v22  ;;  %v4066_v55 = vpack.c.bf16 %v676_v23, %v668_v20  ;;  %v1010_v19 = vld [vmem:[#allocation6 + $0x1558] sm:$0xff]  ;;  %v731_v20 = vld [vmem:[#allocation6 + $0xca0] sm:$0xff] }
 0x175   :  { %1661 = vmatmul.mubr.f32.vlgmr.msra.gmra.mrb[2].mxu0 %v5663_v0  ;;  %3923 = vmatprep.subr.bf16.mxu1 %v3922_v29  ;;  %v3940_v29 = vpack.c.bf16 %v929_v21, %v921_v54  ;;  %v739_v23 = vld [vmem:[#allocation6 + $0xce0] sm:$0xff]  ;;  %v748_v54 = vld [vmem:[#allocation6 + $0xd28] sm:$0xff] }
 0x176   :  { %4049 = vmatpush1.bf16.msra.mxu0 %v4048_v31  ;;  %1731 = vmatprep.mubr.f32.mxu0 %v5675_v8  ;;  %v3942_v31 = vpack.c.bf16 %v946_v26, %v938_v25  ;;  %v756_v21 = vld [vmem:[#allocation6 + $0xd68] sm:$0xff]  ;;  %v1001_v25 = vld [vmem:[#allocation6 + $0x1510] sm:$0xff] }
 0x177   :  { %4051 = vmatprep.subr.bf16.mxu0 %v4050_v32  ;;  %v4068_v32 = vpack.c.bf16 %v675_v28, %v667_v38  ;;  %v1009_v26 = vld [vmem:[#allocation6 + $0x1550] sm:$0xff]  ;;  %v1018_v38 = vld [vmem:[#allocation6 + $0x1598] sm:$0xff] }
 0x178   :  { %3925 = vmatpush1.bf16.msra.mxu1 %v3924_v37  ;;  %v4070_v37 = vpack.c.bf16 %v692_v56, %v684_v30  ;;  %v1026_v28 = vld [vmem:[#allocation6 + $0x15d8] sm:$0xff]  ;;  %v747_v30 = vld [vmem:[#allocation6 + $0xd20] sm:$0xff] }
 0x179   :  { %3927 = vmatprep.subr.bf16.mxu1 %v3926_v39  ;;  %v3944_v39 = vpack.c.bf16 %v945_v57, %v937_v35  ;;  %v755_v56 = vld [vmem:[#allocation6 + $0xd60] sm:$0xff]  ;;  %v764_v35 = vld [vmem:[#allocation6 + $0xda8] sm:$0xff] }
 0x17a   :  { %4053 = vmatpush1.bf16.msra.mxu0 %v4052_v59  ;;  %v3946_v59 = vpack.c.bf16 %v962_v36, %v954_v33  ;;  %v772_v57 = vld [vmem:[#allocation6 + $0xde8] sm:$0xff]  ;;  %v1017_v33 = vld [vmem:[#allocation6 + $0x1590] sm:$0xff] }
 0x17b   :  { %4055 = vmatprep.subr.bf16.mxu0 %v4054_v50  ;;  %v4072_v50 = vpack.c.bf16 %v691_v34, %v683_v58  ;;  %v1025_v36 = vld [vmem:[#allocation6 + $0x15d0] sm:$0xff]  ;;  %v1034_v58 = vld [vmem:[#allocation6 + $0x1618] sm:$0xff] }
 0x17c   :  { %3929 = vmatpush1.bf16.msra.mxu1 %v3928_v61  ;;  %v4074_v61 = vpack.c.bf16 %v708_v44, %v700_v43  ;;  %v1042_v34 = vld [vmem:[#allocation6 + $0x1658] sm:$0xff]  ;;  %v763_v43 = vld [vmem:[#allocation6 + $0xda0] sm:$0xff] }
 0x17d   :  { %3931 = vmatprep.subr.bf16.mxu1 %v3930_v1  ;;  %v3948_v1 = vpack.c.bf16 %v961_v45, %v953_v60  ;;  %v771_v44 = vld [vmem:[#allocation6 + $0xde0] sm:$0xff]  ;;  %v780_v60 = vld [vmem:[#allocation6 + $0xe28] sm:$0xff] }
 0x17e   :  { %4057 = vmatpush1.bf16.msra.mxu0 %v4056_v10  ;;  %v3950_v10 = vpack.c.bf16 %v978_v52, %v970_v51  ;;  %v788_v45 = vld [vmem:[#allocation6 + $0xe68] sm:$0xff]  ;;  %v1033_v51 = vld [vmem:[#allocation6 + $0x1610] sm:$0xff] }
 0x17f   :  { %4059 = vmatprep.subr.bf16.mxu0 %v4058_v6  ;;  %v4076_v6 = vpack.c.bf16 %v707_v40, %v699_v63  ;;  %v1041_v52 = vld [vmem:[#allocation6 + $0x1650] sm:$0xff]  ;;  %v1050_v63 = vld [vmem:[#allocation6 + $0x1698] sm:$0xff] }
 0x180   :  { %3933 = vmatpush1.bf16.msra.mxu1 %v3932_v47  ;;  %v4078_v47 = vpack.c.bf16 %v724_v3, %v716_v2  ;;  %v1058_v40 = vld [vmem:[#allocation6 + $0x16d8] sm:$0xff]  ;;  %v779_v2 = vld [vmem:[#allocation6 + $0xe20] sm:$0xff] }
 0x181   :  { %3935 = vmatprep.subr.bf16.mxu1 %v3934_v48  ;;  %v3952_v48 = vpack.c.bf16 %v977_v5, %v969_v12  ;;  %v787_v3 = vld [vmem:[#allocation6 + $0xe60] sm:$0xff]  ;;  %v796_v12 = vld [vmem:[#allocation6 + $0xea8] sm:$0xff] }
 0x182   :  { %4061 = vmatpush1.bf16.msra.mxu0 %v4060_v15  ;;  %v3954_v15 = vpack.c.bf16 %v994_v46, %v986_v42  ;;  %v804_v5 = vld [vmem:[#allocation6 + $0xee8] sm:$0xff]  ;;  %v1049_v42 = vld [vmem:[#allocation6 + $0x1690] sm:$0xff] }
 0x183   :  { %4063 = vmatprep.subr.bf16.mxu0 %v4062_v17  ;;  %v4080_v17 = vpack.c.bf16 %v723_v9, %v715_v7  ;;  %v1057_v46 = vld [vmem:[#allocation6 + $0x16d0] sm:$0xff]  ;;  %v1066_v7 = vld [vmem:[#allocation6 + $0x1718] sm:$0xff] }
 0x184   :  { %3937 = vmatpush1.bf16.msra.mxu1 %v3936_v53  ;;  %v4082_v53 = vpack.c.bf16 %v740_v14, %v732_v13  ;;  %v1074_v9 = vld [vmem:[#allocation6 + $0x1758] sm:$0xff]  ;;  %v795_v13 = vld [vmem:[#allocation6 + $0xea0] sm:$0xff] }
 0x185   :  { %3939 = vmatprep.subr.bf16.mxu1 %v3938_v24  ;;  %v3956_v24 = vpack.c.bf16 %v993_v16, %v985_v62  ;;  %v803_v14 = vld [vmem:[#allocation6 + $0xee0] sm:$0xff]  ;;  %v812_v62 = vld [vmem:[#allocation6 + $0xf28] sm:$0xff] }
 0x186   :  { %4065 = vmatpush1.bf16.msra.mxu0 %v4064_v27  ;;  %v3958_v27 = vpack.c.bf16 %v1010_v19, %v1002_v18  ;;  %v820_v16 = vld [vmem:[#allocation6 + $0xf68] sm:$0xff]  ;;  %v1065_v18 = vld [vmem:[#allocation6 + $0x1710] sm:$0xff] }
 0x187   :  { %4067 = vmatprep.subr.bf16.mxu0 %v4066_v55  ;;  %v4084_v55 = vpack.c.bf16 %v739_v23, %v731_v20  ;;  %v1073_v19 = vld [vmem:[#allocation6 + $0x1750] sm:$0xff]  ;;  %v1082_v20 = vld [vmem:[#allocation6 + $0x1798] sm:$0xff] }
 0x188   :  { %3941 = vmatpush1.bf16.msra.mxu1 %v3940_v29  ;;  %v4086_v29 = vpack.c.bf16 %v756_v21, %v748_v54  ;;  %v1090_v23 = vld [vmem:[#allocation6 + $0x17d8] sm:$0xff]  ;;  %v811_v54 = vld [vmem:[#allocation6 + $0xf20] sm:$0xff] }
 0x189   :  { %3943 = vmatprep.subr.bf16.mxu1 %v3942_v31  ;;  %v3960_v31 = vpack.c.bf16 %v1009_v26, %v1001_v25  ;;  %v819_v21 = vld [vmem:[#allocation6 + $0xf60] sm:$0xff]  ;;  %v828_v25 = vld [vmem:[#allocation6 + $0xfa8] sm:$0xff] }
 0x18a   :  { %4069 = vmatpush1.bf16.msra.mxu0 %v4068_v32  ;;  %v3962_v32 = vpack.c.bf16 %v1026_v28, %v1018_v38  ;;  %v836_v26 = vld [vmem:[#allocation6 + $0xfe8] sm:$0xff]  ;;  %v1081_v38 = vld [vmem:[#allocation6 + $0x1790] sm:$0xff] }
 0x18b   :  { %4071 = vmatprep.subr.bf16.mxu0 %v4070_v37  ;;  %v4088_v37 = vpack.c.bf16 %v755_v56, %v747_v30  ;;  %v1089_v28 = vld [vmem:[#allocation6 + $0x17d0] sm:$0xff]  ;;  %v334_v30 = vld [vmem:[#allocation6 + $0x38] sm:$0xff] }
 0x18c   :  { %3945 = vmatpush1.bf16.msra.mxu1 %v3944_v39  ;;  %v4090_v39 = vpack.c.bf16 %v772_v57, %v764_v35  ;;  %v342_v56 = vld [vmem:[#allocation6 + $0x78] sm:$0xff]  ;;  %v827_v35 = vld [vmem:[#allocation6 + $0xfa0] sm:$0xff] }
 0x18d   :  { %3947 = vmatprep.subr.bf16.mxu1 %v3946_v59  ;;  %v3964_v59 = vpack.c.bf16 %v1025_v36, %v1017_v33  ;;  %v835_v57 = vld [vmem:[#allocation6 + $0xfe0] sm:$0xff]  ;;  %v844_v33 = vld [vmem:[#allocation6 + $0x1028] sm:$0xff] }
 0x18e   :  { %4073 = vmatpush1.bf16.msra.mxu0 %v4072_v50  ;;  %v3966_v50 = vpack.c.bf16 %v1042_v34, %v1034_v58  ;;  %v852_v36 = vld [vmem:[#allocation6 + $0x1068] sm:$0xff]  ;;  %v333_v58 = vld [vmem:[#allocation6 + $0x30] sm:$0xff] }
 0x18f   :  { %4075 = vmatprep.subr.bf16.mxu0 %v4074_v61  ;;  %v4092_v61 = vpack.c.bf16 %v771_v44, %v763_v43  ;;  %v341_v34 = vld [vmem:[#allocation6 + $0x70] sm:$0xff]  ;;  %v350_v43 = vld [vmem:[#allocation6 + $0xb8] sm:$0xff] }
 0x190   :  { %3949 = vmatpush1.bf16.msra.mxu1 %v3948_v1  ;;  %v4094_v1 = vpack.c.bf16 %v788_v45, %v780_v60  ;;  %v358_v44 = vld [vmem:[#allocation6 + $0xf8] sm:$0xff]  ;;  %v843_v60 = vld [vmem:[#allocation6 + $0x1020] sm:$0xff] }
 0x191   :  { %3951 = vmatprep.subr.bf16.mxu1 %v3950_v10  ;;  %v3968_v10 = vpack.c.bf16 %v1041_v52, %v1033_v51  ;;  %v851_v45 = vld [vmem:[#allocation6 + $0x1060] sm:$0xff]  ;;  %v860_v51 = vld [vmem:[#allocation6 + $0x10a8] sm:$0xff] }
 0x192   :  { %4077 = vmatpush1.bf16.msra.mxu0 %v4076_v6  ;;  %v3970_v6 = vpack.c.bf16 %v1058_v40, %v1050_v63  ;;  %v868_v52 = vld [vmem:[#allocation6 + $0x10e8] sm:$0xff]  ;;  %v349_v63 = vld [vmem:[#allocation6 + $0xb0] sm:$0xff] }
 0x193   :  { %4079 = vmatprep.subr.bf16.mxu0 %v4078_v47  ;;  %v4096_v47 = vpack.c.bf16 %v787_v3, %v779_v2  ;;  %v357_v40 = vld [vmem:[#allocation6 + $0xf0] sm:$0xff]  ;;  %v366_v2 = vld [vmem:[#allocation6 + $0x138] sm:$0xff] }
 0x194   :  { %3953 = vmatpush1.bf16.msra.mxu1 %v3952_v48  ;;  %v4098_v48 = vpack.c.bf16 %v804_v5, %v796_v12  ;;  %v374_v3 = vld [vmem:[#allocation6 + $0x178] sm:$0xff]  ;;  %v859_v12 = vld [vmem:[#allocation6 + $0x10a0] sm:$0xff] }
 0x195   :  { %3955 = vmatprep.subr.bf16.mxu1 %v3954_v15  ;;  %v3972_v15 = vpack.c.bf16 %v1057_v46, %v1049_v42  ;;  %v867_v5 = vld [vmem:[#allocation6 + $0x10e0] sm:$0xff]  ;;  %v876_v42 = vld [vmem:[#allocation6 + $0x1128] sm:$0xff] }
 0x196   :  { %4081 = vmatpush1.bf16.msra.mxu0 %v4080_v17  ;;  %v3974_v17 = vpack.c.bf16 %v1074_v9, %v1066_v7  ;;  %v884_v46 = vld [vmem:[#allocation6 + $0x1168] sm:$0xff]  ;;  %v365_v7 = vld [vmem:[#allocation6 + $0x130] sm:$0xff] }
 0x197   :  { %4083 = vmatprep.subr.bf16.mxu0 %v4082_v53  ;;  %v4100_v53 = vpack.c.bf16 %v803_v14, %v795_v13  ;;  %v373_v9 = vld [vmem:[#allocation6 + $0x170] sm:$0xff]  ;;  %v382_v13 = vld [vmem:[#allocation6 + $0x1b8] sm:$0xff] }
 0x198   :  { %3957 = vmatpush1.bf16.msra.mxu1 %v3956_v24  ;;  %v4102_v24 = vpack.c.bf16 %v820_v16, %v812_v62  ;;  %v390_v14 = vld [vmem:[#allocation6 + $0x1f8] sm:$0xff]  ;;  %v875_v62 = vld [vmem:[#allocation6 + $0x1120] sm:$0xff] }
 0x199   :  { %3959 = vmatprep.subr.bf16.mxu1 %v3958_v27  ;;  %v3976_v27 = vpack.c.bf16 %v1073_v19, %v1065_v18  ;;  %v883_v16 = vld [vmem:[#allocation6 + $0x1160] sm:$0xff]  ;;  %v892_v18 = vld [vmem:[#allocation6 + $0x11a8] sm:$0xff]  ;;  %v4186_v19 = vpack.c.bf16 %v390_v14, %v382_v13  ;;  %v445_v14 = vld [vmem:[#allocation6 + $0x3b0] sm:$0xff] }
 0x19a   :  { %4085 = vmatpush1.bf16.msra.mxu0 %v4084_v55  ;;  %v3978_v55 = vpack.c.bf16 %v1090_v23, %v1082_v20  ;;  %v389_v20 = vld [vmem:[#allocation6 + $0x1f0] sm:$0xff]  ;;  %v4120_v23 = vpack.c.bf16 %v883_v16, %v875_v62  ;;  %v462_v16 = vld [vmem:[#allocation6 + $0x438] sm:$0xff] }
 0x19b   :  { %4087 = vmatprep.subr.bf16.mxu0 %v4086_v29  ;;  %v4104_v29 = vpack.c.bf16 %v819_v21, %v811_v54  ;;  %v406_v54 = vld [vmem:[#allocation6 + $0x278] sm:$0xff] }
 0x19c   :  { %3961 = vmatpush1.bf16.msra.mxu1 %v3960_v31  ;;  %v4106_v31 = vpack.c.bf16 %v836_v26, %v828_v25  ;;  %v899_v25 = vld [vmem:[#allocation6 + $0x11e0] sm:$0xff] }
 0x19d   :  { %3963 = vmatprep.subr.bf16.mxu1 %v3962_v32  ;;  %v3980_v32 = vpack.c.bf16 %v1089_v28, %v1081_v38  ;;  %v916_v38 = vld [vmem:[#allocation6 + $0x1268] sm:$0xff] }
 0x19e   :  { %4089 = vmatpush1.bf16.msra.mxu0 %v4088_v37  ;;  %v4174_v37 = vpack.c.bf16 %v342_v56, %v334_v30  ;;  %v405_v30 = vld [vmem:[#allocation6 + $0x270] sm:$0xff] }
 0x19f   :  { %4091 = vmatprep.subr.bf16.mxu0 %v4090_v39  ;;  %v4108_v39 = vpack.c.bf16 %v835_v57, %v827_v35  ;;  %v422_v35 = vld [vmem:[#allocation6 + $0x2f8] sm:$0xff] }
 0x1a0   :  { %3965 = vmatpush1.bf16.msra.mxu1 %v3964_v59  ;;  %v4110_v59 = vpack.c.bf16 %v852_v36, %v844_v33  ;;  %v915_v33 = vld [vmem:[#allocation6 + $0x1260] sm:$0xff] }
 0x1a1   :  { %3967 = vmatprep.subr.bf16.mxu1 %v3966_v50  ;;  %v4176_v50 = vpack.c.bf16 %v341_v34, %v333_v58  ;;  %v932_v58 = vld [vmem:[#allocation6 + $0x12e8] sm:$0xff] }
 0x1a2   :  { %4093 = vmatpush1.bf16.msra.mxu0 %v4092_v61  ;;  %v4178_v61 = vpack.c.bf16 %v358_v44, %v350_v43  ;;  %v421_v43 = vld [vmem:[#allocation6 + $0x2f0] sm:$0xff] }
 0x1a3   :  { %4095 = vmatprep.subr.bf16.mxu0 %v4094_v1  ;;  %v4112_v1 = vpack.c.bf16 %v851_v45, %v843_v60  ;;  %v438_v60 = vld [vmem:[#allocation6 + $0x378] sm:$0xff] }
 0x1a4   :  { %3969 = vmatpush1.bf16.msra.mxu1 %v3968_v10  ;;  %v4114_v10 = vpack.c.bf16 %v868_v52, %v860_v51  ;;  %v931_v51 = vld [vmem:[#allocation6 + $0x12e0] sm:$0xff] }
 0x1a5   :  { %3971 = vmatprep.subr.bf16.mxu1 %v3970_v6  ;;  %v4180_v6 = vpack.c.bf16 %v357_v40, %v349_v63  ;;  %v948_v63 = vld [vmem:[#allocation6 + $0x1368] sm:$0xff] }
 0x1a6   :  { %4097 = vmatpush1.bf16.msra.mxu0 %v4096_v47  ;;  %v4182_v47 = vpack.c.bf16 %v374_v3, %v366_v2  ;;  %v437_v2 = vld [vmem:[#allocation6 + $0x370] sm:$0xff] }
 0x1a7   :  { %4099 = vmatprep.subr.bf16.mxu0 %v4098_v48  ;;  %v4116_v48 = vpack.c.bf16 %v867_v5, %v859_v12  ;;  %v446_v12 = vld [vmem:[#allocation6 + $0x3b8] sm:$0xff] }
 0x1a8   :  { %3973 = vmatpush1.bf16.msra.mxu1 %v3972_v15  ;;  %v4118_v15 = vpack.c.bf16 %v884_v46, %v876_v42  ;;  %v454_v5 = vld [vmem:[#allocation6 + $0x3f8] sm:$0xff]  ;;  %v939_v46 = vld [vmem:[#allocation6 + $0x1320] sm:$0xff] }
 0x1a9   :  { %3975 = vmatprep.subr.bf16.mxu1 %v3974_v17  ;;  %v4184_v17 = vpack.c.bf16 %v373_v9, %v365_v7  ;;  %v956_v9 = vld [vmem:[#allocation6 + $0x13a8] sm:$0xff]  ;;  %v4202_v13 = vpack.c.bf16 %v454_v5, %v446_v12  ;;  %v509_v5 = vld [vmem:[#allocation6 + $0x5b0] sm:$0xff] }
 0x1aa   :  { %4101 = vmatpush1.bf16.msra.mxu0 %v4100_v53  ;;  %v381_v53 = vld [vmem:[#allocation6 + $0x1b0] sm:$0xff] }
 0x1ab   :  { %4103 = vmatprep.subr.bf16.mxu0 %v4102_v24  ;;  %v398_v24 = vld [vmem:[#allocation6 + $0x238] sm:$0xff]  ;;  %v4188_v26 = vpack.c.bf16 %v389_v20, %v381_v53  ;;  %v972_v20 = vld [vmem:[#allocation6 + $0x1428] sm:$0xff] }
 0x1ac   :  { %3977 = vmatpush1.bf16.msra.mxu1 %v3976_v27  ;;  %v891_v27 = vld [vmem:[#allocation6 + $0x11a0] sm:$0xff]  ;;  %v4190_v28 = vpack.c.bf16 %v406_v54, %v398_v24  ;;  %v461_v54 = vld [vmem:[#allocation6 + $0x430] sm:$0xff] }
 0x1ad   :  { %3979 = vmatprep.subr.bf16.mxu1 %v3978_v55  ;;  %v908_v55 = vld [vmem:[#allocation6 + $0x1228] sm:$0xff]  ;;  %v4124_v56 = vpack.c.bf16 %v899_v25, %v891_v27  ;;  %v478_v25 = vld [vmem:[#allocation6 + $0x4b8] sm:$0xff] }
 0x1ae   :  { %4105 = vmatpush1.bf16.msra.mxu0 %v4104_v29  ;;  %v397_v29 = vld [vmem:[#allocation6 + $0x230] sm:$0xff]  ;;  %v4126_v57 = vpack.c.bf16 %v916_v38, %v908_v55  ;;  %v971_v38 = vld [vmem:[#allocation6 + $0x1420] sm:$0xff] }
 0x1af   :  { %4107 = vmatprep.subr.bf16.mxu0 %v4106_v31  ;;  %v414_v31 = vld [vmem:[#allocation6 + $0x2b8] sm:$0xff]  ;;  %v4192_v36 = vpack.c.bf16 %v405_v30, %v397_v29  ;;  %v988_v30 = vld [vmem:[#allocation6 + $0x14a8] sm:$0xff] }
 0x1b0   :  { %3981 = vmatpush1.bf16.msra.mxu1 %v3980_v32  ;;  %v907_v32 = vld [vmem:[#allocation6 + $0x1220] sm:$0xff]  ;;  %v4194_v34 = vpack.c.bf16 %v422_v35, %v414_v31  ;;  %v477_v35 = vld [vmem:[#allocation6 + $0x4b0] sm:$0xff] }
 0x1b1   :  { %4175 = vmatprep.subr.bf16.mxu1 %v4174_v37  ;;  %v924_v37 = vld [vmem:[#allocation6 + $0x12a8] sm:$0xff]  ;;  %v4128_v44 = vpack.c.bf16 %v915_v33, %v907_v32  ;;  %v494_v33 = vld [vmem:[#allocation6 + $0x538] sm:$0xff] }
 0x1b2   :  { %4109 = vmatpush1.bf16.msra.mxu0 %v4108_v39  ;;  %v413_v39 = vld [vmem:[#allocation6 + $0x2b0] sm:$0xff]  ;;  %v4130_v45 = vpack.c.bf16 %v932_v58, %v924_v37  ;;  %v987_v58 = vld [vmem:[#allocation6 + $0x14a0] sm:$0xff] }
 0x1b3   :  { %1590 = vmatmul.mubr.f32.vlgmr.msra.gmra.mrb[2].mxu1 %v5688_v49  ;;  %4111 = vmatprep.subr.bf16.mxu0 %v4110_v59  ;;  %v430_v59 = vld [vmem:[#allocation6 + $0x338] sm:$0xff]  ;;  %v4196_v52 = vpack.c.bf16 %v421_v43, %v413_v39  ;;  %v1004_v43 = vld [vmem:[#allocation6 + $0x1528] sm:$0xff] }
 0x1b4   :  { %4177 = vmatpush1.bf16.msra.mxu1 %v4176_v50  ;;  %1873 = vmatprep.mubr.f32.mxu1 %v5667_v41  ;;  %v900_v41 = vld [vmem:[#allocation6 + $0x11e8] sm:$0xff]  ;;  %v923_v50 = vld [vmem:[#allocation6 + $0x12a0] sm:$0xff]  ;;  %v4198_v40 = vpack.c.bf16 %v438_v60, %v430_v59  ;;  %v493_v60 = vld [vmem:[#allocation6 + $0x530] sm:$0xff] }
 0x1b5   :  { %1732 = vmatmul.mubr.f32.vlgmr.msra.gmra.mrb[2].mxu0 %v5670_v4  ;;  %4179 = vmatprep.subr.bf16.mxu1 %v4178_v61  ;;  %v4122_v21 = vpack.c.bf16 %v900_v41, %v892_v18  ;;  %v940_v61 = vld [vmem:[#allocation6 + $0x1328] sm:$0xff]  ;;  %v955_v41 = vld [vmem:[#allocation6 + $0x13a0] sm:$0xff] }
 0x1b6   :  { %4113 = vmatpush1.bf16.msra.mxu0 %v4112_v1  ;;  %1802 = vmatprep.mubr.f32.mxu0 %v5692_v22  ;;  %v429_v1 = vld [vmem:[#allocation6 + $0x330] sm:$0xff]  ;;  %v4134_v42 = vpack.c.bf16 %v948_v63, %v940_v61  ;;  %v1003_v63 = vld [vmem:[#allocation6 + $0x1520] sm:$0xff] }
 0x1b7   :  { %4115 = vmatprep.subr.bf16.mxu0 %v4114_v10  ;;  %v4132_v10 = vpack.c.bf16 %v931_v51, %v923_v50  ;;  %v4200_v7 = vpack.c.bf16 %v437_v2, %v429_v1  ;;  %v510_v51 = vld [vmem:[#allocation6 + $0x5b8] sm:$0xff]  ;;  %v1020_v2 = vld [vmem:[#allocation6 + $0x15a8] sm:$0xff] }
 0x1b8   :  { %4181 = vmatpush1.bf16.msra.mxu1 %v4180_v6 }
 0x1b9   :  { %4183 = vmatprep.subr.bf16.mxu1 %v4182_v47  ;;  %v947_v47 = vld [vmem:[#allocation6 + $0x1360] sm:$0xff] }
 0x1ba   :  { %4117 = vmatpush1.bf16.msra.mxu0 %v4116_v48  ;;  %v964_v48 = vld [vmem:[#allocation6 + $0x13e8] sm:$0xff]  ;;  %v4136_v62 = vpack.c.bf16 %v947_v47, %v939_v46  ;;  %v526_v47 = vld [vmem:[#allocation6 + $0x638] sm:$0xff] }
 0x1bb   :  { %4119 = vmatprep.subr.bf16.mxu0 %v4118_v15  ;;  %v453_v15 = vld [vmem:[#allocation6 + $0x3f0] sm:$0xff]  ;;  %v4138_v18 = vpack.c.bf16 %v964_v48, %v956_v9  ;;  %v1019_v48 = vld [vmem:[#allocation6 + $0x15a0] sm:$0xff] }
 0x1bc   :  { %4185 = vmatpush1.bf16.msra.mxu1 %v4184_v17  ;;  %v470_v17 = vld [vmem:[#allocation6 + $0x478] sm:$0xff]  ;;  %v4204_v53 = vpack.c.bf16 %v453_v15, %v445_v14  ;;  %v1036_v15 = vld [vmem:[#allocation6 + $0x1628] sm:$0xff] }
 0x1bd   :  { %4187 = vmatprep.subr.bf16.mxu1 %v4186_v19  ;;  %v963_v19 = vld [vmem:[#allocation6 + $0x13e0] sm:$0xff]  ;;  %v4206_v24 = vpack.c.bf16 %v470_v17, %v462_v16  ;;  %v525_v17 = vld [vmem:[#allocation6 + $0x630] sm:$0xff] }
 0x1be   :  { %4121 = vmatpush1.bf16.msra.mxu0 %v4120_v23  ;;  %v980_v23 = vld [vmem:[#allocation6 + $0x1468] sm:$0xff]  ;;  %v4140_v27 = vpack.c.bf16 %v963_v19, %v955_v41  ;;  %v542_v19 = vld [vmem:[#allocation6 + $0x6b8] sm:$0xff] }
 0x1bf   :  { %4123 = vmatprep.subr.bf16.mxu0 %v4122_v21  ;;  %v469_v21 = vld [vmem:[#allocation6 + $0x470] sm:$0xff]  ;;  %v4142_v55 = vpack.c.bf16 %v980_v23, %v972_v20  ;;  %v1035_v23 = vld [vmem:[#allocation6 + $0x1620] sm:$0xff] }
 0x1c0   :  { %4189 = vmatpush1.bf16.msra.mxu1 %v4188_v26  ;;  %v486_v26 = vld [vmem:[#allocation6 + $0x4f8] sm:$0xff]  ;;  %v4208_v29 = vpack.c.bf16 %v469_v21, %v461_v54  ;;  %v1052_v21 = vld [vmem:[#allocation6 + $0x16a8] sm:$0xff] }
 0x1c1   :  { %4191 = vmatprep.subr.bf16.mxu1 %v4190_v28  ;;  %v979_v28 = vld [vmem:[#allocation6 + $0x1460] sm:$0xff]  ;;  %v4210_v31 = vpack.c.bf16 %v486_v26, %v478_v25  ;;  %v541_v26 = vld [vmem:[#allocation6 + $0x6b0] sm:$0xff] }
 0x1c2   :  { %4125 = vmatpush1.bf16.msra.mxu0 %v4124_v56  ;;  %v996_v56 = vld [vmem:[#allocation6 + $0x14e8] sm:$0xff]  ;;  %v4144_v32 = vpack.c.bf16 %v979_v28, %v971_v38  ;;  %v558_v28 = vld [vmem:[#allocation6 + $0x738] sm:$0xff] }
 0x1c3   :  { %4127 = vmatprep.subr.bf16.mxu0 %v4126_v57  ;;  %v485_v57 = vld [vmem:[#allocation6 + $0x4f0] sm:$0xff]  ;;  %v4146_v37 = vpack.c.bf16 %v996_v56, %v988_v30  ;;  %v1051_v56 = vld [vmem:[#allocation6 + $0x16a0] sm:$0xff] }
 0x1c4   :  { %4193 = vmatpush1.bf16.msra.mxu1 %v4192_v36  ;;  %v502_v36 = vld [vmem:[#allocation6 + $0x578] sm:$0xff]  ;;  %v4212_v39 = vpack.c.bf16 %v485_v57, %v477_v35  ;;  %v1068_v57 = vld [vmem:[#allocation6 + $0x1728] sm:$0xff] }
 0x1c5   :  { %4195 = vmatprep.subr.bf16.mxu1 %v4194_v34  ;;  %v995_v34 = vld [vmem:[#allocation6 + $0x14e0] sm:$0xff]  ;;  %v4214_v59 = vpack.c.bf16 %v502_v36, %v494_v33  ;;  %v557_v36 = vld [vmem:[#allocation6 + $0x730] sm:$0xff] }
 0x1c6   :  { %4129 = vmatpush1.bf16.msra.mxu0 %v4128_v44  ;;  %v5707_v3 = vpop.f32.mrb[0].mxu1  ;;  %v1012_v44 = vld [vmem:[#allocation6 + $0x1568] sm:$0xff]  ;;  %v4148_v50 = vpack.c.bf16 %v995_v34, %v987_v58  ;;  %v574_v34 = vld [vmem:[#allocation6 + $0x7b8] sm:$0xff] }
 0x1c7   :  { %v5709_v6 = vpop.f32.mrb[1].mxu1  ;;  %4131 = vmatprep.subr.bf16.mxu0 %v4130_v45  ;;  %v501_v45 = vld [vmem:[#allocation6 + $0x570] sm:$0xff]  ;;  %v4150_v61 = vpack.c.bf16 %v1012_v44, %v1004_v43  ;;  %v1067_v44 = vld [vmem:[#allocation6 + $0x1720] sm:$0xff] }
 0x1c8   :  { %4197 = vmatpush1.bf16.msra.mxu1 %v4196_v52  ;;  %v518_v52 = vld [vmem:[#allocation6 + $0x5f8] sm:$0xff]  ;;  %v4216_v1 = vpack.c.bf16 %v501_v45, %v493_v60  ;;  %v1084_v45 = vld [vmem:[#allocation6 + $0x17a8] sm:$0xff] }
 0x1c9   :  { %4199 = vmatprep.subr.bf16.mxu1 %v4198_v40  ;;  %v1011_v40 = vld [vmem:[#allocation6 + $0x1560] sm:$0xff]  ;;  %v4218_v12 = vpack.c.bf16 %v518_v52, %v510_v51  ;;  %v573_v52 = vld [vmem:[#allocation6 + $0x7b0] sm:$0xff] }
 0x1ca   :  { %4133 = vmatpush1.bf16.msra.mxu0 %v4132_v10  ;;  %v1028_v10 = vld [vmem:[#allocation6 + $0x15e8] sm:$0xff]  ;;  %v4152_v46 = vpack.c.bf16 %v1011_v40, %v1003_v63  ;;  %v590_v40 = vld [vmem:[#allocation6 + $0x838] sm:$0xff] }
 0x1cb   :  { %4135 = vmatprep.subr.bf16.mxu0 %v4134_v42  ;;  %v517_v42 = vld [vmem:[#allocation6 + $0x5f0] sm:$0xff]  ;;  %v4154_v9 = vpack.c.bf16 %v1028_v10, %v1020_v2  ;;  %v1083_v10 = vld [vmem:[#allocation6 + $0x17a0] sm:$0xff] }
 0x1cc   :  { %4201 = vmatpush1.bf16.msra.mxu1 %v4200_v7  ;;  %v534_v7 = vld [vmem:[#allocation6 + $0x678] sm:$0xff]  ;;  %v4220_v14 = vpack.c.bf16 %v517_v42, %v509_v5  ;;  %v2031_v42 = vld [vmem:[#allocation9 + $0x8] sm:$0xff] }
 0x1cd   :  { %4203 = vmatprep.subr.bf16.mxu1 %v4202_v13  ;;  %v1027_v13 = vld [vmem:[#allocation6 + $0x15e0] sm:$0xff]  ;;  %v4222_v16 = vpack.c.bf16 %v534_v7, %v526_v47  ;;  %v589_v7 = vld [vmem:[#allocation6 + $0x830] sm:$0xff] }
 0x1ce   :  { %4137 = vmatpush1.bf16.msra.mxu0 %v4136_v62  ;;  %v1044_v62 = vld [vmem:[#allocation6 + $0x1668] sm:$0xff]  ;;  %v4156_v41 = vpack.c.bf16 %v1027_v13, %v1019_v48  ;;  %v606_v13 = vld [vmem:[#allocation6 + $0x8b8] sm:$0xff] }
 0x1cf   :  { %4139 = vmatprep.subr.bf16.mxu0 %v4138_v18  ;;  %v533_v18 = vld [vmem:[#allocation6 + $0x670] sm:$0xff]  ;;  %v4158_v20 = vpack.c.bf16 %v1044_v62, %v1036_v15  ;;  %v2030_v62 = vld [vmem:[#allocation9] sm:$0xff] }
 0x1d0   :  { %4205 = vmatpush1.bf16.msra.mxu1 %v4204_v53  ;;  %v550_v53 = vld [vmem:[#allocation6 + $0x6f8] sm:$0xff]  ;;  %v4224_v54 = vpack.c.bf16 %v533_v18, %v525_v17  ;;  %v2039_v18 = vld [vmem:[#allocation9 + $0x48] sm:$0xff] }
 0x1d1   :  { %4207 = vmatprep.subr.bf16.mxu1 %v4206_v24  ;;  %v1043_v24 = vld [vmem:[#allocation6 + $0x1660] sm:$0xff]  ;;  %v4226_v25 = vpack.c.bf16 %v550_v53, %v542_v19  ;;  %v605_v53 = vld [vmem:[#allocation6 + $0x8b0] sm:$0xff] }
 0x1d2   :  { %4141 = vmatpush1.bf16.msra.mxu0 %v4140_v27  ;;  %v1060_v27 = vld [vmem:[#allocation6 + $0x16e8] sm:$0xff]  ;;  %v4160_v38 = vpack.c.bf16 %v1043_v24, %v1035_v23  ;;  %v622_v24 = vld [vmem:[#allocation6 + $0x938] sm:$0xff] }
 0x1d3   :  { %4143 = vmatprep.subr.bf16.mxu0 %v4142_v55  ;;  %v549_v55 = vld [vmem:[#allocation6 + $0x6f0] sm:$0xff]  ;;  %v4162_v30 = vpack.c.bf16 %v1060_v27, %v1052_v21  ;;  %v2038_v27 = vld [vmem:[#allocation9 + $0x40] sm:$0xff] }
 0x1d4   :  { %4209 = vmatpush1.bf16.msra.mxu1 %v4208_v29  ;;  %v566_v29 = vld [vmem:[#allocation6 + $0x778] sm:$0xff]  ;;  %v4228_v35 = vpack.c.bf16 %v549_v55, %v541_v26  ;;  %v2047_v55 = vld [vmem:[#allocation9 + $0x88] sm:$0xff] }
 0x1d5   :  { %4211 = vmatprep.subr.bf16.mxu1 %v4210_v31  ;;  %v1059_v31 = vld [vmem:[#allocation6 + $0x16e0] sm:$0xff]  ;;  %v4230_v33 = vpack.c.bf16 %v566_v29, %v558_v28  ;;  %v621_v29 = vld [vmem:[#allocation6 + $0x930] sm:$0xff] }
 0x1d6   :  { %4145 = vmatpush1.bf16.msra.mxu0 %v4144_v32  ;;  %v1076_v32 = vld [vmem:[#allocation6 + $0x1768] sm:$0xff]  ;;  %v4164_v58 = vpack.c.bf16 %v1059_v31, %v1051_v56  ;;  %v638_v31 = vld [vmem:[#allocation6 + $0x9b8] sm:$0xff] }
 0x1d7   :  { %4147 = vmatprep.subr.bf16.mxu0 %v4146_v37  ;;  %v565_v37 = vld [vmem:[#allocation6 + $0x770] sm:$0xff]  ;;  %v4166_v43 = vpack.c.bf16 %v1076_v32, %v1068_v57  ;;  %v2046_v57 = vld [vmem:[#allocation9 + $0x80] sm:$0xff] }
 0x1d8   :  { %4213 = vmatpush1.bf16.msra.mxu1 %v4212_v39  ;;  %v582_v39 = vld [vmem:[#allocation6 + $0x7f8] sm:$0xff]  ;;  %v4232_v60 = vpack.c.bf16 %v565_v37, %v557_v36  ;;  %v2050_v32 = vld [vmem:[#allocation9 + $0xa0] sm:$0xff]  ;;  %v2055_v36 = vld [vmem:[#allocation9 + $0xc8] sm:$0xff] }
 0x1d9   :  { %4215 = vmatprep.subr.bf16.mxu1 %v4214_v59  ;;  %v1075_v59 = vld [vmem:[#allocation6 + $0x1760] sm:$0xff]  ;;  %v4234_v51 = vpack.c.bf16 %v582_v39, %v574_v34  ;;  %v2059_v37 = vld [vmem:[#allocation9 + $0xe8] sm:$0xff]  ;;  %v4376_v39 = vpack.c.bf16 %v2050_v32, %v2046_v57 }
 0x1da   :  { %4149 = vmatpush1.bf16.msra.mxu0 %v4148_v50  ;;  %v1092_v50 = vld [vmem:[#allocation6 + $0x17e8] sm:$0xff]  ;;  %v4168_v63 = vpack.c.bf16 %v1075_v59, %v1067_v44  ;;  %v645_v34 = vld [vmem:[#allocation6 + $0x9f0] sm:$0xff]  ;;  %v662_v44 = vld [vmem:[#allocation6 + $0xa78] sm:$0xff]  ;;  %v4378_v59 = vpack.c.bf16 %v2059_v37, %v2055_v36 }
 0x1db   :  { %4151 = vmatprep.subr.bf16.mxu0 %v4150_v61  ;;  %v581_v61 = vld [vmem:[#allocation6 + $0x7f0] sm:$0xff]  ;;  %v4170_v2 = vpack.c.bf16 %v1092_v50, %v1084_v45  ;;  %v2058_v45 = vld [vmem:[#allocation9 + $0xe0] sm:$0xff] }
 0x1dc   :  { %4217 = vmatpush1.bf16.msra.mxu1 %v4216_v1  ;;  %v598_v1 = vld [vmem:[#allocation6 + $0x878] sm:$0xff]  ;;  %v4236_v5 = vpack.c.bf16 %v581_v61, %v573_v52  ;;  %v2067_v52 = vld [vmem:[#allocation9 + $0x128] sm:$0xff] }
 0x1dd   :  { %4219 = vmatprep.subr.bf16.mxu1 %v4218_v12  ;;  %v1091_v12 = vld [vmem:[#allocation6 + $0x17e0] sm:$0xff]  ;;  %v4238_v47 = vpack.c.bf16 %v598_v1, %v590_v40  ;;  %v661_v40 = vld [vmem:[#allocation6 + $0xa70] sm:$0xff] }
 0x1de   :  { %4153 = vmatpush1.bf16.msra.mxu0 %v4152_v46  ;;  %v2035_v46 = vld [vmem:[#allocation9 + $0x28] sm:$0xff]  ;;  %v4172_v48 = vpack.c.bf16 %v1091_v12, %v1083_v10  ;;  %v678_v10 = vld [vmem:[#allocation6 + $0xaf8] sm:$0xff]  ;;  %v5715_v12 = vsub.s32 0, %v5524_v11 }
 0x1df   :  { %4155 = vmatprep.subr.bf16.mxu0 %v4154_v9  ;;  %v597_v9 = vld [vmem:[#allocation6 + $0x870] sm:$0xff]  ;;  %v4366_v15 = vpack.c.bf16 %v2035_v46, %v2031_v42  ;;  %v2062_v42 = vld [vmem:[#allocation9 + $0x100] sm:$0xff] }
 0x1e0   :  { %4221 = vmatpush1.bf16.msra.mxu1 %v4220_v14  ;;  %v614_v14 = vld [vmem:[#allocation6 + $0x8f8] sm:$0xff]  ;;  %v4240_v17 = vpack.c.bf16 %v597_v9, %v589_v7  ;;  %v2066_v46 = vld [vmem:[#allocation9 + $0x120] sm:$0xff]  ;;  %v5720_v7 = vsub.s32 1, %v5524_v11  ;;  %v2087_v32 = vld [vmem:[#allocation9 + $0x1c8] sm:$0xff] }
 0x1e1   :  { %4223 = vmatprep.subr.bf16.mxu1 %v4222_v16  ;;  %v2034_v16 = vld [vmem:[#allocation9 + $0x20] sm:$0xff]  ;;  %v4242_v19 = vpack.c.bf16 %v614_v14, %v606_v13  ;;  %v2075_v13 = vld [vmem:[#allocation9 + $0x168] sm:$0xff] }
 0x1e2   :  { %4157 = vmatpush1.bf16.msra.mxu0 %v4156_v41  ;;  %v2043_v41 = vld [vmem:[#allocation9 + $0x68] sm:$0xff]  ;;  %v4368_v23 = vpack.c.bf16 %v2034_v16, %v2030_v62  ;;  %v4384_v16 = vpack.c.bf16 %v2066_v46, %v2062_v42  ;;  %v2094_v42 = vld [vmem:[#allocation9 + $0x200] sm:$0xff] }
 0x1e3   :  { %4159 = vmatprep.subr.bf16.mxu0 %v4158_v20  ;;  %v613_v20 = vld [vmem:[#allocation6 + $0x8f0] sm:$0xff]  ;;  %v4370_v21 = vpack.c.bf16 %v2043_v41, %v2039_v18  ;;  %v694_v18 = vld [vmem:[#allocation6 + $0xb78] sm:$0xff]  ;;  %v2098_v46 = vld [vmem:[#allocation9 + $0x220] sm:$0xff] }
 0x1e4   :  { %4225 = vmatpush1.bf16.msra.mxu1 %v4224_v54  ;;  %v630_v54 = vld [vmem:[#allocation6 + $0x978] sm:$0xff]  ;;  %v4244_v26 = vpack.c.bf16 %v613_v20, %v605_v53  ;;  %v677_v62 = vld [vmem:[#allocation6 + $0xaf0] sm:$0xff]  ;;  %v2070_v53 = vld [vmem:[#allocation9 + $0x140] sm:$0xff] }
 0x1e5   :  { %4227 = vmatprep.subr.bf16.mxu1 %v4226_v25  ;;  %v2042_v25 = vld [vmem:[#allocation9 + $0x60] sm:$0xff]  ;;  %v4246_v28 = vpack.c.bf16 %v630_v54, %v622_v24  ;;  %v2079_v54 = vld [vmem:[#allocation9 + $0x188] sm:$0xff] }
 0x1e6   :  { %4161 = vmatpush1.bf16.msra.mxu0 %v4160_v38  ;;  %v2051_v38 = vld [vmem:[#allocation9 + $0xa8] sm:$0xff]  ;;  %v4372_v56 = vpack.c.bf16 %v2042_v25, %v2038_v27  ;;  %v2074_v20 = vld [vmem:[#allocation9 + $0x160] sm:$0xff] }
 0x1e7   :  { %4163 = vmatprep.subr.bf16.mxu0 %v4162_v30  ;;  %v629_v30 = vld [vmem:[#allocation6 + $0x970] sm:$0xff] }
 0x1e8   :  { %4229 = vmatpush1.bf16.msra.mxu1 %v4228_v35  ;;  %v646_v35 = vld [vmem:[#allocation6 + $0x9f8] sm:$0xff]  ;;  %v685_v25 = vld [vmem:[#allocation6 + $0xb30] sm:$0xff] }
 0x1e9   :  { %4231 = vmatprep.subr.bf16.mxu1 %v4230_v33  ;;  %v4248_v33 = vpack.c.bf16 %v629_v30, %v621_v29 }
 0x1ea   :  { %4165 = vmatpush1.bf16.msra.mxu0 %v4164_v58  ;;  %v637_v58 = vld [vmem:[#allocation6 + $0x9b0] sm:$0xff] }
 0x1eb   :  { %4167 = vmatprep.subr.bf16.mxu0 %v4166_v43  ;;  %v654_v43 = vld [vmem:[#allocation6 + $0xa38] sm:$0xff]  ;;  %v4252_v50 = vpack.c.bf16 %v645_v34, %v637_v58  ;;  %v701_v58 = vld [vmem:[#allocation6 + $0xbb0] sm:$0xff] }
 0x1ec   :  { %4233 = vmatpush1.bf16.msra.mxu1 %v4232_v60  ;;  %v2054_v60 = vld [vmem:[#allocation9 + $0xc0] sm:$0xff]  ;;  %v4254_v61 = vpack.c.bf16 %v662_v44, %v654_v43  ;;  %v709_v34 = vld [vmem:[#allocation6 + $0xbf0] sm:$0xff]  ;;  %v718_v43 = vld [vmem:[#allocation6 + $0xc38] sm:$0xff] }
 0x1ed   :  { %4235 = vmatprep.subr.bf16.mxu1 %v4234_v51  ;;  %v2063_v51 = vld [vmem:[#allocation9 + $0x108] sm:$0xff]  ;;  %v4380_v1 = vpack.c.bf16 %v2058_v45, %v2054_v60  ;;  %v726_v44 = vld [vmem:[#allocation6 + $0xc78] sm:$0xff]  ;;  %v2090_v60 = vld [vmem:[#allocation9 + $0x1e0] sm:$0xff] }
 0x1ee   :  { %4169 = vmatpush1.bf16.msra.mxu0 %v4168_v63  ;;  %v653_v63 = vld [vmem:[#allocation6 + $0xa30] sm:$0xff] }
 0x1ef   :  { %4171 = vmatprep.subr.bf16.mxu0 %v4170_v2  ;;  %v670_v2 = vld [vmem:[#allocation6 + $0xab8] sm:$0xff]  ;;  %v4256_v9 = vpack.c.bf16 %v661_v40, %v653_v63  ;;  %v717_v63 = vld [vmem:[#allocation6 + $0xc30] sm:$0xff] }
 0x1f0   :  { %4237 = vmatpush1.bf16.msra.mxu1 %v4236_v5  ;;  %v4382_v5 = vpack.c.bf16 %v2067_v52, %v2063_v51  ;;  %v4258_v14 = vpack.c.bf16 %v678_v10, %v670_v2  ;;  %v2095_v51 = vld [vmem:[#allocation9 + $0x208] sm:$0xff]  ;;  %v734_v2 = vld [vmem:[#allocation6 + $0xcb8] sm:$0xff] }
 0x1f1   :  { %4239 = vmatprep.subr.bf16.mxu1 %v4238_v47  ;;  %v5717_v47 = vld [vmem:[#allocation8] sm:$0xff]  ;;  %v2099_v52 = vld [vmem:[#allocation9 + $0x228] sm:$0xff]  ;;  %v742_v10 = vld [vmem:[#allocation6 + $0xcf8] sm:$0xff] }
 0x1f2   :  { %4173 = vmatpush1.bf16.msra.mxu0 %v4172_v48  ;;  %v2071_v48 = vld [vmem:[#allocation9 + $0x148] sm:$0xff]  ;;  %v1100_v41 = vrot.slane %v5717_v47, %v5715_v12 }
 0x1f3   :  { %4367 = vmatprep.subr.bf16.mxu0 %v4366_v15  ;;  %1874 = vmatmul.mubr.f32.vlgmr.msra.gmra.mrb[4].mxu1 %v5663_v0  ;;  %v4374_v0 = vpack.c.bf16 %v2051_v38, %v2047_v55  ;;  %v669_v15 = vld [vmem:[#allocation6 + $0xab0] sm:$0xff]  ;;  %v4388_v55 = vpack.c.bf16 %v2074_v20, %v2070_v53  ;;  %v702_v38 = vld [vmem:[#allocation6 + $0xbb8] sm:$0xff]  ;;  %v2106_v53 = vld [vmem:[#allocation9 + $0x260] sm:$0xff] }
 0x1f4   :  { %4241 = vmatpush1.bf16.msra.mxu1 %v4240_v17  ;;  %1944 = vmatprep.mubr.f32.mxu1 %v5675_v8  ;;  %v4250_v8 = vpack.c.bf16 %v646_v35, %v638_v31  ;;  %v686_v17 = vld [vmem:[#allocation6 + $0xb38] sm:$0xff]  ;;  %v4260_v24 = vpack.c.bf16 %v677_v62, %v669_v15  ;;  %v1237_v29 = vadd.f32 %v5707_v3, %v1100_v41  ;;  %v2082_v31 = vld [vmem:[#allocation9 + $0x1a0] sm:$0xff]  ;;  %v725_v40 = vld [vmem:[#allocation6 + $0xc70] sm:$0xff] }
 0x1f5   :  { %1803 = vmatmul.mubr.f32.vlgmr.msra.gmra.mrb[2].mxu0 %v5688_v49  ;;  %4243 = vmatprep.subr.bf16.mxu1 %v4242_v19  ;;  %v4386_v19 = vpack.c.bf16 %v2075_v13, %v2071_v48  ;;  %v4262_v27 = vpack.c.bf16 %v694_v18, %v686_v17  ;;  %v2103_v48 = vld [vmem:[#allocation9 + $0x248] sm:$0xff]  ;;  %v750_v17 = vld [vmem:[#allocation6 + $0xd38] sm:$0xff] }
 0x1f6   :  { %4369 = vmatpush1.bf16.msra.mxu0 %v4368_v23  ;;  %v1104_v23 = vrot.slane %v5717_v47, %v5720_v7  ;;  %v2107_v13 = vld [vmem:[#allocation9 + $0x268] sm:$0xff]  ;;  %v758_v18 = vld [vmem:[#allocation6 + $0xd78] sm:$0xff] }
 0x1f7   :  { %4371 = vmatprep.subr.bf16.mxu0 %v4370_v21  ;;  %v2083_v21 = vld [vmem:[#allocation9 + $0x1a8] sm:$0xff]  ;;  %v4402_v41 = vpack.c.bf16 %v2107_v13, %v2103_v48  ;;  %v814_v48 = vld [vmem:[#allocation6 + $0xf38] sm:$0xff] }
 0x1f8   :  { %4245 = vmatpush1.bf16.msra.mxu1 %v4244_v26  ;;  %v693_v26 = vld [vmem:[#allocation6 + $0xb70] sm:$0xff]  ;;  %v4390_v30 = vpack.c.bf16 %v2083_v21, %v2079_v54  ;;  %v1239_v35 = vadd.f32 %v5709_v6, %v1104_v23  ;;  %v4278_v54 = vpack.c.bf16 %v758_v18, %v750_v17  ;;  %v822_v13 = vld [vmem:[#allocation6 + $0xf78] sm:$0xff] }
 0x1f9   :  { %4247 = vmatprep.subr.bf16.mxu1 %v4246_v28  ;;  %v710_v28 = vld [vmem:[#allocation6 + $0xbf8] sm:$0xff]  ;;  %v4264_v57 = vpack.c.bf16 %v693_v26, %v685_v25  ;;  %v733_v15 = vld [vmem:[#allocation6 + $0xcb0] sm:$0xff] }
 0x1fa   :  { %4373 = vmatpush1.bf16.msra.mxu0 %v4372_v56  ;;  %v2078_v56 = vld [vmem:[#allocation9 + $0x180] sm:$0xff]  ;;  %v741_v62 = vld [vmem:[#allocation6 + $0xcf0] sm:$0xff]  ;;  %v766_v26 = vld [vmem:[#allocation6 + $0xdb8] sm:$0xff] }
 0x1fb   :  { %4375 = vmatprep.subr.bf16.mxu0 %v4374_v0  ;;  %v4392_v3 = vpack.c.bf16 %v2082_v31, %v2078_v56  ;;  %v4276_v20 = vpack.c.bf16 %v741_v62, %v733_v15  ;;  %v2111_v23 = vld [vmem:[#allocation9 + $0x288] sm:$0xff]  ;;  %v2134_v15 = vld [vmem:[#allocation9 + $0x340] sm:$0xff] }
 0x1fc   :  { %4249 = vmatpush1.bf16.msra.mxu1 %v4248_v33  ;;  %v2091_v33 = vld [vmem:[#allocation9 + $0x1e8] sm:$0xff]  ;;  %v2138_v62 = vld [vmem:[#allocation9 + $0x360] sm:$0xff] }
 0x1fd   :  { %4251 = vmatprep.subr.bf16.mxu1 %v4250_v8  ;;  %v4266_v8 = vpack.c.bf16 %v710_v28, %v702_v38  ;;  %v4394_v6 = vpack.c.bf16 %v2091_v33, %v2087_v32  ;;  %v749_v21 = vld [vmem:[#allocation6 + $0xd30] sm:$0xff]  ;;  %v2110_v28 = vld [vmem:[#allocation9 + $0x280] sm:$0xff]  ;;  %v782_v33 = vld [vmem:[#allocation6 + $0xe38] sm:$0xff] }
 0x1fe   :  { %4377 = vmatpush1.bf16.msra.mxu0 %v4376_v39  ;;  %v2119_v56 = vld [vmem:[#allocation9 + $0x2c8] sm:$0xff] }
 0x1ff   :  { %4379 = vmatprep.subr.bf16.mxu0 %v4378_v59  ;;  %v2086_v59 = vld [vmem:[#allocation9 + $0x1c0] sm:$0xff]  ;;  %v2123_v31 = vld [vmem:[#allocation9 + $0x2e8] sm:$0xff] }
 0x200   :  { %4253 = vmatpush1.bf16.msra.mxu1 %v4252_v50  ;;  %v4268_v50 = vpack.c.bf16 %v709_v34, %v701_v58  ;;  %v2118_v58 = vld [vmem:[#allocation9 + $0x2c0] sm:$0xff]  ;;  %v2143_v17 = vld [vmem:[#allocation9 + $0x388] sm:$0xff] }
 0x201   :  { %4255 = vmatprep.subr.bf16.mxu1 %v4254_v61  ;;  %v4270_v61 = vpack.c.bf16 %v726_v44, %v718_v43  ;;  %v2122_v34 = vld [vmem:[#allocation9 + $0x2e0] sm:$0xff]  ;;  %v2127_v43 = vld [vmem:[#allocation9 + $0x308] sm:$0xff] }
 0x202   :  { %4381 = vmatpush1.bf16.msra.mxu0 %v4380_v1  ;;  %v4396_v1 = vpack.c.bf16 %v2090_v60, %v2086_v59  ;;  %v2131_v44 = vld [vmem:[#allocation9 + $0x328] sm:$0xff] }
 0x203   :  { %4383 = vmatprep.subr.bf16.mxu0 %v4382_v5  ;;  %v4398_v5 = vpack.c.bf16 %v2099_v52, %v2095_v51  ;;  %v781_v59 = vld [vmem:[#allocation6 + $0xe30] sm:$0xff]  ;;  %v798_v51 = vld [vmem:[#allocation6 + $0xeb8] sm:$0xff] }
 0x204   :  { %4257 = vmatpush1.bf16.msra.mxu1 %v4256_v9  ;;  %v4272_v9 = vpack.c.bf16 %v725_v40, %v717_v63  ;;  %v789_v60 = vld [vmem:[#allocation6 + $0xe70] sm:$0xff]  ;;  %v806_v52 = vld [vmem:[#allocation6 + $0xef8] sm:$0xff]  ;;  %v2126_v63 = vld [vmem:[#allocation9 + $0x300] sm:$0xff] }
 0x205   :  { %4259 = vmatprep.subr.bf16.mxu1 %v4258_v14  ;;  %v4274_v14 = vpack.c.bf16 %v742_v10, %v734_v2  ;;  %v2130_v40 = vld [vmem:[#allocation9 + $0x320] sm:$0xff]  ;;  %v2135_v2 = vld [vmem:[#allocation9 + $0x348] sm:$0xff] }
 0x206   :  { %4385 = vmatpush1.bf16.msra.mxu0 %v4384_v16  ;;  %v4400_v16 = vpack.c.bf16 %v2098_v46, %v2094_v42  ;;  %v2139_v10 = vld [vmem:[#allocation9 + $0x368] sm:$0xff] }
 0x207   :  { %4387 = vmatprep.subr.bf16.mxu0 %v4386_v19  ;;  %v2102_v19 = vld [vmem:[#allocation9 + $0x240] sm:$0xff]  ;;  %v797_v42 = vld [vmem:[#allocation6 + $0xeb0] sm:$0xff] }
 0x208   :  { %v1378_v0 = vpop.f32.mrb[0].mxu0  ;;  %4261 = vmatpush1.bf16.msra.mxu1 %v4260_v24  ;;  %v2115_v24 = vld [vmem:[#allocation9 + $0x2a8] sm:$0xff]  ;;  %v4404_v25 = vpack.c.bf16 %v2106_v53, %v2102_v19 }
 0x209   :  { %v5728_v36 = vadd.f32 %v1378_v0, %v1237_v29  ;;  %v1380_v37 = vpop.f32.mrb[1].mxu0  ;;  %4263 = vmatprep.subr.bf16.mxu1 %v4262_v27  ;;  %v757_v27 = vld [vmem:[#allocation6 + $0xd70] sm:$0xff]  ;;  %v4406_v38 = vpack.c.bf16 %v2115_v24, %v2111_v23  ;;  %v2114_v29 = vld [vmem:[#allocation9 + $0x2a0] sm:$0xff]  ;;  %v830_v23 = vld [vmem:[#allocation6 + $0xfb8] sm:$0xff] }
 0x20a   :  { %v5730_v39 = vadd.f32 %v1380_v37, %v1239_v35  ;;  %4389 = vmatpush1.bf16.msra.mxu0 %v4388_v55  ;;  %v774_v55 = vld [vmem:[#allocation6 + $0xdf8] sm:$0xff]  ;;  %v765_v0 = vld [vmem:[#allocation6 + $0xdb0] sm:$0xff]  ;;  %v4408_v32 = vpack.c.bf16 %v2114_v29, %v2110_v28 }
 0x20b   :  { %4391 = vmatprep.subr.bf16.mxu0 %v4390_v30  ;;  %v4280_v30 = vpack.c.bf16 %v757_v27, %v749_v21  ;;  %v4282_v35 = vpack.c.bf16 %v774_v55, %v766_v26  ;;  %v790_v37 = vld [vmem:[#allocation6 + $0xe78] sm:$0xff]  ;;  %v805_v46 = vld [vmem:[#allocation6 + $0xef0] sm:$0xff]  ;;  %v2142_v21 = vld [vmem:[#allocation9 + $0x380] sm:$0xff] }
 0x20c   :  { %v2023_v45 = vmax.f32 %v5730_v39, 0.0  ;;  %4265 = vmatpush1.bf16.msra.mxu1 %v4264_v57  ;;  %v773_v57 = vld [vmem:[#allocation6 + $0xdf0] sm:$0xff]  ;;  %v838_v24 = vld [vmem:[#allocation6 + $0xff8] sm:$0xff]  ;;  %v2146_v27 = vld [vmem:[#allocation9 + $0x3a0] sm:$0xff] }
 0x20d   :  { %4267 = vmatprep.subr.bf16.mxu1 %v4266_v8  ;;  %v4410_v8 = vpack.c.bf16 %v2123_v31, %v2119_v56  ;;  %v2147_v18 = vld [vmem:[#allocation9 + $0x3a8] sm:$0xff]  ;;  %v846_v56 = vld [vmem:[#allocation6 + $0x1038] sm:$0xff] }
 0x20e   :  { %4393 = vmatpush1.bf16.msra.mxu0 %v4392_v3  ;;  %2628 = vmatprep.mubr.f32.mxu0 %v2023_v45  ;;  %v4284_v3 = vpack.c.bf16 %v773_v57, %v765_v0  ;;  %v813_v19 = vld [vmem:[#allocation6 + $0xf30] sm:$0xff]  ;;  %v854_v31 = vld [vmem:[#allocation6 + $0x1078] sm:$0xff]  ;;  %v2150_v0 = vld [vmem:[#allocation9 + $0x3c0] sm:$0xff] }
 0x20f   :  { %4395 = vmatprep.subr.bf16.mxu0 %v4394_v6  ;;  %v4286_v6 = vpack.c.bf16 %v790_v37, %v782_v33  ;;  %v821_v53 = vld [vmem:[#allocation6 + $0xf70] sm:$0xff]  ;;  %v2154_v57 = vld [vmem:[#allocation9 + $0x3e0] sm:$0xff] }
 0x210   :  { %4269 = vmatpush1.bf16.msra.mxu1 %v4268_v50  ;;  %v4412_v50 = vpack.c.bf16 %v2122_v34, %v2118_v58  ;;  %v2151_v26 = vld [vmem:[#allocation9 + $0x3c8] sm:$0xff] }
 0x211   :  { %4271 = vmatprep.subr.bf16.mxu1 %v4270_v61  ;;  %v4414_v61 = vpack.c.bf16 %v2131_v44, %v2127_v43  ;;  %v2155_v55 = vld [vmem:[#allocation9 + $0x3e8] sm:$0xff]  ;;  %v862_v43 = vld [vmem:[#allocation6 + $0x10b8] sm:$0xff] }
 0x212   :  { %4397 = vmatpush1.bf16.msra.mxu0 %v4396_v1  ;;  %v4288_v1 = vpack.c.bf16 %v789_v60, %v781_v59  ;;  %v829_v28 = vld [vmem:[#allocation6 + $0xfb0] sm:$0xff]  ;;  %v870_v44 = vld [vmem:[#allocation6 + $0x10f8] sm:$0xff]  ;;  %v2158_v59 = vld [vmem:[#allocation9 + $0x400] sm:$0xff] }
 0x213   :  { %4399 = vmatprep.subr.bf16.mxu0 %v4398_v5  ;;  %v4290_v5 = vpack.c.bf16 %v806_v52, %v798_v51  ;;  %v837_v29 = vld [vmem:[#allocation6 + $0xff0] sm:$0xff]  ;;  %v2162_v60 = vld [vmem:[#allocation9 + $0x420] sm:$0xff] }
 0x214   :  { %4273 = vmatpush1.bf16.msra.mxu1 %v4272_v9  ;;  %v4416_v9 = vpack.c.bf16 %v2130_v40, %v2126_v63  ;;  %v2159_v33 = vld [vmem:[#allocation9 + $0x408] sm:$0xff] }
 0x215   :  { %4275 = vmatprep.subr.bf16.mxu1 %v4274_v14  ;;  %v4418_v14 = vpack.c.bf16 %v2139_v10, %v2135_v2  ;;  %v2163_v37 = vld [vmem:[#allocation9 + $0x428] sm:$0xff]  ;;  %v886_v2 = vld [vmem:[#allocation6 + $0x1178] sm:$0xff]  ;;  %v4432_v10 = vpack.c.bf16 %v2162_v60, %v2158_v59 }
 0x216   :  { %4401 = vmatpush1.bf16.msra.mxu0 %v4400_v16  ;;  %v4292_v16 = vpack.c.bf16 %v805_v46, %v797_v42  ;;  %v845_v58 = vld [vmem:[#allocation6 + $0x1030] sm:$0xff]  ;;  %v2166_v46 = vld [vmem:[#allocation9 + $0x440] sm:$0xff]  ;;  %v942_v60 = vld [vmem:[#allocation6 + $0x1338] sm:$0xff] }
 0x217   :  { %4403 = vmatprep.subr.bf16.mxu0 %v4402_v41  ;;  %v4294_v41 = vpack.c.bf16 %v822_v13, %v814_v48  ;;  %v853_v34 = vld [vmem:[#allocation6 + $0x1070] sm:$0xff] }
 0x218   :  { %4277 = vmatpush1.bf16.msra.mxu1 %v4276_v20  ;;  %v4420_v20 = vpack.c.bf16 %v2138_v62, %v2134_v15  ;;  %v2167_v51 = vld [vmem:[#allocation9 + $0x448] sm:$0xff] }
 0x219   :  { %4279 = vmatprep.subr.bf16.mxu1 %v4278_v54  ;;  %v4422_v54 = vpack.c.bf16 %v2147_v18, %v2143_v17  ;;  %v2171_v52 = vld [vmem:[#allocation9 + $0x468] sm:$0xff]  ;;  %v894_v17 = vld [vmem:[#allocation6 + $0x11b8] sm:$0xff] }
 0x21a   :  { %4405 = vmatpush1.bf16.msra.mxu0 %v4404_v25  ;;  %v4296_v25 = vpack.c.bf16 %v821_v53, %v813_v19  ;;  %v861_v63 = vld [vmem:[#allocation6 + $0x10b0] sm:$0xff]  ;;  %v4434_v42 = vpack.c.bf16 %v2171_v52, %v2167_v51  ;;  %v902_v18 = vld [vmem:[#allocation6 + $0x11f8] sm:$0xff]  ;;  %v2174_v19 = vld [vmem:[#allocation9 + $0x480] sm:$0xff] }
 0x21b   :  { %4407 = vmatprep.subr.bf16.mxu0 %v4406_v38  ;;  %v4298_v38 = vpack.c.bf16 %v838_v24, %v830_v23  ;;  %v869_v40 = vld [vmem:[#allocation6 + $0x10f0] sm:$0xff]  ;;  %v2178_v53 = vld [vmem:[#allocation9 + $0x4a0] sm:$0xff] }
 0x21c   :  { %4281 = vmatpush1.bf16.msra.mxu1 %v4280_v30  ;;  %v4424_v30 = vpack.c.bf16 %v2146_v27, %v2142_v21  ;;  %v4308_v48 = vpack.c.bf16 %v869_v40, %v861_v63  ;;  %v2175_v13 = vld [vmem:[#allocation9 + $0x488] sm:$0xff]  ;;  %v910_v27 = vld [vmem:[#allocation6 + $0x1238] sm:$0xff]  ;;  %v2202_v63 = vld [vmem:[#allocation9 + $0x560] sm:$0xff] }
 0x21d   :  { %4283 = vmatprep.subr.bf16.mxu1 %v4282_v35  ;;  %v4426_v35 = vpack.c.bf16 %v2155_v55, %v2151_v26  ;;  %v877_v62 = vld [vmem:[#allocation6 + $0x1130] sm:$0xff]  ;;  %v4440_v26 = vpack.c.bf16 %v2178_v53, %v2174_v19  ;;  %v974_v53 = vld [vmem:[#allocation6 + $0x1438] sm:$0xff] }
 0x21e   :  { %4409 = vmatpush1.bf16.msra.mxu0 %v4408_v32  ;;  %v4300_v32 = vpack.c.bf16 %v837_v29, %v829_v28  ;;  %v2183_v23 = vld [vmem:[#allocation9 + $0x4c8] sm:$0xff]  ;;  %v2186_v28 = vld [vmem:[#allocation9 + $0x4e0] sm:$0xff] }
 0x21f   :  { %4411 = vmatprep.subr.bf16.mxu0 %v4410_v8  ;;  %v4302_v8 = vpack.c.bf16 %v854_v31, %v846_v56  ;;  %v2187_v24 = vld [vmem:[#allocation9 + $0x4e8] sm:$0xff] }
 0x220   :  { %4285 = vmatpush1.bf16.msra.mxu1 %v4284_v3  ;;  %v4428_v3 = vpack.c.bf16 %v2154_v57, %v2150_v0  ;;  %v901_v21 = vld [vmem:[#allocation6 + $0x11f0] sm:$0xff]  ;;  %v4442_v55 = vpack.c.bf16 %v2187_v24, %v2183_v23  ;;  %v926_v57 = vld [vmem:[#allocation6 + $0x12b8] sm:$0xff] }
 0x221   :  { %4287 = vmatprep.subr.bf16.mxu1 %v4286_v6  ;;  %v4430_v6 = vpack.c.bf16 %v2163_v37, %v2159_v33  ;;  %v2195_v56 = vld [vmem:[#allocation9 + $0x528] sm:$0xff] }
 0x222   :  { %4413 = vmatpush1.bf16.msra.mxu0 %v4412_v50  ;;  %v4304_v50 = vpack.c.bf16 %v853_v34, %v845_v58  ;;  %v917_v0 = vld [vmem:[#allocation6 + $0x1270] sm:$0xff]  ;;  %v2194_v58 = vld [vmem:[#allocation9 + $0x520] sm:$0xff] }
 0x223   :  { %4415 = vmatprep.subr.bf16.mxu0 %v4414_v61  ;;  %v4306_v61 = vpack.c.bf16 %v870_v44, %v862_v43  ;;  %v2203_v43 = vld [vmem:[#allocation9 + $0x568] sm:$0xff] }
 0x224   :  { %4289 = vmatpush1.bf16.msra.mxu1 %v4288_v1  ;;  %v878_v1 = vld [vmem:[#allocation6 + $0x1138] sm:$0xff]  ;;  %v933_v59 = vld [vmem:[#allocation6 + $0x12f0] sm:$0xff] }
 0x225   :  { %4291 = vmatprep.subr.bf16.mxu1 %v4290_v5  ;;  %v2022_v5 = vmax.f32 %v5728_v36, 0.0  ;;  %v4310_v15 = vpack.c.bf16 %v886_v2, %v878_v1  ;;  %v2207_v1 = vld [vmem:[#allocation9 + $0x588] sm:$0xff]  ;;  %v2189_v36 = vld [vmem:[#allocation9 + $0x4f8] sm:$0xff] }
 0x226   :  { %4417 = vmatpush1.bf16.msra.mxu0 %v4416_v9  ;;  %v2170_v9 = vld [vmem:[#allocation9 + $0x460] sm:$0xff]  ;;  %v2211_v2 = vld [vmem:[#allocation9 + $0x5a8] sm:$0xff] }
 0x227   :  { %4419 = vmatprep.subr.bf16.mxu0 %v4418_v14  ;;  %v2179_v14 = vld [vmem:[#allocation9 + $0x4a8] sm:$0xff] }
 0x228   :  { %4293 = vmatpush1.bf16.msra.mxu1 %v4292_v16  ;;  %v885_v16 = vld [vmem:[#allocation6 + $0x1170] sm:$0xff] }
 0x229   :  { %4295 = vmatprep.subr.bf16.mxu1 %v4294_v41  ;;  %v4438_v41 = vpack.c.bf16 %v2179_v14, %v2175_v13  ;;  %v4454_v14 = vpack.c.bf16 %v2211_v2, %v2207_v1  ;;  %v965_v19 = vld [vmem:[#allocation6 + $0x13f0] sm:$0xff] }
 0x22a   :  { %4421 = vmatpush1.bf16.msra.mxu0 %v4420_v20  ;;  %v4312_v20 = vpack.c.bf16 %v885_v16, %v877_v62  ;;  %v2210_v62 = vld [vmem:[#allocation9 + $0x5a0] sm:$0xff] }
 0x22b   :  { %4423 = vmatprep.subr.bf16.mxu0 %v4422_v54  ;;  %v893_v54 = vld [vmem:[#allocation6 + $0x11b0] sm:$0xff] }
 0x22c   :  { %4297 = vmatpush1.bf16.msra.mxu1 %v4296_v25  ;;  %v918_v25 = vld [vmem:[#allocation6 + $0x1278] sm:$0xff]  ;;  %v4316_v29 = vpack.c.bf16 %v901_v21, %v893_v54  ;;  %v2218_v54 = vld [vmem:[#allocation9 + $0x5e0] sm:$0xff] }
 0x22d   :  { %4299 = vmatprep.subr.bf16.mxu1 %v4298_v38  ;;  %v2182_v38 = vld [vmem:[#allocation9 + $0x4c0] sm:$0xff]  ;;  %v4318_v31 = vpack.c.bf16 %v918_v25, %v910_v27  ;;  %v2223_v27 = vld [vmem:[#allocation9 + $0x608] sm:$0xff] }
 0x22e   :  { %4425 = vmatpush1.bf16.msra.mxu0 %v4424_v30  ;;  %v2191_v30 = vld [vmem:[#allocation9 + $0x508] sm:$0xff]  ;;  %v4444_v33 = vpack.c.bf16 %v2186_v28, %v2182_v38  ;;  %v990_v28 = vld [vmem:[#allocation6 + $0x14b8] sm:$0xff] }
 0x22f   :  { %4427 = vmatprep.subr.bf16.mxu0 %v4426_v35  ;;  %v909_v35 = vld [vmem:[#allocation6 + $0x1230] sm:$0xff]  ;;  %v4446_v37 = vpack.c.bf16 %v2195_v56, %v2191_v30 }
 0x230   :  { %4301 = vmatpush1.bf16.msra.mxu1 %v4300_v32  ;;  %v934_v32 = vld [vmem:[#allocation6 + $0x12f8] sm:$0xff]  ;;  %v4320_v34 = vpack.c.bf16 %v917_v0, %v909_v35  ;;  %v2227_v25 = vld [vmem:[#allocation9 + $0x628] sm:$0xff]  ;;  %v2226_v35 = vld [vmem:[#allocation9 + $0x620] sm:$0xff] }
 0x231   :  { %4303 = vmatprep.subr.bf16.mxu1 %v4302_v8  ;;  %v2190_v8 = vld [vmem:[#allocation9 + $0x500] sm:$0xff]  ;;  %v4322_v44 = vpack.c.bf16 %v934_v32, %v926_v57  ;;  %v981_v38 = vld [vmem:[#allocation6 + $0x1470] sm:$0xff]  ;;  %v4462_v56 = vpack.c.bf16 %v2227_v25, %v2223_v27 }
 0x232   :  { %4429 = vmatpush1.bf16.msra.mxu0 %v4428_v3  ;;  %v2199_v3 = vld [vmem:[#allocation9 + $0x548] sm:$0xff]  ;;  %v4448_v51 = vpack.c.bf16 %v2194_v58, %v2190_v8  ;;  %v1006_v58 = vld [vmem:[#allocation6 + $0x1538] sm:$0xff] }
 0x233   :  { %1945 = vmatmul.mubr.f32.vlgmr.msra.gmra.mrb[4].mxu1 %v5670_v4  ;;  %4431 = vmatprep.subr.bf16.mxu0 %v4430_v6  ;;  %v4436_v4 = vpack.c.bf16 %v2170_v9, %v2166_v46  ;;  %v925_v6 = vld [vmem:[#allocation6 + $0x12b0] sm:$0xff]  ;;  %v4450_v52 = vpack.c.bf16 %v2203_v43, %v2199_v3  ;;  %v958_v9 = vld [vmem:[#allocation6 + $0x13b8] sm:$0xff] }
 0x234   :  { %4305 = vmatpush1.bf16.msra.mxu1 %v4304_v50  ;;  %2015 = vmatprep.mubr.f32.mxu1 %v5692_v22  ;;  %v4314_v22 = vpack.c.bf16 %v902_v18, %v894_v17  ;;  %v950_v50 = vld [vmem:[#allocation6 + $0x1378] sm:$0xff]  ;;  %v4324_v40 = vpack.c.bf16 %v933_v59, %v925_v6  ;;  %v949_v46 = vld [vmem:[#allocation6 + $0x1370] sm:$0xff]  ;;  %v2234_v6 = vld [vmem:[#allocation9 + $0x660] sm:$0xff] }
 0x235   :  { %2629 = vmatmul.mubr.f32.vlgmr.msra.gmra.mrb[4].mxu0 %v2022_v5  ;;  %4307 = vmatprep.subr.bf16.mxu1 %v4306_v61  ;;  %v2198_v61 = vld [vmem:[#allocation9 + $0x540] sm:$0xff]  ;;  %v2215_v17 = vld [vmem:[#allocation9 + $0x5c8] sm:$0xff] }
 0x236   :  { %4433 = vmatpush1.bf16.msra.mxu0 %v4432_v10  ;;  %v4326_v10 = vpack.c.bf16 %v950_v50, %v942_v60  ;;  %v4452_v13 = vpack.c.bf16 %v2202_v63, %v2198_v61  ;;  %v2219_v18 = vld [vmem:[#allocation9 + $0x5e8] sm:$0xff]  ;;  %v1022_v63 = vld [vmem:[#allocation6 + $0x15b8] sm:$0xff] }
 0x237   :  { %4435 = vmatprep.subr.bf16.mxu0 %v4434_v42  ;;  %v941_v42 = vld [vmem:[#allocation6 + $0x1330] sm:$0xff]  ;;  %v4458_v24 = vpack.c.bf16 %v2219_v18, %v2215_v17 }
 0x238   :  { %4309 = vmatpush1.bf16.msra.mxu1 %v4308_v48  ;;  %v966_v48 = vld [vmem:[#allocation6 + $0x13f8] sm:$0xff]  ;;  %v4328_v16 = vpack.c.bf16 %v949_v46, %v941_v42  ;;  %v2231_v57 = vld [vmem:[#allocation9 + $0x648] sm:$0xff]  ;;  %v2242_v42 = vld [vmem:[#allocation9 + $0x6a0] sm:$0xff] }
 0x239   :  { %4311 = vmatprep.subr.bf16.mxu1 %v4310_v15  ;;  %v2206_v15 = vld [vmem:[#allocation9 + $0x580] sm:$0xff]  ;;  %v2235_v32 = vld [vmem:[#allocation9 + $0x668] sm:$0xff] }
 0x23a   :  { %4437 = vmatpush1.bf16.msra.mxu0 %v4436_v4  ;;  %v4330_v4 = vpack.c.bf16 %v966_v48, %v958_v9  ;;  %v4456_v23 = vpack.c.bf16 %v2210_v62, %v2206_v15  ;;  %v997_v8 = vld [vmem:[#allocation6 + $0x14f0] sm:$0xff]  ;;  %v4466_v43 = vpack.c.bf16 %v2235_v32, %v2231_v57  ;;  %v1038_v62 = vld [vmem:[#allocation6 + $0x1638] sm:$0xff] }
 0x23b   :  { %4439 = vmatprep.subr.bf16.mxu0 %v4438_v41  ;;  %v957_v41 = vld [vmem:[#allocation6 + $0x13b0] sm:$0xff] }
 0x23c   :  { %4313 = vmatpush1.bf16.msra.mxu1 %v4312_v20  ;;  %v982_v20 = vld [vmem:[#allocation6 + $0x1478] sm:$0xff]  ;;  %v4332_v21 = vpack.c.bf16 %v965_v19, %v957_v41  ;;  %v2239_v60 = vld [vmem:[#allocation9 + $0x688] sm:$0xff]  ;;  %v2250_v41 = vld [vmem:[#allocation9 + $0x6e0] sm:$0xff] }
 0x23d   :  { %4315 = vmatprep.subr.bf16.mxu1 %v4314_v22  ;;  %v2214_v22 = vld [vmem:[#allocation9 + $0x5c0] sm:$0xff]  ;;  %v2243_v50 = vld [vmem:[#allocation9 + $0x6a8] sm:$0xff] }
 0x23e   :  { %4441 = vmatpush1.bf16.msra.mxu0 %v4440_v26  ;;  %v4334_v26 = vpack.c.bf16 %v982_v20, %v974_v53  ;;  %v4460_v30 = vpack.c.bf16 %v2218_v54, %v2214_v22  ;;  %v1013_v61 = vld [vmem:[#allocation6 + $0x1570] sm:$0xff]  ;;  %v4470_v2 = vpack.c.bf16 %v2243_v50, %v2239_v60  ;;  %v1054_v54 = vld [vmem:[#allocation6 + $0x16b8] sm:$0xff] }
 0x23f   :  { %4443 = vmatprep.subr.bf16.mxu0 %v4442_v55  ;;  %v973_v55 = vld [vmem:[#allocation6 + $0x1430] sm:$0xff] }
 0x240   :  { %4317 = vmatpush1.bf16.msra.mxu1 %v4316_v29  ;;  %v998_v29 = vld [vmem:[#allocation6 + $0x14f8] sm:$0xff]  ;;  %v4336_v0 = vpack.c.bf16 %v981_v38, %v973_v55  ;;  %v2247_v9 = vld [vmem:[#allocation9 + $0x6c8] sm:$0xff]  ;;  %v2258_v55 = vld [vmem:[#allocation9 + $0x720] sm:$0xff] }
 0x241   :  { %4319 = vmatprep.subr.bf16.mxu1 %v4318_v31  ;;  %v2222_v31 = vld [vmem:[#allocation9 + $0x600] sm:$0xff]  ;;  %v2251_v48 = vld [vmem:[#allocation9 + $0x6e8] sm:$0xff] }
 0x242   :  { %4445 = vmatpush1.bf16.msra.mxu0 %v4444_v33  ;;  %v4338_v33 = vpack.c.bf16 %v998_v29, %v990_v28  ;;  %v4464_v3 = vpack.c.bf16 %v2226_v35, %v2222_v31  ;;  %v1029_v15 = vld [vmem:[#allocation6 + $0x15f0] sm:$0xff]  ;;  %v4474_v18 = vpack.c.bf16 %v2251_v48, %v2247_v9  ;;  %v1070_v35 = vld [vmem:[#allocation6 + $0x1738] sm:$0xff] }
 0x243   :  { %4447 = vmatprep.subr.bf16.mxu0 %v4446_v37  ;;  %v989_v37 = vld [vmem:[#allocation6 + $0x14b0] sm:$0xff] }
 0x244   :  { %4321 = vmatpush1.bf16.msra.mxu1 %v4320_v34  ;;  %v1014_v34 = vld [vmem:[#allocation6 + $0x1578] sm:$0xff]  ;;  %v4340_v59 = vpack.c.bf16 %v997_v8, %v989_v37  ;;  %v2255_v53 = vld [vmem:[#allocation9 + $0x708] sm:$0xff]  ;;  %v2266_v37 = vld [vmem:[#allocation9 + $0x760] sm:$0xff] }
 0x245   :  { %4323 = vmatprep.subr.bf16.mxu1 %v4322_v44  ;;  %v2230_v44 = vld [vmem:[#allocation9 + $0x640] sm:$0xff]  ;;  %v2259_v20 = vld [vmem:[#allocation9 + $0x728] sm:$0xff] }
 0x246   :  { %4449 = vmatpush1.bf16.msra.mxu0 %v4448_v51  ;;  %v4342_v51 = vpack.c.bf16 %v1014_v34, %v1006_v58  ;;  %v4468_v1 = vpack.c.bf16 %v2234_v6, %v2230_v44  ;;  %v1045_v22 = vld [vmem:[#allocation6 + $0x1670] sm:$0xff]  ;;  %v4478_v25 = vpack.c.bf16 %v2259_v20, %v2255_v53  ;;  %v1086_v6 = vld [vmem:[#allocation6 + $0x17b8] sm:$0xff] }
 0x247   :  { %4451 = vmatprep.subr.bf16.mxu0 %v4450_v52  ;;  %v1005_v52 = vld [vmem:[#allocation6 + $0x1530] sm:$0xff] }
 0x248   :  { %4325 = vmatpush1.bf16.msra.mxu1 %v4324_v40  ;;  %v1030_v40 = vld [vmem:[#allocation6 + $0x15f8] sm:$0xff]  ;;  %v4344_v46 = vpack.c.bf16 %v1013_v61, %v1005_v52  ;;  %v2263_v28 = vld [vmem:[#allocation9 + $0x748] sm:$0xff]  ;;  %v2274_v52 = vld [vmem:[#allocation9 + $0x7a0] sm:$0xff] }
 0x249   :  { %4327 = vmatprep.subr.bf16.mxu1 %v4326_v10  ;;  %v2238_v10 = vld [vmem:[#allocation9 + $0x680] sm:$0xff]  ;;  %v2267_v29 = vld [vmem:[#allocation9 + $0x768] sm:$0xff] }
 0x24a   :  { %4453 = vmatpush1.bf16.msra.mxu0 %v4452_v13  ;;  %v4346_v13 = vpack.c.bf16 %v1030_v40, %v1022_v63  ;;  %v4472_v17 = vpack.c.bf16 %v2242_v42, %v2238_v10  ;;  %v1061_v31 = vld [vmem:[#allocation6 + $0x16f0] sm:$0xff]  ;;  %v4482_v32 = vpack.c.bf16 %v2267_v29, %v2263_v28  ;;  %v2033_v42 = vld [vmem:[#allocation9 + $0x18] sm:$0xff] }
 0x24b   :  { %4455 = vmatprep.subr.bf16.mxu0 %v4454_v14  ;;  %v1021_v14 = vld [vmem:[#allocation6 + $0x15b0] sm:$0xff]  ;;  %v2057_v28 = vld [vmem:[#allocation9 + $0xd8] sm:$0xff] }
 0x24c   :  { %4329 = vmatpush1.bf16.msra.mxu1 %v4328_v16  ;;  %v1046_v16 = vld [vmem:[#allocation6 + $0x1678] sm:$0xff]  ;;  %v4348_v19 = vpack.c.bf16 %v1029_v15, %v1021_v14  ;;  %v2271_v58 = vld [vmem:[#allocation9 + $0x788] sm:$0xff]  ;;  %v2282_v14 = vld [vmem:[#allocation9 + $0x7e0] sm:$0xff] }
 0x24d   :  { %4331 = vmatprep.subr.bf16.mxu1 %v4330_v4  ;;  %v2246_v4 = vld [vmem:[#allocation9 + $0x6c0] sm:$0xff]  ;;  %v2275_v34 = vld [vmem:[#allocation9 + $0x7a8] sm:$0xff]  ;;  %v2061_v29 = vld [vmem:[#allocation9 + $0xf8] sm:$0xff] }
 0x24e   :  { %4457 = vmatpush1.bf16.msra.mxu0 %v4456_v23  ;;  %v4350_v23 = vpack.c.bf16 %v1046_v16, %v1038_v62  ;;  %v4476_v27 = vpack.c.bf16 %v2250_v41, %v2246_v4  ;;  %v1077_v44 = vld [vmem:[#allocation6 + $0x1770] sm:$0xff]  ;;  %v4486_v50 = vpack.c.bf16 %v2275_v34, %v2271_v58  ;;  %v2036_v4 = vld [vmem:[#allocation9 + $0x30] sm:$0xff]  ;;  %v2041_v41 = vld [vmem:[#allocation9 + $0x58] sm:$0xff]  ;;  %v1111_v34 = vsub.s32 3, %v5524_v11 }
 0x24f   :  { %4459 = vmatprep.subr.bf16.mxu0 %v4458_v24  ;;  %v1037_v24 = vld [vmem:[#allocation6 + $0x1630] sm:$0xff] }
 0x250   :  { %4333 = vmatpush1.bf16.msra.mxu1 %v4332_v21  ;;  %v1062_v21 = vld [vmem:[#allocation6 + $0x16f8] sm:$0xff]  ;;  %v4352_v38 = vpack.c.bf16 %v1045_v22, %v1037_v24  ;;  %v2279_v63 = vld [vmem:[#allocation9 + $0x7c8] sm:$0xff] }
 0x251   :  { %4335 = vmatprep.subr.bf16.mxu1 %v4334_v26  ;;  %v2254_v26 = vld [vmem:[#allocation9 + $0x700] sm:$0xff]  ;;  %v2283_v40 = vld [vmem:[#allocation9 + $0x7e8] sm:$0xff]  ;;  %v2040_v22 = vld [vmem:[#allocation9 + $0x50] sm:$0xff] }
 0x252   :  { %4461 = vmatpush1.bf16.msra.mxu0 %v4460_v30  ;;  %v4354_v30 = vpack.c.bf16 %v1062_v21, %v1054_v54  ;;  %v4480_v57 = vpack.c.bf16 %v2258_v55, %v2254_v26  ;;  %v1093_v10 = vld [vmem:[#allocation6 + $0x17f0] sm:$0xff]  ;;  %v4490_v48 = vpack.c.bf16 %v2283_v40, %v2279_v63  ;;  %v2044_v54 = vld [vmem:[#allocation9 + $0x70] sm:$0xff]  ;;  %v2049_v21 = vld [vmem:[#allocation9 + $0x98] sm:$0xff] }
 0x253   :  { %4463 = vmatprep.subr.bf16.mxu0 %v4462_v56  ;;  %v1053_v56 = vld [vmem:[#allocation6 + $0x16b0] sm:$0xff]  ;;  %v2048_v55 = vld [vmem:[#allocation9 + $0x90] sm:$0xff] }
 0x254   :  { %4337 = vmatpush1.bf16.msra.mxu1 %v4336_v0  ;;  %v1078_v0 = vld [vmem:[#allocation6 + $0x1778] sm:$0xff]  ;;  %v4356_v8 = vpack.c.bf16 %v1061_v31, %v1053_v56  ;;  %v2287_v62 = vld [vmem:[#allocation9 + $0x808] sm:$0xff]  ;;  %v4634_v56 = vpack.c.bf16 %v2061_v29, %v2057_v28  ;;  %v2302_v29 = vld [vmem:[#allocation9 + $0x880] sm:$0xff] }
 0x255   :  { %4339 = vmatprep.subr.bf16.mxu1 %v4338_v33  ;;  %v2262_v33 = vld [vmem:[#allocation9 + $0x740] sm:$0xff]  ;;  %v2291_v16 = vld [vmem:[#allocation9 + $0x828] sm:$0xff]  ;;  %v2056_v31 = vld [vmem:[#allocation9 + $0xd0] sm:$0xff] }
 0x256   :  { %4465 = vmatpush1.bf16.msra.mxu0 %v4464_v3  ;;  %v4358_v3 = vpack.c.bf16 %v1078_v0, %v1070_v35  ;;  %v4484_v60 = vpack.c.bf16 %v2266_v37, %v2262_v33  ;;  %v4494_v20 = vpack.c.bf16 %v2291_v16, %v2287_v62  ;;  %v2060_v35 = vld [vmem:[#allocation9 + $0xf0] sm:$0xff]  ;;  %v2065_v0 = vld [vmem:[#allocation9 + $0x118] sm:$0xff] }
 0x257   :  { %4467 = vmatprep.subr.bf16.mxu0 %v4466_v43  ;;  %v1069_v43 = vld [vmem:[#allocation6 + $0x1730] sm:$0xff]  ;;  %v2073_v33 = vld [vmem:[#allocation9 + $0x158] sm:$0xff]  ;;  %v2084_v63 = vld [vmem:[#allocation9 + $0x1b0] sm:$0xff] }
 0x258   :  { %4341 = vmatpush1.bf16.msra.mxu1 %v4340_v59  ;;  %v1094_v59 = vld [vmem:[#allocation6 + $0x17f8] sm:$0xff]  ;;  %v4360_v61 = vpack.c.bf16 %v1077_v44, %v1069_v43  ;;  %v2077_v37 = vld [vmem:[#allocation9 + $0x178] sm:$0xff] }
 0x259   :  { %4343 = vmatprep.subr.bf16.mxu1 %v4342_v51  ;;  %v2270_v51 = vld [vmem:[#allocation9 + $0x780] sm:$0xff]  ;;  %v2072_v43 = vld [vmem:[#allocation9 + $0x150] sm:$0xff] }
 0x25a   :  { %4469 = vmatpush1.bf16.msra.mxu0 %v4468_v1  ;;  %v4362_v1 = vpack.c.bf16 %v1094_v59, %v1086_v6  ;;  %v4488_v9 = vpack.c.bf16 %v2274_v52, %v2270_v51  ;;  %v2076_v44 = vld [vmem:[#allocation9 + $0x170] sm:$0xff]  ;;  %v2081_v6 = vld [vmem:[#allocation9 + $0x198] sm:$0xff] }
 0x25b   :  { %4471 = vmatprep.subr.bf16.mxu0 %v4470_v2  ;;  %v1085_v2 = vld [vmem:[#allocation6 + $0x17b0] sm:$0xff]  ;;  %v2085_v59 = vld [vmem:[#allocation9 + $0x1b8] sm:$0xff]  ;;  %v4644_v51 = vpack.c.bf16 %v2076_v44, %v2072_v43  ;;  %v2088_v62 = vld [vmem:[#allocation9 + $0x1d0] sm:$0xff] }
 0x25c   :  { %4345 = vmatpush1.bf16.msra.mxu1 %v4344_v46  ;;  %v2037_v46 = vld [vmem:[#allocation9 + $0x38] sm:$0xff]  ;;  %v4364_v15 = vpack.c.bf16 %v1093_v10, %v1085_v2  ;;  %v4646_v52 = vpack.c.bf16 %v2085_v59, %v2081_v6  ;;  %v2092_v16 = vld [vmem:[#allocation9 + $0x1f0] sm:$0xff]  ;;  %v2319_v43 = vld [vmem:[#allocation9 + $0x908] sm:$0xff] }
 0x25d   :  { %4347 = vmatprep.subr.bf16.mxu1 %v4346_v13  ;;  %v2278_v13 = vld [vmem:[#allocation9 + $0x7c0] sm:$0xff]  ;;  %v2093_v2 = vld [vmem:[#allocation9 + $0x1f8] sm:$0xff]  ;;  %v2323_v44 = vld [vmem:[#allocation9 + $0x928] sm:$0xff] }
 0x25e   :  { %4473 = vmatpush1.bf16.msra.mxu0 %v4472_v17  ;;  %v4622_v17 = vpack.c.bf16 %v2037_v46, %v2033_v42  ;;  %v4492_v53 = vpack.c.bf16 %v2282_v14, %v2278_v13  ;;  %v2286_v46 = vld [vmem:[#allocation9 + $0x800] sm:$0xff]  ;;  %v2295_v14 = vld [vmem:[#allocation9 + $0x848] sm:$0xff]  ;;  %v2112_v59 = vld [vmem:[#allocation9 + $0x290] sm:$0xff] }
 0x25f   :  { %4475 = vmatprep.subr.bf16.mxu0 %v4474_v18  ;;  %v2032_v18 = vld [vmem:[#allocation9 + $0x10] sm:$0xff] }
 0x260   :  { %4349 = vmatpush1.bf16.msra.mxu1 %v4348_v19  ;;  %v2045_v19 = vld [vmem:[#allocation9 + $0x78] sm:$0xff] }
 0x261   :  { %4351 = vmatprep.subr.bf16.mxu1 %v4350_v23  ;;  %v4624_v23 = vpack.c.bf16 %v2036_v4, %v2032_v18  ;;  %v4626_v24 = vpack.c.bf16 %v2045_v19, %v2041_v41  ;;  %v2097_v4 = vld [vmem:[#allocation9 + $0x218] sm:$0xff] }
 0x262   :  { %4477 = vmatpush1.bf16.msra.mxu0 %v4476_v27  ;;  %v2053_v27 = vld [vmem:[#allocation9 + $0xb8] sm:$0xff] }
 0x263   :  { %4479 = vmatprep.subr.bf16.mxu0 %v4478_v25  ;;  %v4628_v25 = vpack.c.bf16 %v2044_v54, %v2040_v22  ;;  %v4630_v26 = vpack.c.bf16 %v2053_v27, %v2049_v21  ;;  %v2101_v41 = vld [vmem:[#allocation9 + $0x238] sm:$0xff]  ;;  %v2303_v22 = vld [vmem:[#allocation9 + $0x888] sm:$0xff]  ;;  %v2096_v27 = vld [vmem:[#allocation9 + $0x210] sm:$0xff] }
 0x264   :  { %4353 = vmatpush1.bf16.msra.mxu1 %v4352_v38  ;;  %v2052_v38 = vld [vmem:[#allocation9 + $0xb0] sm:$0xff]  ;;  %v2307_v54 = vld [vmem:[#allocation9 + $0x8a8] sm:$0xff]  ;;  %v4654_v21 = vpack.c.bf16 %v2101_v41, %v2097_v4 }
 0x265   :  { %4355 = vmatprep.subr.bf16.mxu1 %v4354_v30  ;;  %v4632_v30 = vpack.c.bf16 %v2052_v38, %v2048_v55  ;;  %v2105_v55 = vld [vmem:[#allocation9 + $0x258] sm:$0xff]  ;;  %v4502_v28 = vpack.c.bf16 %v2307_v54, %v2303_v22  ;;  %v2335_v41 = vld [vmem:[#allocation9 + $0x988] sm:$0xff] }
 0x266   :  { %4481 = vmatpush1.bf16.msra.mxu0 %v4480_v57  ;;  %v4636_v57 = vpack.c.bf16 %v2060_v35, %v2056_v31  ;;  %v2109_v38 = vld [vmem:[#allocation9 + $0x278] sm:$0xff]  ;;  %v2311_v31 = vld [vmem:[#allocation9 + $0x8c8] sm:$0xff] }
 0x267   :  { %4483 = vmatprep.subr.bf16.mxu0 %v4482_v32  ;;  %v2068_v32 = vld [vmem:[#allocation9 + $0x130] sm:$0xff]  ;;  %v2315_v35 = vld [vmem:[#allocation9 + $0x8e8] sm:$0xff]  ;;  %v2137_v54 = vld [vmem:[#allocation9 + $0x358] sm:$0xff] }
 0x268   :  { %4357 = vmatpush1.bf16.msra.mxu1 %v4356_v8  ;;  %v1107_v8 = vsub.s32 2, %v5524_v11 }
 0x269   :  { %4359 = vmatprep.subr.bf16.mxu1 %v4358_v3  ;;  %v4642_v3 = vpack.c.bf16 %v2077_v37, %v2073_v33  ;;  %v4506_v33 = vpack.c.bf16 %v2315_v35, %v2311_v31  ;;  %v2310_v37 = vld [vmem:[#allocation9 + $0x8c0] sm:$0xff]  ;;  %v2145_v35 = vld [vmem:[#allocation9 + $0x398] sm:$0xff] }
 0x26a   :  { %4485 = vmatpush1.bf16.msra.mxu0 %v4484_v60  ;;  %v1108_v60 = vrot.slane %v5717_v47, %v1107_v8 }
 0x26b   :  { %4487 = vmatprep.subr.bf16.mxu0 %v4486_v50  ;;  %v1112_v50 = vrot.slane %v5717_v47, %v1111_v34 }
 0x26c   :  { %4361 = vmatpush1.bf16.msra.mxu1 %v4360_v61  ;;  %v2080_v61 = vld [vmem:[#allocation9 + $0x190] sm:$0xff] }
 0x26d   :  { %4363 = vmatprep.subr.bf16.mxu1 %v4362_v1  ;;  %v2089_v1 = vld [vmem:[#allocation9 + $0x1d8] sm:$0xff]  ;;  %v4648_v13 = vpack.c.bf16 %v2084_v63, %v2080_v61  ;;  %v4510_v61 = vpack.c.bf16 %v2323_v44, %v2319_v43  ;;  %v2318_v63 = vld [vmem:[#allocation9 + $0x900] sm:$0xff] }
 0x26e   :  { %4489 = vmatpush1.bf16.msra.mxu0 %v4488_v9  ;;  %v2290_v9 = vld [vmem:[#allocation9 + $0x820] sm:$0xff]  ;;  %v4650_v47 = vpack.c.bf16 %v2093_v2, %v2089_v1  ;;  %v2327_v2 = vld [vmem:[#allocation9 + $0x948] sm:$0xff]  ;;  %v2153_v44 = vld [vmem:[#allocation9 + $0x3d8] sm:$0xff] }
 0x26f   :  { %4491 = vmatprep.subr.bf16.mxu0 %v4490_v48  ;;  %v4496_v18 = vpack.c.bf16 %v2290_v9, %v2286_v46  ;;  %v2120_v9 = vld [vmem:[#allocation9 + $0x2d0] sm:$0xff] }
 0x270   :  { %4365 = vmatpush1.bf16.msra.mxu1 %v4364_v15  ;;  %v2299_v15 = vld [vmem:[#allocation9 + $0x868] sm:$0xff] }
 0x271   :  { %4623 = vmatprep.subr.bf16.mxu1 %v4622_v17 }
 0x272   :  { %4493 = vmatpush1.bf16.msra.mxu0 %v4492_v53  ;;  %v4498_v53 = vpack.c.bf16 %v2299_v15, %v2295_v14  ;;  %v2129_v15 = vld [vmem:[#allocation9 + $0x318] sm:$0xff] }
 0x273   :  { %2016 = vmatmul.mubr.f32.vlgmr.msra.gmra.mrb[4].mxu1 %v5688_v49  ;;  %4495 = vmatprep.subr.bf16.mxu0 %v4494_v20  ;;  %v2069_v49 = vld [vmem:[#allocation9 + $0x138] sm:$0xff]  ;;  %v2294_v20 = vld [vmem:[#allocation9 + $0x840] sm:$0xff] }
 0x274   :  { %4625 = vmatpush1.bf16.msra.mxu1 %v4624_v23  ;;  %2912 = vmatprep.mubr.f32.mxu1 %v2023_v45  ;;  %v4638_v39 = vpack.c.bf16 %v2069_v49, %v2065_v0  ;;  %v2064_v45 = vld [vmem:[#allocation9 + $0x110] sm:$0xff]  ;;  %v2298_v23 = vld [vmem:[#allocation9 + $0x860] sm:$0xff]  ;;  %v4658_v0 = vpack.c.bf16 %v2109_v38, %v2105_v55  ;;  %v2343_v38 = vld [vmem:[#allocation9 + $0x9c8] sm:$0xff] }
 0x275   :  { %4627 = vmatprep.subr.bf16.mxu1 %v4626_v24  ;;  %v4640_v58 = vpack.c.bf16 %v2068_v32, %v2064_v45  ;;  %v4652_v24 = vpack.c.bf16 %v2092_v16, %v2088_v62  ;;  %v2104_v49 = vld [vmem:[#allocation9 + $0x250] sm:$0xff]  ;;  %v2113_v45 = vld [vmem:[#allocation9 + $0x298] sm:$0xff]  ;;  %v2326_v16 = vld [vmem:[#allocation9 + $0x940] sm:$0xff] }
 0x276   :  { %v2117_v32 = vld [vmem:[#allocation9 + $0x2b8] sm:$0xff] }
 0x277   :  { %v4662_v6 = vpack.c.bf16 %v2117_v32, %v2113_v45  ;;  %v2351_v32 = vld [vmem:[#allocation9 + $0xa08] sm:$0xff] }
 0x278   :  { %4629 = vmatpush1.bf16.msra.mxu1 %v4628_v25  ;;  %v2100_v25 = vld [vmem:[#allocation9 + $0x230] sm:$0xff] }
 0x279   :  { %4631 = vmatprep.subr.bf16.mxu1 %v4630_v26  ;;  %v4500_v26 = vpack.c.bf16 %v2298_v23, %v2294_v20  ;;  %v2128_v23 = vld [vmem:[#allocation9 + $0x310] sm:$0xff] }
 0x27c   :  { %4633 = vmatpush1.bf16.msra.mxu1 %v4632_v30  ;;  %v2306_v30 = vld [vmem:[#allocation9 + $0x8a0] sm:$0xff] }
 0x27d   :  { %4635 = vmatprep.subr.bf16.mxu1 %v4634_v56  ;;  %v4656_v56 = vpack.c.bf16 %v2100_v25, %v2096_v27  ;;  %v2334_v25 = vld [vmem:[#allocation9 + $0x980] sm:$0xff] }
 0x280   :  { %4637 = vmatpush1.bf16.msra.mxu1 %v4636_v57  ;;  %v2108_v57 = vld [vmem:[#allocation9 + $0x270] sm:$0xff] }
 0x281   :  { %4639 = vmatprep.subr.bf16.mxu1 %v4638_v39  ;;  %v4504_v39 = vpack.c.bf16 %v2306_v30, %v2302_v29  ;;  %v2136_v30 = vld [vmem:[#allocation9 + $0x350] sm:$0xff] }
 0x284   :  { %4641 = vmatpush1.bf16.msra.mxu1 %v4640_v58  ;;  %v2314_v58 = vld [vmem:[#allocation9 + $0x8e0] sm:$0xff] }
 0x285   :  { %4643 = vmatprep.subr.bf16.mxu1 %v4642_v3  ;;  %v4660_v3 = vpack.c.bf16 %v2108_v57, %v2104_v49  ;;  %v2342_v57 = vld [vmem:[#allocation9 + $0x9c0] sm:$0xff] }
 0x286   :  { %v1591_v40 = vpop.f32.mrb[2].mxu1 }
 0x287   :  { %v5751_v10 = vadd.f32 %v1591_v40, %v1108_v60  ;;  %v1593_v42 = vpop.f32.mrb[3].mxu1  ;;  %v2116_v60 = vld [vmem:[#allocation9 + $0x2b0] sm:$0xff]  ;;  %v2322_v40 = vld [vmem:[#allocation9 + $0x920] sm:$0xff] }
 0x288   :  { %v5753_v48 = vadd.f32 %v1593_v42, %v1112_v50  ;;  %4645 = vmatpush1.bf16.msra.mxu1 %v4644_v51  ;;  %v4508_v50 = vpack.c.bf16 %v2314_v58, %v2310_v37  ;;  %v2121_v51 = vld [vmem:[#allocation9 + $0x2d8] sm:$0xff]  ;;  %v4664_v1 = vpack.c.bf16 %v2116_v60, %v2112_v59  ;;  %v2331_v42 = vld [vmem:[#allocation9 + $0x968] sm:$0xff]  ;;  %v4512_v14 = vpack.c.bf16 %v2322_v40, %v2318_v63  ;;  %v2144_v58 = vld [vmem:[#allocation9 + $0x390] sm:$0xff] }
 0x289   :  { %4647 = vmatprep.subr.bf16.mxu1 %v4646_v52  ;;  %v2024_v19 = vmax.f32 %v5751_v10, 0.0  ;;  %v2125_v52 = vld [vmem:[#allocation9 + $0x2f8] sm:$0xff]  ;;  %v4514_v62 = vpack.c.bf16 %v2331_v42, %v2327_v2  ;;  %v2350_v60 = vld [vmem:[#allocation9 + $0xa00] sm:$0xff]  ;;  %v2152_v40 = vld [vmem:[#allocation9 + $0x3d0] sm:$0xff] }
 0x28a   :  { %v2025_v17 = vmax.f32 %v5753_v48, 0.0  ;;  %v4666_v46 = vpack.c.bf16 %v2125_v52, %v2121_v51  ;;  %v2359_v52 = vld [vmem:[#allocation9 + $0xa48] sm:$0xff]  ;;  %v2161_v42 = vld [vmem:[#allocation9 + $0x418] sm:$0xff]  ;;  %v2506_v10 = vld [vmem:[#allocation9 + $0xee0] sm:$0xff] }
 0x28b   :  { %v2395_v48 = vld [vmem:[#allocation9 + $0xb68] sm:$0xff] }
 0x28c   :  { %2699 = vmatprep.mubr.f32.mxu0 %v2025_v17  ;;  %4649 = vmatpush1.bf16.msra.mxu1 %v4648_v13  ;;  %v2124_v13 = vld [vmem:[#allocation9 + $0x2f0] sm:$0xff] }
 0x28d   :  { %2700 = vmatmul.mubr.f32.vlgmr.msra.gmra.mrb[4].mxu0 %v2024_v19  ;;  %4651 = vmatprep.subr.bf16.mxu1 %v4650_v47  ;;  %v2133_v47 = vld [vmem:[#allocation9 + $0x338] sm:$0xff]  ;;  %v4668_v4 = vpack.c.bf16 %v2124_v13, %v2120_v9  ;;  %v2358_v13 = vld [vmem:[#allocation9 + $0xa40] sm:$0xff] }
 0x28e   :  { %4497 = vmatpush1.bf16.msra.mxu0 %v4496_v18  ;;  %v2330_v18 = vld [vmem:[#allocation9 + $0x960] sm:$0xff]  ;;  %v4670_v20 = vpack.c.bf16 %v2133_v47, %v2129_v15  ;;  %v2367_v47 = vld [vmem:[#allocation9 + $0xa88] sm:$0xff] }
 0x28f   :  { %4499 = vmatprep.subr.bf16.mxu0 %v4498_v53  ;;  %v2339_v53 = vld [vmem:[#allocation9 + $0x9a8] sm:$0xff]  ;;  %v4516_v22 = vpack.c.bf16 %v2330_v18, %v2326_v16  ;;  %v2160_v18 = vld [vmem:[#allocation9 + $0x410] sm:$0xff] }
 0x290   :  { %4653 = vmatpush1.bf16.msra.mxu1 %v4652_v24  ;;  %v2132_v24 = vld [vmem:[#allocation9 + $0x330] sm:$0xff]  ;;  %v4518_v27 = vpack.c.bf16 %v2339_v53, %v2335_v41  ;;  %v2169_v53 = vld [vmem:[#allocation9 + $0x458] sm:$0xff] }
 0x291   :  { %4655 = vmatprep.subr.bf16.mxu1 %v4654_v21  ;;  %v2141_v21 = vld [vmem:[#allocation9 + $0x378] sm:$0xff]  ;;  %v4672_v55 = vpack.c.bf16 %v2132_v24, %v2128_v23  ;;  %v2366_v24 = vld [vmem:[#allocation9 + $0xa80] sm:$0xff] }
 0x292   :  { %4501 = vmatpush1.bf16.msra.mxu0 %v4500_v26  ;;  %v2338_v26 = vld [vmem:[#allocation9 + $0x9a0] sm:$0xff]  ;;  %v4674_v29 = vpack.c.bf16 %v2141_v21, %v2137_v54  ;;  %v2375_v21 = vld [vmem:[#allocation9 + $0xac8] sm:$0xff] }
 0x293   :  { %4503 = vmatprep.subr.bf16.mxu0 %v4502_v28  ;;  %v2347_v28 = vld [vmem:[#allocation9 + $0x9e8] sm:$0xff]  ;;  %v4520_v31 = vpack.c.bf16 %v2338_v26, %v2334_v25  ;;  %v2168_v26 = vld [vmem:[#allocation9 + $0x450] sm:$0xff] }
 0x294   :  { %4657 = vmatpush1.bf16.msra.mxu1 %v4656_v56  ;;  %v2140_v56 = vld [vmem:[#allocation9 + $0x370] sm:$0xff]  ;;  %v4522_v49 = vpack.c.bf16 %v2347_v28, %v2343_v38  ;;  %v2177_v28 = vld [vmem:[#allocation9 + $0x498] sm:$0xff] }
 0x295   :  { %4659 = vmatprep.subr.bf16.mxu1 %v4658_v0  ;;  %v2149_v0 = vld [vmem:[#allocation9 + $0x3b8] sm:$0xff]  ;;  %v4676_v45 = vpack.c.bf16 %v2140_v56, %v2136_v30  ;;  %v2374_v56 = vld [vmem:[#allocation9 + $0xac0] sm:$0xff] }
 0x296   :  { %4505 = vmatpush1.bf16.msra.mxu0 %v4504_v39  ;;  %v2346_v39 = vld [vmem:[#allocation9 + $0x9e0] sm:$0xff]  ;;  %v4678_v37 = vpack.c.bf16 %v2149_v0, %v2145_v35  ;;  %v2383_v0 = vld [vmem:[#allocation9 + $0xb08] sm:$0xff] }
 0x297   :  { %4507 = vmatprep.subr.bf16.mxu0 %v4506_v33  ;;  %v2355_v33 = vld [vmem:[#allocation9 + $0xa28] sm:$0xff]  ;;  %v4524_v43 = vpack.c.bf16 %v2346_v39, %v2342_v57  ;;  %v2176_v39 = vld [vmem:[#allocation9 + $0x490] sm:$0xff] }
 0x298   :  { %4661 = vmatpush1.bf16.msra.mxu1 %v4660_v3  ;;  %v2148_v3 = vld [vmem:[#allocation9 + $0x3b0] sm:$0xff]  ;;  %v4526_v59 = vpack.c.bf16 %v2355_v33, %v2351_v32  ;;  %v2185_v33 = vld [vmem:[#allocation9 + $0x4d8] sm:$0xff] }
 0x299   :  { %4663 = vmatprep.subr.bf16.mxu1 %v4662_v6  ;;  %v2157_v6 = vld [vmem:[#allocation9 + $0x3f8] sm:$0xff]  ;;  %v4680_v51 = vpack.c.bf16 %v2148_v3, %v2144_v58  ;;  %v2386_v58 = vld [vmem:[#allocation9 + $0xb20] sm:$0xff] }
 0x29a   :  { %4509 = vmatpush1.bf16.msra.mxu0 %v4508_v50  ;;  %v2354_v50 = vld [vmem:[#allocation9 + $0xa20] sm:$0xff]  ;;  %v4682_v63 = vpack.c.bf16 %v2157_v6, %v2153_v44  ;;  %v2184_v44 = vld [vmem:[#allocation9 + $0x4d0] sm:$0xff] }
 0x29b   :  { %4511 = vmatprep.subr.bf16.mxu0 %v4510_v61  ;;  %v2363_v61 = vld [vmem:[#allocation9 + $0xa68] sm:$0xff]  ;;  %v4528_v2 = vpack.c.bf16 %v2354_v50, %v2350_v60  ;;  %v2188_v6 = vld [vmem:[#allocation9 + $0x4f0] sm:$0xff]  ;;  %v2193_v60 = vld [vmem:[#allocation9 + $0x518] sm:$0xff] }
 0x29c   :  { %4665 = vmatpush1.bf16.msra.mxu1 %v4664_v1  ;;  %v2156_v1 = vld [vmem:[#allocation9 + $0x3f0] sm:$0xff]  ;;  %v4530_v9 = vpack.c.bf16 %v2363_v61, %v2359_v52  ;;  %v2197_v50 = vld [vmem:[#allocation9 + $0x538] sm:$0xff]  ;;  %v2390_v52 = vld [vmem:[#allocation9 + $0xb40] sm:$0xff] }
 0x29d   :  { %4667 = vmatprep.subr.bf16.mxu1 %v4666_v46  ;;  %v2165_v46 = vld [vmem:[#allocation9 + $0x438] sm:$0xff]  ;;  %v4684_v15 = vpack.c.bf16 %v2156_v1, %v2152_v40  ;;  %v2394_v61 = vld [vmem:[#allocation9 + $0xb60] sm:$0xff]  ;;  %v2399_v40 = vld [vmem:[#allocation9 + $0xb88] sm:$0xff] }
 0x29e   :  { %4513 = vmatpush1.bf16.msra.mxu0 %v4512_v14  ;;  %v2362_v14 = vld [vmem:[#allocation9 + $0xa60] sm:$0xff]  ;;  %v4686_v16 = vpack.c.bf16 %v2165_v46, %v2161_v42  ;;  %v2403_v1 = vld [vmem:[#allocation9 + $0xba8] sm:$0xff]  ;;  %v2192_v42 = vld [vmem:[#allocation9 + $0x510] sm:$0xff] }
 0x29f   :  { %4515 = vmatprep.subr.bf16.mxu0 %v4514_v62  ;;  %v2371_v62 = vld [vmem:[#allocation9 + $0xaa8] sm:$0xff]  ;;  %v4532_v41 = vpack.c.bf16 %v2362_v14, %v2358_v13  ;;  %v2196_v46 = vld [vmem:[#allocation9 + $0x530] sm:$0xff]  ;;  %v2201_v13 = vld [vmem:[#allocation9 + $0x558] sm:$0xff] }
 0x2a0   :  { %4669 = vmatpush1.bf16.msra.mxu1 %v4668_v4  ;;  %v2164_v4 = vld [vmem:[#allocation9 + $0x430] sm:$0xff]  ;;  %v4534_v23 = vpack.c.bf16 %v2371_v62, %v2367_v47  ;;  %v2205_v14 = vld [vmem:[#allocation9 + $0x578] sm:$0xff]  ;;  %v2398_v47 = vld [vmem:[#allocation9 + $0xb80] sm:$0xff] }
 0x2a1   :  { %4671 = vmatprep.subr.bf16.mxu1 %v4670_v20  ;;  %v2173_v20 = vld [vmem:[#allocation9 + $0x478] sm:$0xff]  ;;  %v4688_v54 = vpack.c.bf16 %v2164_v4, %v2160_v18  ;;  %v2402_v62 = vld [vmem:[#allocation9 + $0xba0] sm:$0xff]  ;;  %v2407_v18 = vld [vmem:[#allocation9 + $0xbc8] sm:$0xff] }
 0x2a2   :  { %4517 = vmatpush1.bf16.msra.mxu0 %v4516_v22  ;;  %v2370_v22 = vld [vmem:[#allocation9 + $0xaa0] sm:$0xff]  ;;  %v4690_v25 = vpack.c.bf16 %v2173_v20, %v2169_v53  ;;  %v2411_v4 = vld [vmem:[#allocation9 + $0xbe8] sm:$0xff]  ;;  %v4706_v53 = vpack.c.bf16 %v2205_v14, %v2201_v13  ;;  %v2200_v20 = vld [vmem:[#allocation9 + $0x550] sm:$0xff] }
 0x2a3   :  { %4519 = vmatprep.subr.bf16.mxu0 %v4518_v27  ;;  %v2379_v27 = vld [vmem:[#allocation9 + $0xae8] sm:$0xff]  ;;  %v4536_v38 = vpack.c.bf16 %v2370_v22, %v2366_v24  ;;  %v4552_v24 = vpack.c.bf16 %v2402_v62, %v2398_v47  ;;  %v1119_v22 = vsub.s32 5, %v5524_v11  ;;  %v2237_v13 = vld [vmem:[#allocation9 + $0x678] sm:$0xff]  ;;  %v2232_v62 = vld [vmem:[#allocation9 + $0x650] sm:$0xff] }
 0x2a4   :  { %4673 = vmatpush1.bf16.msra.mxu1 %v4672_v55  ;;  %v2172_v55 = vld [vmem:[#allocation9 + $0x470] sm:$0xff]  ;;  %v4538_v30 = vpack.c.bf16 %v2379_v27, %v2375_v21  ;;  %v2213_v21 = vld [vmem:[#allocation9 + $0x5b8] sm:$0xff]  ;;  %v4554_v27 = vpack.c.bf16 %v2411_v4, %v2407_v18  ;;  %v2431_v14 = vld [vmem:[#allocation9 + $0xc88] sm:$0xff] }
 0x2a5   :  { %4675 = vmatprep.subr.bf16.mxu1 %v4674_v29  ;;  %v2181_v29 = vld [vmem:[#allocation9 + $0x4b8] sm:$0xff]  ;;  %v4692_v35 = vpack.c.bf16 %v2172_v55, %v2168_v26  ;;  %v2410_v26 = vld [vmem:[#allocation9 + $0xbe0] sm:$0xff] }
 0x2a6   :  { %4521 = vmatpush1.bf16.msra.mxu0 %v4520_v31  ;;  %v2378_v31 = vld [vmem:[#allocation9 + $0xae0] sm:$0xff]  ;;  %v4694_v57 = vpack.c.bf16 %v2181_v29, %v2177_v28  ;;  %v2419_v28 = vld [vmem:[#allocation9 + $0xc28] sm:$0xff]  ;;  %v5767_v29 = vld [vmem:[#allocation8] sm:$0xff] }
 0x2a7   :  { %4523 = vmatprep.subr.bf16.mxu0 %v4522_v49  ;;  %v2387_v49 = vld [vmem:[#allocation9 + $0xb28] sm:$0xff]  ;;  %v4540_v32 = vpack.c.bf16 %v2378_v31, %v2374_v56  ;;  %v2208_v31 = vld [vmem:[#allocation9 + $0x590] sm:$0xff] }
 0x2a8   :  { %4677 = vmatpush1.bf16.msra.mxu1 %v4676_v45  ;;  %v2180_v45 = vld [vmem:[#allocation9 + $0x4b0] sm:$0xff] }
 0x2a9   :  { %4679 = vmatprep.subr.bf16.mxu1 %v4678_v37  ;;  %v2382_v37 = vld [vmem:[#allocation9 + $0xb00] sm:$0xff]  ;;  %v4696_v3 = vpack.c.bf16 %v2180_v45, %v2176_v39  ;;  %v2221_v39 = vld [vmem:[#allocation9 + $0x5f8] sm:$0xff] }
 0x2aa   :  { %4525 = vmatpush1.bf16.msra.mxu0 %v4524_v43  ;;  %v2391_v43 = vld [vmem:[#allocation9 + $0xb48] sm:$0xff] }
 0x2ab   :  { %4527 = vmatprep.subr.bf16.mxu0 %v4526_v59  ;;  %v4544_v59 = vpack.c.bf16 %v2386_v58, %v2382_v37 }
 0x2ac   :  { %4681 = vmatpush1.bf16.msra.mxu1 %v4680_v51  ;;  %v4546_v51 = vpack.c.bf16 %v2395_v48, %v2391_v43  ;;  %v2225_v43 = vld [vmem:[#allocation9 + $0x618] sm:$0xff]  ;;  %v2414_v48 = vld [vmem:[#allocation9 + $0xc00] sm:$0xff] }
 0x2ad   :  { %4683 = vmatprep.subr.bf16.mxu1 %v4682_v63  ;;  %v4700_v63 = vpack.c.bf16 %v2188_v6, %v2184_v44  ;;  %v2229_v6 = vld [vmem:[#allocation9 + $0x638] sm:$0xff] }
 0x2ae   :  { %4529 = vmatpush1.bf16.msra.mxu0 %v4528_v2  ;;  %v4702_v2 = vpack.c.bf16 %v2197_v50, %v2193_v60  ;;  %v2427_v60 = vld [vmem:[#allocation9 + $0xc68] sm:$0xff] }
 0x2af   :  { %4531 = vmatprep.subr.bf16.mxu0 %v4530_v9  ;;  %v4548_v9 = vpack.c.bf16 %v2394_v61, %v2390_v52  ;;  %v2224_v52 = vld [vmem:[#allocation9 + $0x610] sm:$0xff] }
 0x2b0   :  { %4685 = vmatpush1.bf16.msra.mxu1 %v4684_v15  ;;  %v4550_v15 = vpack.c.bf16 %v2403_v1, %v2399_v40  ;;  %v2228_v61 = vld [vmem:[#allocation9 + $0x630] sm:$0xff]  ;;  %v4718_v1 = vpack.c.bf16 %v2229_v6, %v2225_v43  ;;  %v2455_v43 = vld [vmem:[#allocation9 + $0xd48] sm:$0xff] }
 0x2b1   :  { %4687 = vmatprep.subr.bf16.mxu1 %v4686_v16  ;;  %v4704_v16 = vpack.c.bf16 %v2196_v46, %v2192_v42  ;;  %v2422_v46 = vld [vmem:[#allocation9 + $0xc40] sm:$0xff]  ;;  %v4720_v47 = vpack.c.bf16 %v2228_v61, %v2224_v52  ;;  %v2256_v6 = vld [vmem:[#allocation9 + $0x710] sm:$0xff]  ;;  %v2265_v52 = vld [vmem:[#allocation9 + $0x758] sm:$0xff] }
 0x2b2   :  { %4533 = vmatpush1.bf16.msra.mxu0 %v4532_v41  ;;  %v1115_v41 = vsub.s32 4, %v5524_v11 }
 0x2b3   :  { %2913 = vmatmul.mubr.f32.vlgmr.msra.gmra.mrb[6].mxu1 %v2022_v5  ;;  %4535 = vmatprep.subr.bf16.mxu0 %v4534_v23  ;;  %v4542_v5 = vpack.c.bf16 %v2387_v49, %v2383_v0  ;;  %v2204_v23 = vld [vmem:[#allocation9 + $0x570] sm:$0xff]  ;;  %v1120_v0 = vrot.slane %v5767_v29, %v1119_v22  ;;  %v2439_v22 = vld [vmem:[#allocation9 + $0xcc8] sm:$0xff] }
 0x2b4   :  { %4689 = vmatpush1.bf16.msra.mxu1 %v4688_v54  ;;  %2983 = vmatprep.mubr.f32.mxu1 %v2025_v17  ;;  %v4698_v17 = vpack.c.bf16 %v2189_v36, %v2185_v33  ;;  %v2209_v54 = vld [vmem:[#allocation9 + $0x598] sm:$0xff]  ;;  %v4708_v55 = vpack.c.bf16 %v2204_v23, %v2200_v20  ;;  %v2216_v36 = vld [vmem:[#allocation9 + $0x5d0] sm:$0xff]  ;;  %v2430_v20 = vld [vmem:[#allocation9 + $0xc80] sm:$0xff] }
 0x2b5   :  { %4691 = vmatprep.subr.bf16.mxu1 %v4690_v25  ;;  %v2406_v25 = vld [vmem:[#allocation9 + $0xbc0] sm:$0xff]  ;;  %v4710_v56 = vpack.c.bf16 %v2213_v21, %v2209_v54  ;;  %v2443_v54 = vld [vmem:[#allocation9 + $0xce8] sm:$0xff] }
 0x2b6   :  { %4537 = vmatpush1.bf16.msra.mxu0 %v4536_v38  ;;  %v2415_v38 = vld [vmem:[#allocation9 + $0xc08] sm:$0xff]  ;;  %v4556_v49 = vpack.c.bf16 %v2410_v26, %v2406_v25  ;;  %v2434_v23 = vld [vmem:[#allocation9 + $0xca0] sm:$0xff]  ;;  %v2244_v25 = vld [vmem:[#allocation9 + $0x6b0] sm:$0xff] }
 0x2b7   :  { %4539 = vmatprep.subr.bf16.mxu0 %v4538_v30  ;;  %v1116_v30 = vrot.slane %v5767_v29, %v1115_v41  ;;  %v4558_v45 = vpack.c.bf16 %v2419_v28, %v2415_v38  ;;  %v2241_v41 = vld [vmem:[#allocation9 + $0x698] sm:$0xff]  ;;  %v4568_v26 = vpack.c.bf16 %v2434_v23, %v2430_v20  ;;  %v4570_v28 = vpack.c.bf16 %v2443_v54, %v2439_v22  ;;  %v2475_v20 = vld [vmem:[#allocation9 + $0xde8] sm:$0xff]  ;;  %v2276_v22 = vld [vmem:[#allocation9 + $0x7b0] sm:$0xff] }
 0x2b8   :  { %4693 = vmatpush1.bf16.msra.mxu1 %v4692_v35  ;;  %v2212_v35 = vld [vmem:[#allocation9 + $0x5b0] sm:$0xff]  ;;  %v2249_v38 = vld [vmem:[#allocation9 + $0x6d8] sm:$0xff] }
 0x2b9   :  { %4695 = vmatprep.subr.bf16.mxu1 %v4694_v57  ;;  %v2217_v57 = vld [vmem:[#allocation9 + $0x5d8] sm:$0xff]  ;;  %v4712_v33 = vpack.c.bf16 %v2212_v35, %v2208_v31  ;;  %v2447_v35 = vld [vmem:[#allocation9 + $0xd08] sm:$0xff] }
 0x2ba   :  { %4541 = vmatpush1.bf16.msra.mxu0 %v4540_v32  ;;  %v2253_v31 = vld [vmem:[#allocation9 + $0x6f8] sm:$0xff] }
 0x2bb   :  { %4543 = vmatprep.subr.bf16.mxu0 %v4542_v5  ;;  %v2220_v5 = vld [vmem:[#allocation9 + $0x5f0] sm:$0xff] }
 0x2bc   :  { %4697 = vmatpush1.bf16.msra.mxu1 %v4696_v3  ;;  %v4714_v3 = vpack.c.bf16 %v2221_v39, %v2217_v57  ;;  %v2248_v57 = vld [vmem:[#allocation9 + $0x6d0] sm:$0xff] }
 0x2bd   :  { %4699 = vmatprep.subr.bf16.mxu1 %v4698_v17  ;;  %v2418_v17 = vld [vmem:[#allocation9 + $0xc20] sm:$0xff]  ;;  %v2252_v39 = vld [vmem:[#allocation9 + $0x6f0] sm:$0xff] }
 0x2be   :  { %4545 = vmatpush1.bf16.msra.mxu0 %v4544_v59  ;;  %v2423_v59 = vld [vmem:[#allocation9 + $0xc48] sm:$0xff] }
 0x2bf   :  { %4547 = vmatprep.subr.bf16.mxu0 %v4546_v51  ;;  %v4716_v51 = vpack.c.bf16 %v2220_v5, %v2216_v36  ;;  %v4562_v42 = vpack.c.bf16 %v2427_v60, %v2423_v59  ;;  %v2446_v5 = vld [vmem:[#allocation9 + $0xd00] sm:$0xff]  ;;  %v2260_v59 = vld [vmem:[#allocation9 + $0x730] sm:$0xff] }
 0x2c0   :  { %4701 = vmatpush1.bf16.msra.mxu1 %v4700_v63  ;;  %v4560_v63 = vpack.c.bf16 %v2418_v17, %v2414_v48  ;;  %v2459_v48 = vld [vmem:[#allocation9 + $0xd68] sm:$0xff]  ;;  %v4732_v17 = vpack.c.bf16 %v2252_v39, %v2248_v57  ;;  %v2289_v57 = vld [vmem:[#allocation9 + $0x818] sm:$0xff] }
 0x2c1   :  { %4703 = vmatprep.subr.bf16.mxu1 %v4702_v2  ;;  %v2233_v2 = vld [vmem:[#allocation9 + $0x658] sm:$0xff]  ;;  %v4578_v61 = vpack.c.bf16 %v2459_v48, %v2455_v43  ;;  %v2288_v48 = vld [vmem:[#allocation9 + $0x810] sm:$0xff] }
 0x2c2   :  { %4549 = vmatpush1.bf16.msra.mxu0 %v4548_v9  ;;  %v2426_v9 = vld [vmem:[#allocation9 + $0xc60] sm:$0xff]  ;;  %v4722_v4 = vpack.c.bf16 %v2237_v13, %v2233_v2  ;;  %v2269_v2 = vld [vmem:[#allocation9 + $0x778] sm:$0xff]  ;;  %v2264_v13 = vld [vmem:[#allocation9 + $0x750] sm:$0xff] }
 0x2c3   :  { %4551 = vmatprep.subr.bf16.mxu0 %v4550_v15  ;;  %v2435_v15 = vld [vmem:[#allocation9 + $0xca8] sm:$0xff]  ;;  %v4564_v18 = vpack.c.bf16 %v2426_v9, %v2422_v46  ;;  %v4736_v9 = vpack.c.bf16 %v2260_v59, %v2256_v6  ;;  %v2297_v6 = vld [vmem:[#allocation9 + $0x858] sm:$0xff] }
 0x2c4   :  { %4705 = vmatpush1.bf16.msra.mxu1 %v4704_v16  ;;  %v2236_v16 = vld [vmem:[#allocation9 + $0x670] sm:$0xff]  ;;  %v2467_v46 = vld [vmem:[#allocation9 + $0xda8] sm:$0xff] }
 0x2c5   :  { %4707 = vmatprep.subr.bf16.mxu1 %v4706_v53  ;;  %v4566_v53 = vpack.c.bf16 %v2435_v15, %v2431_v14  ;;  %v4724_v21 = vpack.c.bf16 %v2236_v16, %v2232_v62  ;;  %v2268_v14 = vld [vmem:[#allocation9 + $0x770] sm:$0xff]  ;;  %v2273_v62 = vld [vmem:[#allocation9 + $0x798] sm:$0xff] }
 0x2c6   :  { %4553 = vmatpush1.bf16.msra.mxu0 %v4552_v24  ;;  %v2245_v24 = vld [vmem:[#allocation9 + $0x6b8] sm:$0xff]  ;;  %v4740_v23 = vpack.c.bf16 %v2268_v14, %v2264_v13 }
 0x2c7   :  { %4555 = vmatprep.subr.bf16.mxu0 %v4554_v27  ;;  %v2240_v27 = vld [vmem:[#allocation9 + $0x690] sm:$0xff]  ;;  %v2309_v14 = vld [vmem:[#allocation9 + $0x8b8] sm:$0xff] }
 0x2c8   :  { %v1804_v32 = vpop.f32.mrb[2].mxu0  ;;  %4709 = vmatpush1.bf16.msra.mxu1 %v4708_v55  ;;  %v4726_v55 = vpack.c.bf16 %v2245_v24, %v2241_v41  ;;  %v2277_v41 = vld [vmem:[#allocation9 + $0x7b8] sm:$0xff]  ;;  %v2272_v24 = vld [vmem:[#allocation9 + $0x790] sm:$0xff] }
 0x2c9   :  { %v5771_v37 = vadd.f32 %v1804_v32, %v1116_v30  ;;  %v1806_v58 = vpop.f32.mrb[3].mxu0  ;;  %4711 = vmatprep.subr.bf16.mxu1 %v4710_v56  ;;  %v2438_v30 = vld [vmem:[#allocation9 + $0xcc0] sm:$0xff]  ;;  %v4730_v32 = vpack.c.bf16 %v2253_v31, %v2249_v38  ;;  %v2285_v38 = vld [vmem:[#allocation9 + $0x7f8] sm:$0xff]  ;;  %v2280_v31 = vld [vmem:[#allocation9 + $0x7d0] sm:$0xff] }
 0x2ca   :  { %v5773_v44 = vadd.f32 %v1806_v58, %v1120_v0  ;;  %4557 = vmatpush1.bf16.msra.mxu0 %v4556_v49  ;;  %v2442_v56 = vld [vmem:[#allocation9 + $0xce0] sm:$0xff]  ;;  %v2451_v0 = vld [vmem:[#allocation9 + $0xd28] sm:$0xff]  ;;  %v4728_v49 = vpack.c.bf16 %v2244_v25, %v2240_v27  ;;  %v2281_v27 = vld [vmem:[#allocation9 + $0x7d8] sm:$0xff] }
 0x2cb   :  { %4559 = vmatprep.subr.bf16.mxu0 %v4558_v45  ;;  %v2026_v40 = vmax.f32 %v5771_v37, 0.0  ;;  %v4572_v45 = vpack.c.bf16 %v2442_v56, %v2438_v30  ;;  %v4574_v36 = vpack.c.bf16 %v2451_v0, %v2447_v35  ;;  %v2450_v58 = vld [vmem:[#allocation9 + $0xd20] sm:$0xff]  ;;  %v2483_v30 = vld [vmem:[#allocation9 + $0xe28] sm:$0xff]  ;;  %v4744_v56 = vpack.c.bf16 %v2276_v22, %v2272_v24  ;;  %v2284_v35 = vld [vmem:[#allocation9 + $0x7f0] sm:$0xff] }
 0x2cc   :  { %v2027_v50 = vmax.f32 %v5773_v44, 0.0  ;;  %4713 = vmatpush1.bf16.msra.mxu1 %v4712_v33  ;;  %v2257_v33 = vld [vmem:[#allocation9 + $0x718] sm:$0xff]  ;;  %v4576_v60 = vpack.c.bf16 %v2450_v58, %v2446_v5  ;;  %v2491_v5 = vld [vmem:[#allocation9 + $0xe68] sm:$0xff]  ;;  %v4748_v58 = vpack.c.bf16 %v2284_v35, %v2280_v31  ;;  %v2514_v31 = vld [vmem:[#allocation9 + $0xf20] sm:$0xff] }
 0x2cd   :  { %4715 = vmatprep.subr.bf16.mxu1 %v4714_v3  ;;  %v2261_v3 = vld [vmem:[#allocation9 + $0x738] sm:$0xff]  ;;  %v2519_v35 = vld [vmem:[#allocation9 + $0xf48] sm:$0xff] }
 0x2ce   :  { %2770 = vmatprep.mubr.f32.mxu0 %v2027_v50  ;;  %v2317_v22 = vld [vmem:[#allocation9 + $0x8f8] sm:$0xff] }
 0x2cf   :  { %2771 = vmatmul.mubr.f32.vlgmr.msra.gmra.mrb[4].mxu0 %v2026_v40 }
 0x2d0   :  { %4717 = vmatpush1.bf16.msra.mxu1 %v4716_v51  ;;  %4561 = vmatpush1.bf16.msra.mxu0 %v4560_v63  ;;  %v4734_v51 = vpack.c.bf16 %v2261_v3, %v2257_v33  ;;  %v2454_v63 = vld [vmem:[#allocation9 + $0xd40] sm:$0xff]  ;;  %v2293_v33 = vld [vmem:[#allocation9 + $0x838] sm:$0xff] }
 0x2d1   :  { %4719 = vmatprep.subr.bf16.mxu1 %v4718_v1  ;;  %4563 = vmatprep.subr.bf16.mxu0 %v4562_v42  ;;  %v2458_v1 = vld [vmem:[#allocation9 + $0xd60] sm:$0xff]  ;;  %v2463_v42 = vld [vmem:[#allocation9 + $0xd88] sm:$0xff]  ;;  %v4750_v43 = vpack.c.bf16 %v2293_v33, %v2289_v57 }
 0x2d2   :  { %v4580_v15 = vpack.c.bf16 %v2458_v1, %v2454_v63  ;;  %v4582_v16 = vpack.c.bf16 %v2467_v46, %v2463_v42  ;;  %v2499_v63 = vld [vmem:[#allocation9 + $0xea8] sm:$0xff]  ;;  %v2296_v42 = vld [vmem:[#allocation9 + $0x850] sm:$0xff] }
 0x2d3   :  { %v2300_v46 = vld [vmem:[#allocation9 + $0x870] sm:$0xff] }
 0x2d4   :  { %4721 = vmatpush1.bf16.msra.mxu1 %v4720_v47  ;;  %4565 = vmatpush1.bf16.msra.mxu0 %v4564_v18  ;;  %v4738_v47 = vpack.c.bf16 %v2269_v2, %v2265_v52  ;;  %v2462_v18 = vld [vmem:[#allocation9 + $0xd80] sm:$0xff] }
 0x2d5   :  { %4723 = vmatprep.subr.bf16.mxu1 %v4722_v4  ;;  %4567 = vmatprep.subr.bf16.mxu0 %v4566_v53  ;;  %v2466_v4 = vld [vmem:[#allocation9 + $0xda0] sm:$0xff]  ;;  %v2471_v53 = vld [vmem:[#allocation9 + $0xdc8] sm:$0xff] }
 0x2d6   :  { %v4584_v54 = vpack.c.bf16 %v2466_v4, %v2462_v18  ;;  %v4586_v25 = vpack.c.bf16 %v2475_v20, %v2471_v53  ;;  %v2490_v52 = vld [vmem:[#allocation9 + $0xe60] sm:$0xff]  ;;  %v2507_v18 = vld [vmem:[#allocation9 + $0xee8] sm:$0xff]  ;;  %v4756_v4 = vpack.c.bf16 %v2300_v46, %v2296_v42  ;;  %v2304_v53 = vld [vmem:[#allocation9 + $0x890] sm:$0xff] }
 0x2d7   :  { %v2308_v20 = vld [vmem:[#allocation9 + $0x8b0] sm:$0xff]  ;;  %v2535_v42 = vld [vmem:[#allocation9 + $0xfc8] sm:$0xff] }
 0x2d8   :  { %4725 = vmatpush1.bf16.msra.mxu1 %v4724_v21  ;;  %4569 = vmatpush1.bf16.msra.mxu0 %v4568_v26  ;;  %v4742_v21 = vpack.c.bf16 %v2277_v41, %v2273_v62  ;;  %v2470_v26 = vld [vmem:[#allocation9 + $0xdc0] sm:$0xff]  ;;  %v2539_v46 = vld [vmem:[#allocation9 + $0xfe8] sm:$0xff] }
 0x2d9   :  { %4727 = vmatprep.subr.bf16.mxu1 %v4726_v55  ;;  %4571 = vmatprep.subr.bf16.mxu0 %v4570_v28  ;;  %v2474_v55 = vld [vmem:[#allocation9 + $0xde0] sm:$0xff]  ;;  %v2479_v28 = vld [vmem:[#allocation9 + $0xe08] sm:$0xff] }
 0x2da   :  { %v4588_v0 = vpack.c.bf16 %v2474_v55, %v2470_v26  ;;  %v4590_v39 = vpack.c.bf16 %v2483_v30, %v2479_v28  ;;  %v2498_v62 = vld [vmem:[#allocation9 + $0xea0] sm:$0xff]  ;;  %v2316_v26 = vld [vmem:[#allocation9 + $0x8f0] sm:$0xff]  ;;  %v2321_v55 = vld [vmem:[#allocation9 + $0x918] sm:$0xff] }
 0x2db   :  { %v2325_v28 = vld [vmem:[#allocation9 + $0x938] sm:$0xff] }
 0x2dc   :  { %4729 = vmatpush1.bf16.msra.mxu1 %v4728_v49  ;;  %4573 = vmatpush1.bf16.msra.mxu0 %v4572_v45  ;;  %v4746_v49 = vpack.c.bf16 %v2285_v38, %v2281_v27  ;;  %v2478_v45 = vld [vmem:[#allocation9 + $0xe00] sm:$0xff]  ;;  %v2515_v27 = vld [vmem:[#allocation9 + $0xf28] sm:$0xff]  ;;  %v4766_v57 = vpack.c.bf16 %v2325_v28, %v2321_v55  ;;  %v2361_v55 = vld [vmem:[#allocation9 + $0xa58] sm:$0xff] }
 0x2dd   :  { %4731 = vmatprep.subr.bf16.mxu1 %v4730_v32  ;;  %4575 = vmatprep.subr.bf16.mxu0 %v4574_v36  ;;  %v2482_v32 = vld [vmem:[#allocation9 + $0xe20] sm:$0xff]  ;;  %v2487_v36 = vld [vmem:[#allocation9 + $0xe48] sm:$0xff] }
 0x2de   :  { %v4592_v3 = vpack.c.bf16 %v2482_v32, %v2478_v45  ;;  %v4594_v59 = vpack.c.bf16 %v2491_v5, %v2487_v36  ;;  %v2324_v45 = vld [vmem:[#allocation9 + $0x930] sm:$0xff]  ;;  %v2329_v32 = vld [vmem:[#allocation9 + $0x958] sm:$0xff] }
 0x2df   :  { %v2333_v36 = vld [vmem:[#allocation9 + $0x978] sm:$0xff] }
 0x2e0   :  { %4733 = vmatpush1.bf16.msra.mxu1 %v4732_v17  ;;  %4577 = vmatpush1.bf16.msra.mxu0 %v4576_v60  ;;  %v2292_v17 = vld [vmem:[#allocation9 + $0x830] sm:$0xff]  ;;  %v2301_v60 = vld [vmem:[#allocation9 + $0x878] sm:$0xff] }
 0x2e1   :  { %4735 = vmatprep.subr.bf16.mxu1 %v4734_v51  ;;  %4579 = vmatprep.subr.bf16.mxu0 %v4578_v61  ;;  %v2486_v51 = vld [vmem:[#allocation9 + $0xe40] sm:$0xff]  ;;  %v2495_v61 = vld [vmem:[#allocation9 + $0xe88] sm:$0xff]  ;;  %v4752_v1 = vpack.c.bf16 %v2292_v17, %v2288_v48  ;;  %v4754_v2 = vpack.c.bf16 %v2301_v60, %v2297_v6  ;;  %v4770_v6 = vpack.c.bf16 %v2333_v36, %v2329_v32  ;;  %v2332_v60 = vld [vmem:[#allocation9 + $0x970] sm:$0xff] }
 0x2e2   :  { %v4596_v13 = vpack.c.bf16 %v2490_v52, %v2486_v51  ;;  %v2531_v48 = vld [vmem:[#allocation9 + $0xfa8] sm:$0xff]  ;;  %v2337_v51 = vld [vmem:[#allocation9 + $0x998] sm:$0xff] }
 0x2e3   :  { %v2377_v32 = vld [vmem:[#allocation9 + $0xad8] sm:$0xff] }
 0x2e4   :  { %4737 = vmatpush1.bf16.msra.mxu1 %v4736_v9  ;;  %4581 = vmatpush1.bf16.msra.mxu0 %v4580_v15  ;;  %v2305_v9 = vld [vmem:[#allocation9 + $0x898] sm:$0xff]  ;;  %v4598_v15 = vpack.c.bf16 %v2499_v63, %v2495_v61 }
 0x2e5   :  { %4739 = vmatprep.subr.bf16.mxu1 %v4738_v47  ;;  %4583 = vmatprep.subr.bf16.mxu0 %v4582_v16  ;;  %v2494_v47 = vld [vmem:[#allocation9 + $0xe80] sm:$0xff]  ;;  %v2503_v16 = vld [vmem:[#allocation9 + $0xec8] sm:$0xff]  ;;  %v4758_v41 = vpack.c.bf16 %v2309_v14, %v2305_v9  ;;  %v2341_v61 = vld [vmem:[#allocation9 + $0x9b8] sm:$0xff] }
 0x2e6   :  { %v4600_v24 = vpack.c.bf16 %v2498_v62, %v2494_v47  ;;  %v2336_v14 = vld [vmem:[#allocation9 + $0x990] sm:$0xff]  ;;  %v2345_v47 = vld [vmem:[#allocation9 + $0x9d8] sm:$0xff] }
 0x2e8   :  { %4741 = vmatpush1.bf16.msra.mxu1 %v4740_v23  ;;  %4585 = vmatpush1.bf16.msra.mxu0 %v4584_v54  ;;  %v2313_v23 = vld [vmem:[#allocation9 + $0x8d8] sm:$0xff]  ;;  %v4602_v54 = vpack.c.bf16 %v2507_v18, %v2503_v16  ;;  %v4618_v18 = vpack.c.bf16 %v2539_v46, %v2535_v42 }
 0x2e9   :  { %4743 = vmatprep.subr.bf16.mxu1 %v4742_v21  ;;  %4587 = vmatprep.subr.bf16.mxu0 %v4586_v25  ;;  %v2502_v21 = vld [vmem:[#allocation9 + $0xec0] sm:$0xff]  ;;  %v4760_v25 = vpack.c.bf16 %v2308_v20, %v2304_v53  ;;  %v4762_v44 = vpack.c.bf16 %v2317_v22, %v2313_v23  ;;  %v2349_v16 = vld [vmem:[#allocation9 + $0x9f8] sm:$0xff]  ;;  %v3137_v53 = vld [vmem:[#allocation12 + $0x8] sm:$0xff] }
 0x2ea   :  { %v4604_v38 = vpack.c.bf16 %v2506_v10, %v2502_v21  ;;  %v3139_v20 = vld [vmem:[#allocation12 + $0x18] sm:$0xff]  ;;  %v2344_v22 = vld [vmem:[#allocation9 + $0x9d0] sm:$0xff] }
 0x2eb   :  { %v2353_v10 = vld [vmem:[#allocation9 + $0xa18] sm:$0xff] }
 0x2ec   :  { %4745 = vmatpush1.bf16.msra.mxu1 %v4744_v56  ;;  %4589 = vmatpush1.bf16.msra.mxu0 %v4588_v0  ;;  %v2510_v56 = vld [vmem:[#allocation9 + $0xf00] sm:$0xff]  ;;  %v2523_v0 = vld [vmem:[#allocation9 + $0xf68] sm:$0xff]  ;;  %v2401_v42 = vld [vmem:[#allocation9 + $0xb98] sm:$0xff] }
 0x2ed   :  { %4747 = vmatprep.subr.bf16.mxu1 %v4746_v49  ;;  %4591 = vmatprep.subr.bf16.mxu0 %v4590_v39  ;;  %v2320_v39 = vld [vmem:[#allocation9 + $0x910] sm:$0xff]  ;;  %v4608_v33 = vpack.c.bf16 %v2514_v31, %v2510_v56  ;;  %v4610_v5 = vpack.c.bf16 %v2523_v0, %v2519_v35  ;;  %v2369_v35 = vld [vmem:[#allocation9 + $0xa98] sm:$0xff] }
 0x2ee   :  { %v4768_v17 = vpack.c.bf16 %v2324_v45, %v2320_v39  ;;  %v2360_v56 = vld [vmem:[#allocation9 + $0xa50] sm:$0xff]  ;;  %v2373_v0 = vld [vmem:[#allocation9 + $0xab8] sm:$0xff] }
 0x2ef   :  { %v2364_v31 = vld [vmem:[#allocation9 + $0xa70] sm:$0xff]  ;;  %v2405_v46 = vld [vmem:[#allocation9 + $0xbb8] sm:$0xff] }
 0x2f0   :  { %4749 = vmatpush1.bf16.msra.mxu1 %v4748_v58  ;;  %4593 = vmatpush1.bf16.msra.mxu0 %v4592_v3  ;;  %v2518_v58 = vld [vmem:[#allocation9 + $0xf40] sm:$0xff]  ;;  %v2368_v39 = vld [vmem:[#allocation9 + $0xa90] sm:$0xff] }
 0x2f1   :  { %4751 = vmatprep.subr.bf16.mxu1 %v4750_v43  ;;  %4595 = vmatprep.subr.bf16.mxu0 %v4594_v59  ;;  %v2522_v3 = vld [vmem:[#allocation9 + $0xf60] sm:$0xff]  ;;  %v2527_v43 = vld [vmem:[#allocation9 + $0xf88] sm:$0xff]  ;;  %v2328_v59 = vld [vmem:[#allocation9 + $0x950] sm:$0xff] }
 0x2f2   :  { %v4612_v52 = vpack.c.bf16 %v2522_v3, %v2518_v58  ;;  %v4614_v63 = vpack.c.bf16 %v2531_v48, %v2527_v43  ;;  %v4772_v9 = vpack.c.bf16 %v2332_v60, %v2328_v59  ;;  %v2372_v45 = vld [vmem:[#allocation9 + $0xab0] sm:$0xff]  ;;  %v2385_v43 = vld [vmem:[#allocation9 + $0xb18] sm:$0xff] }
 0x2f3   :  { %2984 = vmatmul.mubr.f32.vlgmr.msra.gmra.mrb[6].mxu1 %v2024_v19  ;;  %v2511_v19 = vld [vmem:[#allocation9 + $0xf08] sm:$0xff]  ;;  %v4792_v36 = vpack.c.bf16 %v2372_v45, %v2368_v39  ;;  %v2376_v58 = vld [vmem:[#allocation9 + $0xad0] sm:$0xff]  ;;  %v2389_v48 = vld [vmem:[#allocation9 + $0xb38] sm:$0xff] }
 0x2f4   :  { %4753 = vmatpush1.bf16.msra.mxu1 %v4752_v1  ;;  %3054 = vmatprep.mubr.f32.mxu1 %v2027_v50  ;;  %v2312_v50 = vld [vmem:[#allocation9 + $0x8d0] sm:$0xff]  ;;  %v4606_v30 = vpack.c.bf16 %v2515_v27, %v2511_v19  ;;  %v2526_v1 = vld [vmem:[#allocation9 + $0xf80] sm:$0xff]  ;;  %v2357_v19 = vld [vmem:[#allocation9 + $0xa38] sm:$0xff]  ;;  %v4878_v27 = vpack.c.bf16 %v3139_v20, %v3137_v53 }
 0x2f5   :  { %4755 = vmatprep.subr.bf16.mxu1 %v4754_v2  ;;  %4597 = vmatpush1.bf16.msra.mxu0 %v4596_v13  ;;  %v4764_v49 = vpack.c.bf16 %v2316_v26, %v2312_v50  ;;  %v2530_v2 = vld [vmem:[#allocation9 + $0xfa0] sm:$0xff]  ;;  %v4774_v13 = vpack.c.bf16 %v2341_v61, %v2337_v51  ;;  %v2352_v50 = vld [vmem:[#allocation9 + $0xa10] sm:$0xff]  ;;  %v2393_v51 = vld [vmem:[#allocation9 + $0xb58] sm:$0xff] }
 0x2f6   :  { %4599 = vmatprep.subr.bf16.mxu0 %v4598_v15  ;;  %v2340_v15 = vld [vmem:[#allocation9 + $0x9b0] sm:$0xff]  ;;  %v4616_v62 = vpack.c.bf16 %v2530_v2, %v2526_v1  ;;  %v2417_v53 = vld [vmem:[#allocation9 + $0xc18] sm:$0xff] }
 0x2f7   :  { %v4776_v23 = vpack.c.bf16 %v2340_v15, %v2336_v14  ;;  %v2356_v26 = vld [vmem:[#allocation9 + $0xa30] sm:$0xff]  ;;  %v2421_v20 = vld [vmem:[#allocation9 + $0xc38] sm:$0xff] }
 0x2f8   :  { %4757 = vmatpush1.bf16.msra.mxu1 %v4756_v4  ;;  %v2534_v4 = vld [vmem:[#allocation9 + $0xfc0] sm:$0xff]  ;;  %v4784_v28 = vpack.c.bf16 %v2356_v26, %v2352_v50  ;;  %v2380_v3 = vld [vmem:[#allocation9 + $0xaf0] sm:$0xff]  ;;  %v2433_v50 = vld [vmem:[#allocation9 + $0xc98] sm:$0xff] }
 0x2f9   :  { %4759 = vmatprep.subr.bf16.mxu1 %v4758_v41  ;;  %4601 = vmatpush1.bf16.msra.mxu0 %v4600_v24  ;;  %v2538_v41 = vld [vmem:[#allocation9 + $0xfe0] sm:$0xff]  ;;  %v4778_v24 = vpack.c.bf16 %v2349_v16, %v2345_v47  ;;  %v2384_v59 = vld [vmem:[#allocation9 + $0xb10] sm:$0xff]  ;;  %v2409_v47 = vld [vmem:[#allocation9 + $0xbd8] sm:$0xff] }
 0x2fa   :  { %4603 = vmatprep.subr.bf16.mxu0 %v4602_v54  ;;  %v2348_v54 = vld [vmem:[#allocation9 + $0x9f0] sm:$0xff]  ;;  %v4620_v21 = vpack.c.bf16 %v2538_v41, %v2534_v4  ;;  %v2437_v26 = vld [vmem:[#allocation9 + $0xcb8] sm:$0xff] }
 0x2fb   :  { %v2388_v60 = vld [vmem:[#allocation9 + $0xb30] sm:$0xff]  ;;  %v2449_v39 = vld [vmem:[#allocation9 + $0xd18] sm:$0xff] }
 0x2fc   :  { %4761 = vmatpush1.bf16.msra.mxu1 %v4760_v25  ;;  %v4780_v25 = vpack.c.bf16 %v2348_v54, %v2344_v22  ;;  %v4800_v61 = vpack.c.bf16 %v2388_v60, %v2384_v59  ;;  %v2392_v1 = vld [vmem:[#allocation9 + $0xb50] sm:$0xff]  ;;  %v2453_v45 = vld [vmem:[#allocation9 + $0xd38] sm:$0xff] }
 0x2fd   :  { %4763 = vmatprep.subr.bf16.mxu1 %v4762_v44  ;;  %4605 = vmatpush1.bf16.msra.mxu0 %v4604_v38  ;;  %v4782_v44 = vpack.c.bf16 %v2357_v19, %v2353_v10  ;;  %v2365_v38 = vld [vmem:[#allocation9 + $0xa78] sm:$0xff]  ;;  %v2396_v2 = vld [vmem:[#allocation9 + $0xb70] sm:$0xff]  ;;  %v4830_v37 = vpack.c.bf16 %v2453_v45, %v2449_v39 }
 0x2fe   :  { %4607 = vmatprep.subr.bf16.mxu0 %v4606_v30  ;;  %v4786_v30 = vpack.c.bf16 %v2365_v38, %v2361_v55  ;;  %v2400_v14 = vld [vmem:[#allocation9 + $0xb90] sm:$0xff]  ;;  %v2429_v10 = vld [vmem:[#allocation9 + $0xc78] sm:$0xff]  ;;  %v4822_v38 = vpack.c.bf16 %v2437_v26, %v2433_v50 }
 0x2ff   :  { %v2404_v15 = vld [vmem:[#allocation9 + $0xbb0] sm:$0xff]  ;;  %v2465_v59 = vld [vmem:[#allocation9 + $0xd98] sm:$0xff] }
 0x300   :  { %4765 = vmatpush1.bf16.msra.mxu1 %v4764_v49  ;;  %v4788_v49 = vpack.c.bf16 %v2364_v31, %v2360_v56  ;;  %v4808_v16 = vpack.c.bf16 %v2404_v15, %v2400_v14  ;;  %v2408_v4 = vld [vmem:[#allocation9 + $0xbd0] sm:$0xff]  ;;  %v2441_v56 = vld [vmem:[#allocation9 + $0xcd8] sm:$0xff]  ;;  %v3136_v15 = vld [vmem:[#allocation12] sm:$0xff] }
 0x301   :  { %4767 = vmatprep.subr.bf16.mxu1 %v4766_v57  ;;  %4609 = vmatpush1.bf16.msra.mxu0 %v4608_v33  ;;  %v4790_v57 = vpack.c.bf16 %v2373_v0, %v2369_v35  ;;  %v2381_v33 = vld [vmem:[#allocation9 + $0xaf8] sm:$0xff]  ;;  %v2412_v41 = vld [vmem:[#allocation9 + $0xbf0] sm:$0xff] }
 0x302   :  { %4611 = vmatprep.subr.bf16.mxu0 %v4610_v5  ;;  %v4794_v5 = vpack.c.bf16 %v2381_v33, %v2377_v32  ;;  %v2416_v22 = vld [vmem:[#allocation9 + $0xc10] sm:$0xff]  ;;  %v2445_v31 = vld [vmem:[#allocation9 + $0xcf8] sm:$0xff] }
 0x303   :  { %v2420_v54 = vld [vmem:[#allocation9 + $0xc30] sm:$0xff]  ;;  %v4826_v0 = vpack.c.bf16 %v2445_v31, %v2441_v56  ;;  %v2469_v60 = vld [vmem:[#allocation9 + $0xdb8] sm:$0xff]  ;;  %v3144_v31 = vld [vmem:[#allocation12 + $0x40] sm:$0xff] }
 0x304   :  { %4769 = vmatpush1.bf16.msra.mxu1 %v4768_v17  ;;  %v4796_v17 = vpack.c.bf16 %v2380_v3, %v2376_v58  ;;  %v4816_v19 = vpack.c.bf16 %v2420_v54, %v2416_v22  ;;  %v2452_v33 = vld [vmem:[#allocation9 + $0xd30] sm:$0xff]  ;;  %v1123_v58 = vsub.s32 6, %v5524_v11  ;;  %v2477_v14 = vld [vmem:[#allocation9 + $0xdf8] sm:$0xff] }
 0x305   :  { %4771 = vmatprep.subr.bf16.mxu1 %v4770_v6  ;;  %4613 = vmatpush1.bf16.msra.mxu0 %v4612_v52  ;;  %v4798_v6 = vpack.c.bf16 %v2389_v48, %v2385_v43  ;;  %v2397_v52 = vld [vmem:[#allocation9 + $0xb78] sm:$0xff]  ;;  %v1127_v43 = vsub.s32 7, %v5524_v11  ;;  %v2480_v26 = vld [vmem:[#allocation9 + $0xe10] sm:$0xff]  ;;  %v3433_v11 = vld [vmem:[%s5930_s7 + $0x68] sm:$0xff] }
 0x306   :  { %4615 = vmatprep.subr.bf16.mxu0 %v4614_v63  ;;  %v4802_v63 = vpack.c.bf16 %v2397_v52, %v2393_v51  ;;  %v1124_v51 = vrot.slane %v5767_v29, %v1123_v58  ;;  %v2488_v45 = vld [vmem:[#allocation9 + $0xe50] sm:$0xff] }
 0x307   :  { %v1128_v52 = vrot.slane %v5767_v29, %v1127_v43  ;;  %v2472_v29 = vld [vmem:[#allocation9 + $0xdd0] sm:$0xff] }
 0x308   :  { %4773 = vmatpush1.bf16.msra.mxu1 %v4772_v9  ;;  %v4804_v9 = vpack.c.bf16 %v2396_v2, %v2392_v1  ;;  %v2464_v1 = vld [vmem:[#allocation9 + $0xd90] sm:$0xff] }
 0x309   :  { %4775 = vmatprep.subr.bf16.mxu1 %v4774_v13  ;;  %4617 = vmatpush1.bf16.msra.mxu0 %v4616_v62  ;;  %v4806_v13 = vpack.c.bf16 %v2405_v46, %v2401_v42  ;;  %v2413_v62 = vld [vmem:[#allocation9 + $0xbf8] sm:$0xff]  ;;  %v2468_v2 = vld [vmem:[#allocation9 + $0xdb0] sm:$0xff] }
 0x30a   :  { %4619 = vmatprep.subr.bf16.mxu0 %v4618_v18  ;;  %v4810_v18 = vpack.c.bf16 %v2413_v62, %v2409_v47  ;;  %v2473_v46 = vld [vmem:[#allocation9 + $0xdd8] sm:$0xff]  ;;  %v3153_v43 = vld [vmem:[#allocation12 + $0x88] sm:$0xff] }
 0x30b   :  { %v3138_v47 = vld [vmem:[#allocation12 + $0x10] sm:$0xff] }
 0x30c   :  { %4777 = vmatpush1.bf16.msra.mxu1 %v4776_v23  ;;  %v4812_v23 = vpack.c.bf16 %v2412_v41, %v2408_v4  ;;  %v3143_v4 = vld [vmem:[#allocation12 + $0x38] sm:$0xff]  ;;  %v2476_v41 = vld [vmem:[#allocation9 + $0xdf0] sm:$0xff]  ;;  %v4880_v22 = vpack.c.bf16 %v3138_v47, %v3136_v15 }
 0x30d   :  { %4779 = vmatprep.subr.bf16.mxu1 %v4778_v24  ;;  %4621 = vmatpush1.bf16.msra.mxu0 %v4620_v21  ;;  %v4814_v24 = vpack.c.bf16 %v2421_v20, %v2417_v53  ;;  %v2425_v21 = vld [vmem:[#allocation9 + $0xc58] sm:$0xff]  ;;  %v4842_v20 = vpack.c.bf16 %v2477_v14, %v2473_v46  ;;  %v2504_v14 = vld [vmem:[#allocation9 + $0xed0] sm:$0xff] }
 0x30e   :  { %4879 = vmatprep.subr.bf16.mxu0 %v4878_v27  ;;  %v4818_v27 = vpack.c.bf16 %v2429_v10, %v2425_v21  ;;  %v3140_v10 = vld [vmem:[#allocation12 + $0x20] sm:$0xff]  ;;  %v3150_v58 = vld [vmem:[#allocation12 + $0x70] sm:$0xff]  ;;  %v3159_v46 = vld [vmem:[#allocation12 + $0xb8] sm:$0xff] }
 0x30f   :  { %v2508_v15 = vld [vmem:[#allocation9 + $0xef0] sm:$0xff]  ;;  %v2513_v47 = vld [vmem:[#allocation9 + $0xf18] sm:$0xff] }
 0x310   :  { %4781 = vmatpush1.bf16.msra.mxu1 %v4780_v25  ;;  %v2424_v25 = vld [vmem:[#allocation9 + $0xc50] sm:$0xff] }
 0x311   :  { %4783 = vmatprep.subr.bf16.mxu1 %v4782_v44  ;;  %v2428_v44 = vld [vmem:[#allocation9 + $0xc70] sm:$0xff] }
 0x312   :  { %v4820_v55 = vpack.c.bf16 %v2428_v44, %v2424_v25  ;;  %v3145_v25 = vld [vmem:[#allocation12 + $0x48] sm:$0xff]  ;;  %v3147_v44 = vld [vmem:[#allocation12 + $0x58] sm:$0xff] }
 0x313   :  { %v4886_v56 = vpack.c.bf16 %v3147_v44, %v3145_v25  ;;  %v3160_v25 = vld [vmem:[#allocation12 + $0xc0] sm:$0xff]  ;;  %v3162_v44 = vld [vmem:[#allocation12 + $0xd0] sm:$0xff] }
 0x314   :  { %4785 = vmatpush1.bf16.msra.mxu1 %v4784_v28  ;;  %v2432_v28 = vld [vmem:[#allocation9 + $0xc90] sm:$0xff] }
 0x315   :  { %4787 = vmatprep.subr.bf16.mxu1 %v4786_v30  ;;  %v2436_v30 = vld [vmem:[#allocation9 + $0xcb0] sm:$0xff] }
 0x316   :  { %v4824_v35 = vpack.c.bf16 %v2436_v30, %v2432_v28  ;;  %v2493_v28 = vld [vmem:[#allocation9 + $0xe78] sm:$0xff] }
 0x318   :  { %4789 = vmatpush1.bf16.msra.mxu1 %v4788_v49  ;;  %v2440_v49 = vld [vmem:[#allocation9 + $0xcd0] sm:$0xff] }
 0x319   :  { %4791 = vmatprep.subr.bf16.mxu1 %v4790_v57  ;;  %v2444_v57 = vld [vmem:[#allocation9 + $0xcf0] sm:$0xff] }
 0x31a   :  { %v4828_v32 = vpack.c.bf16 %v2444_v57, %v2440_v49  ;;  %v3149_v49 = vld [vmem:[#allocation12 + $0x68] sm:$0xff]  ;;  %v3151_v57 = vld [vmem:[#allocation12 + $0x78] sm:$0xff] }
 0x31c   :  { %4793 = vmatpush1.bf16.msra.mxu1 %v4792_v36  ;;  %v2457_v36 = vld [vmem:[#allocation9 + $0xd58] sm:$0xff] }
 0x31d   :  { %4795 = vmatprep.subr.bf16.mxu1 %v4794_v5  ;;  %v2461_v5 = vld [vmem:[#allocation9 + $0xd78] sm:$0xff] }
 0x31e   :  { %v4834_v48 = vpack.c.bf16 %v2461_v5, %v2457_v36  ;;  %v4890_v36 = vpack.c.bf16 %v3151_v57, %v3149_v49  ;;  %v3148_v5 = vld [vmem:[#allocation12 + $0x60] sm:$0xff]  ;;  %v3166_v57 = vld [vmem:[#allocation12 + $0xf0] sm:$0xff] }
 0x31f   :  { %v3164_v49 = vld [vmem:[#allocation12 + $0xe0] sm:$0xff] }
 0x320   :  { %4797 = vmatpush1.bf16.msra.mxu1 %v4796_v17  ;;  %v2456_v17 = vld [vmem:[#allocation9 + $0xd50] sm:$0xff] }
 0x321   :  { %4799 = vmatprep.subr.bf16.mxu1 %v4798_v6  ;;  %v2460_v6 = vld [vmem:[#allocation9 + $0xd70] sm:$0xff] }
 0x324   :  { %4801 = vmatpush1.bf16.msra.mxu1 %v4800_v61  ;;  %v4836_v61 = vpack.c.bf16 %v2460_v6, %v2456_v17  ;;  %v2496_v6 = vld [vmem:[#allocation9 + $0xe90] sm:$0xff] }
 0x325   :  { %4803 = vmatprep.subr.bf16.mxu1 %v4802_v63  ;;  %v4838_v63 = vpack.c.bf16 %v2469_v60, %v2465_v59  ;;  %v2500_v59 = vld [vmem:[#allocation9 + $0xeb0] sm:$0xff]  ;;  %v2505_v60 = vld [vmem:[#allocation9 + $0xed8] sm:$0xff] }
 0x328   :  { %4805 = vmatpush1.bf16.msra.mxu1 %v4804_v9 }
 0x329   :  { %4807 = vmatprep.subr.bf16.mxu1 %v4806_v13 }
 0x32c   :  { %4809 = vmatpush1.bf16.msra.mxu1 %v4808_v16  ;;  %v4840_v16 = vpack.c.bf16 %v2468_v2, %v2464_v1  ;;  %v3154_v1 = vld [vmem:[#allocation12 + $0x90] sm:$0xff]  ;;  %v4856_v2 = vpack.c.bf16 %v2500_v59, %v2496_v6  ;;  %v3173_v6 = vld [vmem:[#allocation12 + $0x128] sm:$0xff]  ;;  %v3175_v59 = vld [vmem:[#allocation12 + $0x138] sm:$0xff] }
 0x32d   :  { %4811 = vmatprep.subr.bf16.mxu1 %v4810_v18  ;;  %v3141_v18 = vld [vmem:[#allocation12 + $0x28] sm:$0xff] }
 0x32e   :  { %v4882_v21 = vpack.c.bf16 %v3143_v4, %v3141_v18  ;;  %v3156_v4 = vld [vmem:[#allocation12 + $0xa0] sm:$0xff] }
 0x330   :  { %4813 = vmatpush1.bf16.msra.mxu1 %v4812_v23  ;;  %v2481_v23 = vld [vmem:[#allocation9 + $0xe18] sm:$0xff] }
 0x331   :  { %4815 = vmatprep.subr.bf16.mxu1 %v4814_v24  ;;  %v2485_v24 = vld [vmem:[#allocation9 + $0xe38] sm:$0xff] }
 0x332   :  { %v4846_v50 = vpack.c.bf16 %v2485_v24, %v2481_v23  ;;  %v2512_v24 = vld [vmem:[#allocation9 + $0xf10] sm:$0xff] }
 0x333   :  { %3055 = vmatmul.mubr.f32.vlgmr.msra.gmra.mrb[6].mxu1 %v2026_v40  ;;  %v2448_v40 = vld [vmem:[#allocation9 + $0xd10] sm:$0xff] }
 0x334   :  { %4817 = vmatpush1.bf16.msra.mxu1 %v4816_v19  ;;  %v4832_v3 = vpack.c.bf16 %v2452_v33, %v2448_v40  ;;  %v3142_v19 = vld [vmem:[#allocation12 + $0x30] sm:$0xff] }
 0x335   :  { %4819 = vmatprep.subr.bf16.mxu1 %v4818_v27  ;;  %v4844_v27 = vpack.c.bf16 %v2476_v41, %v2472_v29  ;;  %v4884_v30 = vpack.c.bf16 %v3142_v19, %v3140_v10  ;;  %v2501_v40 = vld [vmem:[#allocation9 + $0xeb8] sm:$0xff]  ;;  %v4860_v41 = vpack.c.bf16 %v2508_v15, %v2504_v14 }
 0x336   :  { %v3158_v29 = vld [vmem:[#allocation12 + $0xb0] sm:$0xff] }
 0x337   :  { %v2525_v10 = vld [vmem:[#allocation9 + $0xf78] sm:$0xff]  ;;  %v4900_v19 = vpack.c.bf16 %v3158_v29, %v3156_v4 }
 0x338   :  { %4821 = vmatpush1.bf16.msra.mxu1 %v4820_v55  ;;  %v2484_v55 = vld [vmem:[#allocation9 + $0xe30] sm:$0xff] }
 0x339   :  { %4823 = vmatprep.subr.bf16.mxu1 %v4822_v38  ;;  %v2489_v38 = vld [vmem:[#allocation9 + $0xe58] sm:$0xff] }
 0x33a   :  { %v4850_v39 = vpack.c.bf16 %v2493_v28, %v2489_v38  ;;  %v2520_v28 = vld [vmem:[#allocation9 + $0xf50] sm:$0xff] }
 0x33c   :  { %4825 = vmatpush1.bf16.msra.mxu1 %v4824_v35  ;;  %v3146_v35 = vld [vmem:[#allocation12 + $0x50] sm:$0xff] }
 0x33d   :  { %4827 = vmatprep.subr.bf16.mxu1 %v4826_v0  ;;  %v4848_v0 = vpack.c.bf16 %v2484_v55, %v2480_v26  ;;  %v4888_v33 = vpack.c.bf16 %v3146_v35, %v3144_v31  ;;  %v3165_v26 = vld [vmem:[#allocation12 + $0xe8] sm:$0xff]  ;;  %v3167_v55 = vld [vmem:[#allocation12 + $0xf8] sm:$0xff]  ;;  %v4904_v35 = vpack.c.bf16 %v3162_v44, %v3160_v25 }
 0x33e   :  { %v2533_v31 = vld [vmem:[#allocation9 + $0xfb8] sm:$0xff] }
 0x340   :  { %4829 = vmatpush1.bf16.msra.mxu1 %v4828_v32  ;;  %v2492_v32 = vld [vmem:[#allocation9 + $0xe70] sm:$0xff] }
 0x341   :  { %4831 = vmatprep.subr.bf16.mxu1 %v4830_v37  ;;  %v2497_v37 = vld [vmem:[#allocation9 + $0xe98] sm:$0xff] }
 0x342   :  { %v4854_v17 = vpack.c.bf16 %v2501_v40, %v2497_v37  ;;  %v2528_v40 = vld [vmem:[#allocation9 + $0xf90] sm:$0xff] }
 0x344   :  { %4833 = vmatpush1.bf16.msra.mxu1 %v4832_v3  ;;  %v4852_v3 = vpack.c.bf16 %v2492_v32, %v2488_v45  ;;  %v3169_v45 = vld [vmem:[#allocation12 + $0x108] sm:$0xff]  ;;  %v3171_v32 = vld [vmem:[#allocation12 + $0x118] sm:$0xff] }
 0x345   :  { %4835 = vmatprep.subr.bf16.mxu1 %v4834_v48  ;;  %v3155_v48 = vld [vmem:[#allocation12 + $0x98] sm:$0xff] }
 0x346   :  { %v2017_v42 = vpop.f32.mrb[4].mxu1 }
 0x347   :  { %v5791_v9 = vadd.f32 %v2017_v42, %v1124_v51  ;;  %v2019_v13 = vpop.f32.mrb[5].mxu1  ;;  %v2509_v51 = vld [vmem:[#allocation9 + $0xef8] sm:$0xff]  ;;  %v3157_v42 = vld [vmem:[#allocation12 + $0xa8] sm:$0xff] }
 0x348   :  { %v5047_v62 = vadd.f32 %v2019_v13, %v1128_v52  ;;  %4837 = vmatpush1.bf16.msra.mxu1 %v4836_v61  ;;  %v4892_v52 = vpack.c.bf16 %v3150_v58, %v3148_v5  ;;  %v4894_v61 = vpack.c.bf16 %v3155_v48, %v3153_v43  ;;  %v4858_v13 = vpack.c.bf16 %v2509_v51, %v2505_v60  ;;  %v2541_v5 = vld [vmem:[#allocation9 + $0xff8] sm:$0xff]  ;;  %v3168_v43 = vld [vmem:[#allocation12 + $0x100] sm:$0xff]  ;;  %v2536_v51 = vld [vmem:[#allocation9 + $0xfd0] sm:$0xff] }
 0x349   :  { %4839 = vmatprep.subr.bf16.mxu1 %v4838_v63  ;;  %v2028_v54 = vmax.f32 %v5791_v9, 0.0  ;;  %v3152_v63 = vld [vmem:[#allocation12 + $0x80] sm:$0xff]  ;;  %v4898_v18 = vpack.c.bf16 %v3159_v46, %v3157_v42  ;;  %v4908_v58 = vpack.c.bf16 %v3166_v57, %v3164_v49  ;;  %v3170_v48 = vld [vmem:[#allocation12 + $0x110] sm:$0xff]  ;;  %v3177_v46 = vld [vmem:[#allocation12 + $0x148] sm:$0xff] }
 0x34a   :  { %v2029_v53 = vmax.f32 %v5047_v62, 0.0  ;;  %v2517_v62 = vld [vmem:[#allocation9 + $0xf38] sm:$0xff]  ;;  %v3188_v9 = vld [vmem:[#allocation12 + $0x1a0] sm:$0xff] }
 0x34b   :  { %v4862_v23 = vpack.c.bf16 %v2517_v62, %v2513_v47  ;;  %v3176_v47 = vld [vmem:[#allocation12 + $0x140] sm:$0xff]  ;;  %v3178_v62 = vld [vmem:[#allocation12 + $0x150] sm:$0xff] }
 0x34c   :  { %2841 = vmatprep.mubr.f32.mxu0 %v2029_v53  ;;  %4841 = vmatpush1.bf16.msra.mxu1 %v4840_v16  ;;  %v4896_v16 = vpack.c.bf16 %v3154_v1, %v3152_v63  ;;  %v4914_v63 = vpack.c.bf16 %v3175_v59, %v3173_v6  ;;  %v3172_v1 = vld [vmem:[#allocation12 + $0x120] sm:$0xff]  ;;  %v4920_v4 = vpack.c.bf16 %v3178_v62, %v3176_v47  ;;  %v3198_v57 = vld [vmem:[#allocation12 + $0x1f0] sm:$0xff]  ;;  %v3422_v6 = vld [vmem:[%s5930_s7 + $0x10] sm:$0xff] }
 0x34d   :  { %3125 = vmatprep.mubr.f32.mxu1 %v2029_v53  ;;  %2842 = vmatmul.mubr.f32.vlgmr.msra.gmra.mrb[4].mxu0 %v2028_v54  ;;  %v3161_v53 = vld [vmem:[#allocation12 + $0xc8] sm:$0xff]  ;;  %v3196_v49 = vld [vmem:[#allocation12 + $0x1e0] sm:$0xff]  ;;  %v3423_v59 = vld [vmem:[%s5930_s7 + $0x18] sm:$0xff] }
 0x34e   :  { %4843 = vmatprep.subr.bf16.mxu1 %v4842_v20  ;;  %4881 = vmatpush1.bf16.msra.mxu0 %v4880_v22  ;;  %v3163_v20 = vld [vmem:[#allocation12 + $0xd8] sm:$0xff]  ;;  %v2516_v22 = vld [vmem:[#allocation9 + $0xf30] sm:$0xff]  ;;  %v3445_v62 = vld [vmem:[%s5930_s7 + $0xc8] sm:$0xff] }
 0x34f   :  { %4883 = vmatprep.subr.bf16.mxu0 %v4882_v21  ;;  %v2521_v21 = vld [vmem:[#allocation9 + $0xf58] sm:$0xff] }
 0x350   :  { %4845 = vmatpush1.bf16.msra.mxu1 %v4844_v27  ;;  %v4902_v27 = vpack.c.bf16 %v3163_v20, %v3161_v53  ;;  %v4866_v38 = vpack.c.bf16 %v2525_v10, %v2521_v21  ;;  %v3182_v53 = vld [vmem:[#allocation12 + $0x170] sm:$0xff]  ;;  %v3185_v20 = vld [vmem:[#allocation12 + $0x188] sm:$0xff]  ;;  %v3184_v21 = vld [vmem:[#allocation12 + $0x180] sm:$0xff] }
 0x351   :  { %4847 = vmatprep.subr.bf16.mxu1 %v4846_v50  ;;  %v4864_v50 = vpack.c.bf16 %v2516_v22, %v2512_v24  ;;  %v3186_v10 = vld [vmem:[#allocation12 + $0x190] sm:$0xff]  ;;  %v3444_v47 = vld [vmem:[%s5930_s7 + $0xc0] sm:$0xff] }
 0x352   :  { %4885 = vmatpush1.bf16.msra.mxu0 %v4884_v30  ;;  %v2524_v30 = vld [vmem:[#allocation9 + $0xf70] sm:$0xff]  ;;  %v4928_v25 = vpack.c.bf16 %v3186_v10, %v3184_v21  ;;  %v3448_v21 = vld [vmem:[%s5930_s7 + $0xe0] sm:$0xff]  ;;  %v3449_v10 = vld [vmem:[%s5930_s7 + $0xe8] sm:$0xff] }
 0x353   :  { %4887 = vmatprep.subr.bf16.mxu0 %v4886_v56  ;;  %v2529_v56 = vld [vmem:[#allocation9 + $0xf98] sm:$0xff] }
 0x354   :  { %4849 = vmatpush1.bf16.msra.mxu1 %v4848_v0  ;;  %v4906_v0 = vpack.c.bf16 %v3167_v55, %v3165_v26  ;;  %v4870_v37 = vpack.c.bf16 %v2533_v31, %v2529_v56  ;;  %v3195_v26 = vld [vmem:[#allocation12 + $0x1d8] sm:$0xff]  ;;  %v3197_v31 = vld [vmem:[#allocation12 + $0x1e8] sm:$0xff] }
 0x355   :  { %4851 = vmatprep.subr.bf16.mxu1 %v4850_v39  ;;  %v4868_v39 = vpack.c.bf16 %v2524_v30, %v2520_v28  ;;  %v3192_v28 = vld [vmem:[#allocation12 + $0x1c0] sm:$0xff]  ;;  %v3194_v30 = vld [vmem:[#allocation12 + $0x1d0] sm:$0xff] }
 0x356   :  { %4889 = vmatpush1.bf16.msra.mxu0 %v4888_v33  ;;  %v2532_v33 = vld [vmem:[#allocation9 + $0xfb0] sm:$0xff]  ;;  %v4936_v56 = vpack.c.bf16 %v3194_v30, %v3192_v28 }
 0x357   :  { %4891 = vmatprep.subr.bf16.mxu0 %v4890_v36  ;;  %v2537_v36 = vld [vmem:[#allocation9 + $0xfd8] sm:$0xff]  ;;  %v3205_v30 = vld [vmem:[#allocation12 + $0x228] sm:$0xff] }
 0x358   :  { %4853 = vmatpush1.bf16.msra.mxu1 %v4852_v3  ;;  %v4910_v3 = vpack.c.bf16 %v3171_v32, %v3169_v45  ;;  %v4874_v60 = vpack.c.bf16 %v2541_v5, %v2537_v36  ;;  %v3201_v45 = vld [vmem:[#allocation12 + $0x208] sm:$0xff]  ;;  %v3203_v32 = vld [vmem:[#allocation12 + $0x218] sm:$0xff] }
 0x359   :  { %4855 = vmatprep.subr.bf16.mxu1 %v4854_v17  ;;  %v4872_v17 = vpack.c.bf16 %v2532_v33, %v2528_v40  ;;  %v3436_v40 = vld [vmem:[%s5930_s7 + $0x80] sm:$0xff]  ;;  %v3437_v33 = vld [vmem:[%s5930_s7 + $0x88] sm:$0xff] }
 0x35a   :  { %4893 = vmatpush1.bf16.msra.mxu0 %v4892_v52  ;;  %v2540_v52 = vld [vmem:[#allocation9 + $0xff0] sm:$0xff]  ;;  %v3420_v36 = vld [vmem:[%s5930_s7] sm:$0xff]  ;;  %v5006_v5 = vpack.c.bf16 %v3437_v33, %v3436_v40  ;;  %v3208_v33 = vld [vmem:[#allocation12 + $0x240] sm:$0xff] }
 0x35b   :  { %4895 = vmatprep.subr.bf16.mxu0 %v4894_v61  ;;  %v4912_v61 = vpack.c.bf16 %v3170_v48, %v3168_v43  ;;  %v4876_v42 = vpack.c.bf16 %v2540_v52, %v2536_v51  ;;  %v3439_v43 = vld [vmem:[%s5930_s7 + $0x98] sm:$0xff]  ;;  %v3441_v51 = vld [vmem:[%s5930_s7 + $0xa8] sm:$0xff]  ;;  %v5012_v52 = vpack.c.bf16 %v3423_v59, %v3422_v6  ;;  %v3217_v6 = vld [vmem:[#allocation12 + $0x288] sm:$0xff] }
 0x35c   :  { %4857 = vmatpush1.bf16.msra.mxu1 %v4856_v2  ;;  %v3174_v2 = vld [vmem:[#allocation12 + $0x130] sm:$0xff]  ;;  %v3219_v59 = vld [vmem:[#allocation12 + $0x298] sm:$0xff] }
 0x35d   :  { %4859 = vmatprep.subr.bf16.mxu1 %v4858_v13  ;;  %v3179_v13 = vld [vmem:[#allocation12 + $0x158] sm:$0xff]  ;;  %v4916_v14 = vpack.c.bf16 %v3174_v2, %v3172_v1  ;;  %v3425_v1 = vld [vmem:[%s5930_s7 + $0x28] sm:$0xff]  ;;  %v3442_v2 = vld [vmem:[%s5930_s7 + $0xb0] sm:$0xff] }
 0x35e   :  { %4897 = vmatpush1.bf16.msra.mxu0 %v4896_v16  ;;  %v4918_v15 = vpack.c.bf16 %v3179_v13, %v3177_v46  ;;  %v3181_v16 = vld [vmem:[#allocation12 + $0x168] sm:$0xff] }
 0x35f   :  { %4899 = vmatprep.subr.bf16.mxu0 %v4898_v18  ;;  %v3183_v18 = vld [vmem:[#allocation12 + $0x178] sm:$0xff] }
 0x360   :  { %4861 = vmatpush1.bf16.msra.mxu1 %v4860_v41  ;;  %v4922_v29 = vpack.c.bf16 %v3183_v18, %v3181_v16  ;;  %v3180_v41 = vld [vmem:[#allocation12 + $0x160] sm:$0xff]  ;;  %v5022_v18 = vpack.c.bf16 %v3445_v62, %v3444_v47 }
 0x361   :  { %4863 = vmatprep.subr.bf16.mxu1 %v4862_v23  ;;  %v3187_v23 = vld [vmem:[#allocation12 + $0x198] sm:$0xff]  ;;  %v4924_v24 = vpack.c.bf16 %v3182_v53, %v3180_v41  ;;  %v3446_v41 = vld [vmem:[%s5930_s7 + $0xd0] sm:$0xff]  ;;  %v3447_v53 = vld [vmem:[%s5930_s7 + $0xd8] sm:$0xff] }
 0x362   :  { %4901 = vmatpush1.bf16.msra.mxu0 %v4900_v19  ;;  %v4926_v22 = vpack.c.bf16 %v3187_v23, %v3185_v20  ;;  %v3189_v19 = vld [vmem:[#allocation12 + $0x1a8] sm:$0xff]  ;;  %v5026_v23 = vpack.c.bf16 %v3447_v53, %v3446_v41 }
 0x363   :  { %4903 = vmatprep.subr.bf16.mxu0 %v4902_v27  ;;  %v3191_v27 = vld [vmem:[#allocation12 + $0x1b8] sm:$0xff] }
 0x364   :  { %4865 = vmatpush1.bf16.msra.mxu1 %v4864_v50  ;;  %v4930_v44 = vpack.c.bf16 %v3191_v27, %v3189_v19  ;;  %v3193_v50 = vld [vmem:[#allocation12 + $0x1c8] sm:$0xff]  ;;  %v5030_v27 = vpack.c.bf16 %v3449_v10, %v3448_v21 }
 0x365   :  { %4867 = vmatprep.subr.bf16.mxu1 %v4866_v38  ;;  %v4934_v38 = vpack.c.bf16 %v3195_v26, %v3193_v50 }
 0x366   :  { %4905 = vmatpush1.bf16.msra.mxu0 %v4904_v35  ;;  %v3199_v35 = vld [vmem:[#allocation12 + $0x1f8] sm:$0xff] }
 0x367   :  { %4907 = vmatprep.subr.bf16.mxu0 %v4906_v0  ;;  %v4938_v0 = vpack.c.bf16 %v3199_v35, %v3197_v31 }
 0x368   :  { %4869 = vmatpush1.bf16.msra.mxu1 %v4868_v39  ;;  %v4940_v39 = vpack.c.bf16 %v3198_v57, %v3196_v49  ;;  %v3204_v57 = vld [vmem:[#allocation12 + $0x220] sm:$0xff] }
 0x369   :  { %4871 = vmatprep.subr.bf16.mxu1 %v4870_v37  ;;  %v4942_v37 = vpack.c.bf16 %v3203_v32, %v3201_v45  ;;  %v3209_v45 = vld [vmem:[#allocation12 + $0x248] sm:$0xff]  ;;  %v3211_v32 = vld [vmem:[#allocation12 + $0x258] sm:$0xff] }
 0x36a   :  { %4909 = vmatpush1.bf16.msra.mxu0 %v4908_v58  ;;  %v3421_v58 = vld [vmem:[%s5930_s7 + $0x8] sm:$0xff]  ;;  %v4950_v40 = vpack.c.bf16 %v3211_v32, %v3209_v45  ;;  %v3245_v32 = vld [vmem:[#allocation12 + $0x368] sm:$0xff] }
 0x36b   :  { %4911 = vmatprep.subr.bf16.mxu0 %v4910_v3  ;;  %v3438_v3 = vld [vmem:[%s5930_s7 + $0x90] sm:$0xff]  ;;  %v5008_v48 = vpack.c.bf16 %v3421_v58, %v3420_v36  ;;  %v3210_v36 = vld [vmem:[#allocation12 + $0x250] sm:$0xff]  ;;  %v3215_v58 = vld [vmem:[#allocation12 + $0x278] sm:$0xff] }
 0x36c   :  { %4873 = vmatpush1.bf16.msra.mxu1 %v4872_v17  ;;  %v5010_v17 = vpack.c.bf16 %v3439_v43, %v3438_v3  ;;  %v4952_v3 = vpack.c.bf16 %v3210_v36, %v3208_v33  ;;  %v3244_v33 = vld [vmem:[#allocation12 + $0x360] sm:$0xff]  ;;  %v3246_v36 = vld [vmem:[#allocation12 + $0x370] sm:$0xff] }
 0x36d   :  { %4875 = vmatprep.subr.bf16.mxu1 %v4874_v60  ;;  %v3440_v60 = vld [vmem:[%s5930_s7 + $0xa0] sm:$0xff] }
 0x36e   :  { %4913 = vmatpush1.bf16.msra.mxu0 %v4912_v61  ;;  %v5014_v61 = vpack.c.bf16 %v3441_v51, %v3440_v60  ;;  %v4958_v51 = vpack.c.bf16 %v3219_v59, %v3217_v6  ;;  %v3253_v6 = vld [vmem:[#allocation12 + $0x3a8] sm:$0xff]  ;;  %v3255_v59 = vld [vmem:[#allocation12 + $0x3b8] sm:$0xff] }
 0x36f   :  { %4915 = vmatprep.subr.bf16.mxu0 %v4914_v63  ;;  %v3424_v63 = vld [vmem:[%s5930_s7 + $0x20] sm:$0xff] }
 0x370   :  { %4877 = vmatpush1.bf16.msra.mxu1 %v4876_v42  ;;  %v3443_v42 = vld [vmem:[%s5930_s7 + $0xb8] sm:$0xff]  ;;  %v5016_v46 = vpack.c.bf16 %v3425_v1, %v3424_v63  ;;  %v3221_v63 = vld [vmem:[#allocation12 + $0x2a8] sm:$0xff]  ;;  %v3223_v1 = vld [vmem:[#allocation12 + $0x2b8] sm:$0xff] }
 0x371   :  { %5007 = vmatprep.subr.bf16.mxu1 %v5006_v5  ;;  %v5018_v13 = vpack.c.bf16 %v3443_v42, %v3442_v2  ;;  %v3213_v5 = vld [vmem:[#allocation12 + $0x268] sm:$0xff]  ;;  %v4962_v42 = vpack.c.bf16 %v3223_v1, %v3221_v63  ;;  %v3259_v1 = vld [vmem:[#allocation12 + $0x3d8] sm:$0xff] }
 0x372   :  { %4917 = vmatpush1.bf16.msra.mxu0 %v4916_v14  ;;  %v3426_v14 = vld [vmem:[%s5930_s7 + $0x30] sm:$0xff]  ;;  %v4954_v43 = vpack.c.bf16 %v3215_v58, %v3213_v5  ;;  %v3251_v58 = vld [vmem:[#allocation12 + $0x398] sm:$0xff] }
 0x373   :  { %3126 = vmatmul.mubr.f32.vlgmr.msra.gmra.mrb[6].mxu1 %v2028_v54  ;;  %4919 = vmatprep.subr.bf16.mxu0 %v4918_v15  ;;  %v3190_v54 = vld [vmem:[#allocation12 + $0x1b0] sm:$0xff]  ;;  %v3249_v5 = vld [vmem:[#allocation12 + $0x388] sm:$0xff] }
 0x374   :  { %v4932_v55 = vpack.c.bf16 %v3190_v54, %v3188_v9  ;;  %5009 = vmatpush3.bf16.msra.mxu1 %v5008_v48  ;;  %v3427_v15 = vld [vmem:[%s5930_s7 + $0x38] sm:$0xff]  ;;  %v3212_v48 = vld [vmem:[#allocation12 + $0x260] sm:$0xff]  ;;  %v3257_v63 = vld [vmem:[#allocation12 + $0x3c8] sm:$0xff] }
 0x375   :  { %5011 = vmatprep.subr.bf16.mxu1 %v5010_v17  ;;  %v5020_v16 = vpack.c.bf16 %v3427_v15, %v3426_v14  ;;  %v3214_v17 = vld [vmem:[#allocation12 + $0x270] sm:$0xff]  ;;  %v3225_v14 = vld [vmem:[#allocation12 + $0x2c8] sm:$0xff]  ;;  %v3227_v15 = vld [vmem:[#allocation12 + $0x2d8] sm:$0xff] }
 0x376   :  { %4921 = vmatpush1.bf16.msra.mxu0 %v4920_v4  ;;  %v3428_v4 = vld [vmem:[%s5930_s7 + $0x40] sm:$0xff]  ;;  %v4956_v60 = vpack.c.bf16 %v3214_v17, %v3212_v48  ;;  %v4966_v62 = vpack.c.bf16 %v3227_v15, %v3225_v14  ;;  %v3248_v48 = vld [vmem:[#allocation12 + $0x380] sm:$0xff]  ;;  %v3250_v17 = vld [vmem:[#allocation12 + $0x390] sm:$0xff] }
 0x377   :  { %4923 = vmatprep.subr.bf16.mxu0 %v4922_v29  ;;  %v3429_v29 = vld [vmem:[%s5930_s7 + $0x48] sm:$0xff]  ;;  %v3261_v14 = vld [vmem:[#allocation12 + $0x3e8] sm:$0xff]  ;;  %v3263_v15 = vld [vmem:[#allocation12 + $0x3f8] sm:$0xff] }
 0x378   :  { %5013 = vmatpush3.bf16.msra.mxu1 %v5012_v52  ;;  %v5024_v20 = vpack.c.bf16 %v3429_v29, %v3428_v4  ;;  %v3216_v52 = vld [vmem:[#allocation12 + $0x280] sm:$0xff]  ;;  %v3229_v4 = vld [vmem:[#allocation12 + $0x2e8] sm:$0xff]  ;;  %v3231_v29 = vld [vmem:[#allocation12 + $0x2f8] sm:$0xff] }
 0x379   :  { %5015 = vmatprep.subr.bf16.mxu1 %v5014_v61  ;;  %v3218_v61 = vld [vmem:[#allocation12 + $0x290] sm:$0xff]  ;;  %v4970_v53 = vpack.c.bf16 %v3231_v29, %v3229_v4 }
 0x37a   :  { %4925 = vmatpush1.bf16.msra.mxu0 %v4924_v24  ;;  %v3430_v24 = vld [vmem:[%s5930_s7 + $0x50] sm:$0xff]  ;;  %v4960_v2 = vpack.c.bf16 %v3218_v61, %v3216_v52  ;;  %v3252_v52 = vld [vmem:[#allocation12 + $0x3a0] sm:$0xff]  ;;  %v3254_v61 = vld [vmem:[#allocation12 + $0x3b0] sm:$0xff] }
 0x37b   :  { %4927 = vmatprep.subr.bf16.mxu0 %v4926_v22  ;;  %v3431_v22 = vld [vmem:[%s5930_s7 + $0x58] sm:$0xff] }
 0x37c   :  { %5017 = vmatpush3.bf16.msra.mxu1 %v5016_v46  ;;  %v5028_v19 = vpack.c.bf16 %v3431_v22, %v3430_v24  ;;  %v3220_v46 = vld [vmem:[#allocation12 + $0x2a0] sm:$0xff]  ;;  %v3233_v24 = vld [vmem:[#allocation12 + $0x308] sm:$0xff]  ;;  %v3235_v22 = vld [vmem:[#allocation12 + $0x318] sm:$0xff] }
 0x37d   :  { %5019 = vmatprep.subr.bf16.mxu1 %v5018_v13  ;;  %v3222_v13 = vld [vmem:[#allocation12 + $0x2b0] sm:$0xff]  ;;  %v4974_v10 = vpack.c.bf16 %v3235_v22, %v3233_v24  ;;  %v3434_v22 = vld [vmem:[%s5930_s7 + $0x70] sm:$0xff] }
 0x37e   :  { %4929 = vmatpush1.bf16.msra.mxu0 %v4928_v25  ;;  %v5876_v25 = vld [vmem:[#allocation11] sm:$0xf]  ;;  %v4964_v47 = vpack.c.bf16 %v3222_v13, %v3220_v46  ;;  %v3256_v46 = vld [vmem:[#allocation12 + $0x3c0] sm:$0xff]  ;;  %v3258_v13 = vld [vmem:[#allocation12 + $0x3d0] sm:$0xff] }
 0x37f   :  { %4931 = vmatprep.subr.bf16.mxu0 %v4930_v44  ;;  %v2547_v44 = vrot.slane %v5876_v25, %v5715_v12  ;;  %v2551_v9 = vrot.slane %v5876_v25, %v5720_v7  ;;  %v3262_v4 = vld [vmem:[#allocation12 + $0x3f0] sm:$0xff] }
 0x380   :  { %5021 = vmatpush3.bf16.msra.mxu1 %v5020_v16  ;;  %v3224_v16 = vld [vmem:[#allocation12 + $0x2c0] sm:$0xff] }
 0x381   :  { %5023 = vmatprep.subr.bf16.mxu1 %v5022_v18  ;;  %v3226_v18 = vld [vmem:[#allocation12 + $0x2d0] sm:$0xff] }
 0x382   :  { %4933 = vmatpush1.bf16.msra.mxu0 %v4932_v55  ;;  %v3200_v55 = vld [vmem:[#allocation12 + $0x200] sm:$0xff]  ;;  %v4968_v41 = vpack.c.bf16 %v3226_v18, %v3224_v16  ;;  %v5002_v16 = vpack.c.bf16 %v3263_v15, %v3261_v14 }
 0x383   :  { %4935 = vmatprep.subr.bf16.mxu0 %v4934_v38  ;;  %v3202_v38 = vld [vmem:[#allocation12 + $0x210] sm:$0xff]  ;;  %v3260_v18 = vld [vmem:[#allocation12 + $0x3e0] sm:$0xff] }
 0x384   :  { %5025 = vmatpush3.bf16.msra.mxu1 %v5024_v20  ;;  %v4944_v35 = vpack.c.bf16 %v3202_v38, %v3200_v55  ;;  %v3228_v20 = vld [vmem:[#allocation12 + $0x2e0] sm:$0xff]  ;;  %v3238_v38 = vld [vmem:[#allocation12 + $0x330] sm:$0xff]  ;;  %v5004_v29 = vpack.c.bf16 %v3262_v4, %v3260_v18 }
 0x385   :  { %5027 = vmatprep.subr.bf16.mxu1 %v5026_v23  ;;  %v3230_v23 = vld [vmem:[#allocation12 + $0x2f0] sm:$0xff]  ;;  %v3236_v55 = vld [vmem:[#allocation12 + $0x320] sm:$0xff] }
 0x386   :  { %4937 = vmatpush1.bf16.msra.mxu0 %v4936_v56  ;;  %v3207_v56 = vld [vmem:[#allocation12 + $0x238] sm:$0xff]  ;;  %v4972_v21 = vpack.c.bf16 %v3230_v23, %v3228_v20  ;;  %v3451_v23 = vld [vmem:[%s5930_s7 + $0xf8] sm:$0xff] }
 0x387   :  { %4939 = vmatprep.subr.bf16.mxu0 %v4938_v0  ;;  %v4946_v49 = vpack.c.bf16 %v3207_v56, %v3205_v30  ;;  %v3241_v30 = vld [vmem:[#allocation12 + $0x348] sm:$0xff]  ;;  %v3243_v56 = vld [vmem:[#allocation12 + $0x358] sm:$0xff] }
 0x388   :  { %5029 = vmatpush3.bf16.msra.mxu1 %v5028_v19  ;;  %v3232_v19 = vld [vmem:[#allocation12 + $0x300] sm:$0xff]  ;;  %v3432_v20 = vld [vmem:[%s5930_s7 + $0x60] sm:$0xff] }
 0x389   :  { %5031 = vmatprep.subr.bf16.mxu1 %v5030_v27  ;;  %v3234_v27 = vld [vmem:[#allocation12 + $0x310] sm:$0xff] }
 0x38a   :  { %4941 = vmatpush1.bf16.msra.mxu0 %v4940_v39  ;;  %v3206_v39 = vld [vmem:[#allocation12 + $0x230] sm:$0xff] }
 0x38b   :  { %4943 = vmatprep.subr.bf16.mxu0 %v4942_v37  ;;  %v4948_v37 = vpack.c.bf16 %v3206_v39, %v3204_v57  ;;  %v3240_v57 = vld [vmem:[#allocation12 + $0x340] sm:$0xff]  ;;  %v3242_v39 = vld [vmem:[#allocation12 + $0x350] sm:$0xff] }
 0x420   :  { %v2843_v54 = vpop.f32.mrb[4].mxu0 }
 0x421   :  { %v5048_v50 = vadd.f32 %v2843_v54, %v2547_v44  ;;  %v2845_v26 = vpop.f32.mrb[5].mxu0  ;;  %v3237_v44 = vld [vmem:[#allocation12 + $0x328] sm:$0xff]  ;;  %v2559_v54 = vrot.slane %v5876_v25, %v1111_v34  ;;  %v4984_v34 = vpack.c.bf16 %v3242_v39, %v3240_v57 }
 0x422   :  { %v5049_v28 = vadd.f32 %v2845_v26, %v2551_v9  ;;  %v3239_v9 = vld [vmem:[#allocation12 + $0x338] sm:$0xff] }
 0x423   :  { %v3132_v0 = vmax.f32 %v5048_v50, 0.0  ;;  %v4976_v50 = vpack.c.bf16 %v3234_v27, %v3232_v19  ;;  %v4978_v26 = vpack.c.bf16 %v3239_v9, %v3237_v44  ;;  %v3264_v19 = vld [vmem:[#allocation14] sm:$0x3] }
 0x424   :  { %v3133_v31 = vmax.f32 %v5049_v28, 0.0  ;;  %v3269_v27 = vrot.slane %v3264_v19, %v5715_v12  ;;  %v3273_v44 = vrot.slane %v3264_v19, %v5720_v7 }
 0x426   :  { %3340 = vmatprep.mubr.f32.mxu0 %v3133_v31 }
 0x427   :  { %3341 = vmatmul.mubr.f32.vlgmr.msra.gmra.mrb[6].mxu0 %v3132_v0  ;;  %v4980_v0 = vpack.c.bf16 %v3238_v38, %v3236_v55 }
 0x428   :  { %4945 = vmatpush1.bf16.msra.mxu0 %v4944_v35 }
 0x429   :  { %4947 = vmatprep.subr.bf16.mxu0 %v4946_v49  ;;  %v4982_v49 = vpack.c.bf16 %v3243_v56, %v3241_v30  ;;  %v3562_v56 = vld [vmem:[#allocation15] ss:$0 sm:$0xff] }
 0x42c   :  { %4949 = vmatpush1.bf16.msra.mxu0 %v4948_v37  ;;  %v3247_v37 = vld [vmem:[#allocation12 + $0x378] sm:$0xff] }
 0x42d   :  { %4951 = vmatprep.subr.bf16.mxu0 %v4950_v40  ;;  %v4986_v40 = vpack.c.bf16 %v3247_v37, %v3245_v32 }
 0x430   :  { %4953 = vmatpush1.bf16.msra.mxu0 %v4952_v3  ;;  %v4988_v3 = vpack.c.bf16 %v3246_v36, %v3244_v33 }
 0x431   :  { %4955 = vmatprep.subr.bf16.mxu0 %v4954_v43  ;;  %v4990_v43 = vpack.c.bf16 %v3251_v58, %v3249_v5 }
 0x434   :  { %4957 = vmatpush1.bf16.msra.mxu0 %v4956_v60  ;;  %v4992_v60 = vpack.c.bf16 %v3250_v17, %v3248_v48 }
 0x435   :  { %4959 = vmatprep.subr.bf16.mxu0 %v4958_v51  ;;  %v4994_v51 = vpack.c.bf16 %v3255_v59, %v3253_v6 }
 0x438   :  { %4961 = vmatpush1.bf16.msra.mxu0 %v4960_v2  ;;  %v4996_v2 = vpack.c.bf16 %v3254_v61, %v3252_v52 }
 0x439   :  { %4963 = vmatprep.subr.bf16.mxu0 %v4962_v42  ;;  %v4998_v42 = vpack.c.bf16 %v3259_v1, %v3257_v63 }
 0x43c   :  { %4965 = vmatpush1.bf16.msra.mxu0 %v4964_v47  ;;  %v5000_v47 = vpack.c.bf16 %v3258_v13, %v3256_v46 }
 0x43d   :  { %4967 = vmatprep.subr.bf16.mxu0 %v4966_v62  ;;  %v2555_v62 = vrot.slane %v5876_v25, %v1107_v8  ;;  %v5032_v8 = vpack.c.bf16 %v3433_v11, %v3432_v20  ;;  %v3450_v25 = vld [vmem:[%s5930_s7 + $0xf0] sm:$0xff] }
 0x43e   :  { %v5034_v24 = vpack.c.bf16 %v3451_v23, %v3450_v25 }
 0x43f   :  { %5033 = vmatpush3.bf16.msra.mxu1 %v5032_v8 }
 0x440   :  { %4969 = vmatpush1.bf16.msra.mxu0 %v4968_v41  ;;  %5035 = vmatprep.subr.bf16.mxu1 %v5034_v24 }
 0x441   :  { %4971 = vmatprep.subr.bf16.mxu0 %v4970_v53 }
 0x444   :  { %4973 = vmatpush1.bf16.msra.mxu0 %v4972_v21  ;;  %v3435_v21 = vld [vmem:[%s5930_s7 + $0x78] sm:$0xff]  ;;  %s5334_s7 = smov [#allocation17]  }
 0x445   :  { %4975 = vmatprep.subr.bf16.mxu0 %v4974_v10  ;;  %v5036_v10 = vpack.c.bf16 %v3435_v21, %v3434_v22  ;;  %s3549_s19 = sshll.u32 %s5334_s7, 4  ;;  %s3550_s19 = int_to_ptr.vmem [resolvable:$true] %s3549_s19 }
 0x446   :  { %v3127_v28 = vpop.f32.mrb[6].mxu1  ;;  %s5282_s20 = scalar_lea.vmem %s3550_s19, 32  ;;  %p5287_p9 = scmp.lt.s32.totalorder %s3550_s19, %s3550_s19 }
 0x447   :  { %v3129_v31 = vpop.f32.mrb[7].mxu1  ;;  %v5050_v41 = vadd.f32 %v3127_v28, %v2555_v62  ;;  %5037 = vmatpush3.bf16.msra.mxu1 %v5036_v10  ;;  %p5283_p8 = scmp.ne.s32.totalorder %s3550_s19, %s5282_s20  ;;  %p5288_p10 = scmp.lt.s32.totalorder %s5282_s20, %s5282_s20 }
 0x448   :  { %v5051_v35 = vadd.f32 %v3129_v31, %v2559_v54  ;;  %4977 = vmatpush1.bf16.msra.mxu0 %v4976_v50 }
 0x449   :  { %4979 = vmatprep.subr.bf16.mxu0 %v4978_v26  ;;  %v3134_v53 = vmax.f32 %v5050_v41, 0.0  ;;  %p5289_p11 = por %p5288_p10, %p5287_p9 }
 0x44a   :  { %v3135_v45 = vmax.f32 %v5051_v35, 0.0 }
 0x44b   :  { %p5290_p12 = pnand %p5289_p11, %p5283_p8 }
 0x44c   :  { %4981 = vmatpush1.bf16.msra.mxu0 %v4980_v0  ;;  %3411 = vmatprep.mubr.f32.mxu0 %v3135_v45 }
 0x44d   :  { %4983 = vmatprep.subr.bf16.mxu0 %v4982_v49 }
 0x450   :  { %4985 = vmatpush1.bf16.msra.mxu0 %v4984_v34 }
 0x451   :  { %4987 = vmatprep.subr.bf16.mxu0 %v4986_v40 }
 0x454   :  { %4989 = vmatpush1.bf16.msra.mxu0 %v4988_v3 }
 0x455   :  { %4991 = vmatprep.subr.bf16.mxu0 %v4990_v43 }
 0x458   :  { %4993 = vmatpush1.bf16.msra.mxu0 %v4992_v60 }
 0x459   :  { %4995 = vmatprep.subr.bf16.mxu0 %v4994_v51 }
 0x45c   :  { %4997 = vmatpush1.bf16.msra.mxu0 %v4996_v2 }
 0x45d   :  { %4999 = vmatprep.subr.bf16.mxu0 %v4998_v42 }
 0x460   :  { %5001 = vmatpush1.bf16.msra.mxu0 %v5000_v47 }
 0x461   :  { %5003 = vmatprep.subr.bf16.mxu0 %v5002_v16 }
 0x464   :  { %5005 = vmatpush1.bf16.msra.mxu0 %v5004_v29 }
 0x467   :  { %3412 = vmatmul.mubr.f32.vlgmr.msra.gmra.mrb[6].mxu0 %v3134_v53 }
 0x53a   :  { %v3413_v9 = vpop.f32.mrb[6].mxu0 }
 0x53b   :  { %v5052_v54 = vadd.f32 %v3413_v9, %v3269_v27  ;;  %v3415_v50 = vpop.f32.mrb[7].mxu0 }
 0x53c   :  { %v5053_v26 = vadd.f32 %v3415_v50, %v3273_v44 }
 0x53d   :  { %v3418_v38 = vmax.f32 %v5052_v54, 0.0 }
 0x53e   :  { %v3419_v55 = vmax.f32 %v5053_v26, 0.0 }
 0x540   :  { %3523 = vmatprep.mubr.f32.mxu1 %v3419_v55 }
 0x541   :  { %3524 = vmatmul.mubr.f32.vlgmr.msra.gmra.mrb[8].mxu1 %v3418_v38 }
 0x614   :  { %v3595_v28 = vpop.f32.mrb[8].mxu1 }
 0x615   :  { %v3596_v30 = vpop.f32.mrb[9].mxu1 }
 0x616   :  { %v3597_v31 = vadd.f32 %v3596_v30, %v3595_v28 }
 0x618   :  { %v3526_v35 = vadd.f32 %v3597_v31, %v3562_v56 }
 0x61a   :  { %v3530_v0 = vsel %vm3529_vm4, %v3526_v35, -inf }
 0x61b   :  { %3531 = vmax.xlane.f32.xlu0 %v3530_v0 }
 0x6a8   :  { %v3532_v12 = vpop.xlane.xlu0 %3531 }
 0x6a9   :  { %v3533_v49 = vsub.f32 %v3526_v35, %v3532_v12 }
 0x6ab   :  { %v3534_v7 = vmul.f32 1.442695, %v3533_v49 }
 0x6ad   :  { %5101 = vpow2.f32 %v3534_v7 }
 0x6b7   :  { %v5102_v57 = vpop.eup %5101 }
 0x6b8   :  { %v3536_v39 = vsel %vm3529_vm4, %v5102_v57, 0.0 }
 0x6b9   :  { %3537 = vadd.xlane.f32.xlu0 %v3536_v39 }
 0x746   :  { %v3538_v45 = vpop.xlane.xlu0 %3537 }
 0x747   :  { %5103 = vlog2.f32 %v3538_v45 }
 0x751   :  { %v5104_v32 = vpop.eup %5103 }
 0x752   :  { %v3540_v37 = vmul.f32 0.6931472, %v5104_v32 }
 0x754   :  { %v3541_v34 = vsub.f32 %v3533_v49, %v3540_v37 }
 0x756   :  { %3542 = vst.msk [vmem:[#allocation17] sm:$0x3] %vm3529_vm4, %v3541_v34 }
 0x757   :  { %5293 = shalt.err (!%p5290_p12)
}
 0x758   :  { %s5294_s25 = scalar_lea.hbm %s5932_s9, 32 }
 0x759   :  { %p5295_p13 = scmp.ne.s32.totalorder %s5932_s9, %s5294_s25  ;;  %p5298_p0 = scmp.lt.u32.totalorder %s5294_s25, %s5932_s9 }
 0x75b   :  { %p5300_p1 = pnand %p5298_p0, %p5295_p13 }
 0x75d   :  { %5303 = shalt.err (!%p5300_p1)
}
 0x75e   :  { %3552 = dma.vmem_to_hbm [thread:$0]  %s3550_s19, 32, %s5932_s9, [#allocation5]  }
 0x75f   :  { %5314 = dma.done.wait [#allocation5], 32  }
 0x760   :  { %5315 = vsyncadd [#allocation5], 4294967264 }
 0x761   :  { %3556 = vsyncpa [#allocation4], 1 }
 0x762   :  { %3557 = vsyncpa [#allocation7], 1 }
 0x763   :  { %3558 = vsyncpa [#allocation10], 1 }
 0x764   :  { %3559 = vsyncpa [#allocation13], 1 }
 0x765   :  { %3560 = vsyncpa [#allocation16], 1 }
 0x766   :  { %3561 = vsyncpa [#allocation5], 1 }

// kernel: _simple_cls_forward.1
= control target key start
LH: loop header
LB: loop body
LE: loop exit
PB: predicated region body
PF: predicated region fallthrough
CT: control target
= control target key end

     0   :  { %14 = vsyncpa [#allocation4], 0  ;;  %s5923_s0 = inlined_call_operand.hbm [shape: bf16[2,8,768], index: 0, kind: input, shape index: {}]   ;;  %s5924_s1 = inlined_call_operand.hbm [shape: f32[768,1024], index: 1, kind: input, shape index: {}]   ;;  %s5925_s2 = inlined_call_operand.hbm [shape: f32[1,1024], index: 2, kind: input, shape index: {}]   ;;  %s5926_s3 = inlined_call_operand.hbm [shape: f32[1024,512], index: 3, kind: input, shape index: {}]   ;;  %s5927_s4 = inlined_call_operand.hbm [shape: f32[1,512], index: 4, kind: input, shape index: {}]   ;;  %s5928_s5 = inlined_call_operand.hbm [shape: f32[512,256], index: 5, kind: input, shape index: {}]   ;;  %s5929_s6 = inlined_call_operand.hbm [shape: f32[1,256], index: 6, kind: input, shape index: {}]   ;;  %s5930_s7 = inlined_call_operand.vmem [shape: f32[256,3], index: 7, kind: input, shape index: {}]   ;;  %s5931_s8 = inlined_call_operand.hbm [shape: f32[1,3], index: 8, kind: input, shape index: {}]   ;;  %s5932_s9 = inlined_call_operand.hbm [shape: f32[2,3], index: 9, kind: output, shape index: {}]  }
   0x1   :  { %15 = vsyncpa [#allocation7], 0 }
   0x2   :  { %16 = vsyncpa [#allocation10], 0 }
   0x3   :  { %17 = vsyncpa [#allocation13], 0 }
   0x4   :  { %18 = vsyncpa [#allocation16], 0 }
   0x5   :  { %19 = vsyncpa [#allocation5], 0  ;;  %s5316_s30 = smov [#allocation6]   ;;  %s5106_s13 = scalar_lea.hbm %s5924_s1, 98304 }
   0x6   :  { %s37_s10 = sshll.u32 %s5316_s30, 4  ;;  %p5107_p0 = scmp.ne.s32.totalorder %s5924_s1, %s5106_s13  ;;  %s38_s10 = int_to_ptr.vmem [resolvable:$true] %s37_s10 }
   0x7   :  { %p5110_p1 = scmp.lt.u32.totalorder %s5106_s13, %s5924_s1 }
   0x9   :  { %p5112_p2 = pnand %p5110_p1, %p5107_p0 }
   0xb   :  { %5115 = shalt.err (!%p5112_p2)
}
   0xc   :  { %s5116_s18 = scalar_lea.vmem %s38_s10, 98304  ;;  %p5121_p4 = scmp.lt.s32.totalorder %s38_s10, %s38_s10 }
   0xd   :  { %p5117_p3 = scmp.ne.s32.totalorder %s38_s10, %s5116_s18  ;;  %p5122_p5 = scmp.lt.s32.totalorder %s5116_s18, %s5116_s18 }
   0xf   :  { %p5123_p6 = por %p5122_p5, %p5121_p4 }
  0x11   :  { %p5124_p7 = pnand %p5123_p6, %p5117_p3 }
  0x13   :  { %5127 = shalt.err (!%p5124_p7)
}
  0x14   :  { %s5317_s19 = smov 1024   ;;  %s5318_s20 = smov 64  }
  0x15   :  { %43 = dma.hbm_to_vmem [thread:$0]  %s5924_s1, 98304, %s38_s10, [#allocation7], %s5317_s19, %s5317_s19, %s5318_s20  }
  0x16   :  { %s5319_s23 = smov [#allocation9]   ;;  %s5128_s27 = scalar_lea.hbm %s5926_s3, 65536 }
  0x17   :  { %s59_s24 = sshll.u32 %s5319_s23, 4  ;;  %p5129_p8 = scmp.ne.s32.totalorder %s5926_s3, %s5128_s27  ;;  %s60_s24 = int_to_ptr.vmem [resolvable:$true] %s59_s24 }
  0x18   :  { %p5132_p9 = scmp.lt.u32.totalorder %s5128_s27, %s5926_s3 }
  0x1a   :  { %p5134_p10 = pnand %p5132_p9, %p5129_p8 }
  0x1c   :  { %5137 = shalt.err (!%p5134_p10)
}
  0x1d   :  { %s5138_s12 = scalar_lea.vmem %s60_s24, 65536  ;;  %p5143_p12 = scmp.lt.s32.totalorder %s60_s24, %s60_s24 }
  0x1e   :  { %p5139_p11 = scmp.ne.s32.totalorder %s60_s24, %s5138_s12  ;;  %p5144_p13 = scmp.lt.s32.totalorder %s5138_s12, %s5138_s12 }
  0x20   :  { %p5145_p0 = por %p5144_p13, %p5143_p12 }
  0x22   :  { %p5146_p1 = pnand %p5145_p0, %p5139_p11 }
  0x24   :  { %5149 = shalt.err (!%p5146_p1)
}
  0x25   :  { %s5320_s1 = smov 512   ;;  %s5321_s10 = smov 32  }
  0x26   :  { %65 = dma.hbm_to_vmem [thread:$0]  %s5926_s3, 65536, %s60_s24, [#allocation10], %s5320_s1, %s5320_s1, %s5321_s10  }
  0x27   :  { %s5322_s15 = smov [#allocation12]   ;;  %s5150_s19 = scalar_lea.hbm %s5928_s5, 16384 }
  0x28   :  { %s81_s16 = sshll.u32 %s5322_s15, 4  ;;  %p5151_p2 = scmp.ne.s32.totalorder %s5928_s5, %s5150_s19  ;;  %s82_s16 = int_to_ptr.vmem [resolvable:$true] %s81_s16 }
  0x29   :  { %p5154_p3 = scmp.lt.u32.totalorder %s5150_s19, %s5928_s5 }
  0x2b   :  { %p5156_p4 = pnand %p5154_p3, %p5151_p2 }
  0x2d   :  { %5159 = shalt.err (!%p5156_p4)
}
  0x2e   :  { %s5160_s25 = scalar_lea.vmem %s82_s16, 16384  ;;  %p5165_p6 = scmp.lt.s32.totalorder %s82_s16, %s82_s16 }
  0x2f   :  { %p5161_p5 = scmp.ne.s32.totalorder %s82_s16, %s5160_s25  ;;  %p5166_p7 = scmp.lt.s32.totalorder %s5160_s25, %s5160_s25 }
  0x31   :  { %p5167_p8 = por %p5166_p7, %p5165_p6 }
  0x33   :  { %p5168_p9 = pnand %p5167_p8, %p5161_p5 }
  0x35   :  { %5171 = shalt.err (!%p5168_p9)
}
  0x36   :  { %s5323_s3 = smov 256   ;;  %s5324_s24 = smov 16  }
  0x37   :  { %87 = dma.hbm_to_vmem [thread:$0]  %s5928_s5, 16384, %s82_s16, [#allocation13], %s5323_s3, %s5323_s3, %s5324_s24  }
  0x38   :  { %s5325_s28 = smov [#allocation3]   ;;  %s5172_s12 = scalar_lea.hbm %s5923_s0, 768 }
  0x39   :  { %s25_s29 = sshll.u32 %s5325_s28, 4  ;;  %p5173_p10 = scmp.ne.s32.totalorder %s5923_s0, %s5172_s12  ;;  %s26_s29 = int_to_ptr.vmem [resolvable:$true] %s25_s29 }
  0x3a   :  { %p5176_p11 = scmp.lt.u32.totalorder %s5172_s12, %s5923_s0 }
  0x3c   :  { %p5178_p12 = pnand %p5176_p11, %p5173_p10 }
  0x3e   :  { %5181 = shalt.err (!%p5178_p12)
}
  0x3f   :  { %s5182_s15 = scalar_lea.vmem %s26_s29, 768  ;;  %p5187_p0 = scmp.lt.s32.totalorder %s26_s29, %s26_s29 }
  0x40   :  { %p5183_p13 = scmp.ne.s32.totalorder %s26_s29, %s5182_s15  ;;  %p5188_p1 = scmp.lt.s32.totalorder %s5182_s15, %s5182_s15 }
  0x42   :  { %p5189_p2 = por %p5188_p1, %p5187_p0 }
  0x44   :  { %p5190_p3 = pnand %p5189_p2, %p5183_p13 }
  0x46   :  { %5193 = shalt.err (!%p5190_p3)
}
  0x47   :  { %s5326_s5 = smov 384   ;;  %s5327_s16 = smov 24  }
  0x48   :  { %31 = dma.hbm_to_vmem [thread:$0]  %s5923_s0, 768, %s26_s29, [#allocation4], %s5326_s5, %s5326_s5, %s5327_s16  }
  0x49   :  { %s5328_s19 = smov [#allocation8]   ;;  %s5329_s21 = smov [#allocation11]  }
  0x4a   :  { %s50_s20 = sshll.u32 %s5328_s19, 4  ;;  %s72_s22 = sshll.u32 %s5329_s21, 4  ;;  %s51_s20 = int_to_ptr.vmem [resolvable:$true] %s50_s20  ;;  %s73_s22 = int_to_ptr.vmem [resolvable:$true] %s72_s22 }
  0x4b   :  { %s5194_s3 = scalar_lea.hbm %s5925_s2, 128 }
  0x4c   :  { %p5195_p4 = scmp.ne.s32.totalorder %s5925_s2, %s5194_s3  ;;  %p5198_p5 = scmp.lt.u32.totalorder %s5194_s3, %s5925_s2 }
  0x4e   :  { %p5200_p6 = pnand %p5198_p5, %p5195_p4 }
  0x50   :  { %5203 = shalt.err (!%p5200_p6)
}
  0x51   :  { %s5204_s0 = scalar_lea.vmem %s51_s20, 128  ;;  %p5209_p8 = scmp.lt.s32.totalorder %s51_s20, %s51_s20 }
  0x52   :  { %p5205_p7 = scmp.ne.s32.totalorder %s51_s20, %s5204_s0  ;;  %p5210_p9 = scmp.lt.s32.totalorder %s5204_s0, %s5204_s0 }
  0x54   :  { %p5211_p10 = por %p5210_p9, %p5209_p8 }
  0x56   :  { %p5212_p11 = pnand %p5211_p10, %p5205_p7 }
  0x58   :  { %5215 = shalt.err (!%p5212_p11)
}
  0x59   :  { %53 = dma.hbm_to_vmem [thread:$0]  %s5925_s2, 128, %s51_s20, [#allocation7]  }
  0x5a   :  { %s5216_s1 = scalar_lea.hbm %s5927_s4, 64 }
  0x5b   :  { %p5217_p12 = scmp.ne.s32.totalorder %s5927_s4, %s5216_s1  ;;  %p5220_p13 = scmp.lt.u32.totalorder %s5216_s1, %s5927_s4 }
  0x5d   :  { %p5222_p0 = pnand %p5220_p13, %p5217_p12 }
  0x5f   :  { %5225 = shalt.err (!%p5222_p0)
}
  0x60   :  { %s5226_s5 = scalar_lea.vmem %s73_s22, 64  ;;  %p5231_p2 = scmp.lt.s32.totalorder %s73_s22, %s73_s22 }
  0x61   :  { %p5227_p1 = scmp.ne.s32.totalorder %s73_s22, %s5226_s5  ;;  %p5232_p3 = scmp.lt.s32.totalorder %s5226_s5, %s5226_s5 }
  0x63   :  { %p5233_p4 = por %p5232_p3, %p5231_p2 }
  0x65   :  { %p5234_p5 = pnand %p5233_p4, %p5227_p1 }
  0x67   :  { %5237 = shalt.err (!%p5234_p5)
}
  0x68   :  { %75 = dma.hbm_to_vmem [thread:$0]  %s5927_s4, 64, %s73_s22, [#allocation10]  }
  0x69   :  { %s5330_s17 = smov [#allocation14]   ;;  %s5331_s19 = smov [#allocation15]  }
  0x6a   :  { %s94_s18 = sshll.u32 %s5330_s17, 4  ;;  %s106_s20 = sshll.u32 %s5331_s19, 4  ;;  %s95_s18 = int_to_ptr.vmem [resolvable:$true] %s94_s18  ;;  %s107_s20 = int_to_ptr.vmem [resolvable:$true] %s106_s20 }
  0x6b   :  { %s5238_s25 = scalar_lea.hbm %s5929_s6, 32 }
  0x6c   :  { %p5239_p6 = scmp.ne.s32.totalorder %s5929_s6, %s5238_s25  ;;  %p5242_p7 = scmp.lt.u32.totalorder %s5238_s25, %s5929_s6 }
  0x6e   :  { %p5244_p8 = pnand %p5242_p7, %p5239_p6 }
  0x70   :  { %5247 = shalt.err (!%p5244_p8)
}
  0x71   :  { %s5248_s4 = scalar_lea.vmem %s95_s18, 32  ;;  %p5253_p10 = scmp.lt.s32.totalorder %s95_s18, %s95_s18 }
  0x72   :  { %p5249_p9 = scmp.ne.s32.totalorder %s95_s18, %s5248_s4  ;;  %p5254_p11 = scmp.lt.s32.totalorder %s5248_s4, %s5248_s4 }
  0x74   :  { %p5255_p12 = por %p5254_p11, %p5253_p10 }
  0x76   :  { %p5256_p13 = pnand %p5255_p12, %p5249_p9 }
  0x78   :  { %5259 = shalt.err (!%p5256_p13)
}
  0x79   :  { %97 = dma.hbm_to_vmem [thread:$0]  %s5929_s6, 32, %s95_s18, [#allocation13]  }
  0x7a   :  { %s5260_s30 = scalar_lea.hbm %s5931_s8, 16 }
  0x7b   :  { %p5261_p0 = scmp.ne.s32.totalorder %s5931_s8, %s5260_s30  ;;  %p5264_p1 = scmp.lt.u32.totalorder %s5260_s30, %s5931_s8 }
  0x7d   :  { %p5266_p2 = pnand %p5264_p1, %p5261_p0 }
  0x7f   :  { %5269 = shalt.err (!%p5266_p2)
}
  0x80   :  { %s5270_s13 = scalar_lea.vmem %s107_s20, 16  ;;  %s5274_s14 = scalar_lea.vmem %s107_s20, 32 }
  0x81   :  { %p5271_p3 = scmp.ne.s32.totalorder %s107_s20, %s5270_s13  ;;  %p5275_p4 = scmp.lt.s32.totalorder %s107_s20, %s107_s20 }
  0x82   :  { %p5276_p5 = scmp.lt.s32.totalorder %s5274_s14, %s5270_s13 }
  0x84   :  { %p5277_p6 = por %p5276_p5, %p5275_p4 }
  0x86   :  { %p5278_p7 = pnand %p5277_p6, %p5271_p3 }
  0x88   :  { %5281 = shalt.err (!%p5278_p7)
}
  0x89   :  { %109 = dma.hbm_to_vmem [thread:$0]  %s5931_s8, 16, %s107_s20, [#allocation16]  }
  0x8a   :  { %5304 = dma.done.wait [#allocation4], 768  }
  0x8b   :  { %5305 = vsyncadd [#allocation4], 4294966528 }
  0x8c   :  { %5306 = dma.done.wait [#allocation7], 98432  }
  0x8d   :  { %5307 = vsyncadd [#allocation7], 4294868864 }
  0x8e   :  { %5308 = dma.done.wait [#allocation10], 65600  }
  0x8f   :  { %5309 = vsyncadd [#allocation10], 4294901696 }
  0x90   :  { %5310 = dma.done.wait [#allocation13], 16416  }
  0x91   :  { %5311 = vsyncadd [#allocation13], 4294950880 }
  0x92   :  { %5312 = dma.done.wait [#allocation16], 16  }
  0x93   :  { %5313 = vsyncadd [#allocation16], 4294967280  ;;  %v5332_v0 = vmov 0.0   ;;  %v328_v1 = vld [vmem:[#allocation6 + $0x8] sm:$0xff]  ;;  %v327_v6 = vld [vmem:[#allocation6] sm:$0xff]  ;;  %vm299_vm0 = vcmask 1041409  }
  0x94   :  { %139 = vst [vmem:[#allocation2 + $0x8] sm:$0xf] %v5332_v0  ;;  %v336_v2 = vld [vmem:[#allocation6 + $0x48] sm:$0xff]  ;;  %v335_v7 = vld [vmem:[#allocation6 + $0x40] sm:$0xff]  ;;  %vm301_vm1 = vcmask 1043459   ;;  %vm303_vm2 = vcmask 1045509  }
  0x95   :  { %v584_v3 = vld [vmem:[#allocation6 + $0x808] sm:$0xff]  ;;  %v3598_v4 = vpack.c.bf16 %v336_v2, %v328_v1  ;;  %v3600_v9 = vpack.c.bf16 %v335_v7, %v327_v6  ;;  %v583_v10 = vld [vmem:[#allocation6 + $0x800] sm:$0xff]  ;;  %vm305_vm3 = vcmask 1047559   ;;  %vm3529_vm4 = vcmask 17408  }
  0x96   :  { %v592_v5 = vld [vmem:[#allocation6 + $0x848] sm:$0xff]  ;;  %v591_v11 = vld [vmem:[#allocation6 + $0x840] sm:$0xff] }
  0x97   :  { %v3662_v8 = vpack.c.bf16 %v592_v5, %v584_v3  ;;  %v344_v12 = vld [vmem:[#allocation6 + $0x88] sm:$0xff]  ;;  %3599 = vmatprep.subr.bf16.mxu1 %v3598_v4  ;;  %v3664_v13 = vpack.c.bf16 %v591_v11, %v583_v10  ;;  %v343_v19 = vld [vmem:[#allocation6 + $0x80] sm:$0xff] }
  0x98   :  { %v352_v14 = vld [vmem:[#allocation6 + $0xc8] sm:$0xff]  ;;  %3601 = vmatpush1.bf16.msra.mxu1 %v3600_v9  ;;  %v351_v20 = vld [vmem:[#allocation6 + $0xc0] sm:$0xff] }
  0x99   :  { %v600_v15 = vld [vmem:[#allocation6 + $0x888] sm:$0xff]  ;;  %3663 = vmatprep.subr.bf16.mxu0 %v3662_v8  ;;  %v3602_v17 = vpack.c.bf16 %v352_v14, %v344_v12  ;;  %v599_v21 = vld [vmem:[#allocation6 + $0x880] sm:$0xff]  ;;  %v3604_v22 = vpack.c.bf16 %v351_v20, %v343_v19 }
  0x9a   :  { %v608_v16 = vld [vmem:[#allocation6 + $0x8c8] sm:$0xff]  ;;  %3665 = vmatpush1.bf16.msra.mxu0 %v3664_v13  ;;  %v607_v23 = vld [vmem:[#allocation6 + $0x8c0] sm:$0xff] }
  0x9b   :  { %v3666_v18 = vpack.c.bf16 %v608_v16, %v600_v15  ;;  %v360_v24 = vld [vmem:[#allocation6 + $0x108] sm:$0xff]  ;;  %3603 = vmatprep.subr.bf16.mxu1 %v3602_v17  ;;  %v3668_v26 = vpack.c.bf16 %v607_v23, %v599_v21  ;;  %v359_v30 = vld [vmem:[#allocation6 + $0x100] sm:$0xff] }
  0x9c   :  { %v368_v25 = vld [vmem:[#allocation6 + $0x148] sm:$0xff]  ;;  %v367_v32 = vld [vmem:[#allocation6 + $0x140] sm:$0xff]  ;;  %3605 = vmatpush1.bf16.msra.mxu1 %v3604_v22 }
  0x9d   :  { %3667 = vmatprep.subr.bf16.mxu0 %v3666_v18  ;;  %v3606_v27 = vpack.c.bf16 %v368_v25, %v360_v24  ;;  %v616_v28 = vld [vmem:[#allocation6 + $0x908] sm:$0xff]  ;;  %v615_v33 = vld [vmem:[#allocation6 + $0x900] sm:$0xff]  ;;  %v3608_v35 = vpack.c.bf16 %v367_v32, %v359_v30 }
  0x9e   :  { %v624_v29 = vld [vmem:[#allocation6 + $0x948] sm:$0xff]  ;;  %v623_v34 = vld [vmem:[#allocation6 + $0x940] sm:$0xff]  ;;  %3669 = vmatpush1.bf16.msra.mxu0 %v3668_v26 }
  0x9f   :  { %v3670_v31 = vpack.c.bf16 %v624_v29, %v616_v28  ;;  %v376_v36 = vld [vmem:[#allocation6 + $0x188] sm:$0xff]  ;;  %3607 = vmatprep.subr.bf16.mxu1 %v3606_v27  ;;  %v3672_v39 = vpack.c.bf16 %v623_v34, %v615_v33  ;;  %v375_v42 = vld [vmem:[#allocation6 + $0x180] sm:$0xff] }
  0xa0   :  { %v384_v37 = vld [vmem:[#allocation6 + $0x1c8] sm:$0xff]  ;;  %v383_v43 = vld [vmem:[#allocation6 + $0x1c0] sm:$0xff]  ;;  %3609 = vmatpush1.bf16.msra.mxu1 %v3608_v35 }
  0xa1   :  { %v632_v38 = vld [vmem:[#allocation6 + $0x988] sm:$0xff]  ;;  %v3610_v40 = vpack.c.bf16 %v384_v37, %v376_v36  ;;  %3671 = vmatprep.subr.bf16.mxu0 %v3670_v31  ;;  %v631_v45 = vld [vmem:[#allocation6 + $0x980] sm:$0xff]  ;;  %v3612_v51 = vpack.c.bf16 %v383_v43, %v375_v42 }
  0xa2   :  { %v640_v41 = vld [vmem:[#allocation6 + $0x9c8] sm:$0xff]  ;;  %v639_v46 = vld [vmem:[#allocation6 + $0x9c0] sm:$0xff]  ;;  %3673 = vmatpush1.bf16.msra.mxu0 %v3672_v39 }
  0xa3   :  { %v3674_v44 = vpack.c.bf16 %v640_v41, %v632_v38  ;;  %v392_v47 = vld [vmem:[#allocation6 + $0x208] sm:$0xff]  ;;  %3611 = vmatprep.subr.bf16.mxu1 %v3610_v40  ;;  %v3676_v52 = vpack.c.bf16 %v639_v46, %v631_v45  ;;  %v391_v54 = vld [vmem:[#allocation6 + $0x200] sm:$0xff]  ;;  %v5333_v46 = vmov 1983009808  }
  0xa4   :  { %v400_v48 = vld [vmem:[#allocation6 + $0x248] sm:$0xff]  ;;  %v399_v55 = vld [vmem:[#allocation6 + $0x240] sm:$0xff]  ;;  %3613 = vmatpush1.bf16.msra.mxu1 %v3612_v51 }
  0xa5   :  { %v648_v49 = vld [vmem:[#allocation6 + $0xa08] sm:$0xff]  ;;  %v3614_v53 = vpack.c.bf16 %v400_v48, %v392_v47  ;;  %v647_v56 = vld [vmem:[#allocation6 + $0xa00] sm:$0xff]  ;;  %3675 = vmatprep.subr.bf16.mxu0 %v3674_v44  ;;  %v3616_v63 = vpack.c.bf16 %v399_v55, %v391_v54  ;;  %v5481_v47 = vunpack.c.l.s4 %v5333_v46  ;;  %v249_v48 = vlaneseq }
  0xa6   :  { %v656_v50 = vld [vmem:[#allocation6 + $0xa48] sm:$0xff]  ;;  %v655_v58 = vld [vmem:[#allocation6 + $0xa40] sm:$0xff]  ;;  %3677 = vmatpush1.bf16.msra.mxu0 %v3676_v52 }
  0xa7   :  { %v3678_v57 = vpack.c.bf16 %v656_v50, %v648_v49  ;;  %v408_v59 = vld [vmem:[#allocation6 + $0x288] sm:$0xff]  ;;  %3615 = vmatprep.subr.bf16.mxu1 %v3614_v53  ;;  %v3680_v0 = vpack.c.bf16 %v655_v58, %v647_v56  ;;  %v407_v2 = vld [vmem:[#allocation6 + $0x280] sm:$0xff] }
  0xa8   :  { %v416_v60 = vld [vmem:[#allocation6 + $0x2c8] sm:$0xff]  ;;  %v415_v3 = vld [vmem:[#allocation6 + $0x2c0] sm:$0xff]  ;;  %3617 = vmatpush1.bf16.msra.mxu1 %v3616_v63 }
  0xa9   :  { %v664_v61 = vld [vmem:[#allocation6 + $0xa88] sm:$0xff]  ;;  %v3618_v1 = vpack.c.bf16 %v416_v60, %v408_v59  ;;  %v663_v4 = vld [vmem:[#allocation6 + $0xa80] sm:$0xff]  ;;  %3679 = vmatprep.subr.bf16.mxu0 %v3678_v57  ;;  %v3620_v11 = vpack.c.bf16 %v415_v3, %v407_v2 }
  0xaa   :  { %v672_v62 = vld [vmem:[#allocation6 + $0xac8] sm:$0xff]  ;;  %v671_v6 = vld [vmem:[#allocation6 + $0xac0] sm:$0xff]  ;;  %3681 = vmatpush1.bf16.msra.mxu0 %v3680_v0 }
  0xab   :  { %v3682_v5 = vpack.c.bf16 %v672_v62, %v664_v61  ;;  %v424_v7 = vld [vmem:[#allocation6 + $0x308] sm:$0xff]  ;;  %3619 = vmatprep.subr.bf16.mxu1 %v3618_v1  ;;  %v3684_v12 = vpack.c.bf16 %v671_v6, %v663_v4  ;;  %v423_v14 = vld [vmem:[#allocation6 + $0x300] sm:$0xff] }
  0xac   :  { %v432_v8 = vld [vmem:[#allocation6 + $0x348] sm:$0xff]  ;;  %v431_v15 = vld [vmem:[#allocation6 + $0x340] sm:$0xff]  ;;  %3621 = vmatpush1.bf16.msra.mxu1 %v3620_v11  ;;  %v5524_v11 = vshrl.u32 %v249_v48, 7 }
  0xad   :  { %v680_v9 = vld [vmem:[#allocation6 + $0xb08] sm:$0xff]  ;;  %v3622_v13 = vpack.c.bf16 %v432_v8, %v424_v7  ;;  %v679_v16 = vld [vmem:[#allocation6 + $0xb00] sm:$0xff]  ;;  %3683 = vmatprep.subr.bf16.mxu0 %v3682_v5  ;;  %v3624_v23 = vpack.c.bf16 %v431_v15, %v423_v14 }
  0xae   :  { %v688_v10 = vld [vmem:[#allocation6 + $0xb48] sm:$0xff]  ;;  %v687_v18 = vld [vmem:[#allocation6 + $0xb40] sm:$0xff]  ;;  %3685 = vmatpush1.bf16.msra.mxu0 %v3684_v12 }
  0xaf   :  { %v3686_v17 = vpack.c.bf16 %v688_v10, %v680_v9  ;;  %v440_v19 = vld [vmem:[#allocation6 + $0x388] sm:$0xff]  ;;  %3623 = vmatprep.subr.bf16.mxu1 %v3622_v13  ;;  %v3688_v24 = vpack.c.bf16 %v687_v18, %v679_v16  ;;  %v439_v26 = vld [vmem:[#allocation6 + $0x380] sm:$0xff]  ;;  %v248_v10 = vunpack.c.0.s8 %v5481_v47 }
  0xb0   :  { %v448_v20 = vld [vmem:[#allocation6 + $0x3c8] sm:$0xff]  ;;  %v447_v27 = vld [vmem:[#allocation6 + $0x3c0] sm:$0xff]  ;;  %3625 = vmatpush1.bf16.msra.mxu1 %v3624_v23 }
  0xb1   :  { %v696_v21 = vld [vmem:[#allocation6 + $0xb88] sm:$0xff]  ;;  %v3626_v25 = vpack.c.bf16 %v448_v20, %v440_v19  ;;  %v695_v28 = vld [vmem:[#allocation6 + $0xb80] sm:$0xff]  ;;  %3687 = vmatprep.subr.bf16.mxu0 %v3686_v17  ;;  %v3628_v35 = vpack.c.bf16 %v447_v27, %v439_v26 }
  0xb2   :  { %v704_v22 = vld [vmem:[#allocation6 + $0xbc8] sm:$0xff]  ;;  %v703_v30 = vld [vmem:[#allocation6 + $0xbc0] sm:$0xff]  ;;  %3689 = vmatpush1.bf16.msra.mxu0 %v3688_v24 }
  0xb3   :  { %v3690_v29 = vpack.c.bf16 %v704_v22, %v696_v21  ;;  %v456_v31 = vld [vmem:[#allocation6 + $0x408] sm:$0xff]  ;;  %v455_v36 = vld [vmem:[#allocation6 + $0x400] sm:$0xff]  ;;  %3627 = vmatprep.subr.bf16.mxu1 %v3626_v25  ;;  %v3692_v37 = vpack.c.bf16 %v703_v30, %v695_v28 }
  0xb4   :  { %v464_v32 = vld [vmem:[#allocation6 + $0x448] sm:$0xff]  ;;  %v463_v39 = vld [vmem:[#allocation6 + $0x440] sm:$0xff]  ;;  %3629 = vmatpush1.bf16.msra.mxu1 %v3628_v35 }
  0xb5   :  { %v712_v33 = vld [vmem:[#allocation6 + $0xc08] sm:$0xff]  ;;  %v3630_v38 = vpack.c.bf16 %v464_v32, %v456_v31  ;;  %v711_v40 = vld [vmem:[#allocation6 + $0xc00] sm:$0xff]  ;;  %3691 = vmatprep.subr.bf16.mxu0 %v3690_v29  ;;  %v3632_v52 = vpack.c.bf16 %v463_v39, %v455_v36 }
  0xb6   :  { %v720_v34 = vld [vmem:[#allocation6 + $0xc48] sm:$0xff]  ;;  %v719_v41 = vld [vmem:[#allocation6 + $0xc40] sm:$0xff]  ;;  %3693 = vmatpush1.bf16.msra.mxu0 %v3692_v37 }
  0xb7   :  { %v3694_v42 = vpack.c.bf16 %v720_v34, %v712_v33  ;;  %v472_v43 = vld [vmem:[#allocation6 + $0x488] sm:$0xff]  ;;  %v5483_v50 = vld [vmem:[#allocation6 + $0x480] sm:$0xff]  ;;  %3631 = vmatprep.subr.bf16.mxu1 %v3630_v38  ;;  %v3696_v57 = vpack.c.bf16 %v719_v41, %v711_v40  ;;  %v5579_v38 = vsub.s32 %v248_v10, %v5524_v11 }
  0xb8   :  { %v480_v44 = vld [vmem:[#allocation6 + $0x4c8] sm:$0xff]  ;;  %v5485_v51 = vld [vmem:[#allocation6 + $0x4c0] sm:$0xff]  ;;  %3633 = vmatpush1.bf16.msra.mxu1 %v3632_v52 }
  0xb9   :  { %v728_v45 = vld [vmem:[#allocation6 + $0xc88] sm:$0xff]  ;;  %v5487_v53 = vld [vmem:[#allocation6 + $0xc80] sm:$0xff]  ;;  %v3634_v58 = vpack.c.bf16 %v480_v44, %v472_v43  ;;  %3695 = vmatprep.subr.bf16.mxu0 %v3694_v42  ;;  %v3636_v20 = vpack.c.bf16 %v5485_v51, %v5483_v50 }
  0xba   :  { %v736_v49 = vld [vmem:[#allocation6 + $0xcc8] sm:$0xff]  ;;  %v5489_v54 = vld [vmem:[#allocation6 + $0xcc0] sm:$0xff]  ;;  %3697 = vmatpush1.bf16.msra.mxu0 %v3696_v57 }
  0xbb   :  { %v5491_v55 = vld [vmem:[#allocation6 + $0x508] sm:$0xff]  ;;  %v5499_v61 = vld [vmem:[#allocation6 + $0x500] sm:$0xff]  ;;  %v3698_v1 = vpack.c.bf16 %v736_v49, %v728_v45  ;;  %3635 = vmatprep.subr.bf16.mxu1 %v3634_v58  ;;  %v3700_v27 = vpack.c.bf16 %v5489_v54, %v5487_v53 }
  0xbc   :  { %v5493_v56 = vld [vmem:[#allocation6 + $0x548] sm:$0xff]  ;;  %v5501_v62 = vld [vmem:[#allocation6 + $0x540] sm:$0xff]  ;;  %3637 = vmatpush1.bf16.msra.mxu1 %v3636_v20 }
  0xbd   :  { %v5495_v59 = vld [vmem:[#allocation6 + $0xd08] sm:$0xff]  ;;  %v5503_v63 = vld [vmem:[#allocation6 + $0xd00] sm:$0xff]  ;;  %v3638_v28 = vpack.c.bf16 %v5493_v56, %v5491_v55  ;;  %3699 = vmatprep.subr.bf16.mxu0 %v3698_v1  ;;  %v3640_v33 = vpack.c.bf16 %v5501_v62, %v5499_v61  ;;  %v146_v1 = vld [vmem:[#allocation3 + $0x20] sm:$0xff] }
  0xbe   :  { %v5497_v60 = vld [vmem:[#allocation6 + $0xd48] sm:$0xff]  ;;  %v5505_v0 = vld [vmem:[#allocation6 + $0xd40] sm:$0xff]  ;;  %3701 = vmatpush1.bf16.msra.mxu0 %v3700_v27 }
  0xbf   :  { %v5507_v2 = vld [vmem:[#allocation6 + $0x588] sm:$0xff]  ;;  %v5515_v6 = vld [vmem:[#allocation6 + $0x580] sm:$0xff]  ;;  %v3702_v32 = vpack.c.bf16 %v5497_v60, %v5495_v59  ;;  %v3704_v34 = vpack.c.bf16 %v5505_v0, %v5503_v63  ;;  %3639 = vmatprep.subr.bf16.mxu1 %v3638_v28  ;;  %v142_v60 = vld [vmem:[#allocation3] sm:$0xff] }
  0xc0   :  { %v5509_v3 = vld [vmem:[#allocation6 + $0x5c8] sm:$0xff]  ;;  %v5517_v7 = vld [vmem:[#allocation6 + $0x5c0] sm:$0xff]  ;;  %v143_v63 = vld [vmem:[#allocation3 + $0x8] sm:$0xff]  ;;  %3641 = vmatpush1.bf16.msra.mxu1 %v3640_v33 }
  0xc1   :  { %v5511_v4 = vld [vmem:[#allocation6 + $0xd88] sm:$0xff]  ;;  %v5519_v8 = vld [vmem:[#allocation6 + $0xd80] sm:$0xff]  ;;  %v3642_v39 = vpack.c.bf16 %v5509_v3, %v5507_v2  ;;  %v3644_v41 = vpack.c.bf16 %v5517_v7, %v5515_v6  ;;  %3703 = vmatprep.subr.bf16.mxu0 %v3702_v32  ;;  %v148_v2 = vunpack.c.l.bf16 %v142_v60  ;;  %v149_v3 = vunpack.c.h.bf16 %v142_v60 }
  0xc2   :  { %v5513_v5 = vld [vmem:[#allocation6 + $0xdc8] sm:$0xff]  ;;  %v5521_v9 = vld [vmem:[#allocation6 + $0xdc0] sm:$0xff]  ;;  %3705 = vmatpush1.bf16.msra.mxu0 %v3704_v34 }
  0xc3   :  { %v5526_v12 = vld [vmem:[#allocation6 + $0x608] sm:$0xff]  ;;  %v5534_v16 = vld [vmem:[#allocation6 + $0x600] sm:$0xff]  ;;  %v3706_v40 = vpack.c.bf16 %v5513_v5, %v5511_v4  ;;  %v3708_v42 = vpack.c.bf16 %v5521_v9, %v5519_v8  ;;  %v150_v4 = vunpack.c.l.bf16 %v143_v63  ;;  %v151_v5 = vunpack.c.h.bf16 %v143_v63  ;;  %3643 = vmatprep.subr.bf16.mxu1 %v3642_v39 }
  0xc4   :  { %v5528_v13 = vld [vmem:[#allocation6 + $0x648] sm:$0xff]  ;;  %v5536_v17 = vld [vmem:[#allocation6 + $0x640] sm:$0xff]  ;;  %v156_v8 = vunpack.c.l.bf16 %v146_v1  ;;  %v157_v9 = vunpack.c.h.bf16 %v146_v1  ;;  %v160_v10 = vrot.slane %v148_v2, 4  ;;  %3645 = vmatpush1.bf16.msra.mxu1 %v3644_v41 }
  0xc5   :  { %v5530_v14 = vld [vmem:[#allocation6 + $0xe08] sm:$0xff]  ;;  %v5538_v18 = vld [vmem:[#allocation6 + $0xe00] sm:$0xff]  ;;  %v3646_v46 = vpack.c.bf16 %v5528_v13, %v5526_v12  ;;  %v3648_v48 = vpack.c.bf16 %v5536_v17, %v5534_v16  ;;  %v166_v12 = vrot.slane %v149_v3, 4  ;;  %3707 = vmatprep.subr.bf16.mxu0 %v3706_v40  ;;  %v172_v13 = vrot.slane %v150_v4, 4 }
  0xc6   :  { %v5532_v15 = vld [vmem:[#allocation6 + $0xe48] sm:$0xff]  ;;  %v5540_v19 = vld [vmem:[#allocation6 + $0xe40] sm:$0xff]  ;;  %v161_v17 = vadd.f32 %v160_v10, %v148_v2  ;;  %3709 = vmatpush1.bf16.msra.mxu0 %v3708_v42 }
  0xc7   :  { %v5544_v21 = vld [vmem:[#allocation6 + $0x688] sm:$0xff]  ;;  %v5552_v25 = vld [vmem:[#allocation6 + $0x680] sm:$0xff]  ;;  %v3710_v47 = vpack.c.bf16 %v5532_v15, %v5530_v14  ;;  %v3712_v49 = vpack.c.bf16 %v5540_v19, %v5538_v18  ;;  %v178_v14 = vrot.slane %v151_v5, 4  ;;  %v167_v20 = vadd.f32 %v166_v12, %v149_v3  ;;  %3647 = vmatprep.subr.bf16.mxu1 %v3646_v46 }
  0xc8   :  { %v5546_v22 = vld [vmem:[#allocation6 + $0x6c8] sm:$0xff]  ;;  %v5554_v26 = vld [vmem:[#allocation6 + $0x6c0] sm:$0xff]  ;;  %v173_v27 = vadd.f32 %v172_v13, %v150_v4  ;;  %v162_v34 = vrot.slane %v161_v17, 2  ;;  %3649 = vmatpush1.bf16.msra.mxu1 %v3648_v48 }
  0xc9   :  { %v5548_v23 = vld [vmem:[#allocation6 + $0xe88] sm:$0xff]  ;;  %v5560_v29 = vld [vmem:[#allocation6 + $0xe80] sm:$0xff]  ;;  %v3650_v53 = vpack.c.bf16 %v5546_v22, %v5544_v21  ;;  %v3652_v55 = vpack.c.bf16 %v5554_v26, %v5552_v25  ;;  %v208_v21 = vrot.slane %v156_v8, 4  ;;  %v214_v22 = vrot.slane %v157_v9, 4  ;;  %3711 = vmatprep.subr.bf16.mxu0 %v3710_v47 }
  0xca   :  { %v5550_v24 = vld [vmem:[#allocation6 + $0xec8] sm:$0xff]  ;;  %v5562_v30 = vld [vmem:[#allocation6 + $0xec0] sm:$0xff]  ;;  %v179_v28 = vadd.f32 %v178_v14, %v151_v5  ;;  %v168_v39 = vrot.slane %v167_v20, 2  ;;  %v174_v40 = vrot.slane %v173_v27, 2  ;;  %v163_v2 = vadd.f32 %v162_v34, %v161_v17  ;;  %3713 = vmatpush1.bf16.msra.mxu0 %v3712_v49 }
  0xcb   :  { %v5564_v31 = vld [vmem:[#allocation6 + $0x708] sm:$0xff]  ;;  %v5589_v43 = vld [vmem:[#allocation6 + $0x700] sm:$0xff]  ;;  %v3714_v54 = vpack.c.bf16 %v5550_v24, %v5548_v23  ;;  %v3716_v56 = vpack.c.bf16 %v5562_v30, %v5560_v29  ;;  %v209_v60 = vadd.f32 %v208_v21, %v156_v8  ;;  %v215_v63 = vadd.f32 %v214_v22, %v157_v9  ;;  %3651 = vmatprep.subr.bf16.mxu1 %v3650_v53  ;;  %v330_v29 = vld [vmem:[#allocation6 + $0x18] sm:$0xff] }
  0xcc   :  { %v5572_v35 = vld [vmem:[#allocation6 + $0x748] sm:$0xff]  ;;  %v5591_v44 = vld [vmem:[#allocation6 + $0x740] sm:$0xff]  ;;  %v169_v3 = vadd.f32 %v168_v39, %v167_v20  ;;  %v175_v41 = vadd.f32 %v174_v40, %v173_v27  ;;  %v164_v42 = vrot.slane %v163_v2, 1  ;;  %3653 = vmatpush1.bf16.msra.mxu1 %v3652_v55  ;;  %v338_v30 = vld [vmem:[#allocation6 + $0x58] sm:$0xff] }
  0xcd   :  { %v5574_v36 = vld [vmem:[#allocation6 + $0xf08] sm:$0xff]  ;;  %v5593_v45 = vld [vmem:[#allocation6 + $0xf00] sm:$0xff]  ;;  %v3654_v57 = vpack.c.bf16 %v5572_v35, %v5564_v31  ;;  %v3656_v59 = vpack.c.bf16 %v5591_v44, %v5589_v43  ;;  %v210_v10 = vrot.slane %v209_v60, 2  ;;  %v216_v12 = vrot.slane %v215_v63, 2  ;;  %3715 = vmatprep.subr.bf16.mxu0 %v3714_v54  ;;  %v337_v40 = vld [vmem:[#allocation6 + $0x50] sm:$0xff] }
  0xce   :  { %v5576_v37 = vld [vmem:[#allocation6 + $0xf48] sm:$0xff]  ;;  %v5603_v50 = vld [vmem:[#allocation6 + $0xf40] sm:$0xff]  ;;  %v170_v46 = vrot.slane %v169_v3, 1  ;;  %v176_v8 = vrot.slane %v175_v41, 1  ;;  %3717 = vmatpush1.bf16.msra.mxu0 %v3716_v56  ;;  %v3790_v39 = vpack.c.bf16 %v338_v30, %v330_v29 }
  0xcf   :  { %v5605_v51 = vld [vmem:[#allocation6 + $0x788] sm:$0xff]  ;;  %v3718_v58 = vpack.c.bf16 %v5576_v37, %v5574_v36  ;;  %v3720_v61 = vpack.c.bf16 %v5603_v50, %v5593_v45  ;;  %v211_v47 = vadd.f32 %v210_v10, %v209_v60  ;;  %3655 = vmatprep.subr.bf16.mxu1 %v3654_v57  ;;  %v567_v23 = vld [vmem:[#allocation6 + $0x780] sm:$0xff] }
  0xd0   :  { %v5607_v52 = vld [vmem:[#allocation6 + $0x7c8] sm:$0xff]  ;;  %v177_v19 = vadd.f32 %v176_v8, %v175_v41  ;;  %v575_v24 = vld [vmem:[#allocation6 + $0x7c0] sm:$0xff]  ;;  %3657 = vmatpush1.bf16.msra.mxu1 %v3656_v59 }
  0xd1   :  { %v145_v0 = vld [vmem:[#allocation3 + $0x18] sm:$0xff]  ;;  %v212_v17 = vrot.slane %v211_v47, 1  ;;  %v823_v54 = vld [vmem:[#allocation6 + $0xf80] sm:$0xff]  ;;  %3719 = vmatprep.subr.bf16.mxu0 %v3718_v58  ;;  %v5933_v37 = vpack.c.bf16 %v5607_v52, %v5605_v51 }
  0xd2   :  { %v154_v6 = vunpack.c.l.bf16 %v145_v0  ;;  %v155_v7 = vunpack.c.h.bf16 %v145_v0  ;;  %v180_v0 = vrot.slane %v179_v28, 2  ;;  %v824_v14 = vld [vmem:[#allocation6 + $0xf88] sm:$0xff]  ;;  %v831_v26 = vld [vmem:[#allocation6 + $0xfc0] sm:$0xff]  ;;  %3721 = vmatpush1.bf16.msra.mxu0 %v3720_v61 }
  0xd3   :  { %v213_v21 = vadd.f32 %v212_v17, %v211_v47  ;;  %v840_v35 = vld [vmem:[#allocation6 + $0x1008] sm:$0xff]  ;;  %3659 = vmatprep.subr.bf16.mxu1 %v5933_v37  ;;  %v3724_v58 = vpack.c.bf16 %v831_v26, %v823_v54  ;;  %v839_v10 = vld [vmem:[#allocation6 + $0x1000] sm:$0xff]  ;;  %v345_v47 = vld [vmem:[#allocation6 + $0x90] sm:$0xff] }
  0xd4   :  { %v196_v15 = vrot.slane %v154_v6, 4  ;;  %v202_v16 = vrot.slane %v155_v7, 4  ;;  %v181_v4 = vadd.f32 %v180_v0, %v179_v28  ;;  %v848_v57 = vld [vmem:[#allocation6 + $0x1048] sm:$0xff]  ;;  %v887_v30 = vld [vmem:[#allocation6 + $0x1180] sm:$0xff] }
  0xd5   :  { %v3726_v43 = vpack.c.bf16 %v848_v57, %v840_v35  ;;  %v872_v17 = vld [vmem:[#allocation6 + $0x1108] sm:$0xff]  ;;  %v394_v35 = vld [vmem:[#allocation6 + $0x218] sm:$0xff]  ;;  %v144_v37 = vld [vmem:[#allocation3 + $0x10] sm:$0xff] }
  0xd6   :  { %v197_v32 = vadd.f32 %v196_v15, %v154_v6  ;;  %v203_v33 = vadd.f32 %v202_v16, %v155_v7  ;;  %v217_v7 = vadd.f32 %v216_v12, %v215_v63  ;;  %v182_v9 = vrot.slane %v181_v4, 1  ;;  %v832_v15 = vld [vmem:[#allocation6 + $0xfc8] sm:$0xff]  ;;  %v329_v63 = vld [vmem:[#allocation6 + $0x10] sm:$0xff]  ;;  %v847_v12 = vld [vmem:[#allocation6 + $0x1040] sm:$0xff] }
  0xd7   :  { %v171_v16 = vadd.f32 %v170_v46, %v169_v3  ;;  %v3722_v25 = vpack.c.bf16 %v832_v15, %v824_v14  ;;  %v354_v3 = vld [vmem:[#allocation6 + $0xd8] sm:$0xff]  ;;  %v855_v15 = vld [vmem:[#allocation6 + $0x1080] sm:$0xff]  ;;  %v896_v26 = vld [vmem:[#allocation6 + $0x11c8] sm:$0xff] }
  0xd8   :  { %v198_v1 = vrot.slane %v197_v32, 2  ;;  %v204_v62 = vrot.slane %v203_v33, 2  ;;  %v218_v18 = vrot.slane %v217_v7, 1  ;;  %v183_v49 = vadd.f32 %v182_v9, %v181_v4  ;;  %v402_v57 = vld [vmem:[#allocation6 + $0x258] sm:$0xff] }
  0xd9   :  { %3723 = vmatprep.subr.bf16.mxu0 %v3722_v25  ;;  %v3728_v9 = vpack.c.bf16 %v847_v12, %v839_v10 }
  0xda   :  { %v199_v5 = vadd.f32 %v198_v1, %v197_v32  ;;  %v205_v6 = vadd.f32 %v204_v62, %v203_v33  ;;  %v165_v62 = vadd.f32 %v164_v42, %v163_v2  ;;  %v219_v22 = vadd.f32 %v218_v18, %v217_v7  ;;  %3725 = vmatpush1.bf16.msra.mxu0 %v3724_v58  ;;  %v346_v2 = vld [vmem:[#allocation6 + $0x98] sm:$0xff]  ;;  %v864_v42 = vld [vmem:[#allocation6 + $0x10c8] sm:$0xff]  ;;  %v353_v7 = vld [vmem:[#allocation6 + $0xd0] sm:$0xff] }
  0xdb   :  { %v245_v55 = vcombine.low %v177_v19, %v183_v49  ;;  %v3660_v32 = vpack.c.bf16 %v575_v24, %v567_v23  ;;  %3727 = vmatprep.subr.bf16.mxu0 %v3726_v43  ;;  %v3794_v46 = vpack.c.bf16 %v354_v3, %v346_v2  ;;  %v880_v18 = vld [vmem:[#allocation6 + $0x1148] sm:$0xff]  ;;  %v361_v49 = vld [vmem:[#allocation6 + $0x110] sm:$0xff]  ;;  %v378_v23 = vld [vmem:[#allocation6 + $0x198] sm:$0xff] }
  0xdc   :  { %v200_v48 = vrot.slane %v199_v5, 1  ;;  %v206_v13 = vrot.slane %v205_v6, 1  ;;  %v244_v27 = vcombine.low %v165_v62, %v171_v16  ;;  %v270_v31 = vcombine.low %v213_v21, %v219_v22  ;;  %v863_v62 = vld [vmem:[#allocation6 + $0x10c0] sm:$0xff]  ;;  %v386_v24 = vld [vmem:[#allocation6 + $0x1d8] sm:$0xff]  ;;  %v401_v43 = vld [vmem:[#allocation6 + $0x250] sm:$0xff] }
  0xdd   :  { %v259_v33 = vrot.slane %v245_v55, %v5579_v38  ;;  %3661 = vmatpush1.bf16.msra.mxu1 %v3660_v32  ;;  %v3796_v16 = vpack.c.bf16 %v353_v7, %v345_v47  ;;  %v3734_v54 = vpack.c.bf16 %v880_v18, %v872_v17  ;;  %v871_v21 = vld [vmem:[#allocation6 + $0x1100] sm:$0xff]  ;;  %v377_v55 = vld [vmem:[#allocation6 + $0x190] sm:$0xff]  ;;  %v3802_v29 = vpack.c.bf16 %v386_v24, %v378_v23  ;;  %v147_v58 = vld [vmem:[#allocation3 + $0x28] sm:$0xff] }
  0xde   :  { %v201_v53 = vadd.f32 %v200_v48, %v199_v5  ;;  %v207_v20 = vadd.f32 %v206_v13, %v205_v6  ;;  %v252_v56 = vrot.slane %v244_v27, %v5579_v38  ;;  %v284_v34 = vrot.slane %v270_v31, %v5579_v38  ;;  %3791 = vmatprep.subr.bf16.mxu1 %v3790_v39  ;;  %v856_v6 = vld [vmem:[#allocation6 + $0x1088] sm:$0xff]  ;;  %v362_v48 = vld [vmem:[#allocation6 + $0x118] sm:$0xff]  ;;  %v879_v22 = vld [vmem:[#allocation6 + $0x1140] sm:$0xff] }
  0xdf   :  { %v3792_v5 = vpack.c.bf16 %v337_v40, %v329_v63  ;;  %v370_v13 = vld [vmem:[#allocation6 + $0x158] sm:$0xff]  ;;  %v3730_v14 = vpack.c.bf16 %v864_v42, %v856_v6  ;;  %v888_v27 = vld [vmem:[#allocation6 + $0x1188] sm:$0xff]  ;;  %v895_v31 = vld [vmem:[#allocation6 + $0x11c0] sm:$0xff] }
  0xe0   :  { %v269_v28 = vcombine.low %v201_v53, %v207_v20  ;;  %v260_v44 = vcombine.low %v252_v56, %v259_v33  ;;  %v3798_v19 = vpack.c.bf16 %v370_v13, %v362_v48  ;;  %v369_v53 = vld [vmem:[#allocation6 + $0x150] sm:$0xff]  ;;  %v3732_v20 = vpack.c.bf16 %v863_v62, %v855_v15  ;;  %v410_v63 = vld [vmem:[#allocation6 + $0x298] sm:$0xff]  ;;  %v920_v6 = vld [vmem:[#allocation6 + $0x1288] sm:$0xff] }
  0xe1   :  { %v3800_v25 = vpack.c.bf16 %v369_v53, %v361_v49  ;;  %v3736_v56 = vpack.c.bf16 %v879_v22, %v871_v21  ;;  %v3738_v32 = vpack.c.bf16 %v896_v26, %v888_v27  ;;  %v393_v39 = vld [vmem:[#allocation6 + $0x210] sm:$0xff]  ;;  %v418_v40 = vld [vmem:[#allocation6 + $0x2d8] sm:$0xff]  ;;  %v928_v42 = vld [vmem:[#allocation6 + $0x12c8] sm:$0xff] }
  0xe2   :  { %v277_v36 = vrot.slane %v269_v28, %v5579_v38  ;;  %v385_v28 = vld [vmem:[#allocation6 + $0x1d0] sm:$0xff]  ;;  %v3810_v15 = vpack.c.bf16 %v418_v40, %v410_v63  ;;  %v919_v62 = vld [vmem:[#allocation6 + $0x1280] sm:$0xff]  ;;  %v426_v17 = vld [vmem:[#allocation6 + $0x318] sm:$0xff]  ;;  %v3746_v23 = vpack.c.bf16 %v928_v42, %v920_v6 }
  0xe3   :  { %v3804_v33 = vpack.c.bf16 %v385_v28, %v377_v55  ;;  %v417_v47 = vld [vmem:[#allocation6 + $0x2d0] sm:$0xff]  ;;  %v434_v18 = vld [vmem:[#allocation6 + $0x358] sm:$0xff]  ;;  %v944_v21 = vld [vmem:[#allocation6 + $0x1348] sm:$0xff] }
  0xe4   :  { %v285_v59 = vcombine.low %v277_v36, %v284_v34  ;;  %v904_v36 = vld [vmem:[#allocation6 + $0x1208] sm:$0xff]  ;;  %v425_v22 = vld [vmem:[#allocation6 + $0x310] sm:$0xff]  ;;  %v458_v63 = vld [vmem:[#allocation6 + $0x418] sm:$0xff] }
  0xe5   :  { %v912_v34 = vld [vmem:[#allocation6 + $0x1248] sm:$0xff]  ;;  %v433_v27 = vld [vmem:[#allocation6 + $0x350] sm:$0xff]  ;;  %v466_v40 = vld [vmem:[#allocation6 + $0x458] sm:$0xff] }
  0xe6   :  { %v298_v60 = vrot.slane %v285_v59, 7  ;;  %v153_v59 = vunpack.c.h.bf16 %v144_v37  ;;  %v3742_v12 = vpack.c.bf16 %v912_v34, %v904_v36  ;;  %v3816_v34 = vpack.c.bf16 %v433_v27, %v425_v22  ;;  %v968_v6 = vld [vmem:[#allocation6 + $0x1408] sm:$0xff] }
  0xe7   :  { %v976_v42 = vld [vmem:[#allocation6 + $0x1448] sm:$0xff] }
  0xe8   :  { %v300_v45 = vsel %vm299_vm0, %v298_v60, %v260_v44  ;;  %v152_v44 = vunpack.c.l.bf16 %v144_v37  ;;  %v190_v2 = vrot.slane %v153_v59, 4  ;;  %v935_v37 = vld [vmem:[#allocation6 + $0x1300] sm:$0xff] }
  0xe9   :  { %v302_v50 = vsel %vm301_vm1, %v298_v60, %v300_v45  ;;  %v159_v45 = vunpack.c.h.bf16 %v147_v58 }
  0xea   :  { %v304_v51 = vsel %vm303_vm2, %v298_v60, %v302_v50  ;;  %v3740_v50 = vpack.c.bf16 %v895_v31, %v887_v30  ;;  %v3814_v30 = vpack.c.bf16 %v434_v18, %v426_v17  ;;  %v450_v31 = vld [vmem:[#allocation6 + $0x3d8] sm:$0xff]  ;;  %v967_v17 = vld [vmem:[#allocation6 + $0x1400] sm:$0xff] }
  0xeb   :  { %v306_v52 = vsel %vm305_vm3, %v298_v60, %v304_v51  ;;  %v158_v60 = vunpack.c.l.bf16 %v147_v58  ;;  %v3806_v51 = vpack.c.bf16 %v402_v57, %v394_v35  ;;  %v226_v10 = vrot.slane %v159_v45, 4  ;;  %v943_v58 = vld [vmem:[#allocation6 + $0x1340] sm:$0xff] }
  0xec   :  { %v325_v61 = vmul.f32 0.125, %v306_v52  ;;  %v903_v52 = vld [vmem:[#allocation6 + $0x1200] sm:$0xff] }
  0xed   :  { %v220_v3 = vrot.slane %v158_v60, 4  ;;  %v227_v13 = vadd.f32 %v226_v10, %v159_v45  ;;  %v951_v10 = vld [vmem:[#allocation6 + $0x1380] sm:$0xff] }
  0xee   :  { %v5663_v0 = vrot.slane %v325_v61, %v5579_v38  ;;  %v1139_v1 = vcombine.high %v325_v61, %v325_v61  ;;  %v911_v61 = vld [vmem:[#allocation6 + $0x1240] sm:$0xff] }
  0xef   :  { %v221_v48 = vadd.f32 %v220_v3, %v158_v60  ;;  %v975_v18 = vld [vmem:[#allocation6 + $0x1440] sm:$0xff] }
  0xf0   :  { %v5667_v41 = vcombine.high %v5663_v0, %v5663_v0  ;;  %v5670_v4 = vrot.slane %v1139_v1, %v5579_v38  ;;  %v184_v1 = vrot.slane %v152_v44, 4  ;;  %v3760_v27 = vpack.c.bf16 %v975_v18, %v967_v17  ;;  %v1048_v18 = vld [vmem:[#allocation6 + $0x1688] sm:$0xff] }
  0xf1   :  { %v222_v53 = vrot.slane %v221_v48, 2 }
  0xf2   :  { %1234 = vmatprep.mubr.f32.mxu1 %v5667_v41  ;;  %v5675_v8 = vcombine.high %v5670_v4, %v5670_v4  ;;  %v185_v7 = vadd.f32 %v184_v1, %v152_v44 }
  0xf3   :  { %1235 = vmatmul.mubr.f32.vlgmr.msra.gmra.mrb[0].mxu1 %v5663_v0  ;;  %v223_v55 = vadd.f32 %v222_v53, %v221_v48  ;;  %v465_v48 = vld [vmem:[#allocation6 + $0x450] sm:$0xff]  ;;  %v992_v53 = vld [vmem:[#allocation6 + $0x14c8] sm:$0xff] }
  0xf4   :  { %1305 = vmatprep.mubr.f32.mxu0 %v5675_v8  ;;  %3793 = vmatpush1.bf16.msra.mxu1 %v3792_v5  ;;  %v3808_v5 = vpack.c.bf16 %v401_v43, %v393_v39  ;;  %v952_v39 = vld [vmem:[#allocation6 + $0x1388] sm:$0xff] }
  0xf5   :  { %1306 = vmatmul.mubr.f32.vlgmr.msra.gmra.mrb[0].mxu0 %v5670_v4  ;;  %3795 = vmatprep.subr.bf16.mxu1 %v3794_v46  ;;  %v409_v46 = vld [vmem:[#allocation6 + $0x290] sm:$0xff]  ;;  %v960_v43 = vld [vmem:[#allocation6 + $0x13c8] sm:$0xff] }
  0xf6   :  { %3729 = vmatpush1.bf16.msra.mxu0 %v3728_v9  ;;  %1447 = vmatprep.mubr.f32.mxu1 %v5667_v41  ;;  %v191_v9 = vadd.f32 %v190_v2, %v153_v59  ;;  %v3812_v24 = vpack.c.bf16 %v417_v47, %v409_v46  ;;  %v3754_v3 = vpack.c.bf16 %v960_v43, %v952_v39  ;;  %v514_v39 = vld [vmem:[#allocation6 + $0x5d8] sm:$0xff] }
  0xf7   :  { %3731 = vmatprep.subr.bf16.mxu0 %v3730_v14  ;;  %v3744_v14 = vpack.c.bf16 %v911_v61, %v903_v52  ;;  %v449_v52 = vld [vmem:[#allocation6 + $0x3d0] sm:$0xff]  ;;  %v3752_v61 = vpack.c.bf16 %v943_v58, %v935_v37 }
  0xf8   :  { %3797 = vmatpush1.bf16.msra.mxu1 %v3796_v16  ;;  %v927_v16 = vld [vmem:[#allocation6 + $0x12c0] sm:$0xff]  ;;  %v192_v49 = vrot.slane %v191_v9, 2  ;;  %v497_v37 = vld [vmem:[#allocation6 + $0x550] sm:$0xff] }
  0xf9   :  { %3799 = vmatprep.subr.bf16.mxu1 %v3798_v19  ;;  %v186_v19 = vrot.slane %v185_v7, 2 }
  0xfa   :  { %3733 = vmatpush1.bf16.msra.mxu0 %v3732_v20  ;;  %v228_v20 = vrot.slane %v227_v13, 2  ;;  %v193_v26 = vadd.f32 %v192_v49, %v191_v9  ;;  %v457_v9 = vld [vmem:[#allocation6 + $0x410] sm:$0xff]  ;;  %v984_v49 = vld [vmem:[#allocation6 + $0x1488] sm:$0xff] }
  0xfb   :  { %3735 = vmatprep.subr.bf16.mxu0 %v3734_v54  ;;  %v936_v54 = vld [vmem:[#allocation6 + $0x1308] sm:$0xff] }
  0xfc   :  { %3801 = vmatpush1.bf16.msra.mxu1 %v3800_v25  ;;  %v187_v25 = vadd.f32 %v186_v19, %v185_v7  ;;  %v229_v28 = vadd.f32 %v228_v20, %v227_v13  ;;  %v194_v57 = vrot.slane %v193_v26, 1  ;;  %v3750_v36 = vpack.c.bf16 %v944_v21, %v936_v54  ;;  %v481_v54 = vld [vmem:[#allocation6 + $0x4d0] sm:$0xff]  ;;  %v141_v21 = vld [vmem:[#allocation2 + $0x8] sm:$0xf] }
  0xfd   :  { %3803 = vmatprep.subr.bf16.mxu1 %v3802_v29  ;;  %v3748_v29 = vpack.c.bf16 %v927_v16, %v919_v62  ;;  %v3822_v7 = vpack.c.bf16 %v466_v40, %v458_v63  ;;  %v3758_v16 = vpack.c.bf16 %v976_v42, %v968_v6  ;;  %v3824_v19 = vpack.c.bf16 %v465_v48, %v457_v9  ;;  %v522_v40 = vld [vmem:[#allocation6 + $0x618] sm:$0xff]  ;;  %v1040_v6 = vld [vmem:[#allocation6 + $0x1648] sm:$0xff] }
  0xfe   :  { %3737 = vmatpush1.bf16.msra.mxu0 %v3736_v56  ;;  %v442_v56 = vld [vmem:[#allocation6 + $0x398] sm:$0xff]  ;;  %v188_v35 = vrot.slane %v187_v25, 1  ;;  %v195_v59 = vadd.f32 %v194_v57, %v193_v26  ;;  %v1008_v57 = vld [vmem:[#allocation6 + $0x1548] sm:$0xff] }
  0xff   :  { %3739 = vmatprep.subr.bf16.mxu0 %v3738_v32  ;;  %v224_v32 = vrot.slane %v223_v55, 1  ;;  %v498_v26 = vld [vmem:[#allocation6 + $0x558] sm:$0xff] }
 0x100   :  { %3805 = vmatpush1.bf16.msra.mxu1 %v3804_v33  ;;  %v230_v33 = vrot.slane %v229_v28, 1  ;;  %v189_v44 = vadd.f32 %v188_v35, %v187_v25  ;;  %v490_v25 = vld [vmem:[#allocation6 + $0x518] sm:$0xff]  ;;  %v1000_v35 = vld [vmem:[#allocation6 + $0x1508] sm:$0xff] }
 0x101   :  { %3807 = vmatprep.subr.bf16.mxu1 %v3806_v51  ;;  %v225_v60 = vadd.f32 %v224_v32, %v223_v55  ;;  %v441_v51 = vld [vmem:[#allocation6 + $0x390] sm:$0xff]  ;;  %v3766_v43 = vpack.c.bf16 %v1008_v57, %v1000_v35  ;;  %v538_v48 = vld [vmem:[#allocation6 + $0x698] sm:$0xff] }
 0x102   :  { %3741 = vmatpush1.bf16.msra.mxu0 %v3740_v50  ;;  %v231_v45 = vadd.f32 %v230_v33, %v229_v28  ;;  %v3818_v50 = vpack.c.bf16 %v450_v31, %v442_v56  ;;  %v261_v1 = vcombine.low %v189_v44, %v195_v59  ;;  %v3762_v28 = vpack.c.bf16 %v992_v53, %v984_v49  ;;  %v999_v44 = vld [vmem:[#allocation6 + $0x1500] sm:$0xff]  ;;  %v570_v35 = vld [vmem:[#allocation6 + $0x798] sm:$0xff] }
 0x103   :  { %3743 = vmatprep.subr.bf16.mxu0 %v3742_v12  ;;  %v959_v12 = vld [vmem:[#allocation6 + $0x13c0] sm:$0xff]  ;;  %v3830_v33 = vpack.c.bf16 %v498_v26, %v490_v25  ;;  %v578_v57 = vld [vmem:[#allocation6 + $0x7d8] sm:$0xff] }
 0x104   :  { %3809 = vmatpush1.bf16.msra.mxu1 %v3808_v5  ;;  %v286_v2 = vcombine.low %v225_v60, %v231_v45  ;;  %v3820_v5 = vpack.c.bf16 %v449_v52, %v441_v51  ;;  %v268_v46 = vrot.slane %v261_v1, %v5579_v38  ;;  %v3756_v13 = vpack.c.bf16 %v959_v12, %v951_v10  ;;  %v1007_v59 = vld [vmem:[#allocation6 + $0x1540] sm:$0xff]  ;;  %v1016_v45 = vld [vmem:[#allocation6 + $0x1588] sm:$0xff]  ;;  %v505_v52 = vld [vmem:[#allocation6 + $0x590] sm:$0xff] }
 0x105   :  { %3811 = vmatprep.subr.bf16.mxu1 %v3810_v15  ;;  %v482_v15 = vld [vmem:[#allocation6 + $0x4d8] sm:$0xff]  ;;  %v3768_v63 = vpack.c.bf16 %v1007_v59, %v999_v44  ;;  %v1023_v10 = vld [vmem:[#allocation6 + $0x15c0] sm:$0xff]  ;;  %v577_v44 = vld [vmem:[#allocation6 + $0x7d0] sm:$0xff] }
 0x106   :  { %3745 = vmatpush1.bf16.msra.mxu0 %v3744_v14  ;;  %v293_v47 = vrot.slane %v286_v2, %v5579_v38  ;;  %v474_v14 = vld [vmem:[#allocation6 + $0x498] sm:$0xff]  ;;  %v1047_v25 = vld [vmem:[#allocation6 + $0x1680] sm:$0xff] }
 0x107   :  { %3747 = vmatprep.subr.bf16.mxu0 %v3746_v23  ;;  %v3826_v23 = vpack.c.bf16 %v482_v15, %v474_v14  ;;  %v530_v1 = vld [vmem:[#allocation6 + $0x658] sm:$0xff]  ;;  %v1055_v26 = vld [vmem:[#allocation6 + $0x16c0] sm:$0xff] }
 0x108   :  { %3813 = vmatpush1.bf16.msra.mxu1 %v3812_v24  ;;  %v309_v62 = vrot.slane %v293_v47, 7  ;;  %v473_v24 = vld [vmem:[#allocation6 + $0x490] sm:$0xff]  ;;  %v3838_v42 = vpack.c.bf16 %v530_v1, %v522_v40  ;;  %v340_v40 = vld [vmem:[#allocation6 + $0x68] sm:$0xff] }
 0x109   :  { %3815 = vmatprep.subr.bf16.mxu1 %v3814_v30  ;;  %v991_v30 = vld [vmem:[#allocation6 + $0x14c0] sm:$0xff]  ;;  %v3828_v31 = vpack.c.bf16 %v481_v54, %v473_v24  ;;  %v529_v47 = vld [vmem:[#allocation6 + $0x650] sm:$0xff]  ;;  %v554_v54 = vld [vmem:[#allocation6 + $0x718] sm:$0xff] }
 0x10a   :  { %3749 = vmatpush1.bf16.msra.mxu0 %v3748_v29  ;;  %v310_v20 = vsel %vm299_vm0, %v309_v62, %v268_v46  ;;  %v983_v29 = vld [vmem:[#allocation6 + $0x1480] sm:$0xff]  ;;  %v521_v46 = vld [vmem:[#allocation6 + $0x610] sm:$0xff] }
 0x10b   :  { %3751 = vmatprep.subr.bf16.mxu0 %v3750_v36  ;;  %v311_v22 = vsel %vm301_vm1, %v309_v62, %v310_v20  ;;  %v489_v36 = vld [vmem:[#allocation6 + $0x510] sm:$0xff]  ;;  %v3764_v58 = vpack.c.bf16 %v991_v30, %v983_v29  ;;  %v3840_v17 = vpack.c.bf16 %v529_v47, %v521_v46  ;;  %v339_v46 = vld [vmem:[#allocation6 + $0x60] sm:$0xff] }
 0x10c   :  { %3817 = vmatpush1.bf16.msra.mxu1 %v3816_v34  ;;  %v312_v55 = vsel %vm303_vm2, %v309_v62, %v311_v22  ;;  %v506_v34 = vld [vmem:[#allocation6 + $0x598] sm:$0xff]  ;;  %v3832_v60 = vpack.c.bf16 %v497_v37, %v489_v36  ;;  %v537_v20 = vld [vmem:[#allocation6 + $0x690] sm:$0xff]  ;;  %v1071_v36 = vld [vmem:[#allocation6 + $0x1740] sm:$0xff] }
 0x10d   :  { %3819 = vmatprep.subr.bf16.mxu1 %v3818_v50  ;;  %v313_v56 = vsel %vm305_vm3, %v309_v62, %v312_v55  ;;  %v1024_v50 = vld [vmem:[#allocation6 + $0x15c8] sm:$0xff]  ;;  %v3834_v51 = vpack.c.bf16 %v514_v39, %v506_v34  ;;  %v1031_v62 = vld [vmem:[#allocation6 + $0x1600] sm:$0xff]  ;;  %v553_v30 = vld [vmem:[#allocation6 + $0x710] sm:$0xff]  ;;  %v3850_v39 = vpack.c.bf16 %v578_v57, %v570_v35 }
 0x10e   :  { %3753 = vmatpush1.bf16.msra.mxu0 %v3752_v61  ;;  %v317_v32 = vadd.f32 %v313_v56, %v141_v21  ;;  %v513_v61 = vld [vmem:[#allocation6 + $0x5d0] sm:$0xff]  ;;  %v3770_v2 = vpack.c.bf16 %v1024_v50, %v1016_v45  ;;  %v562_v21 = vld [vmem:[#allocation6 + $0x758] sm:$0xff]  ;;  %v1088_v34 = vld [vmem:[#allocation6 + $0x17c8] sm:$0xff] }
 0x10f   :  { %3755 = vmatprep.subr.bf16.mxu0 %v3754_v3  ;;  %v1015_v3 = vld [vmem:[#allocation6 + $0x1580] sm:$0xff]  ;;  %v3836_v12 = vpack.c.bf16 %v513_v61, %v505_v52  ;;  %v3846_v29 = vpack.c.bf16 %v562_v21, %v554_v54  ;;  %v561_v56 = vld [vmem:[#allocation6 + $0x750] sm:$0xff]  ;;  %v594_v45 = vld [vmem:[#allocation6 + $0x858] sm:$0xff] }
 0x110   :  { %3821 = vmatpush1.bf16.msra.mxu1 %v3820_v5  ;;  %319 = vst [vmem:[#allocation2 + $0x8] sm:$0xf] %v317_v32  ;;  %v1032_v5 = vld [vmem:[#allocation6 + $0x1608] sm:$0xff]  ;;  %v3772_v9 = vpack.c.bf16 %v1023_v10, %v1015_v3  ;;  %v3848_v37 = vpack.c.bf16 %v561_v56, %v553_v30  ;;  %v1087_v52 = vld [vmem:[#allocation6 + $0x17c0] sm:$0xff]  ;;  %v593_v3 = vld [vmem:[#allocation6 + $0x850] sm:$0xff] }
 0x111   :  { %3823 = vmatprep.subr.bf16.mxu1 %v3822_v7  ;;  %v3774_v15 = vpack.c.bf16 %v1040_v6, %v1032_v5  ;;  %v610_v5 = vld [vmem:[#allocation6 + $0x8d8] sm:$0xff]  ;;  %v617_v54 = vld [vmem:[#allocation6 + $0x910] sm:$0xff]  ;;  %v380_v30 = vld [vmem:[#allocation6 + $0x1a8] sm:$0xff] }
 0x112   :  { %3757 = vmatpush1.bf16.msra.mxu0 %v3756_v13  ;;  %v546_v13 = vld [vmem:[#allocation6 + $0x6d8] sm:$0xff]  ;;  %v625_v21 = vld [vmem:[#allocation6 + $0x950] sm:$0xff]  ;;  %v388_v56 = vld [vmem:[#allocation6 + $0x1e8] sm:$0xff] }
 0x113   :  { %3759 = vmatprep.subr.bf16.mxu0 %v3758_v16  ;;  %v1039_v16 = vld [vmem:[#allocation6 + $0x1640] sm:$0xff]  ;;  %v3842_v53 = vpack.c.bf16 %v546_v13, %v538_v48  ;;  %v601_v13 = vld [vmem:[#allocation6 + $0x890] sm:$0xff] }
 0x114   :  { %3825 = vmatpush1.bf16.msra.mxu1 %v3824_v19  ;;  %v1056_v19 = vld [vmem:[#allocation6 + $0x16c8] sm:$0xff]  ;;  %v3776_v24 = vpack.c.bf16 %v1039_v16, %v1031_v62  ;;  %v618_v62 = vld [vmem:[#allocation6 + $0x918] sm:$0xff]  ;;  %v633_v35 = vld [vmem:[#allocation6 + $0x990] sm:$0xff] }
 0x115   :  { %3827 = vmatprep.subr.bf16.mxu1 %v3826_v23  ;;  %v545_v23 = vld [vmem:[#allocation6 + $0x6d0] sm:$0xff]  ;;  %v626_v16 = vld [vmem:[#allocation6 + $0x958] sm:$0xff] }
 0x116   :  { %3761 = vmatpush1.bf16.msra.mxu0 %v3760_v27  ;;  %v3778_v27 = vpack.c.bf16 %v1056_v19, %v1048_v18  ;;  %v3844_v55 = vpack.c.bf16 %v545_v23, %v537_v20  ;;  %v347_v18 = vld [vmem:[#allocation6 + $0xa0] sm:$0xff]  ;;  %v364_v20 = vld [vmem:[#allocation6 + $0x128] sm:$0xff]  ;;  %v641_v57 = vld [vmem:[#allocation6 + $0x9d0] sm:$0xff] }
 0x117   :  { %3763 = vmatprep.subr.bf16.mxu0 %v3762_v28  ;;  %v324_v7 = vld [vmem:[#allocation2 + $0x8] sm:$0xf]  ;;  %v355_v19 = vld [vmem:[#allocation6 + $0xe0] sm:$0xff] }
 0x118   :  { %3829 = vmatpush1.bf16.msra.mxu1 %v3828_v31  ;;  %v326_v14 = vmul.f32 0.125, %v324_v7  ;;  %v1072_v28 = vld [vmem:[#allocation6 + $0x1748] sm:$0xff]  ;;  %v3780_v31 = vpack.c.bf16 %v1055_v26, %v1047_v25  ;;  %v634_v25 = vld [vmem:[#allocation6 + $0x998] sm:$0xff] }
 0x119   :  { %3831 = vmatprep.subr.bf16.mxu1 %v3830_v33  ;;  %v1063_v33 = vld [vmem:[#allocation6 + $0x1700] sm:$0xff]  ;;  %v348_v7 = vld [vmem:[#allocation6 + $0xa8] sm:$0xff]  ;;  %v642_v26 = vld [vmem:[#allocation6 + $0x9d8] sm:$0xff] }
 0x11a   :  { %3765 = vmatpush1.bf16.msra.mxu0 %v3764_v58  ;;  %v5688_v49 = vrot.slane %v326_v14, %v5579_v38  ;;  %v1064_v38 = vld [vmem:[#allocation6 + $0x1708] sm:$0xff]  ;;  %v3784_v59 = vpack.c.bf16 %v1071_v36, %v1063_v33  ;;  %v609_v14 = vld [vmem:[#allocation6 + $0x8d0] sm:$0xff]  ;;  %v650_v33 = vld [vmem:[#allocation6 + $0xa18] sm:$0xff] }
 0x11b   :  { %3767 = vmatprep.subr.bf16.mxu0 %v3766_v43  ;;  %v3782_v32 = vpack.c.bf16 %v1072_v28, %v1064_v38  ;;  %v1080_v58 = vld [vmem:[#allocation6 + $0x1788] sm:$0xff]  ;;  %v569_v43 = vld [vmem:[#allocation6 + $0x790] sm:$0xff]  ;;  %v363_v38 = vld [vmem:[#allocation6 + $0x120] sm:$0xff] }
 0x11c   :  { %3833 = vmatpush1.bf16.msra.mxu1 %v3832_v60  ;;  %v5692_v22 = vcombine.high %v5688_v49, %v5688_v49  ;;  %v586_v60 = vld [vmem:[#allocation6 + $0x818] sm:$0xff]  ;;  %v3786_v50 = vpack.c.bf16 %v1088_v34, %v1080_v58  ;;  %v3852_v61 = vpack.c.bf16 %v577_v44, %v569_v43  ;;  %v372_v23 = vld [vmem:[#allocation6 + $0x168] sm:$0xff]  ;;  %v371_v28 = vld [vmem:[#allocation6 + $0x160] sm:$0xff] }
 0x11d   :  { %3835 = vmatprep.subr.bf16.mxu1 %v3834_v51  ;;  %v1079_v51 = vld [vmem:[#allocation6 + $0x1780] sm:$0xff]  ;;  %v3854_v1 = vpack.c.bf16 %v594_v45, %v586_v60  ;;  %v658_v36 = vld [vmem:[#allocation6 + $0xa58] sm:$0xff]  ;;  %v396_v43 = vld [vmem:[#allocation6 + $0x228] sm:$0xff] }
 0x11e   :  { %3769 = vmatpush1.bf16.msra.mxu0 %v3768_v63  ;;  %1376 = vmatprep.mubr.f32.mxu0 %v5692_v22  ;;  %v332_v63 = vld [vmem:[#allocation6 + $0x28] sm:$0xff]  ;;  %v3788_v10 = vpack.c.bf16 %v1087_v52, %v1079_v51  ;;  %v379_v58 = vld [vmem:[#allocation6 + $0x1a0] sm:$0xff]  ;;  %v649_v60 = vld [vmem:[#allocation6 + $0xa10] sm:$0xff] }
 0x11f   :  { %3771 = vmatprep.subr.bf16.mxu0 %v3770_v2  ;;  %v585_v2 = vld [vmem:[#allocation6 + $0x810] sm:$0xff]  ;;  %v3982_v6 = vpack.c.bf16 %v340_v40, %v332_v63  ;;  %v387_v34 = vld [vmem:[#allocation6 + $0x1e0] sm:$0xff]  ;;  %v404_v44 = vld [vmem:[#allocation6 + $0x268] sm:$0xff] }
 0x120   :  { %3837 = vmatpush1.bf16.msra.mxu1 %v3836_v12  ;;  %v602_v12 = vld [vmem:[#allocation6 + $0x898] sm:$0xff]  ;;  %v3856_v47 = vpack.c.bf16 %v593_v3, %v585_v2  ;;  %v657_v45 = vld [vmem:[#allocation6 + $0xa50] sm:$0xff]  ;;  %v395_v63 = vld [vmem:[#allocation6 + $0x220] sm:$0xff] }
 0x121   :  { %3839 = vmatprep.subr.bf16.mxu1 %v3838_v42  ;;  %v331_v42 = vld [vmem:[#allocation6 + $0x20] sm:$0xff]  ;;  %v3858_v48 = vpack.c.bf16 %v610_v5, %v602_v12  ;;  %v666_v51 = vld [vmem:[#allocation6 + $0xa98] sm:$0xff]  ;;  %v412_v2 = vld [vmem:[#allocation6 + $0x2a8] sm:$0xff] }
 0x122   :  { %3773 = vmatpush1.bf16.msra.mxu0 %v3772_v9  ;;  %v356_v9 = vld [vmem:[#allocation6 + $0xe8] sm:$0xff]  ;;  %v674_v52 = vld [vmem:[#allocation6 + $0xad8] sm:$0xff]  ;;  %v403_v40 = vld [vmem:[#allocation6 + $0x260] sm:$0xff] }
 0x123   :  { %3775 = vmatprep.subr.bf16.mxu0 %v3774_v15  ;;  %v3984_v15 = vpack.c.bf16 %v339_v46, %v331_v42  ;;  %v420_v3 = vld [vmem:[#allocation6 + $0x2e8] sm:$0xff]  ;;  %v665_v12 = vld [vmem:[#allocation6 + $0xa90] sm:$0xff]  ;;  %v682_v42 = vld [vmem:[#allocation6 + $0xb18] sm:$0xff] }
 0x124   :  { %3841 = vmatpush1.bf16.msra.mxu1 %v3840_v17  ;;  %v3986_v17 = vpack.c.bf16 %v356_v9, %v348_v7  ;;  %v673_v5 = vld [vmem:[#allocation6 + $0xad0] sm:$0xff]  ;;  %v690_v46 = vld [vmem:[#allocation6 + $0xb58] sm:$0xff]  ;;  %v411_v7 = vld [vmem:[#allocation6 + $0x2a0] sm:$0xff] }
 0x125   :  { %3843 = vmatprep.subr.bf16.mxu1 %v3842_v53  ;;  %v3860_v53 = vpack.c.bf16 %v609_v14, %v601_v13  ;;  %v419_v9 = vld [vmem:[#allocation6 + $0x2e0] sm:$0xff]  ;;  %v428_v13 = vld [vmem:[#allocation6 + $0x328] sm:$0xff] }
 0x126   :  { %3777 = vmatpush1.bf16.msra.mxu0 %v3776_v24  ;;  %v3862_v24 = vpack.c.bf16 %v626_v16, %v618_v62  ;;  %v436_v14 = vld [vmem:[#allocation6 + $0x368] sm:$0xff]  ;;  %v681_v62 = vld [vmem:[#allocation6 + $0xb10] sm:$0xff] }
 0x127   :  { %3779 = vmatprep.subr.bf16.mxu0 %v3778_v27  ;;  %v3988_v27 = vpack.c.bf16 %v355_v19, %v347_v18  ;;  %v689_v16 = vld [vmem:[#allocation6 + $0xb50] sm:$0xff]  ;;  %v698_v18 = vld [vmem:[#allocation6 + $0xb98] sm:$0xff] }
 0x128   :  { %3845 = vmatpush1.bf16.msra.mxu1 %v3844_v55  ;;  %v3990_v55 = vpack.c.bf16 %v372_v23, %v364_v20  ;;  %v706_v19 = vld [vmem:[#allocation6 + $0xbd8] sm:$0xff]  ;;  %v427_v20 = vld [vmem:[#allocation6 + $0x320] sm:$0xff] }
 0x129   :  { %3847 = vmatprep.subr.bf16.mxu1 %v3846_v29  ;;  %v3864_v29 = vpack.c.bf16 %v625_v21, %v617_v54  ;;  %v435_v23 = vld [vmem:[#allocation6 + $0x360] sm:$0xff]  ;;  %v444_v54 = vld [vmem:[#allocation6 + $0x3a8] sm:$0xff] }
 0x12a   :  { %3781 = vmatpush1.bf16.msra.mxu0 %v3780_v31  ;;  %v3866_v31 = vpack.c.bf16 %v642_v26, %v634_v25  ;;  %v452_v21 = vld [vmem:[#allocation6 + $0x3e8] sm:$0xff]  ;;  %v697_v25 = vld [vmem:[#allocation6 + $0xb90] sm:$0xff] }
 0x12b   :  { %3783 = vmatprep.subr.bf16.mxu0 %v3782_v32  ;;  %v3992_v32 = vpack.c.bf16 %v371_v28, %v363_v38  ;;  %v705_v26 = vld [vmem:[#allocation6 + $0xbd0] sm:$0xff]  ;;  %v714_v38 = vld [vmem:[#allocation6 + $0xc18] sm:$0xff] }
 0x12c   :  { %3849 = vmatpush1.bf16.msra.mxu1 %v3848_v37  ;;  %v3994_v37 = vpack.c.bf16 %v388_v56, %v380_v30  ;;  %v722_v28 = vld [vmem:[#allocation6 + $0xc58] sm:$0xff]  ;;  %v443_v30 = vld [vmem:[#allocation6 + $0x3a0] sm:$0xff] }
 0x12d   :  { %3851 = vmatprep.subr.bf16.mxu1 %v3850_v39  ;;  %v3868_v39 = vpack.c.bf16 %v641_v57, %v633_v35  ;;  %v451_v56 = vld [vmem:[#allocation6 + $0x3e0] sm:$0xff]  ;;  %v460_v35 = vld [vmem:[#allocation6 + $0x428] sm:$0xff] }
 0x12e   :  { %3785 = vmatpush1.bf16.msra.mxu0 %v3784_v59  ;;  %v3870_v59 = vpack.c.bf16 %v658_v36, %v650_v33  ;;  %v468_v57 = vld [vmem:[#allocation6 + $0x468] sm:$0xff]  ;;  %v713_v33 = vld [vmem:[#allocation6 + $0xc10] sm:$0xff] }
 0x12f   :  { %3787 = vmatprep.subr.bf16.mxu0 %v3786_v50  ;;  %v3996_v50 = vpack.c.bf16 %v387_v34, %v379_v58  ;;  %v721_v36 = vld [vmem:[#allocation6 + $0xc50] sm:$0xff]  ;;  %v730_v58 = vld [vmem:[#allocation6 + $0xc98] sm:$0xff] }
 0x130   :  { %3853 = vmatpush1.bf16.msra.mxu1 %v3852_v61  ;;  %v3998_v61 = vpack.c.bf16 %v404_v44, %v396_v43  ;;  %v738_v34 = vld [vmem:[#allocation6 + $0xcd8] sm:$0xff]  ;;  %v459_v43 = vld [vmem:[#allocation6 + $0x420] sm:$0xff] }
 0x131   :  { %3855 = vmatprep.subr.bf16.mxu1 %v3854_v1  ;;  %v3872_v1 = vpack.c.bf16 %v657_v45, %v649_v60  ;;  %v467_v44 = vld [vmem:[#allocation6 + $0x460] sm:$0xff]  ;;  %v476_v60 = vld [vmem:[#allocation6 + $0x4a8] sm:$0xff] }
 0x132   :  { %3789 = vmatpush1.bf16.msra.mxu0 %v3788_v10  ;;  %v3874_v10 = vpack.c.bf16 %v674_v52, %v666_v51  ;;  %v484_v45 = vld [vmem:[#allocation6 + $0x4e8] sm:$0xff]  ;;  %v729_v51 = vld [vmem:[#allocation6 + $0xc90] sm:$0xff] }
 0x133   :  { %3983 = vmatprep.subr.bf16.mxu0 %v3982_v6  ;;  %1448 = vmatmul.mubr.f32.vlgmr.msra.gmra.mrb[2].mxu1 %v5663_v0  ;;  %v4000_v6 = vpack.c.bf16 %v403_v40, %v395_v63  ;;  %v737_v52 = vld [vmem:[#allocation6 + $0xcd0] sm:$0xff]  ;;  %v746_v63 = vld [vmem:[#allocation6 + $0xd18] sm:$0xff] }
 0x134   :  { %3857 = vmatpush1.bf16.msra.mxu1 %v3856_v47  ;;  %1518 = vmatprep.mubr.f32.mxu1 %v5675_v8  ;;  %v4002_v47 = vpack.c.bf16 %v420_v3, %v412_v2  ;;  %v754_v40 = vld [vmem:[#allocation6 + $0xd58] sm:$0xff]  ;;  %v475_v2 = vld [vmem:[#allocation6 + $0x4a0] sm:$0xff] }
 0x135   :  { %1377 = vmatmul.mubr.f32.vlgmr.msra.gmra.mrb[0].mxu0 %v5688_v49  ;;  %3859 = vmatprep.subr.bf16.mxu1 %v3858_v48  ;;  %v3876_v48 = vpack.c.bf16 %v673_v5, %v665_v12  ;;  %v483_v3 = vld [vmem:[#allocation6 + $0x4e0] sm:$0xff]  ;;  %v492_v12 = vld [vmem:[#allocation6 + $0x528] sm:$0xff] }
 0x136   :  { %3985 = vmatpush1.bf16.msra.mxu0 %v3984_v15  ;;  %1660 = vmatprep.mubr.f32.mxu0 %v5667_v41  ;;  %v3878_v15 = vpack.c.bf16 %v690_v46, %v682_v42  ;;  %v500_v5 = vld [vmem:[#allocation6 + $0x568] sm:$0xff]  ;;  %v745_v42 = vld [vmem:[#allocation6 + $0xd10] sm:$0xff] }
 0x137   :  { %3987 = vmatprep.subr.bf16.mxu0 %v3986_v17  ;;  %v4004_v17 = vpack.c.bf16 %v419_v9, %v411_v7  ;;  %v753_v46 = vld [vmem:[#allocation6 + $0xd50] sm:$0xff]  ;;  %v762_v7 = vld [vmem:[#allocation6 + $0xd98] sm:$0xff] }
 0x138   :  { %3861 = vmatpush1.bf16.msra.mxu1 %v3860_v53  ;;  %v4006_v53 = vpack.c.bf16 %v436_v14, %v428_v13  ;;  %v770_v9 = vld [vmem:[#allocation6 + $0xdd8] sm:$0xff]  ;;  %v491_v13 = vld [vmem:[#allocation6 + $0x520] sm:$0xff] }
 0x139   :  { %3863 = vmatprep.subr.bf16.mxu1 %v3862_v24  ;;  %v3880_v24 = vpack.c.bf16 %v689_v16, %v681_v62  ;;  %v499_v14 = vld [vmem:[#allocation6 + $0x560] sm:$0xff]  ;;  %v508_v62 = vld [vmem:[#allocation6 + $0x5a8] sm:$0xff] }
 0x13a   :  { %3989 = vmatpush1.bf16.msra.mxu0 %v3988_v27  ;;  %v3882_v27 = vpack.c.bf16 %v706_v19, %v698_v18  ;;  %v516_v16 = vld [vmem:[#allocation6 + $0x5e8] sm:$0xff]  ;;  %v761_v18 = vld [vmem:[#allocation6 + $0xd90] sm:$0xff] }
 0x13b   :  { %3991 = vmatprep.subr.bf16.mxu0 %v3990_v55  ;;  %v4008_v55 = vpack.c.bf16 %v435_v23, %v427_v20  ;;  %v769_v19 = vld [vmem:[#allocation6 + $0xdd0] sm:$0xff]  ;;  %v778_v20 = vld [vmem:[#allocation6 + $0xe18] sm:$0xff] }
 0x13c   :  { %3865 = vmatpush1.bf16.msra.mxu1 %v3864_v29  ;;  %v4010_v29 = vpack.c.bf16 %v452_v21, %v444_v54  ;;  %v786_v23 = vld [vmem:[#allocation6 + $0xe58] sm:$0xff]  ;;  %v507_v54 = vld [vmem:[#allocation6 + $0x5a0] sm:$0xff] }
 0x13d   :  { %3867 = vmatprep.subr.bf16.mxu1 %v3866_v31  ;;  %v3884_v31 = vpack.c.bf16 %v705_v26, %v697_v25  ;;  %v515_v21 = vld [vmem:[#allocation6 + $0x5e0] sm:$0xff]  ;;  %v524_v25 = vld [vmem:[#allocation6 + $0x628] sm:$0xff] }
 0x13e   :  { %3993 = vmatpush1.bf16.msra.mxu0 %v3992_v32  ;;  %v3886_v32 = vpack.c.bf16 %v722_v28, %v714_v38  ;;  %v532_v26 = vld [vmem:[#allocation6 + $0x668] sm:$0xff]  ;;  %v777_v38 = vld [vmem:[#allocation6 + $0xe10] sm:$0xff] }
 0x13f   :  { %3995 = vmatprep.subr.bf16.mxu0 %v3994_v37  ;;  %v4012_v37 = vpack.c.bf16 %v451_v56, %v443_v30  ;;  %v785_v28 = vld [vmem:[#allocation6 + $0xe50] sm:$0xff]  ;;  %v794_v30 = vld [vmem:[#allocation6 + $0xe98] sm:$0xff] }
 0x140   :  { %3869 = vmatpush1.bf16.msra.mxu1 %v3868_v39  ;;  %v4014_v39 = vpack.c.bf16 %v468_v57, %v460_v35  ;;  %v802_v56 = vld [vmem:[#allocation6 + $0xed8] sm:$0xff]  ;;  %v523_v35 = vld [vmem:[#allocation6 + $0x620] sm:$0xff] }
 0x141   :  { %3871 = vmatprep.subr.bf16.mxu1 %v3870_v59  ;;  %v3888_v59 = vpack.c.bf16 %v721_v36, %v713_v33  ;;  %v531_v57 = vld [vmem:[#allocation6 + $0x660] sm:$0xff]  ;;  %v540_v33 = vld [vmem:[#allocation6 + $0x6a8] sm:$0xff] }
 0x142   :  { %3997 = vmatpush1.bf16.msra.mxu0 %v3996_v50  ;;  %v3890_v50 = vpack.c.bf16 %v738_v34, %v730_v58  ;;  %v548_v36 = vld [vmem:[#allocation6 + $0x6e8] sm:$0xff]  ;;  %v793_v58 = vld [vmem:[#allocation6 + $0xe90] sm:$0xff] }
 0x143   :  { %3999 = vmatprep.subr.bf16.mxu0 %v3998_v61  ;;  %v4016_v61 = vpack.c.bf16 %v467_v44, %v459_v43  ;;  %v801_v34 = vld [vmem:[#allocation6 + $0xed0] sm:$0xff]  ;;  %v810_v43 = vld [vmem:[#allocation6 + $0xf18] sm:$0xff] }
 0x144   :  { %3873 = vmatpush1.bf16.msra.mxu1 %v3872_v1  ;;  %v4018_v1 = vpack.c.bf16 %v484_v45, %v476_v60  ;;  %v818_v44 = vld [vmem:[#allocation6 + $0xf58] sm:$0xff]  ;;  %v539_v60 = vld [vmem:[#allocation6 + $0x6a0] sm:$0xff] }
 0x145   :  { %3875 = vmatprep.subr.bf16.mxu1 %v3874_v10  ;;  %v3892_v10 = vpack.c.bf16 %v737_v52, %v729_v51  ;;  %v547_v45 = vld [vmem:[#allocation6 + $0x6e0] sm:$0xff]  ;;  %v556_v51 = vld [vmem:[#allocation6 + $0x728] sm:$0xff] }
 0x146   :  { %4001 = vmatpush1.bf16.msra.mxu0 %v4000_v6  ;;  %v3894_v6 = vpack.c.bf16 %v754_v40, %v746_v63  ;;  %v564_v52 = vld [vmem:[#allocation6 + $0x768] sm:$0xff]  ;;  %v809_v63 = vld [vmem:[#allocation6 + $0xf10] sm:$0xff] }
 0x147   :  { %4003 = vmatprep.subr.bf16.mxu0 %v4002_v47  ;;  %v4020_v47 = vpack.c.bf16 %v483_v3, %v475_v2  ;;  %v817_v40 = vld [vmem:[#allocation6 + $0xf50] sm:$0xff]  ;;  %v826_v2 = vld [vmem:[#allocation6 + $0xf98] sm:$0xff] }
 0x148   :  { %3877 = vmatpush1.bf16.msra.mxu1 %v3876_v48  ;;  %v4022_v48 = vpack.c.bf16 %v500_v5, %v492_v12  ;;  %v834_v3 = vld [vmem:[#allocation6 + $0xfd8] sm:$0xff]  ;;  %v555_v12 = vld [vmem:[#allocation6 + $0x720] sm:$0xff] }
 0x149   :  { %3879 = vmatprep.subr.bf16.mxu1 %v3878_v15  ;;  %v3896_v15 = vpack.c.bf16 %v753_v46, %v745_v42  ;;  %v563_v5 = vld [vmem:[#allocation6 + $0x760] sm:$0xff]  ;;  %v572_v42 = vld [vmem:[#allocation6 + $0x7a8] sm:$0xff] }
 0x14a   :  { %4005 = vmatpush1.bf16.msra.mxu0 %v4004_v17  ;;  %v3898_v17 = vpack.c.bf16 %v770_v9, %v762_v7  ;;  %v580_v46 = vld [vmem:[#allocation6 + $0x7e8] sm:$0xff]  ;;  %v825_v7 = vld [vmem:[#allocation6 + $0xf90] sm:$0xff] }
 0x14b   :  { %4007 = vmatprep.subr.bf16.mxu0 %v4006_v53  ;;  %v4024_v53 = vpack.c.bf16 %v499_v14, %v491_v13  ;;  %v833_v9 = vld [vmem:[#allocation6 + $0xfd0] sm:$0xff]  ;;  %v842_v13 = vld [vmem:[#allocation6 + $0x1018] sm:$0xff] }
 0x14c   :  { %3881 = vmatpush1.bf16.msra.mxu1 %v3880_v24  ;;  %v4026_v24 = vpack.c.bf16 %v516_v16, %v508_v62  ;;  %v850_v14 = vld [vmem:[#allocation6 + $0x1058] sm:$0xff]  ;;  %v571_v62 = vld [vmem:[#allocation6 + $0x7a0] sm:$0xff] }
 0x14d   :  { %3883 = vmatprep.subr.bf16.mxu1 %v3882_v27  ;;  %v3900_v27 = vpack.c.bf16 %v769_v19, %v761_v18  ;;  %v579_v16 = vld [vmem:[#allocation6 + $0x7e0] sm:$0xff]  ;;  %v588_v18 = vld [vmem:[#allocation6 + $0x828] sm:$0xff] }
 0x14e   :  { %4009 = vmatpush1.bf16.msra.mxu0 %v4008_v55  ;;  %v3902_v55 = vpack.c.bf16 %v786_v23, %v778_v20  ;;  %v596_v19 = vld [vmem:[#allocation6 + $0x868] sm:$0xff]  ;;  %v841_v20 = vld [vmem:[#allocation6 + $0x1010] sm:$0xff] }
 0x14f   :  { %4011 = vmatprep.subr.bf16.mxu0 %v4010_v29  ;;  %v4028_v29 = vpack.c.bf16 %v515_v21, %v507_v54  ;;  %v849_v23 = vld [vmem:[#allocation6 + $0x1050] sm:$0xff]  ;;  %v858_v54 = vld [vmem:[#allocation6 + $0x1098] sm:$0xff] }
 0x150   :  { %3885 = vmatpush1.bf16.msra.mxu1 %v3884_v31  ;;  %v4030_v31 = vpack.c.bf16 %v532_v26, %v524_v25  ;;  %v866_v21 = vld [vmem:[#allocation6 + $0x10d8] sm:$0xff]  ;;  %v587_v25 = vld [vmem:[#allocation6 + $0x820] sm:$0xff] }
 0x151   :  { %3887 = vmatprep.subr.bf16.mxu1 %v3886_v32  ;;  %v3904_v32 = vpack.c.bf16 %v785_v28, %v777_v38  ;;  %v595_v26 = vld [vmem:[#allocation6 + $0x860] sm:$0xff]  ;;  %v604_v38 = vld [vmem:[#allocation6 + $0x8a8] sm:$0xff] }
 0x152   :  { %4013 = vmatpush1.bf16.msra.mxu0 %v4012_v37  ;;  %v3906_v37 = vpack.c.bf16 %v802_v56, %v794_v30  ;;  %v612_v28 = vld [vmem:[#allocation6 + $0x8e8] sm:$0xff]  ;;  %v857_v30 = vld [vmem:[#allocation6 + $0x1090] sm:$0xff] }
 0x153   :  { %4015 = vmatprep.subr.bf16.mxu0 %v4014_v39  ;;  %v4032_v39 = vpack.c.bf16 %v531_v57, %v523_v35  ;;  %v865_v56 = vld [vmem:[#allocation6 + $0x10d0] sm:$0xff]  ;;  %v874_v35 = vld [vmem:[#allocation6 + $0x1118] sm:$0xff] }
 0x154   :  { %3889 = vmatpush1.bf16.msra.mxu1 %v3888_v59  ;;  %v4034_v59 = vpack.c.bf16 %v548_v36, %v540_v33  ;;  %v882_v57 = vld [vmem:[#allocation6 + $0x1158] sm:$0xff]  ;;  %v603_v33 = vld [vmem:[#allocation6 + $0x8a0] sm:$0xff] }
 0x155   :  { %3891 = vmatprep.subr.bf16.mxu1 %v3890_v50  ;;  %v3908_v50 = vpack.c.bf16 %v801_v34, %v793_v58  ;;  %v611_v36 = vld [vmem:[#allocation6 + $0x8e0] sm:$0xff]  ;;  %v620_v58 = vld [vmem:[#allocation6 + $0x928] sm:$0xff] }
 0x156   :  { %4017 = vmatpush1.bf16.msra.mxu0 %v4016_v61  ;;  %v3910_v61 = vpack.c.bf16 %v818_v44, %v810_v43  ;;  %v628_v34 = vld [vmem:[#allocation6 + $0x968] sm:$0xff]  ;;  %v873_v43 = vld [vmem:[#allocation6 + $0x1110] sm:$0xff] }
 0x157   :  { %4019 = vmatprep.subr.bf16.mxu0 %v4018_v1  ;;  %v4036_v1 = vpack.c.bf16 %v547_v45, %v539_v60  ;;  %v881_v44 = vld [vmem:[#allocation6 + $0x1150] sm:$0xff]  ;;  %v890_v60 = vld [vmem:[#allocation6 + $0x1198] sm:$0xff] }
 0x158   :  { %3893 = vmatpush1.bf16.msra.mxu1 %v3892_v10  ;;  %v4038_v10 = vpack.c.bf16 %v564_v52, %v556_v51  ;;  %v898_v45 = vld [vmem:[#allocation6 + $0x11d8] sm:$0xff]  ;;  %v619_v51 = vld [vmem:[#allocation6 + $0x920] sm:$0xff] }
 0x159   :  { %3895 = vmatprep.subr.bf16.mxu1 %v3894_v6  ;;  %v3912_v6 = vpack.c.bf16 %v817_v40, %v809_v63  ;;  %v627_v52 = vld [vmem:[#allocation6 + $0x960] sm:$0xff]  ;;  %v636_v63 = vld [vmem:[#allocation6 + $0x9a8] sm:$0xff] }
 0x15a   :  { %4021 = vmatpush1.bf16.msra.mxu0 %v4020_v47  ;;  %v3914_v47 = vpack.c.bf16 %v834_v3, %v826_v2  ;;  %v644_v40 = vld [vmem:[#allocation6 + $0x9e8] sm:$0xff]  ;;  %v889_v2 = vld [vmem:[#allocation6 + $0x1190] sm:$0xff] }
 0x15b   :  { %4023 = vmatprep.subr.bf16.mxu0 %v4022_v48  ;;  %v4040_v48 = vpack.c.bf16 %v563_v5, %v555_v12  ;;  %v897_v3 = vld [vmem:[#allocation6 + $0x11d0] sm:$0xff]  ;;  %v906_v12 = vld [vmem:[#allocation6 + $0x1218] sm:$0xff] }
 0x15c   :  { %3897 = vmatpush1.bf16.msra.mxu1 %v3896_v15  ;;  %v4042_v15 = vpack.c.bf16 %v580_v46, %v572_v42  ;;  %v914_v5 = vld [vmem:[#allocation6 + $0x1258] sm:$0xff]  ;;  %v635_v42 = vld [vmem:[#allocation6 + $0x9a0] sm:$0xff] }
 0x15d   :  { %3899 = vmatprep.subr.bf16.mxu1 %v3898_v17  ;;  %v3916_v17 = vpack.c.bf16 %v833_v9, %v825_v7  ;;  %v643_v46 = vld [vmem:[#allocation6 + $0x9e0] sm:$0xff]  ;;  %v652_v7 = vld [vmem:[#allocation6 + $0xa28] sm:$0xff] }
 0x15e   :  { %4025 = vmatpush1.bf16.msra.mxu0 %v4024_v53  ;;  %v3918_v53 = vpack.c.bf16 %v850_v14, %v842_v13  ;;  %v660_v9 = vld [vmem:[#allocation6 + $0xa68] sm:$0xff]  ;;  %v905_v13 = vld [vmem:[#allocation6 + $0x1210] sm:$0xff] }
 0x15f   :  { %4027 = vmatprep.subr.bf16.mxu0 %v4026_v24  ;;  %v4044_v24 = vpack.c.bf16 %v579_v16, %v571_v62  ;;  %v913_v14 = vld [vmem:[#allocation6 + $0x1250] sm:$0xff]  ;;  %v922_v62 = vld [vmem:[#allocation6 + $0x1298] sm:$0xff] }
 0x160   :  { %3901 = vmatpush1.bf16.msra.mxu1 %v3900_v27  ;;  %v4046_v27 = vpack.c.bf16 %v596_v19, %v588_v18  ;;  %v930_v16 = vld [vmem:[#allocation6 + $0x12d8] sm:$0xff]  ;;  %v651_v18 = vld [vmem:[#allocation6 + $0xa20] sm:$0xff] }
 0x161   :  { %3903 = vmatprep.subr.bf16.mxu1 %v3902_v55  ;;  %v3920_v55 = vpack.c.bf16 %v849_v23, %v841_v20  ;;  %v659_v19 = vld [vmem:[#allocation6 + $0xa60] sm:$0xff]  ;;  %v668_v20 = vld [vmem:[#allocation6 + $0xaa8] sm:$0xff] }
 0x162   :  { %4029 = vmatpush1.bf16.msra.mxu0 %v4028_v29  ;;  %v3922_v29 = vpack.c.bf16 %v866_v21, %v858_v54  ;;  %v676_v23 = vld [vmem:[#allocation6 + $0xae8] sm:$0xff]  ;;  %v921_v54 = vld [vmem:[#allocation6 + $0x1290] sm:$0xff] }
 0x163   :  { %4031 = vmatprep.subr.bf16.mxu0 %v4030_v31  ;;  %v4048_v31 = vpack.c.bf16 %v595_v26, %v587_v25  ;;  %v929_v21 = vld [vmem:[#allocation6 + $0x12d0] sm:$0xff]  ;;  %v938_v25 = vld [vmem:[#allocation6 + $0x1318] sm:$0xff] }
 0x164   :  { %3905 = vmatpush1.bf16.msra.mxu1 %v3904_v32  ;;  %v4050_v32 = vpack.c.bf16 %v612_v28, %v604_v38  ;;  %v946_v26 = vld [vmem:[#allocation6 + $0x1358] sm:$0xff]  ;;  %v667_v38 = vld [vmem:[#allocation6 + $0xaa0] sm:$0xff] }
 0x165   :  { %3907 = vmatprep.subr.bf16.mxu1 %v3906_v37  ;;  %v3924_v37 = vpack.c.bf16 %v865_v56, %v857_v30  ;;  %v675_v28 = vld [vmem:[#allocation6 + $0xae0] sm:$0xff]  ;;  %v684_v30 = vld [vmem:[#allocation6 + $0xb28] sm:$0xff] }
 0x166   :  { %4033 = vmatpush1.bf16.msra.mxu0 %v4032_v39  ;;  %v3926_v39 = vpack.c.bf16 %v882_v57, %v874_v35  ;;  %v692_v56 = vld [vmem:[#allocation6 + $0xb68] sm:$0xff]  ;;  %v937_v35 = vld [vmem:[#allocation6 + $0x1310] sm:$0xff] }
 0x167   :  { %4035 = vmatprep.subr.bf16.mxu0 %v4034_v59  ;;  %v4052_v59 = vpack.c.bf16 %v611_v36, %v603_v33  ;;  %v945_v57 = vld [vmem:[#allocation6 + $0x1350] sm:$0xff]  ;;  %v954_v33 = vld [vmem:[#allocation6 + $0x1398] sm:$0xff] }
 0x168   :  { %3909 = vmatpush1.bf16.msra.mxu1 %v3908_v50  ;;  %v4054_v50 = vpack.c.bf16 %v628_v34, %v620_v58  ;;  %v962_v36 = vld [vmem:[#allocation6 + $0x13d8] sm:$0xff]  ;;  %v683_v58 = vld [vmem:[#allocation6 + $0xb20] sm:$0xff] }
 0x169   :  { %3911 = vmatprep.subr.bf16.mxu1 %v3910_v61  ;;  %v3928_v61 = vpack.c.bf16 %v881_v44, %v873_v43  ;;  %v691_v34 = vld [vmem:[#allocation6 + $0xb60] sm:$0xff]  ;;  %v700_v43 = vld [vmem:[#allocation6 + $0xba8] sm:$0xff] }
 0x16a   :  { %4037 = vmatpush1.bf16.msra.mxu0 %v4036_v1  ;;  %v3930_v1 = vpack.c.bf16 %v898_v45, %v890_v60  ;;  %v708_v44 = vld [vmem:[#allocation6 + $0xbe8] sm:$0xff]  ;;  %v953_v60 = vld [vmem:[#allocation6 + $0x1390] sm:$0xff] }
 0x16b   :  { %4039 = vmatprep.subr.bf16.mxu0 %v4038_v10  ;;  %v4056_v10 = vpack.c.bf16 %v627_v52, %v619_v51  ;;  %v961_v45 = vld [vmem:[#allocation6 + $0x13d0] sm:$0xff]  ;;  %v970_v51 = vld [vmem:[#allocation6 + $0x1418] sm:$0xff] }
 0x16c   :  { %3913 = vmatpush1.bf16.msra.mxu1 %v3912_v6  ;;  %v4058_v6 = vpack.c.bf16 %v644_v40, %v636_v63  ;;  %v978_v52 = vld [vmem:[#allocation6 + $0x1458] sm:$0xff]  ;;  %v699_v63 = vld [vmem:[#allocation6 + $0xba0] sm:$0xff] }
 0x16d   :  { %3915 = vmatprep.subr.bf16.mxu1 %v3914_v47  ;;  %v3932_v47 = vpack.c.bf16 %v897_v3, %v889_v2  ;;  %v707_v40 = vld [vmem:[#allocation6 + $0xbe0] sm:$0xff]  ;;  %v716_v2 = vld [vmem:[#allocation6 + $0xc28] sm:$0xff] }
 0x16e   :  { %4041 = vmatpush1.bf16.msra.mxu0 %v4040_v48  ;;  %v3934_v48 = vpack.c.bf16 %v914_v5, %v906_v12  ;;  %v724_v3 = vld [vmem:[#allocation6 + $0xc68] sm:$0xff]  ;;  %v969_v12 = vld [vmem:[#allocation6 + $0x1410] sm:$0xff] }
 0x16f   :  { %4043 = vmatprep.subr.bf16.mxu0 %v4042_v15  ;;  %v4060_v15 = vpack.c.bf16 %v643_v46, %v635_v42  ;;  %v977_v5 = vld [vmem:[#allocation6 + $0x1450] sm:$0xff]  ;;  %v986_v42 = vld [vmem:[#allocation6 + $0x1498] sm:$0xff] }
 0x170   :  { %3917 = vmatpush1.bf16.msra.mxu1 %v3916_v17  ;;  %v4062_v17 = vpack.c.bf16 %v660_v9, %v652_v7  ;;  %v994_v46 = vld [vmem:[#allocation6 + $0x14d8] sm:$0xff]  ;;  %v715_v7 = vld [vmem:[#allocation6 + $0xc20] sm:$0xff] }
 0x171   :  { %3919 = vmatprep.subr.bf16.mxu1 %v3918_v53  ;;  %v3936_v53 = vpack.c.bf16 %v913_v14, %v905_v13  ;;  %v723_v9 = vld [vmem:[#allocation6 + $0xc60] sm:$0xff]  ;;  %v732_v13 = vld [vmem:[#allocation6 + $0xca8] sm:$0xff] }
 0x172   :  { %4045 = vmatpush1.bf16.msra.mxu0 %v4044_v24  ;;  %v3938_v24 = vpack.c.bf16 %v930_v16, %v922_v62  ;;  %v740_v14 = vld [vmem:[#allocation6 + $0xce8] sm:$0xff]  ;;  %v985_v62 = vld [vmem:[#allocation6 + $0x1490] sm:$0xff] }
 0x173   :  { %4047 = vmatprep.subr.bf16.mxu0 %v4046_v27  ;;  %1519 = vmatmul.mubr.f32.vlgmr.msra.gmra.mrb[2].mxu1 %v5670_v4  ;;  %v4064_v27 = vpack.c.bf16 %v659_v19, %v651_v18  ;;  %v993_v16 = vld [vmem:[#allocation6 + $0x14d0] sm:$0xff]  ;;  %v1002_v18 = vld [vmem:[#allocation6 + $0x1518] sm:$0xff] }
 0x174   :  { %3921 = vmatpush1.bf16.msra.mxu1 %v3920_v55  ;;  %1589 = vmatprep.mubr.f32.mxu1 %v5692_v22  ;;  %v4066_v55 = vpack.c.bf16 %v676_v23, %v668_v20  ;;  %v1010_v19 = vld [vmem:[#allocation6 + $0x1558] sm:$0xff]  ;;  %v731_v20 = vld [vmem:[#allocation6 + $0xca0] sm:$0xff] }
 0x175   :  { %1661 = vmatmul.mubr.f32.vlgmr.msra.gmra.mrb[2].mxu0 %v5663_v0  ;;  %3923 = vmatprep.subr.bf16.mxu1 %v3922_v29  ;;  %v3940_v29 = vpack.c.bf16 %v929_v21, %v921_v54  ;;  %v739_v23 = vld [vmem:[#allocation6 + $0xce0] sm:$0xff]  ;;  %v748_v54 = vld [vmem:[#allocation6 + $0xd28] sm:$0xff] }
 0x176   :  { %4049 = vmatpush1.bf16.msra.mxu0 %v4048_v31  ;;  %1731 = vmatprep.mubr.f32.mxu0 %v5675_v8  ;;  %v3942_v31 = vpack.c.bf16 %v946_v26, %v938_v25  ;;  %v756_v21 = vld [vmem:[#allocation6 + $0xd68] sm:$0xff]  ;;  %v1001_v25 = vld [vmem:[#allocation6 + $0x1510] sm:$0xff] }
 0x177   :  { %4051 = vmatprep.subr.bf16.mxu0 %v4050_v32  ;;  %v4068_v32 = vpack.c.bf16 %v675_v28, %v667_v38  ;;  %v1009_v26 = vld [vmem:[#allocation6 + $0x1550] sm:$0xff]  ;;  %v1018_v38 = vld [vmem:[#allocation6 + $0x1598] sm:$0xff] }
 0x178   :  { %3925 = vmatpush1.bf16.msra.mxu1 %v3924_v37  ;;  %v4070_v37 = vpack.c.bf16 %v692_v56, %v684_v30  ;;  %v1026_v28 = vld [vmem:[#allocation6 + $0x15d8] sm:$0xff]  ;;  %v747_v30 = vld [vmem:[#allocation6 + $0xd20] sm:$0xff] }
 0x179   :  { %3927 = vmatprep.subr.bf16.mxu1 %v3926_v39  ;;  %v3944_v39 = vpack.c.bf16 %v945_v57, %v937_v35  ;;  %v755_v56 = vld [vmem:[#allocation6 + $0xd60] sm:$0xff]  ;;  %v764_v35 = vld [vmem:[#allocation6 + $0xda8] sm:$0xff] }
 0x17a   :  { %4053 = vmatpush1.bf16.msra.mxu0 %v4052_v59  ;;  %v3946_v59 = vpack.c.bf16 %v962_v36, %v954_v33  ;;  %v772_v57 = vld [vmem:[#allocation6 + $0xde8] sm:$0xff]  ;;  %v1017_v33 = vld [vmem:[#allocation6 + $0x1590] sm:$0xff] }
 0x17b   :  { %4055 = vmatprep.subr.bf16.mxu0 %v4054_v50  ;;  %v4072_v50 = vpack.c.bf16 %v691_v34, %v683_v58  ;;  %v1025_v36 = vld [vmem:[#allocation6 + $0x15d0] sm:$0xff]  ;;  %v1034_v58 = vld [vmem:[#allocation6 + $0x1618] sm:$0xff] }
 0x17c   :  { %3929 = vmatpush1.bf16.msra.mxu1 %v3928_v61  ;;  %v4074_v61 = vpack.c.bf16 %v708_v44, %v700_v43  ;;  %v1042_v34 = vld [vmem:[#allocation6 + $0x1658] sm:$0xff]  ;;  %v763_v43 = vld [vmem:[#allocation6 + $0xda0] sm:$0xff] }
 0x17d   :  { %3931 = vmatprep.subr.bf16.mxu1 %v3930_v1  ;;  %v3948_v1 = vpack.c.bf16 %v961_v45, %v953_v60  ;;  %v771_v44 = vld [vmem:[#allocation6 + $0xde0] sm:$0xff]  ;;  %v780_v60 = vld [vmem:[#allocation6 + $0xe28] sm:$0xff] }
 0x17e   :  { %4057 = vmatpush1.bf16.msra.mxu0 %v4056_v10  ;;  %v3950_v10 = vpack.c.bf16 %v978_v52, %v970_v51  ;;  %v788_v45 = vld [vmem:[#allocation6 + $0xe68] sm:$0xff]  ;;  %v1033_v51 = vld [vmem:[#allocation6 + $0x1610] sm:$0xff] }
 0x17f   :  { %4059 = vmatprep.subr.bf16.mxu0 %v4058_v6  ;;  %v4076_v6 = vpack.c.bf16 %v707_v40, %v699_v63  ;;  %v1041_v52 = vld [vmem:[#allocation6 + $0x1650] sm:$0xff]  ;;  %v1050_v63 = vld [vmem:[#allocation6 + $0x1698] sm:$0xff] }
 0x180   :  { %3933 = vmatpush1.bf16.msra.mxu1 %v3932_v47  ;;  %v4078_v47 = vpack.c.bf16 %v724_v3, %v716_v2  ;;  %v1058_v40 = vld [vmem:[#allocation6 + $0x16d8] sm:$0xff]  ;;  %v779_v2 = vld [vmem:[#allocation6 + $0xe20] sm:$0xff] }
 0x181   :  { %3935 = vmatprep.subr.bf16.mxu1 %v3934_v48  ;;  %v3952_v48 = vpack.c.bf16 %v977_v5, %v969_v12  ;;  %v787_v3 = vld [vmem:[#allocation6 + $0xe60] sm:$0xff]  ;;  %v796_v12 = vld [vmem:[#allocation6 + $0xea8] sm:$0xff] }
 0x182   :  { %4061 = vmatpush1.bf16.msra.mxu0 %v4060_v15  ;;  %v3954_v15 = vpack.c.bf16 %v994_v46, %v986_v42  ;;  %v804_v5 = vld [vmem:[#allocation6 + $0xee8] sm:$0xff]  ;;  %v1049_v42 = vld [vmem:[#allocation6 + $0x1690] sm:$0xff] }
 0x183   :  { %4063 = vmatprep.subr.bf16.mxu0 %v4062_v17  ;;  %v4080_v17 = vpack.c.bf16 %v723_v9, %v715_v7  ;;  %v1057_v46 = vld [vmem:[#allocation6 + $0x16d0] sm:$0xff]  ;;  %v1066_v7 = vld [vmem:[#allocation6 + $0x1718] sm:$0xff] }
 0x184   :  { %3937 = vmatpush1.bf16.msra.mxu1 %v3936_v53  ;;  %v4082_v53 = vpack.c.bf16 %v740_v14, %v732_v13  ;;  %v1074_v9 = vld [vmem:[#allocation6 + $0x1758] sm:$0xff]  ;;  %v795_v13 = vld [vmem:[#allocation6 + $0xea0] sm:$0xff] }
 0x185   :  { %3939 = vmatprep.subr.bf16.mxu1 %v3938_v24  ;;  %v3956_v24 = vpack.c.bf16 %v993_v16, %v985_v62  ;;  %v803_v14 = vld [vmem:[#allocation6 + $0xee0] sm:$0xff]  ;;  %v812_v62 = vld [vmem:[#allocation6 + $0xf28] sm:$0xff] }
 0x186   :  { %4065 = vmatpush1.bf16.msra.mxu0 %v4064_v27  ;;  %v3958_v27 = vpack.c.bf16 %v1010_v19, %v1002_v18  ;;  %v820_v16 = vld [vmem:[#allocation6 + $0xf68] sm:$0xff]  ;;  %v1065_v18 = vld [vmem:[#allocation6 + $0x1710] sm:$0xff] }
 0x187   :  { %4067 = vmatprep.subr.bf16.mxu0 %v4066_v55  ;;  %v4084_v55 = vpack.c.bf16 %v739_v23, %v731_v20  ;;  %v1073_v19 = vld [vmem:[#allocation6 + $0x1750] sm:$0xff]  ;;  %v1082_v20 = vld [vmem:[#allocation6 + $0x1798] sm:$0xff] }
 0x188   :  { %3941 = vmatpush1.bf16.msra.mxu1 %v3940_v29  ;;  %v4086_v29 = vpack.c.bf16 %v756_v21, %v748_v54  ;;  %v1090_v23 = vld [vmem:[#allocation6 + $0x17d8] sm:$0xff]  ;;  %v811_v54 = vld [vmem:[#allocation6 + $0xf20] sm:$0xff] }
 0x189   :  { %3943 = vmatprep.subr.bf16.mxu1 %v3942_v31  ;;  %v3960_v31 = vpack.c.bf16 %v1009_v26, %v1001_v25  ;;  %v819_v21 = vld [vmem:[#allocation6 + $0xf60] sm:$0xff]  ;;  %v828_v25 = vld [vmem:[#allocation6 + $0xfa8] sm:$0xff] }
 0x18a   :  { %4069 = vmatpush1.bf16.msra.mxu0 %v4068_v32  ;;  %v3962_v32 = vpack.c.bf16 %v1026_v28, %v1018_v38  ;;  %v836_v26 = vld [vmem:[#allocation6 + $0xfe8] sm:$0xff]  ;;  %v1081_v38 = vld [vmem:[#allocation6 + $0x1790] sm:$0xff] }
 0x18b   :  { %4071 = vmatprep.subr.bf16.mxu0 %v4070_v37  ;;  %v4088_v37 = vpack.c.bf16 %v755_v56, %v747_v30  ;;  %v1089_v28 = vld [vmem:[#allocation6 + $0x17d0] sm:$0xff]  ;;  %v334_v30 = vld [vmem:[#allocation6 + $0x38] sm:$0xff] }
 0x18c   :  { %3945 = vmatpush1.bf16.msra.mxu1 %v3944_v39  ;;  %v4090_v39 = vpack.c.bf16 %v772_v57, %v764_v35  ;;  %v342_v56 = vld [vmem:[#allocation6 + $0x78] sm:$0xff]  ;;  %v827_v35 = vld [vmem:[#allocation6 + $0xfa0] sm:$0xff] }
 0x18d   :  { %3947 = vmatprep.subr.bf16.mxu1 %v3946_v59  ;;  %v3964_v59 = vpack.c.bf16 %v1025_v36, %v1017_v33  ;;  %v835_v57 = vld [vmem:[#allocation6 + $0xfe0] sm:$0xff]  ;;  %v844_v33 = vld [vmem:[#allocation6 + $0x1028] sm:$0xff] }
 0x18e   :  { %4073 = vmatpush1.bf16.msra.mxu0 %v4072_v50  ;;  %v3966_v50 = vpack.c.bf16 %v1042_v34, %v1034_v58  ;;  %v852_v36 = vld [vmem:[#allocation6 + $0x1068] sm:$0xff]  ;;  %v333_v58 = vld [vmem:[#allocation6 + $0x30] sm:$0xff] }
 0x18f   :  { %4075 = vmatprep.subr.bf16.mxu0 %v4074_v61  ;;  %v4092_v61 = vpack.c.bf16 %v771_v44, %v763_v43  ;;  %v341_v34 = vld [vmem:[#allocation6 + $0x70] sm:$0xff]  ;;  %v350_v43 = vld [vmem:[#allocation6 + $0xb8] sm:$0xff] }
 0x190   :  { %3949 = vmatpush1.bf16.msra.mxu1 %v3948_v1  ;;  %v4094_v1 = vpack.c.bf16 %v788_v45, %v780_v60  ;;  %v358_v44 = vld [vmem:[#allocation6 + $0xf8] sm:$0xff]  ;;  %v843_v60 = vld [vmem:[#allocation6 + $0x1020] sm:$0xff] }
 0x191   :  { %3951 = vmatprep.subr.bf16.mxu1 %v3950_v10  ;;  %v3968_v10 = vpack.c.bf16 %v1041_v52, %v1033_v51  ;;  %v851_v45 = vld [vmem:[#allocation6 + $0x1060] sm:$0xff]  ;;  %v860_v51 = vld [vmem:[#allocation6 + $0x10a8] sm:$0xff] }
 0x192   :  { %4077 = vmatpush1.bf16.msra.mxu0 %v4076_v6  ;;  %v3970_v6 = vpack.c.bf16 %v1058_v40, %v1050_v63  ;;  %v868_v52 = vld [vmem:[#allocation6 + $0x10e8] sm:$0xff]  ;;  %v349_v63 = vld [vmem:[#allocation6 + $0xb0] sm:$0xff] }
 0x193   :  { %4079 = vmatprep.subr.bf16.mxu0 %v4078_v47  ;;  %v4096_v47 = vpack.c.bf16 %v787_v3, %v779_v2  ;;  %v357_v40 = vld [vmem:[#allocation6 + $0xf0] sm:$0xff]  ;;  %v366_v2 = vld [vmem:[#allocation6 + $0x138] sm:$0xff] }
 0x194   :  { %3953 = vmatpush1.bf16.msra.mxu1 %v3952_v48  ;;  %v4098_v48 = vpack.c.bf16 %v804_v5, %v796_v12  ;;  %v374_v3 = vld [vmem:[#allocation6 + $0x178] sm:$0xff]  ;;  %v859_v12 = vld [vmem:[#allocation6 + $0x10a0] sm:$0xff] }
 0x195   :  { %3955 = vmatprep.subr.bf16.mxu1 %v3954_v15  ;;  %v3972_v15 = vpack.c.bf16 %v1057_v46, %v1049_v42  ;;  %v867_v5 = vld [vmem:[#allocation6 + $0x10e0] sm:$0xff]  ;;  %v876_v42 = vld [vmem:[#allocation6 + $0x1128] sm:$0xff] }
 0x196   :  { %4081 = vmatpush1.bf16.msra.mxu0 %v4080_v17  ;;  %v3974_v17 = vpack.c.bf16 %v1074_v9, %v1066_v7  ;;  %v884_v46 = vld [vmem:[#allocation6 + $0x1168] sm:$0xff]  ;;  %v365_v7 = vld [vmem:[#allocation6 + $0x130] sm:$0xff] }
 0x197   :  { %4083 = vmatprep.subr.bf16.mxu0 %v4082_v53  ;;  %v4100_v53 = vpack.c.bf16 %v803_v14, %v795_v13  ;;  %v373_v9 = vld [vmem:[#allocation6 + $0x170] sm:$0xff]  ;;  %v382_v13 = vld [vmem:[#allocation6 + $0x1b8] sm:$0xff] }
 0x198   :  { %3957 = vmatpush1.bf16.msra.mxu1 %v3956_v24  ;;  %v4102_v24 = vpack.c.bf16 %v820_v16, %v812_v62  ;;  %v390_v14 = vld [vmem:[#allocation6 + $0x1f8] sm:$0xff]  ;;  %v875_v62 = vld [vmem:[#allocation6 + $0x1120] sm:$0xff] }
 0x199   :  { %3959 = vmatprep.subr.bf16.mxu1 %v3958_v27  ;;  %v3976_v27 = vpack.c.bf16 %v1073_v19, %v1065_v18  ;;  %v883_v16 = vld [vmem:[#allocation6 + $0x1160] sm:$0xff]  ;;  %v892_v18 = vld [vmem:[#allocation6 + $0x11a8] sm:$0xff]  ;;  %v4186_v19 = vpack.c.bf16 %v390_v14, %v382_v13  ;;  %v445_v14 = vld [vmem:[#allocation6 + $0x3b0] sm:$0xff] }
 0x19a   :  { %4085 = vmatpush1.bf16.msra.mxu0 %v4084_v55  ;;  %v3978_v55 = vpack.c.bf16 %v1090_v23, %v1082_v20  ;;  %v389_v20 = vld [vmem:[#allocation6 + $0x1f0] sm:$0xff]  ;;  %v4120_v23 = vpack.c.bf16 %v883_v16, %v875_v62  ;;  %v462_v16 = vld [vmem:[#allocation6 + $0x438] sm:$0xff] }
 0x19b   :  { %4087 = vmatprep.subr.bf16.mxu0 %v4086_v29  ;;  %v4104_v29 = vpack.c.bf16 %v819_v21, %v811_v54  ;;  %v406_v54 = vld [vmem:[#allocation6 + $0x278] sm:$0xff] }
 0x19c   :  { %3961 = vmatpush1.bf16.msra.mxu1 %v3960_v31  ;;  %v4106_v31 = vpack.c.bf16 %v836_v26, %v828_v25  ;;  %v899_v25 = vld [vmem:[#allocation6 + $0x11e0] sm:$0xff] }
 0x19d   :  { %3963 = vmatprep.subr.bf16.mxu1 %v3962_v32  ;;  %v3980_v32 = vpack.c.bf16 %v1089_v28, %v1081_v38  ;;  %v916_v38 = vld [vmem:[#allocation6 + $0x1268] sm:$0xff] }
 0x19e   :  { %4089 = vmatpush1.bf16.msra.mxu0 %v4088_v37  ;;  %v4174_v37 = vpack.c.bf16 %v342_v56, %v334_v30  ;;  %v405_v30 = vld [vmem:[#allocation6 + $0x270] sm:$0xff] }
 0x19f   :  { %4091 = vmatprep.subr.bf16.mxu0 %v4090_v39  ;;  %v4108_v39 = vpack.c.bf16 %v835_v57, %v827_v35  ;;  %v422_v35 = vld [vmem:[#allocation6 + $0x2f8] sm:$0xff] }
 0x1a0   :  { %3965 = vmatpush1.bf16.msra.mxu1 %v3964_v59  ;;  %v4110_v59 = vpack.c.bf16 %v852_v36, %v844_v33  ;;  %v915_v33 = vld [vmem:[#allocation6 + $0x1260] sm:$0xff] }
 0x1a1   :  { %3967 = vmatprep.subr.bf16.mxu1 %v3966_v50  ;;  %v4176_v50 = vpack.c.bf16 %v341_v34, %v333_v58  ;;  %v932_v58 = vld [vmem:[#allocation6 + $0x12e8] sm:$0xff] }
 0x1a2   :  { %4093 = vmatpush1.bf16.msra.mxu0 %v4092_v61  ;;  %v4178_v61 = vpack.c.bf16 %v358_v44, %v350_v43  ;;  %v421_v43 = vld [vmem:[#allocation6 + $0x2f0] sm:$0xff] }
 0x1a3   :  { %4095 = vmatprep.subr.bf16.mxu0 %v4094_v1  ;;  %v4112_v1 = vpack.c.bf16 %v851_v45, %v843_v60  ;;  %v438_v60 = vld [vmem:[#allocation6 + $0x378] sm:$0xff] }
 0x1a4   :  { %3969 = vmatpush1.bf16.msra.mxu1 %v3968_v10  ;;  %v4114_v10 = vpack.c.bf16 %v868_v52, %v860_v51  ;;  %v931_v51 = vld [vmem:[#allocation6 + $0x12e0] sm:$0xff] }
 0x1a5   :  { %3971 = vmatprep.subr.bf16.mxu1 %v3970_v6  ;;  %v4180_v6 = vpack.c.bf16 %v357_v40, %v349_v63  ;;  %v948_v63 = vld [vmem:[#allocation6 + $0x1368] sm:$0xff] }
 0x1a6   :  { %4097 = vmatpush1.bf16.msra.mxu0 %v4096_v47  ;;  %v4182_v47 = vpack.c.bf16 %v374_v3, %v366_v2  ;;  %v437_v2 = vld [vmem:[#allocation6 + $0x370] sm:$0xff] }
 0x1a7   :  { %4099 = vmatprep.subr.bf16.mxu0 %v4098_v48  ;;  %v4116_v48 = vpack.c.bf16 %v867_v5, %v859_v12  ;;  %v446_v12 = vld [vmem:[#allocation6 + $0x3b8] sm:$0xff] }
 0x1a8   :  { %3973 = vmatpush1.bf16.msra.mxu1 %v3972_v15  ;;  %v4118_v15 = vpack.c.bf16 %v884_v46, %v876_v42  ;;  %v454_v5 = vld [vmem:[#allocation6 + $0x3f8] sm:$0xff]  ;;  %v939_v46 = vld [vmem:[#allocation6 + $0x1320] sm:$0xff] }
 0x1a9   :  { %3975 = vmatprep.subr.bf16.mxu1 %v3974_v17  ;;  %v4184_v17 = vpack.c.bf16 %v373_v9, %v365_v7  ;;  %v956_v9 = vld [vmem:[#allocation6 + $0x13a8] sm:$0xff]  ;;  %v4202_v13 = vpack.c.bf16 %v454_v5, %v446_v12  ;;  %v509_v5 = vld [vmem:[#allocation6 + $0x5b0] sm:$0xff] }
 0x1aa   :  { %4101 = vmatpush1.bf16.msra.mxu0 %v4100_v53  ;;  %v381_v53 = vld [vmem:[#allocation6 + $0x1b0] sm:$0xff] }
 0x1ab   :  { %4103 = vmatprep.subr.bf16.mxu0 %v4102_v24  ;;  %v398_v24 = vld [vmem:[#allocation6 + $0x238] sm:$0xff]  ;;  %v4188_v26 = vpack.c.bf16 %v389_v20, %v381_v53  ;;  %v972_v20 = vld [vmem:[#allocation6 + $0x1428] sm:$0xff] }
 0x1ac   :  { %3977 = vmatpush1.bf16.msra.mxu1 %v3976_v27  ;;  %v891_v27 = vld [vmem:[#allocation6 + $0x11a0] sm:$0xff]  ;;  %v4190_v28 = vpack.c.bf16 %v406_v54, %v398_v24  ;;  %v461_v54 = vld [vmem:[#allocation6 + $0x430] sm:$0xff] }
 0x1ad   :  { %3979 = vmatprep.subr.bf16.mxu1 %v3978_v55  ;;  %v908_v55 = vld [vmem:[#allocation6 + $0x1228] sm:$0xff]  ;;  %v4124_v56 = vpack.c.bf16 %v899_v25, %v891_v27  ;;  %v478_v25 = vld [vmem:[#allocation6 + $0x4b8] sm:$0xff] }
 0x1ae   :  { %4105 = vmatpush1.bf16.msra.mxu0 %v4104_v29  ;;  %v397_v29 = vld [vmem:[#allocation6 + $0x230] sm:$0xff]  ;;  %v4126_v57 = vpack.c.bf16 %v916_v38, %v908_v55  ;;  %v971_v38 = vld [vmem:[#allocation6 + $0x1420] sm:$0xff] }
 0x1af   :  { %4107 = vmatprep.subr.bf16.mxu0 %v4106_v31  ;;  %v414_v31 = vld [vmem:[#allocation6 + $0x2b8] sm:$0xff]  ;;  %v4192_v36 = vpack.c.bf16 %v405_v30, %v397_v29  ;;  %v988_v30 = vld [vmem:[#allocation6 + $0x14a8] sm:$0xff] }
 0x1b0   :  { %3981 = vmatpush1.bf16.msra.mxu1 %v3980_v32  ;;  %v907_v32 = vld [vmem:[#allocation6 + $0x1220] sm:$0xff]  ;;  %v4194_v34 = vpack.c.bf16 %v422_v35, %v414_v31  ;;  %v477_v35 = vld [vmem:[#allocation6 + $0x4b0] sm:$0xff] }
 0x1b1   :  { %4175 = vmatprep.subr.bf16.mxu1 %v4174_v37  ;;  %v924_v37 = vld [vmem:[#allocation6 + $0x12a8] sm:$0xff]  ;;  %v4128_v44 = vpack.c.bf16 %v915_v33, %v907_v32  ;;  %v494_v33 = vld [vmem:[#allocation6 + $0x538] sm:$0xff] }
 0x1b2   :  { %4109 = vmatpush1.bf16.msra.mxu0 %v4108_v39  ;;  %v413_v39 = vld [vmem:[#allocation6 + $0x2b0] sm:$0xff]  ;;  %v4130_v45 = vpack.c.bf16 %v932_v58, %v924_v37  ;;  %v987_v58 = vld [vmem:[#allocation6 + $0x14a0] sm:$0xff] }
 0x1b3   :  { %1590 = vmatmul.mubr.f32.vlgmr.msra.gmra.mrb[2].mxu1 %v5688_v49  ;;  %4111 = vmatprep.subr.bf16.mxu0 %v4110_v59  ;;  %v430_v59 = vld [vmem:[#allocation6 + $0x338] sm:$0xff]  ;;  %v4196_v52 = vpack.c.bf16 %v421_v43, %v413_v39  ;;  %v1004_v43 = vld [vmem:[#allocation6 + $0x1528] sm:$0xff] }
 0x1b4   :  { %4177 = vmatpush1.bf16.msra.mxu1 %v4176_v50  ;;  %1873 = vmatprep.mubr.f32.mxu1 %v5667_v41  ;;  %v900_v41 = vld [vmem:[#allocation6 + $0x11e8] sm:$0xff]  ;;  %v923_v50 = vld [vmem:[#allocation6 + $0x12a0] sm:$0xff]  ;;  %v4198_v40 = vpack.c.bf16 %v438_v60, %v430_v59  ;;  %v493_v60 = vld [vmem:[#allocation6 + $0x530] sm:$0xff] }
 0x1b5   :  { %1732 = vmatmul.mubr.f32.vlgmr.msra.gmra.mrb[2].mxu0 %v5670_v4  ;;  %4179 = vmatprep.subr.bf16.mxu1 %v4178_v61  ;;  %v4122_v21 = vpack.c.bf16 %v900_v41, %v892_v18  ;;  %v940_v61 = vld [vmem:[#allocation6 + $0x1328] sm:$0xff]  ;;  %v955_v41 = vld [vmem:[#allocation6 + $0x13a0] sm:$0xff] }
 0x1b6   :  { %4113 = vmatpush1.bf16.msra.mxu0 %v4112_v1  ;;  %1802 = vmatprep.mubr.f32.mxu0 %v5692_v22  ;;  %v429_v1 = vld [vmem:[#allocation6 + $0x330] sm:$0xff]  ;;  %v4134_v42 = vpack.c.bf16 %v948_v63, %v940_v61  ;;  %v1003_v63 = vld [vmem:[#allocation6 + $0x1520] sm:$0xff] }
 0x1b7   :  { %4115 = vmatprep.subr.bf16.mxu0 %v4114_v10  ;;  %v4132_v10 = vpack.c.bf16 %v931_v51, %v923_v50  ;;  %v4200_v7 = vpack.c.bf16 %v437_v2, %v429_v1  ;;  %v510_v51 = vld [vmem:[#allocation6 + $0x5b8] sm:$0xff]  ;;  %v1020_v2 = vld [vmem:[#allocation6 + $0x15a8] sm:$0xff] }
 0x1b8   :  { %4181 = vmatpush1.bf16.msra.mxu1 %v4180_v6 }
 0x1b9   :  { %4183 = vmatprep.subr.bf16.mxu1 %v4182_v47  ;;  %v947_v47 = vld [vmem:[#allocation6 + $0x1360] sm:$0xff] }
 0x1ba   :  { %4117 = vmatpush1.bf16.msra.mxu0 %v4116_v48  ;;  %v964_v48 = vld [vmem:[#allocation6 + $0x13e8] sm:$0xff]  ;;  %v4136_v62 = vpack.c.bf16 %v947_v47, %v939_v46  ;;  %v526_v47 = vld [vmem:[#allocation6 + $0x638] sm:$0xff] }
 0x1bb   :  { %4119 = vmatprep.subr.bf16.mxu0 %v4118_v15  ;;  %v453_v15 = vld [vmem:[#allocation6 + $0x3f0] sm:$0xff]  ;;  %v4138_v18 = vpack.c.bf16 %v964_v48, %v956_v9  ;;  %v1019_v48 = vld [vmem:[#allocation6 + $0x15a0] sm:$0xff] }
 0x1bc   :  { %4185 = vmatpush1.bf16.msra.mxu1 %v4184_v17  ;;  %v470_v17 = vld [vmem:[#allocation6 + $0x478] sm:$0xff]  ;;  %v4204_v53 = vpack.c.bf16 %v453_v15, %v445_v14  ;;  %v1036_v15 = vld [vmem:[#allocation6 + $0x1628] sm:$0xff] }
 0x1bd   :  { %4187 = vmatprep.subr.bf16.mxu1 %v4186_v19  ;;  %v963_v19 = vld [vmem:[#allocation6 + $0x13e0] sm:$0xff]  ;;  %v4206_v24 = vpack.c.bf16 %v470_v17, %v462_v16  ;;  %v525_v17 = vld [vmem:[#allocation6 + $0x630] sm:$0xff] }
 0x1be   :  { %4121 = vmatpush1.bf16.msra.mxu0 %v4120_v23  ;;  %v980_v23 = vld [vmem:[#allocation6 + $0x1468] sm:$0xff]  ;;  %v4140_v27 = vpack.c.bf16 %v963_v19, %v955_v41  ;;  %v542_v19 = vld [vmem:[#allocation6 + $0x6b8] sm:$0xff] }
 0x1bf   :  { %4123 = vmatprep.subr.bf16.mxu0 %v4122_v21  ;;  %v469_v21 = vld [vmem:[#allocation6 + $0x470] sm:$0xff]  ;;  %v4142_v55 = vpack.c.bf16 %v980_v23, %v972_v20  ;;  %v1035_v23 = vld [vmem:[#allocation6 + $0x1620] sm:$0xff] }
 0x1c0   :  { %4189 = vmatpush1.bf16.msra.mxu1 %v4188_v26  ;;  %v486_v26 = vld [vmem:[#allocation6 + $0x4f8] sm:$0xff]  ;;  %v4208_v29 = vpack.c.bf16 %v469_v21, %v461_v54  ;;  %v1052_v21 = vld [vmem:[#allocation6 + $0x16a8] sm:$0xff] }
 0x1c1   :  { %4191 = vmatprep.subr.bf16.mxu1 %v4190_v28  ;;  %v979_v28 = vld [vmem:[#allocation6 + $0x1460] sm:$0xff]  ;;  %v4210_v31 = vpack.c.bf16 %v486_v26, %v478_v25  ;;  %v541_v26 = vld [vmem:[#allocation6 + $0x6b0] sm:$0xff] }
 0x1c2   :  { %4125 = vmatpush1.bf16.msra.mxu0 %v4124_v56  ;;  %v996_v56 = vld [vmem:[#allocation6 + $0x14e8] sm:$0xff]  ;;  %v4144_v32 = vpack.c.bf16 %v979_v28, %v971_v38  ;;  %v558_v28 = vld [vmem:[#allocation6 + $0x738] sm:$0xff] }
 0x1c3   :  { %4127 = vmatprep.subr.bf16.mxu0 %v4126_v57  ;;  %v485_v57 = vld [vmem:[#allocation6 + $0x4f0] sm:$0xff]  ;;  %v4146_v37 = vpack.c.bf16 %v996_v56, %v988_v30  ;;  %v1051_v56 = vld [vmem:[#allocation6 + $0x16a0] sm:$0xff] }
 0x1c4   :  { %4193 = vmatpush1.bf16.msra.mxu1 %v4192_v36  ;;  %v502_v36 = vld [vmem:[#allocation6 + $0x578] sm:$0xff]  ;;  %v4212_v39 = vpack.c.bf16 %v485_v57, %v477_v35  ;;  %v1068_v57 = vld [vmem:[#allocation6 + $0x1728] sm:$0xff] }
 0x1c5   :  { %4195 = vmatprep.subr.bf16.mxu1 %v4194_v34  ;;  %v995_v34 = vld [vmem:[#allocation6 + $0x14e0] sm:$0xff]  ;;  %v4214_v59 = vpack.c.bf16 %v502_v36, %v494_v33  ;;  %v557_v36 = vld [vmem:[#allocation6 + $0x730] sm:$0xff] }
 0x1c6   :  { %4129 = vmatpush1.bf16.msra.mxu0 %v4128_v44  ;;  %v5707_v3 = vpop.f32.mrb[0].mxu1  ;;  %v1012_v44 = vld [vmem:[#allocation6 + $0x1568] sm:$0xff]  ;;  %v4148_v50 = vpack.c.bf16 %v995_v34, %v987_v58  ;;  %v574_v34 = vld [vmem:[#allocation6 + $0x7b8] sm:$0xff] }
 0x1c7   :  { %v5709_v6 = vpop.f32.mrb[1].mxu1  ;;  %4131 = vmatprep.subr.bf16.mxu0 %v4130_v45  ;;  %v501_v45 = vld [vmem:[#allocation6 + $0x570] sm:$0xff]  ;;  %v4150_v61 = vpack.c.bf16 %v1012_v44, %v1004_v43  ;;  %v1067_v44 = vld [vmem:[#allocation6 + $0x1720] sm:$0xff] }
 0x1c8   :  { %4197 = vmatpush1.bf16.msra.mxu1 %v4196_v52  ;;  %v518_v52 = vld [vmem:[#allocation6 + $0x5f8] sm:$0xff]  ;;  %v4216_v1 = vpack.c.bf16 %v501_v45, %v493_v60  ;;  %v1084_v45 = vld [vmem:[#allocation6 + $0x17a8] sm:$0xff] }
 0x1c9   :  { %4199 = vmatprep.subr.bf16.mxu1 %v4198_v40  ;;  %v1011_v40 = vld [vmem:[#allocation6 + $0x1560] sm:$0xff]  ;;  %v4218_v12 = vpack.c.bf16 %v518_v52, %v510_v51  ;;  %v573_v52 = vld [vmem:[#allocation6 + $0x7b0] sm:$0xff] }
 0x1ca   :  { %4133 = vmatpush1.bf16.msra.mxu0 %v4132_v10  ;;  %v1028_v10 = vld [vmem:[#allocation6 + $0x15e8] sm:$0xff]  ;;  %v4152_v46 = vpack.c.bf16 %v1011_v40, %v1003_v63  ;;  %v590_v40 = vld [vmem:[#allocation6 + $0x838] sm:$0xff] }
 0x1cb   :  { %4135 = vmatprep.subr.bf16.mxu0 %v4134_v42  ;;  %v517_v42 = vld [vmem:[#allocation6 + $0x5f0] sm:$0xff]  ;;  %v4154_v9 = vpack.c.bf16 %v1028_v10, %v1020_v2  ;;  %v1083_v10 = vld [vmem:[#allocation6 + $0x17a0] sm:$0xff] }
 0x1cc   :  { %4201 = vmatpush1.bf16.msra.mxu1 %v4200_v7  ;;  %v534_v7 = vld [vmem:[#allocation6 + $0x678] sm:$0xff]  ;;  %v4220_v14 = vpack.c.bf16 %v517_v42, %v509_v5  ;;  %v2031_v42 = vld [vmem:[#allocation9 + $0x8] sm:$0xff] }
 0x1cd   :  { %4203 = vmatprep.subr.bf16.mxu1 %v4202_v13  ;;  %v1027_v13 = vld [vmem:[#allocation6 + $0x15e0] sm:$0xff]  ;;  %v4222_v16 = vpack.c.bf16 %v534_v7, %v526_v47  ;;  %v589_v7 = vld [vmem:[#allocation6 + $0x830] sm:$0xff] }
 0x1ce   :  { %4137 = vmatpush1.bf16.msra.mxu0 %v4136_v62  ;;  %v1044_v62 = vld [vmem:[#allocation6 + $0x1668] sm:$0xff]  ;;  %v4156_v41 = vpack.c.bf16 %v1027_v13, %v1019_v48  ;;  %v606_v13 = vld [vmem:[#allocation6 + $0x8b8] sm:$0xff] }
 0x1cf   :  { %4139 = vmatprep.subr.bf16.mxu0 %v4138_v18  ;;  %v533_v18 = vld [vmem:[#allocation6 + $0x670] sm:$0xff]  ;;  %v4158_v20 = vpack.c.bf16 %v1044_v62, %v1036_v15  ;;  %v2030_v62 = vld [vmem:[#allocation9] sm:$0xff] }
 0x1d0   :  { %4205 = vmatpush1.bf16.msra.mxu1 %v4204_v53  ;;  %v550_v53 = vld [vmem:[#allocation6 + $0x6f8] sm:$0xff]  ;;  %v4224_v54 = vpack.c.bf16 %v533_v18, %v525_v17  ;;  %v2039_v18 = vld [vmem:[#allocation9 + $0x48] sm:$0xff] }
 0x1d1   :  { %4207 = vmatprep.subr.bf16.mxu1 %v4206_v24  ;;  %v1043_v24 = vld [vmem:[#allocation6 + $0x1660] sm:$0xff]  ;;  %v4226_v25 = vpack.c.bf16 %v550_v53, %v542_v19  ;;  %v605_v53 = vld [vmem:[#allocation6 + $0x8b0] sm:$0xff] }
 0x1d2   :  { %4141 = vmatpush1.bf16.msra.mxu0 %v4140_v27  ;;  %v1060_v27 = vld [vmem:[#allocation6 + $0x16e8] sm:$0xff]  ;;  %v4160_v38 = vpack.c.bf16 %v1043_v24, %v1035_v23  ;;  %v622_v24 = vld [vmem:[#allocation6 + $0x938] sm:$0xff] }
 0x1d3   :  { %4143 = vmatprep.subr.bf16.mxu0 %v4142_v55  ;;  %v549_v55 = vld [vmem:[#allocation6 + $0x6f0] sm:$0xff]  ;;  %v4162_v30 = vpack.c.bf16 %v1060_v27, %v1052_v21  ;;  %v2038_v27 = vld [vmem:[#allocation9 + $0x40] sm:$0xff] }
 0x1d4   :  { %4209 = vmatpush1.bf16.msra.mxu1 %v4208_v29  ;;  %v566_v29 = vld [vmem:[#allocation6 + $0x778] sm:$0xff]  ;;  %v4228_v35 = vpack.c.bf16 %v549_v55, %v541_v26  ;;  %v2047_v55 = vld [vmem:[#allocation9 + $0x88] sm:$0xff] }
 0x1d5   :  { %4211 = vmatprep.subr.bf16.mxu1 %v4210_v31  ;;  %v1059_v31 = vld [vmem:[#allocation6 + $0x16e0] sm:$0xff]  ;;  %v4230_v33 = vpack.c.bf16 %v566_v29, %v558_v28  ;;  %v621_v29 = vld [vmem:[#allocation6 + $0x930] sm:$0xff] }
 0x1d6   :  { %4145 = vmatpush1.bf16.msra.mxu0 %v4144_v32  ;;  %v1076_v32 = vld [vmem:[#allocation6 + $0x1768] sm:$0xff]  ;;  %v4164_v58 = vpack.c.bf16 %v1059_v31, %v1051_v56  ;;  %v638_v31 = vld [vmem:[#allocation6 + $0x9b8] sm:$0xff] }
 0x1d7   :  { %4147 = vmatprep.subr.bf16.mxu0 %v4146_v37  ;;  %v565_v37 = vld [vmem:[#allocation6 + $0x770] sm:$0xff]  ;;  %v4166_v43 = vpack.c.bf16 %v1076_v32, %v1068_v57  ;;  %v2046_v57 = vld [vmem:[#allocation9 + $0x80] sm:$0xff] }
 0x1d8   :  { %4213 = vmatpush1.bf16.msra.mxu1 %v4212_v39  ;;  %v582_v39 = vld [vmem:[#allocation6 + $0x7f8] sm:$0xff]  ;;  %v4232_v60 = vpack.c.bf16 %v565_v37, %v557_v36  ;;  %v2050_v32 = vld [vmem:[#allocation9 + $0xa0] sm:$0xff]  ;;  %v2055_v36 = vld [vmem:[#allocation9 + $0xc8] sm:$0xff] }
 0x1d9   :  { %4215 = vmatprep.subr.bf16.mxu1 %v4214_v59  ;;  %v1075_v59 = vld [vmem:[#allocation6 + $0x1760] sm:$0xff]  ;;  %v4234_v51 = vpack.c.bf16 %v582_v39, %v574_v34  ;;  %v2059_v37 = vld [vmem:[#allocation9 + $0xe8] sm:$0xff]  ;;  %v4376_v39 = vpack.c.bf16 %v2050_v32, %v2046_v57 }
 0x1da   :  { %4149 = vmatpush1.bf16.msra.mxu0 %v4148_v50  ;;  %v1092_v50 = vld [vmem:[#allocation6 + $0x17e8] sm:$0xff]  ;;  %v4168_v63 = vpack.c.bf16 %v1075_v59, %v1067_v44  ;;  %v645_v34 = vld [vmem:[#allocation6 + $0x9f0] sm:$0xff]  ;;  %v662_v44 = vld [vmem:[#allocation6 + $0xa78] sm:$0xff]  ;;  %v4378_v59 = vpack.c.bf16 %v2059_v37, %v2055_v36 }
 0x1db   :  { %4151 = vmatprep.subr.bf16.mxu0 %v4150_v61  ;;  %v581_v61 = vld [vmem:[#allocation6 + $0x7f0] sm:$0xff]  ;;  %v4170_v2 = vpack.c.bf16 %v1092_v50, %v1084_v45  ;;  %v2058_v45 = vld [vmem:[#allocation9 + $0xe0] sm:$0xff] }
 0x1dc   :  { %4217 = vmatpush1.bf16.msra.mxu1 %v4216_v1  ;;  %v598_v1 = vld [vmem:[#allocation6 + $0x878] sm:$0xff]  ;;  %v4236_v5 = vpack.c.bf16 %v581_v61, %v573_v52  ;;  %v2067_v52 = vld [vmem:[#allocation9 + $0x128] sm:$0xff] }
 0x1dd   :  { %4219 = vmatprep.subr.bf16.mxu1 %v4218_v12  ;;  %v1091_v12 = vld [vmem:[#allocation6 + $0x17e0] sm:$0xff]  ;;  %v4238_v47 = vpack.c.bf16 %v598_v1, %v590_v40  ;;  %v661_v40 = vld [vmem:[#allocation6 + $0xa70] sm:$0xff] }
 0x1de   :  { %4153 = vmatpush1.bf16.msra.mxu0 %v4152_v46  ;;  %v2035_v46 = vld [vmem:[#allocation9 + $0x28] sm:$0xff]  ;;  %v4172_v48 = vpack.c.bf16 %v1091_v12, %v1083_v10  ;;  %v678_v10 = vld [vmem:[#allocation6 + $0xaf8] sm:$0xff]  ;;  %v5715_v12 = vsub.s32 0, %v5524_v11 }
 0x1df   :  { %4155 = vmatprep.subr.bf16.mxu0 %v4154_v9  ;;  %v597_v9 = vld [vmem:[#allocation6 + $0x870] sm:$0xff]  ;;  %v4366_v15 = vpack.c.bf16 %v2035_v46, %v2031_v42  ;;  %v2062_v42 = vld [vmem:[#allocation9 + $0x100] sm:$0xff] }
 0x1e0   :  { %4221 = vmatpush1.bf16.msra.mxu1 %v4220_v14  ;;  %v614_v14 = vld [vmem:[#allocation6 + $0x8f8] sm:$0xff]  ;;  %v4240_v17 = vpack.c.bf16 %v597_v9, %v589_v7  ;;  %v2066_v46 = vld [vmem:[#allocation9 + $0x120] sm:$0xff]  ;;  %v5720_v7 = vsub.s32 1, %v5524_v11  ;;  %v2087_v32 = vld [vmem:[#allocation9 + $0x1c8] sm:$0xff] }
 0x1e1   :  { %4223 = vmatprep.subr.bf16.mxu1 %v4222_v16  ;;  %v2034_v16 = vld [vmem:[#allocation9 + $0x20] sm:$0xff]  ;;  %v4242_v19 = vpack.c.bf16 %v614_v14, %v606_v13  ;;  %v2075_v13 = vld [vmem:[#allocation9 + $0x168] sm:$0xff] }
 0x1e2   :  { %4157 = vmatpush1.bf16.msra.mxu0 %v4156_v41  ;;  %v2043_v41 = vld [vmem:[#allocation9 + $0x68] sm:$0xff]  ;;  %v4368_v23 = vpack.c.bf16 %v2034_v16, %v2030_v62  ;;  %v4384_v16 = vpack.c.bf16 %v2066_v46, %v2062_v42  ;;  %v2094_v42 = vld [vmem:[#allocation9 + $0x200] sm:$0xff] }
 0x1e3   :  { %4159 = vmatprep.subr.bf16.mxu0 %v4158_v20  ;;  %v613_v20 = vld [vmem:[#allocation6 + $0x8f0] sm:$0xff]  ;;  %v4370_v21 = vpack.c.bf16 %v2043_v41, %v2039_v18  ;;  %v694_v18 = vld [vmem:[#allocation6 + $0xb78] sm:$0xff]  ;;  %v2098_v46 = vld [vmem:[#allocation9 + $0x220] sm:$0xff] }
 0x1e4   :  { %4225 = vmatpush1.bf16.msra.mxu1 %v4224_v54  ;;  %v630_v54 = vld [vmem:[#allocation6 + $0x978] sm:$0xff]  ;;  %v4244_v26 = vpack.c.bf16 %v613_v20, %v605_v53  ;;  %v677_v62 = vld [vmem:[#allocation6 + $0xaf0] sm:$0xff]  ;;  %v2070_v53 = vld [vmem:[#allocation9 + $0x140] sm:$0xff] }
 0x1e5   :  { %4227 = vmatprep.subr.bf16.mxu1 %v4226_v25  ;;  %v2042_v25 = vld [vmem:[#allocation9 + $0x60] sm:$0xff]  ;;  %v4246_v28 = vpack.c.bf16 %v630_v54, %v622_v24  ;;  %v2079_v54 = vld [vmem:[#allocation9 + $0x188] sm:$0xff] }
 0x1e6   :  { %4161 = vmatpush1.bf16.msra.mxu0 %v4160_v38  ;;  %v2051_v38 = vld [vmem:[#allocation9 + $0xa8] sm:$0xff]  ;;  %v4372_v56 = vpack.c.bf16 %v2042_v25, %v2038_v27  ;;  %v2074_v20 = vld [vmem:[#allocation9 + $0x160] sm:$0xff] }
 0x1e7   :  { %4163 = vmatprep.subr.bf16.mxu0 %v4162_v30  ;;  %v629_v30 = vld [vmem:[#allocation6 + $0x970] sm:$0xff] }
 0x1e8   :  { %4229 = vmatpush1.bf16.msra.mxu1 %v4228_v35  ;;  %v646_v35 = vld [vmem:[#allocation6 + $0x9f8] sm:$0xff]  ;;  %v685_v25 = vld [vmem:[#allocation6 + $0xb30] sm:$0xff] }
 0x1e9   :  { %4231 = vmatprep.subr.bf16.mxu1 %v4230_v33  ;;  %v4248_v33 = vpack.c.bf16 %v629_v30, %v621_v29 }
 0x1ea   :  { %4165 = vmatpush1.bf16.msra.mxu0 %v4164_v58  ;;  %v637_v58 = vld [vmem:[#allocation6 + $0x9b0] sm:$0xff] }
 0x1eb   :  { %4167 = vmatprep.subr.bf16.mxu0 %v4166_v43  ;;  %v654_v43 = vld [vmem:[#allocation6 + $0xa38] sm:$0xff]  ;;  %v4252_v50 = vpack.c.bf16 %v645_v34, %v637_v58  ;;  %v701_v58 = vld [vmem:[#allocation6 + $0xbb0] sm:$0xff] }
 0x1ec   :  { %4233 = vmatpush1.bf16.msra.mxu1 %v4232_v60  ;;  %v2054_v60 = vld [vmem:[#allocation9 + $0xc0] sm:$0xff]  ;;  %v4254_v61 = vpack.c.bf16 %v662_v44, %v654_v43  ;;  %v709_v34 = vld [vmem:[#allocation6 + $0xbf0] sm:$0xff]  ;;  %v718_v43 = vld [vmem:[#allocation6 + $0xc38] sm:$0xff] }
 0x1ed   :  { %4235 = vmatprep.subr.bf16.mxu1 %v4234_v51  ;;  %v2063_v51 = vld [vmem:[#allocation9 + $0x108] sm:$0xff]  ;;  %v4380_v1 = vpack.c.bf16 %v2058_v45, %v2054_v60  ;;  %v726_v44 = vld [vmem:[#allocation6 + $0xc78] sm:$0xff]  ;;  %v2090_v60 = vld [vmem:[#allocation9 + $0x1e0] sm:$0xff] }
 0x1ee   :  { %4169 = vmatpush1.bf16.msra.mxu0 %v4168_v63  ;;  %v653_v63 = vld [vmem:[#allocation6 + $0xa30] sm:$0xff] }
 0x1ef   :  { %4171 = vmatprep.subr.bf16.mxu0 %v4170_v2  ;;  %v670_v2 = vld [vmem:[#allocation6 + $0xab8] sm:$0xff]  ;;  %v4256_v9 = vpack.c.bf16 %v661_v40, %v653_v63  ;;  %v717_v63 = vld [vmem:[#allocation6 + $0xc30] sm:$0xff] }
 0x1f0   :  { %4237 = vmatpush1.bf16.msra.mxu1 %v4236_v5  ;;  %v4382_v5 = vpack.c.bf16 %v2067_v52, %v2063_v51  ;;  %v4258_v14 = vpack.c.bf16 %v678_v10, %v670_v2  ;;  %v2095_v51 = vld [vmem:[#allocation9 + $0x208] sm:$0xff]  ;;  %v734_v2 = vld [vmem:[#allocation6 + $0xcb8] sm:$0xff] }
 0x1f1   :  { %4239 = vmatprep.subr.bf16.mxu1 %v4238_v47  ;;  %v5717_v47 = vld [vmem:[#allocation8] sm:$0xff]  ;;  %v2099_v52 = vld [vmem:[#allocation9 + $0x228] sm:$0xff]  ;;  %v742_v10 = vld [vmem:[#allocation6 + $0xcf8] sm:$0xff] }
 0x1f2   :  { %4173 = vmatpush1.bf16.msra.mxu0 %v4172_v48  ;;  %v2071_v48 = vld [vmem:[#allocation9 + $0x148] sm:$0xff]  ;;  %v1100_v41 = vrot.slane %v5717_v47, %v5715_v12 }
 0x1f3   :  { %4367 = vmatprep.subr.bf16.mxu0 %v4366_v15  ;;  %1874 = vmatmul.mubr.f32.vlgmr.msra.gmra.mrb[4].mxu1 %v5663_v0  ;;  %v4374_v0 = vpack.c.bf16 %v2051_v38, %v2047_v55  ;;  %v669_v15 = vld [vmem:[#allocation6 + $0xab0] sm:$0xff]  ;;  %v4388_v55 = vpack.c.bf16 %v2074_v20, %v2070_v53  ;;  %v702_v38 = vld [vmem:[#allocation6 + $0xbb8] sm:$0xff]  ;;  %v2106_v53 = vld [vmem:[#allocation9 + $0x260] sm:$0xff] }
 0x1f4   :  { %4241 = vmatpush1.bf16.msra.mxu1 %v4240_v17  ;;  %1944 = vmatprep.mubr.f32.mxu1 %v5675_v8  ;;  %v4250_v8 = vpack.c.bf16 %v646_v35, %v638_v31  ;;  %v686_v17 = vld [vmem:[#allocation6 + $0xb38] sm:$0xff]  ;;  %v4260_v24 = vpack.c.bf16 %v677_v62, %v669_v15  ;;  %v1237_v29 = vadd.f32 %v5707_v3, %v1100_v41  ;;  %v2082_v31 = vld [vmem:[#allocation9 + $0x1a0] sm:$0xff]  ;;  %v725_v40 = vld [vmem:[#allocation6 + $0xc70] sm:$0xff] }
 0x1f5   :  { %1803 = vmatmul.mubr.f32.vlgmr.msra.gmra.mrb[2].mxu0 %v5688_v49  ;;  %4243 = vmatprep.subr.bf16.mxu1 %v4242_v19  ;;  %v4386_v19 = vpack.c.bf16 %v2075_v13, %v2071_v48  ;;  %v4262_v27 = vpack.c.bf16 %v694_v18, %v686_v17  ;;  %v2103_v48 = vld [vmem:[#allocation9 + $0x248] sm:$0xff]  ;;  %v750_v17 = vld [vmem:[#allocation6 + $0xd38] sm:$0xff] }
 0x1f6   :  { %4369 = vmatpush1.bf16.msra.mxu0 %v4368_v23  ;;  %v1104_v23 = vrot.slane %v5717_v47, %v5720_v7  ;;  %v2107_v13 = vld [vmem:[#allocation9 + $0x268] sm:$0xff]  ;;  %v758_v18 = vld [vmem:[#allocation6 + $0xd78] sm:$0xff] }
 0x1f7   :  { %4371 = vmatprep.subr.bf16.mxu0 %v4370_v21  ;;  %v2083_v21 = vld [vmem:[#allocation9 + $0x1a8] sm:$0xff]  ;;  %v4402_v41 = vpack.c.bf16 %v2107_v13, %v2103_v48  ;;  %v814_v48 = vld [vmem:[#allocation6 + $0xf38] sm:$0xff] }
 0x1f8   :  { %4245 = vmatpush1.bf16.msra.mxu1 %v4244_v26  ;;  %v693_v26 = vld [vmem:[#allocation6 + $0xb70] sm:$0xff]  ;;  %v4390_v30 = vpack.c.bf16 %v2083_v21, %v2079_v54  ;;  %v1239_v35 = vadd.f32 %v5709_v6, %v1104_v23  ;;  %v4278_v54 = vpack.c.bf16 %v758_v18, %v750_v17  ;;  %v822_v13 = vld [vmem:[#allocation6 + $0xf78] sm:$0xff] }
 0x1f9   :  { %4247 = vmatprep.subr.bf16.mxu1 %v4246_v28  ;;  %v710_v28 = vld [vmem:[#allocation6 + $0xbf8] sm:$0xff]  ;;  %v4264_v57 = vpack.c.bf16 %v693_v26, %v685_v25  ;;  %v733_v15 = vld [vmem:[#allocation6 + $0xcb0] sm:$0xff] }
 0x1fa   :  { %4373 = vmatpush1.bf16.msra.mxu0 %v4372_v56  ;;  %v2078_v56 = vld [vmem:[#allocation9 + $0x180] sm:$0xff]  ;;  %v741_v62 = vld [vmem:[#allocation6 + $0xcf0] sm:$0xff]  ;;  %v766_v26 = vld [vmem:[#allocation6 + $0xdb8] sm:$0xff] }
 0x1fb   :  { %4375 = vmatprep.subr.bf16.mxu0 %v4374_v0  ;;  %v4392_v3 = vpack.c.bf16 %v2082_v31, %v2078_v56  ;;  %v4276_v20 = vpack.c.bf16 %v741_v62, %v733_v15  ;;  %v2111_v23 = vld [vmem:[#allocation9 + $0x288] sm:$0xff]  ;;  %v2134_v15 = vld [vmem:[#allocation9 + $0x340] sm:$0xff] }
 0x1fc   :  { %4249 = vmatpush1.bf16.msra.mxu1 %v4248_v33  ;;  %v2091_v33 = vld [vmem:[#allocation9 + $0x1e8] sm:$0xff]  ;;  %v2138_v62 = vld [vmem:[#allocation9 + $0x360] sm:$0xff] }
 0x1fd   :  { %4251 = vmatprep.subr.bf16.mxu1 %v4250_v8  ;;  %v4266_v8 = vpack.c.bf16 %v710_v28, %v702_v38  ;;  %v4394_v6 = vpack.c.bf16 %v2091_v33, %v2087_v32  ;;  %v749_v21 = vld [vmem:[#allocation6 + $0xd30] sm:$0xff]  ;;  %v2110_v28 = vld [vmem:[#allocation9 + $0x280] sm:$0xff]  ;;  %v782_v33 = vld [vmem:[#allocation6 + $0xe38] sm:$0xff] }
 0x1fe   :  { %4377 = vmatpush1.bf16.msra.mxu0 %v4376_v39  ;;  %v2119_v56 = vld [vmem:[#allocation9 + $0x2c8] sm:$0xff] }
 0x1ff   :  { %4379 = vmatprep.subr.bf16.mxu0 %v4378_v59  ;;  %v2086_v59 = vld [vmem:[#allocation9 + $0x1c0] sm:$0xff]  ;;  %v2123_v31 = vld [vmem:[#allocation9 + $0x2e8] sm:$0xff] }
 0x200   :  { %4253 = vmatpush1.bf16.msra.mxu1 %v4252_v50  ;;  %v4268_v50 = vpack.c.bf16 %v709_v34, %v701_v58  ;;  %v2118_v58 = vld [vmem:[#allocation9 + $0x2c0] sm:$0xff]  ;;  %v2143_v17 = vld [vmem:[#allocation9 + $0x388] sm:$0xff] }
 0x201   :  { %4255 = vmatprep.subr.bf16.mxu1 %v4254_v61  ;;  %v4270_v61 = vpack.c.bf16 %v726_v44, %v718_v43  ;;  %v2122_v34 = vld [vmem:[#allocation9 + $0x2e0] sm:$0xff]  ;;  %v2127_v43 = vld [vmem:[#allocation9 + $0x308] sm:$0xff] }
 0x202   :  { %4381 = vmatpush1.bf16.msra.mxu0 %v4380_v1  ;;  %v4396_v1 = vpack.c.bf16 %v2090_v60, %v2086_v59  ;;  %v2131_v44 = vld [vmem:[#allocation9 + $0x328] sm:$0xff] }
 0x203   :  { %4383 = vmatprep.subr.bf16.mxu0 %v4382_v5  ;;  %v4398_v5 = vpack.c.bf16 %v2099_v52, %v2095_v51  ;;  %v781_v59 = vld [vmem:[#allocation6 + $0xe30] sm:$0xff]  ;;  %v798_v51 = vld [vmem:[#allocation6 + $0xeb8] sm:$0xff] }
 0x204   :  { %4257 = vmatpush1.bf16.msra.mxu1 %v4256_v9  ;;  %v4272_v9 = vpack.c.bf16 %v725_v40, %v717_v63  ;;  %v789_v60 = vld [vmem:[#allocation6 + $0xe70] sm:$0xff]  ;;  %v806_v52 = vld [vmem:[#allocation6 + $0xef8] sm:$0xff]  ;;  %v2126_v63 = vld [vmem:[#allocation9 + $0x300] sm:$0xff] }
 0x205   :  { %4259 = vmatprep.subr.bf16.mxu1 %v4258_v14  ;;  %v4274_v14 = vpack.c.bf16 %v742_v10, %v734_v2  ;;  %v2130_v40 = vld [vmem:[#allocation9 + $0x320] sm:$0xff]  ;;  %v2135_v2 = vld [vmem:[#allocation9 + $0x348] sm:$0xff] }
 0x206   :  { %4385 = vmatpush1.bf16.msra.mxu0 %v4384_v16  ;;  %v4400_v16 = vpack.c.bf16 %v2098_v46, %v2094_v42  ;;  %v2139_v10 = vld [vmem:[#allocation9 + $0x368] sm:$0xff] }
 0x207   :  { %4387 = vmatprep.subr.bf16.mxu0 %v4386_v19  ;;  %v2102_v19 = vld [vmem:[#allocation9 + $0x240] sm:$0xff]  ;;  %v797_v42 = vld [vmem:[#allocation6 + $0xeb0] sm:$0xff] }
 0x208   :  { %v1378_v0 = vpop.f32.mrb[0].mxu0  ;;  %4261 = vmatpush1.bf16.msra.mxu1 %v4260_v24  ;;  %v2115_v24 = vld [vmem:[#allocation9 + $0x2a8] sm:$0xff]  ;;  %v4404_v25 = vpack.c.bf16 %v2106_v53, %v2102_v19 }
 0x209   :  { %v5728_v36 = vadd.f32 %v1378_v0, %v1237_v29  ;;  %v1380_v37 = vpop.f32.mrb[1].mxu0  ;;  %4263 = vmatprep.subr.bf16.mxu1 %v4262_v27  ;;  %v757_v27 = vld [vmem:[#allocation6 + $0xd70] sm:$0xff]  ;;  %v4406_v38 = vpack.c.bf16 %v2115_v24, %v2111_v23  ;;  %v2114_v29 = vld [vmem:[#allocation9 + $0x2a0] sm:$0xff]  ;;  %v830_v23 = vld [vmem:[#allocation6 + $0xfb8] sm:$0xff] }
 0x20a   :  { %v5730_v39 = vadd.f32 %v1380_v37, %v1239_v35  ;;  %4389 = vmatpush1.bf16.msra.mxu0 %v4388_v55  ;;  %v774_v55 = vld [vmem:[#allocation6 + $0xdf8] sm:$0xff]  ;;  %v765_v0 = vld [vmem:[#allocation6 + $0xdb0] sm:$0xff]  ;;  %v4408_v32 = vpack.c.bf16 %v2114_v29, %v2110_v28 }
 0x20b   :  { %4391 = vmatprep.subr.bf16.mxu0 %v4390_v30  ;;  %v4280_v30 = vpack.c.bf16 %v757_v27, %v749_v21  ;;  %v4282_v35 = vpack.c.bf16 %v774_v55, %v766_v26  ;;  %v790_v37 = vld [vmem:[#allocation6 + $0xe78] sm:$0xff]  ;;  %v805_v46 = vld [vmem:[#allocation6 + $0xef0] sm:$0xff]  ;;  %v2142_v21 = vld [vmem:[#allocation9 + $0x380] sm:$0xff] }
 0x20c   :  { %v2023_v45 = vmax.f32 %v5730_v39, 0.0  ;;  %4265 = vmatpush1.bf16.msra.mxu1 %v4264_v57  ;;  %v773_v57 = vld [vmem:[#allocation6 + $0xdf0] sm:$0xff]  ;;  %v838_v24 = vld [vmem:[#allocation6 + $0xff8] sm:$0xff]  ;;  %v2146_v27 = vld [vmem:[#allocation9 + $0x3a0] sm:$0xff] }
 0x20d   :  { %4267 = vmatprep.subr.bf16.mxu1 %v4266_v8  ;;  %v4410_v8 = vpack.c.bf16 %v2123_v31, %v2119_v56  ;;  %v2147_v18 = vld [vmem:[#allocation9 + $0x3a8] sm:$0xff]  ;;  %v846_v56 = vld [vmem:[#allocation6 + $0x1038] sm:$0xff] }
 0x20e   :  { %4393 = vmatpush1.bf16.msra.mxu0 %v4392_v3  ;;  %2628 = vmatprep.mubr.f32.mxu0 %v2023_v45  ;;  %v4284_v3 = vpack.c.bf16 %v773_v57, %v765_v0  ;;  %v813_v19 = vld [vmem:[#allocation6 + $0xf30] sm:$0xff]  ;;  %v854_v31 = vld [vmem:[#allocation6 + $0x1078] sm:$0xff]  ;;  %v2150_v0 = vld [vmem:[#allocation9 + $0x3c0] sm:$0xff] }
 0x20f   :  { %4395 = vmatprep.subr.bf16.mxu0 %v4394_v6  ;;  %v4286_v6 = vpack.c.bf16 %v790_v37, %v782_v33  ;;  %v821_v53 = vld [vmem:[#allocation6 + $0xf70] sm:$0xff]  ;;  %v2154_v57 = vld [vmem:[#allocation9 + $0x3e0] sm:$0xff] }
 0x210   :  { %4269 = vmatpush1.bf16.msra.mxu1 %v4268_v50  ;;  %v4412_v50 = vpack.c.bf16 %v2122_v34, %v2118_v58  ;;  %v2151_v26 = vld [vmem:[#allocation9 + $0x3c8] sm:$0xff] }
 0x211   :  { %4271 = vmatprep.subr.bf16.mxu1 %v4270_v61  ;;  %v4414_v61 = vpack.c.bf16 %v2131_v44, %v2127_v43  ;;  %v2155_v55 = vld [vmem:[#allocation9 + $0x3e8] sm:$0xff]  ;;  %v862_v43 = vld [vmem:[#allocation6 + $0x10b8] sm:$0xff] }
 0x212   :  { %4397 = vmatpush1.bf16.msra.mxu0 %v4396_v1  ;;  %v4288_v1 = vpack.c.bf16 %v789_v60, %v781_v59  ;;  %v829_v28 = vld [vmem:[#allocation6 + $0xfb0] sm:$0xff]  ;;  %v870_v44 = vld [vmem:[#allocation6 + $0x10f8] sm:$0xff]  ;;  %v2158_v59 = vld [vmem:[#allocation9 + $0x400] sm:$0xff] }
 0x213   :  { %4399 = vmatprep.subr.bf16.mxu0 %v4398_v5  ;;  %v4290_v5 = vpack.c.bf16 %v806_v52, %v798_v51  ;;  %v837_v29 = vld [vmem:[#allocation6 + $0xff0] sm:$0xff]  ;;  %v2162_v60 = vld [vmem:[#allocation9 + $0x420] sm:$0xff] }
 0x214   :  { %4273 = vmatpush1.bf16.msra.mxu1 %v4272_v9  ;;  %v4416_v9 = vpack.c.bf16 %v2130_v40, %v2126_v63  ;;  %v2159_v33 = vld [vmem:[#allocation9 + $0x408] sm:$0xff] }
 0x215   :  { %4275 = vmatprep.subr.bf16.mxu1 %v4274_v14  ;;  %v4418_v14 = vpack.c.bf16 %v2139_v10, %v2135_v2  ;;  %v2163_v37 = vld [vmem:[#allocation9 + $0x428] sm:$0xff]  ;;  %v886_v2 = vld [vmem:[#allocation6 + $0x1178] sm:$0xff]  ;;  %v4432_v10 = vpack.c.bf16 %v2162_v60, %v2158_v59 }
 0x216   :  { %4401 = vmatpush1.bf16.msra.mxu0 %v4400_v16  ;;  %v4292_v16 = vpack.c.bf16 %v805_v46, %v797_v42  ;;  %v845_v58 = vld [vmem:[#allocation6 + $0x1030] sm:$0xff]  ;;  %v2166_v46 = vld [vmem:[#allocation9 + $0x440] sm:$0xff]  ;;  %v942_v60 = vld [vmem:[#allocation6 + $0x1338] sm:$0xff] }
 0x217   :  { %4403 = vmatprep.subr.bf16.mxu0 %v4402_v41  ;;  %v4294_v41 = vpack.c.bf16 %v822_v13, %v814_v48  ;;  %v853_v34 = vld [vmem:[#allocation6 + $0x1070] sm:$0xff] }
 0x218   :  { %4277 = vmatpush1.bf16.msra.mxu1 %v4276_v20  ;;  %v4420_v20 = vpack.c.bf16 %v2138_v62, %v2134_v15  ;;  %v2167_v51 = vld [vmem:[#allocation9 + $0x448] sm:$0xff] }
 0x219   :  { %4279 = vmatprep.subr.bf16.mxu1 %v4278_v54  ;;  %v4422_v54 = vpack.c.bf16 %v2147_v18, %v2143_v17  ;;  %v2171_v52 = vld [vmem:[#allocation9 + $0x468] sm:$0xff]  ;;  %v894_v17 = vld [vmem:[#allocation6 + $0x11b8] sm:$0xff] }
 0x21a   :  { %4405 = vmatpush1.bf16.msra.mxu0 %v4404_v25  ;;  %v4296_v25 = vpack.c.bf16 %v821_v53, %v813_v19  ;;  %v861_v63 = vld [vmem:[#allocation6 + $0x10b0] sm:$0xff]  ;;  %v4434_v42 = vpack.c.bf16 %v2171_v52, %v2167_v51  ;;  %v902_v18 = vld [vmem:[#allocation6 + $0x11f8] sm:$0xff]  ;;  %v2174_v19 = vld [vmem:[#allocation9 + $0x480] sm:$0xff] }
 0x21b   :  { %4407 = vmatprep.subr.bf16.mxu0 %v4406_v38  ;;  %v4298_v38 = vpack.c.bf16 %v838_v24, %v830_v23  ;;  %v869_v40 = vld [vmem:[#allocation6 + $0x10f0] sm:$0xff]  ;;  %v2178_v53 = vld [vmem:[#allocation9 + $0x4a0] sm:$0xff] }
 0x21c   :  { %4281 = vmatpush1.bf16.msra.mxu1 %v4280_v30  ;;  %v4424_v30 = vpack.c.bf16 %v2146_v27, %v2142_v21  ;;  %v4308_v48 = vpack.c.bf16 %v869_v40, %v861_v63  ;;  %v2175_v13 = vld [vmem:[#allocation9 + $0x488] sm:$0xff]  ;;  %v910_v27 = vld [vmem:[#allocation6 + $0x1238] sm:$0xff]  ;;  %v2202_v63 = vld [vmem:[#allocation9 + $0x560] sm:$0xff] }
 0x21d   :  { %4283 = vmatprep.subr.bf16.mxu1 %v4282_v35  ;;  %v4426_v35 = vpack.c.bf16 %v2155_v55, %v2151_v26  ;;  %v877_v62 = vld [vmem:[#allocation6 + $0x1130] sm:$0xff]  ;;  %v4440_v26 = vpack.c.bf16 %v2178_v53, %v2174_v19  ;;  %v974_v53 = vld [vmem:[#allocation6 + $0x1438] sm:$0xff] }
 0x21e   :  { %4409 = vmatpush1.bf16.msra.mxu0 %v4408_v32  ;;  %v4300_v32 = vpack.c.bf16 %v837_v29, %v829_v28  ;;  %v2183_v23 = vld [vmem:[#allocation9 + $0x4c8] sm:$0xff]  ;;  %v2186_v28 = vld [vmem:[#allocation9 + $0x4e0] sm:$0xff] }
 0x21f   :  { %4411 = vmatprep.subr.bf16.mxu0 %v4410_v8  ;;  %v4302_v8 = vpack.c.bf16 %v854_v31, %v846_v56  ;;  %v2187_v24 = vld [vmem:[#allocation9 + $0x4e8] sm:$0xff] }
 0x220   :  { %4285 = vmatpush1.bf16.msra.mxu1 %v4284_v3  ;;  %v4428_v3 = vpack.c.bf16 %v2154_v57, %v2150_v0  ;;  %v901_v21 = vld [vmem:[#allocation6 + $0x11f0] sm:$0xff]  ;;  %v4442_v55 = vpack.c.bf16 %v2187_v24, %v2183_v23  ;;  %v926_v57 = vld [vmem:[#allocation6 + $0x12b8] sm:$0xff] }
 0x221   :  { %4287 = vmatprep.subr.bf16.mxu1 %v4286_v6  ;;  %v4430_v6 = vpack.c.bf16 %v2163_v37, %v2159_v33  ;;  %v2195_v56 = vld [vmem:[#allocation9 + $0x528] sm:$0xff] }
 0x222   :  { %4413 = vmatpush1.bf16.msra.mxu0 %v4412_v50  ;;  %v4304_v50 = vpack.c.bf16 %v853_v34, %v845_v58  ;;  %v917_v0 = vld [vmem:[#allocation6 + $0x1270] sm:$0xff]  ;;  %v2194_v58 = vld [vmem:[#allocation9 + $0x520] sm:$0xff] }
 0x223   :  { %4415 = vmatprep.subr.bf16.mxu0 %v4414_v61  ;;  %v4306_v61 = vpack.c.bf16 %v870_v44, %v862_v43  ;;  %v2203_v43 = vld [vmem:[#allocation9 + $0x568] sm:$0xff] }
 0x224   :  { %4289 = vmatpush1.bf16.msra.mxu1 %v4288_v1  ;;  %v878_v1 = vld [vmem:[#allocation6 + $0x1138] sm:$0xff]  ;;  %v933_v59 = vld [vmem:[#allocation6 + $0x12f0] sm:$0xff] }
 0x225   :  { %4291 = vmatprep.subr.bf16.mxu1 %v4290_v5  ;;  %v2022_v5 = vmax.f32 %v5728_v36, 0.0  ;;  %v4310_v15 = vpack.c.bf16 %v886_v2, %v878_v1  ;;  %v2207_v1 = vld [vmem:[#allocation9 + $0x588] sm:$0xff]  ;;  %v2189_v36 = vld [vmem:[#allocation9 + $0x4f8] sm:$0xff] }
 0x226   :  { %4417 = vmatpush1.bf16.msra.mxu0 %v4416_v9  ;;  %v2170_v9 = vld [vmem:[#allocation9 + $0x460] sm:$0xff]  ;;  %v2211_v2 = vld [vmem:[#allocation9 + $0x5a8] sm:$0xff] }
 0x227   :  { %4419 = vmatprep.subr.bf16.mxu0 %v4418_v14  ;;  %v2179_v14 = vld [vmem:[#allocation9 + $0x4a8] sm:$0xff] }
 0x228   :  { %4293 = vmatpush1.bf16.msra.mxu1 %v4292_v16  ;;  %v885_v16 = vld [vmem:[#allocation6 + $0x1170] sm:$0xff] }
 0x229   :  { %4295 = vmatprep.subr.bf16.mxu1 %v4294_v41  ;;  %v4438_v41 = vpack.c.bf16 %v2179_v14, %v2175_v13  ;;  %v4454_v14 = vpack.c.bf16 %v2211_v2, %v2207_v1  ;;  %v965_v19 = vld [vmem:[#allocation6 + $0x13f0] sm:$0xff] }
 0x22a   :  { %4421 = vmatpush1.bf16.msra.mxu0 %v4420_v20  ;;  %v4312_v20 = vpack.c.bf16 %v885_v16, %v877_v62  ;;  %v2210_v62 = vld [vmem:[#allocation9 + $0x5a0] sm:$0xff] }
 0x22b   :  { %4423 = vmatprep.subr.bf16.mxu0 %v4422_v54  ;;  %v893_v54 = vld [vmem:[#allocation6 + $0x11b0] sm:$0xff] }
 0x22c   :  { %4297 = vmatpush1.bf16.msra.mxu1 %v4296_v25  ;;  %v918_v25 = vld [vmem:[#allocation6 + $0x1278] sm:$0xff]  ;;  %v4316_v29 = vpack.c.bf16 %v901_v21, %v893_v54  ;;  %v2218_v54 = vld [vmem:[#allocation9 + $0x5e0] sm:$0xff] }
 0x22d   :  { %4299 = vmatprep.subr.bf16.mxu1 %v4298_v38  ;;  %v2182_v38 = vld [vmem:[#allocation9 + $0x4c0] sm:$0xff]  ;;  %v4318_v31 = vpack.c.bf16 %v918_v25, %v910_v27  ;;  %v2223_v27 = vld [vmem:[#allocation9 + $0x608] sm:$0xff] }
 0x22e   :  { %4425 = vmatpush1.bf16.msra.mxu0 %v4424_v30  ;;  %v2191_v30 = vld [vmem:[#allocation9 + $0x508] sm:$0xff]  ;;  %v4444_v33 = vpack.c.bf16 %v2186_v28, %v2182_v38  ;;  %v990_v28 = vld [vmem:[#allocation6 + $0x14b8] sm:$0xff] }
 0x22f   :  { %4427 = vmatprep.subr.bf16.mxu0 %v4426_v35  ;;  %v909_v35 = vld [vmem:[#allocation6 + $0x1230] sm:$0xff]  ;;  %v4446_v37 = vpack.c.bf16 %v2195_v56, %v2191_v30 }
 0x230   :  { %4301 = vmatpush1.bf16.msra.mxu1 %v4300_v32  ;;  %v934_v32 = vld [vmem:[#allocation6 + $0x12f8] sm:$0xff]  ;;  %v4320_v34 = vpack.c.bf16 %v917_v0, %v909_v35  ;;  %v2227_v25 = vld [vmem:[#allocation9 + $0x628] sm:$0xff]  ;;  %v2226_v35 = vld [vmem:[#allocation9 + $0x620] sm:$0xff] }
 0x231   :  { %4303 = vmatprep.subr.bf16.mxu1 %v4302_v8  ;;  %v2190_v8 = vld [vmem:[#allocation9 + $0x500] sm:$0xff]  ;;  %v4322_v44 = vpack.c.bf16 %v934_v32, %v926_v57  ;;  %v981_v38 = vld [vmem:[#allocation6 + $0x1470] sm:$0xff]  ;;  %v4462_v56 = vpack.c.bf16 %v2227_v25, %v2223_v27 }
 0x232   :  { %4429 = vmatpush1.bf16.msra.mxu0 %v4428_v3  ;;  %v2199_v3 = vld [vmem:[#allocation9 + $0x548] sm:$0xff]  ;;  %v4448_v51 = vpack.c.bf16 %v2194_v58, %v2190_v8  ;;  %v1006_v58 = vld [vmem:[#allocation6 + $0x1538] sm:$0xff] }
 0x233   :  { %1945 = vmatmul.mubr.f32.vlgmr.msra.gmra.mrb[4].mxu1 %v5670_v4  ;;  %4431 = vmatprep.subr.bf16.mxu0 %v4430_v6  ;;  %v4436_v4 = vpack.c.bf16 %v2170_v9, %v2166_v46  ;;  %v925_v6 = vld [vmem:[#allocation6 + $0x12b0] sm:$0xff]  ;;  %v4450_v52 = vpack.c.bf16 %v2203_v43, %v2199_v3  ;;  %v958_v9 = vld [vmem:[#allocation6 + $0x13b8] sm:$0xff] }
 0x234   :  { %4305 = vmatpush1.bf16.msra.mxu1 %v4304_v50  ;;  %2015 = vmatprep.mubr.f32.mxu1 %v5692_v22  ;;  %v4314_v22 = vpack.c.bf16 %v902_v18, %v894_v17  ;;  %v950_v50 = vld [vmem:[#allocation6 + $0x1378] sm:$0xff]  ;;  %v4324_v40 = vpack.c.bf16 %v933_v59, %v925_v6  ;;  %v949_v46 = vld [vmem:[#allocation6 + $0x1370] sm:$0xff]  ;;  %v2234_v6 = vld [vmem:[#allocation9 + $0x660] sm:$0xff] }
 0x235   :  { %2629 = vmatmul.mubr.f32.vlgmr.msra.gmra.mrb[4].mxu0 %v2022_v5  ;;  %4307 = vmatprep.subr.bf16.mxu1 %v4306_v61  ;;  %v2198_v61 = vld [vmem:[#allocation9 + $0x540] sm:$0xff]  ;;  %v2215_v17 = vld [vmem:[#allocation9 + $0x5c8] sm:$0xff] }
 0x236   :  { %4433 = vmatpush1.bf16.msra.mxu0 %v4432_v10  ;;  %v4326_v10 = vpack.c.bf16 %v950_v50, %v942_v60  ;;  %v4452_v13 = vpack.c.bf16 %v2202_v63, %v2198_v61  ;;  %v2219_v18 = vld [vmem:[#allocation9 + $0x5e8] sm:$0xff]  ;;  %v1022_v63 = vld [vmem:[#allocation6 + $0x15b8] sm:$0xff] }
 0x237   :  { %4435 = vmatprep.subr.bf16.mxu0 %v4434_v42  ;;  %v941_v42 = vld [vmem:[#allocation6 + $0x1330] sm:$0xff]  ;;  %v4458_v24 = vpack.c.bf16 %v2219_v18, %v2215_v17 }
 0x238   :  { %4309 = vmatpush1.bf16.msra.mxu1 %v4308_v48  ;;  %v966_v48 = vld [vmem:[#allocation6 + $0x13f8] sm:$0xff]  ;;  %v4328_v16 = vpack.c.bf16 %v949_v46, %v941_v42  ;;  %v2231_v57 = vld [vmem:[#allocation9 + $0x648] sm:$0xff]  ;;  %v2242_v42 = vld [vmem:[#allocation9 + $0x6a0] sm:$0xff] }
 0x239   :  { %4311 = vmatprep.subr.bf16.mxu1 %v4310_v15  ;;  %v2206_v15 = vld [vmem:[#allocation9 + $0x580] sm:$0xff]  ;;  %v2235_v32 = vld [vmem:[#allocation9 + $0x668] sm:$0xff] }
 0x23a   :  { %4437 = vmatpush1.bf16.msra.mxu0 %v4436_v4  ;;  %v4330_v4 = vpack.c.bf16 %v966_v48, %v958_v9  ;;  %v4456_v23 = vpack.c.bf16 %v2210_v62, %v2206_v15  ;;  %v997_v8 = vld [vmem:[#allocation6 + $0x14f0] sm:$0xff]  ;;  %v4466_v43 = vpack.c.bf16 %v2235_v32, %v2231_v57  ;;  %v1038_v62 = vld [vmem:[#allocation6 + $0x1638] sm:$0xff] }
 0x23b   :  { %4439 = vmatprep.subr.bf16.mxu0 %v4438_v41  ;;  %v957_v41 = vld [vmem:[#allocation6 + $0x13b0] sm:$0xff] }
 0x23c   :  { %4313 = vmatpush1.bf16.msra.mxu1 %v4312_v20  ;;  %v982_v20 = vld [vmem:[#allocation6 + $0x1478] sm:$0xff]  ;;  %v4332_v21 = vpack.c.bf16 %v965_v19, %v957_v41  ;;  %v2239_v60 = vld [vmem:[#allocation9 + $0x688] sm:$0xff]  ;;  %v2250_v41 = vld [vmem:[#allocation9 + $0x6e0] sm:$0xff] }
 0x23d   :  { %4315 = vmatprep.subr.bf16.mxu1 %v4314_v22  ;;  %v2214_v22 = vld [vmem:[#allocation9 + $0x5c0] sm:$0xff]  ;;  %v2243_v50 = vld [vmem:[#allocation9 + $0x6a8] sm:$0xff] }
 0x23e   :  { %4441 = vmatpush1.bf16.msra.mxu0 %v4440_v26  ;;  %v4334_v26 = vpack.c.bf16 %v982_v20, %v974_v53  ;;  %v4460_v30 = vpack.c.bf16 %v2218_v54, %v2214_v22  ;;  %v1013_v61 = vld [vmem:[#allocation6 + $0x1570] sm:$0xff]  ;;  %v4470_v2 = vpack.c.bf16 %v2243_v50, %v2239_v60  ;;  %v1054_v54 = vld [vmem:[#allocation6 + $0x16b8] sm:$0xff] }
 0x23f   :  { %4443 = vmatprep.subr.bf16.mxu0 %v4442_v55  ;;  %v973_v55 = vld [vmem:[#allocation6 + $0x1430] sm:$0xff] }
 0x240   :  { %4317 = vmatpush1.bf16.msra.mxu1 %v4316_v29  ;;  %v998_v29 = vld [vmem:[#allocation6 + $0x14f8] sm:$0xff]  ;;  %v4336_v0 = vpack.c.bf16 %v981_v38, %v973_v55  ;;  %v2247_v9 = vld [vmem:[#allocation9 + $0x6c8] sm:$0xff]  ;;  %v2258_v55 = vld [vmem:[#allocation9 + $0x720] sm:$0xff] }
 0x241   :  { %4319 = vmatprep.subr.bf16.mxu1 %v4318_v31  ;;  %v2222_v31 = vld [vmem:[#allocation9 + $0x600] sm:$0xff]  ;;  %v2251_v48 = vld [vmem:[#allocation9 + $0x6e8] sm:$0xff] }
 0x242   :  { %4445 = vmatpush1.bf16.msra.mxu0 %v4444_v33  ;;  %v4338_v33 = vpack.c.bf16 %v998_v29, %v990_v28  ;;  %v4464_v3 = vpack.c.bf16 %v2226_v35, %v2222_v31  ;;  %v1029_v15 = vld [vmem:[#allocation6 + $0x15f0] sm:$0xff]  ;;  %v4474_v18 = vpack.c.bf16 %v2251_v48, %v2247_v9  ;;  %v1070_v35 = vld [vmem:[#allocation6 + $0x1738] sm:$0xff] }
 0x243   :  { %4447 = vmatprep.subr.bf16.mxu0 %v4446_v37  ;;  %v989_v37 = vld [vmem:[#allocation6 + $0x14b0] sm:$0xff] }
 0x244   :  { %4321 = vmatpush1.bf16.msra.mxu1 %v4320_v34  ;;  %v1014_v34 = vld [vmem:[#allocation6 + $0x1578] sm:$0xff]  ;;  %v4340_v59 = vpack.c.bf16 %v997_v8, %v989_v37  ;;  %v2255_v53 = vld [vmem:[#allocation9 + $0x708] sm:$0xff]  ;;  %v2266_v37 = vld [vmem:[#allocation9 + $0x760] sm:$0xff] }
 0x245   :  { %4323 = vmatprep.subr.bf16.mxu1 %v4322_v44  ;;  %v2230_v44 = vld [vmem:[#allocation9 + $0x640] sm:$0xff]  ;;  %v2259_v20 = vld [vmem:[#allocation9 + $0x728] sm:$0xff] }
 0x246   :  { %4449 = vmatpush1.bf16.msra.mxu0 %v4448_v51  ;;  %v4342_v51 = vpack.c.bf16 %v1014_v34, %v1006_v58  ;;  %v4468_v1 = vpack.c.bf16 %v2234_v6, %v2230_v44  ;;  %v1045_v22 = vld [vmem:[#allocation6 + $0x1670] sm:$0xff]  ;;  %v4478_v25 = vpack.c.bf16 %v2259_v20, %v2255_v53  ;;  %v1086_v6 = vld [vmem:[#allocation6 + $0x17b8] sm:$0xff] }
 0x247   :  { %4451 = vmatprep.subr.bf16.mxu0 %v4450_v52  ;;  %v1005_v52 = vld [vmem:[#allocation6 + $0x1530] sm:$0xff] }
 0x248   :  { %4325 = vmatpush1.bf16.msra.mxu1 %v4324_v40  ;;  %v1030_v40 = vld [vmem:[#allocation6 + $0x15f8] sm:$0xff]  ;;  %v4344_v46 = vpack.c.bf16 %v1013_v61, %v1005_v52  ;;  %v2263_v28 = vld [vmem:[#allocation9 + $0x748] sm:$0xff]  ;;  %v2274_v52 = vld [vmem:[#allocation9 + $0x7a0] sm:$0xff] }
 0x249   :  { %4327 = vmatprep.subr.bf16.mxu1 %v4326_v10  ;;  %v2238_v10 = vld [vmem:[#allocation9 + $0x680] sm:$0xff]  ;;  %v2267_v29 = vld [vmem:[#allocation9 + $0x768] sm:$0xff] }
 0x24a   :  { %4453 = vmatpush1.bf16.msra.mxu0 %v4452_v13  ;;  %v4346_v13 = vpack.c.bf16 %v1030_v40, %v1022_v63  ;;  %v4472_v17 = vpack.c.bf16 %v2242_v42, %v2238_v10  ;;  %v1061_v31 = vld [vmem:[#allocation6 + $0x16f0] sm:$0xff]  ;;  %v4482_v32 = vpack.c.bf16 %v2267_v29, %v2263_v28  ;;  %v2033_v42 = vld [vmem:[#allocation9 + $0x18] sm:$0xff] }
 0x24b   :  { %4455 = vmatprep.subr.bf16.mxu0 %v4454_v14  ;;  %v1021_v14 = vld [vmem:[#allocation6 + $0x15b0] sm:$0xff]  ;;  %v2057_v28 = vld [vmem:[#allocation9 + $0xd8] sm:$0xff] }
 0x24c   :  { %4329 = vmatpush1.bf16.msra.mxu1 %v4328_v16  ;;  %v1046_v16 = vld [vmem:[#allocation6 + $0x1678] sm:$0xff]  ;;  %v4348_v19 = vpack.c.bf16 %v1029_v15, %v1021_v14  ;;  %v2271_v58 = vld [vmem:[#allocation9 + $0x788] sm:$0xff]  ;;  %v2282_v14 = vld [vmem:[#allocation9 + $0x7e0] sm:$0xff] }
 0x24d   :  { %4331 = vmatprep.subr.bf16.mxu1 %v4330_v4  ;;  %v2246_v4 = vld [vmem:[#allocation9 + $0x6c0] sm:$0xff]  ;;  %v2275_v34 = vld [vmem:[#allocation9 + $0x7a8] sm:$0xff]  ;;  %v2061_v29 = vld [vmem:[#allocation9 + $0xf8] sm:$0xff] }
 0x24e   :  { %4457 = vmatpush1.bf16.msra.mxu0 %v4456_v23  ;;  %v4350_v23 = vpack.c.bf16 %v1046_v16, %v1038_v62  ;;  %v4476_v27 = vpack.c.bf16 %v2250_v41, %v2246_v4  ;;  %v1077_v44 = vld [vmem:[#allocation6 + $0x1770] sm:$0xff]  ;;  %v4486_v50 = vpack.c.bf16 %v2275_v34, %v2271_v58  ;;  %v2036_v4 = vld [vmem:[#allocation9 + $0x30] sm:$0xff]  ;;  %v2041_v41 = vld [vmem:[#allocation9 + $0x58] sm:$0xff]  ;;  %v1111_v34 = vsub.s32 3, %v5524_v11 }
 0x24f   :  { %4459 = vmatprep.subr.bf16.mxu0 %v4458_v24  ;;  %v1037_v24 = vld [vmem:[#allocation6 + $0x1630] sm:$0xff] }
 0x250   :  { %4333 = vmatpush1.bf16.msra.mxu1 %v4332_v21  ;;  %v1062_v21 = vld [vmem:[#allocation6 + $0x16f8] sm:$0xff]  ;;  %v4352_v38 = vpack.c.bf16 %v1045_v22, %v1037_v24  ;;  %v2279_v63 = vld [vmem:[#allocation9 + $0x7c8] sm:$0xff] }
 0x251   :  { %4335 = vmatprep.subr.bf16.mxu1 %v4334_v26  ;;  %v2254_v26 = vld [vmem:[#allocation9 + $0x700] sm:$0xff]  ;;  %v2283_v40 = vld [vmem:[#allocation9 + $0x7e8] sm:$0xff]  ;;  %v2040_v22 = vld [vmem:[#allocation9 + $0x50] sm:$0xff] }
 0x252   :  { %4461 = vmatpush1.bf16.msra.mxu0 %v4460_v30  ;;  %v4354_v30 = vpack.c.bf16 %v1062_v21, %v1054_v54  ;;  %v4480_v57 = vpack.c.bf16 %v2258_v55, %v2254_v26  ;;  %v1093_v10 = vld [vmem:[#allocation6 + $0x17f0] sm:$0xff]  ;;  %v4490_v48 = vpack.c.bf16 %v2283_v40, %v2279_v63  ;;  %v2044_v54 = vld [vmem:[#allocation9 + $0x70] sm:$0xff]  ;;  %v2049_v21 = vld [vmem:[#allocation9 + $0x98] sm:$0xff] }
 0x253   :  { %4463 = vmatprep.subr.bf16.mxu0 %v4462_v56  ;;  %v1053_v56 = vld [vmem:[#allocation6 + $0x16b0] sm:$0xff]  ;;  %v2048_v55 = vld [vmem:[#allocation9 + $0x90] sm:$0xff] }
 0x254   :  { %4337 = vmatpush1.bf16.msra.mxu1 %v4336_v0  ;;  %v1078_v0 = vld [vmem:[#allocation6 + $0x1778] sm:$0xff]  ;;  %v4356_v8 = vpack.c.bf16 %v1061_v31, %v1053_v56  ;;  %v2287_v62 = vld [vmem:[#allocation9 + $0x808] sm:$0xff]  ;;  %v4634_v56 = vpack.c.bf16 %v2061_v29, %v2057_v28  ;;  %v2302_v29 = vld [vmem:[#allocation9 + $0x880] sm:$0xff] }
 0x255   :  { %4339 = vmatprep.subr.bf16.mxu1 %v4338_v33  ;;  %v2262_v33 = vld [vmem:[#allocation9 + $0x740] sm:$0xff]  ;;  %v2291_v16 = vld [vmem:[#allocation9 + $0x828] sm:$0xff]  ;;  %v2056_v31 = vld [vmem:[#allocation9 + $0xd0] sm:$0xff] }
 0x256   :  { %4465 = vmatpush1.bf16.msra.mxu0 %v4464_v3  ;;  %v4358_v3 = vpack.c.bf16 %v1078_v0, %v1070_v35  ;;  %v4484_v60 = vpack.c.bf16 %v2266_v37, %v2262_v33  ;;  %v4494_v20 = vpack.c.bf16 %v2291_v16, %v2287_v62  ;;  %v2060_v35 = vld [vmem:[#allocation9 + $0xf0] sm:$0xff]  ;;  %v2065_v0 = vld [vmem:[#allocation9 + $0x118] sm:$0xff] }
 0x257   :  { %4467 = vmatprep.subr.bf16.mxu0 %v4466_v43  ;;  %v1069_v43 = vld [vmem:[#allocation6 + $0x1730] sm:$0xff]  ;;  %v2073_v33 = vld [vmem:[#allocation9 + $0x158] sm:$0xff]  ;;  %v2084_v63 = vld [vmem:[#allocation9 + $0x1b0] sm:$0xff] }
 0x258   :  { %4341 = vmatpush1.bf16.msra.mxu1 %v4340_v59  ;;  %v1094_v59 = vld [vmem:[#allocation6 + $0x17f8] sm:$0xff]  ;;  %v4360_v61 = vpack.c.bf16 %v1077_v44, %v1069_v43  ;;  %v2077_v37 = vld [vmem:[#allocation9 + $0x178] sm:$0xff] }
 0x259   :  { %4343 = vmatprep.subr.bf16.mxu1 %v4342_v51  ;;  %v2270_v51 = vld [vmem:[#allocation9 + $0x780] sm:$0xff]  ;;  %v2072_v43 = vld [vmem:[#allocation9 + $0x150] sm:$0xff] }
 0x25a   :  { %4469 = vmatpush1.bf16.msra.mxu0 %v4468_v1  ;;  %v4362_v1 = vpack.c.bf16 %v1094_v59, %v1086_v6  ;;  %v4488_v9 = vpack.c.bf16 %v2274_v52, %v2270_v51  ;;  %v2076_v44 = vld [vmem:[#allocation9 + $0x170] sm:$0xff]  ;;  %v2081_v6 = vld [vmem:[#allocation9 + $0x198] sm:$0xff] }
 0x25b   :  { %4471 = vmatprep.subr.bf16.mxu0 %v4470_v2  ;;  %v1085_v2 = vld [vmem:[#allocation6 + $0x17b0] sm:$0xff]  ;;  %v2085_v59 = vld [vmem:[#allocation9 + $0x1b8] sm:$0xff]  ;;  %v4644_v51 = vpack.c.bf16 %v2076_v44, %v2072_v43  ;;  %v2088_v62 = vld [vmem:[#allocation9 + $0x1d0] sm:$0xff] }
 0x25c   :  { %4345 = vmatpush1.bf16.msra.mxu1 %v4344_v46  ;;  %v2037_v46 = vld [vmem:[#allocation9 + $0x38] sm:$0xff]  ;;  %v4364_v15 = vpack.c.bf16 %v1093_v10, %v1085_v2  ;;  %v4646_v52 = vpack.c.bf16 %v2085_v59, %v2081_v6  ;;  %v2092_v16 = vld [vmem:[#allocation9 + $0x1f0] sm:$0xff]  ;;  %v2319_v43 = vld [vmem:[#allocation9 + $0x908] sm:$0xff] }
 0x25d   :  { %4347 = vmatprep.subr.bf16.mxu1 %v4346_v13  ;;  %v2278_v13 = vld [vmem:[#allocation9 + $0x7c0] sm:$0xff]  ;;  %v2093_v2 = vld [vmem:[#allocation9 + $0x1f8] sm:$0xff]  ;;  %v2323_v44 = vld [vmem:[#allocation9 + $0x928] sm:$0xff] }
 0x25e   :  { %4473 = vmatpush1.bf16.msra.mxu0 %v4472_v17  ;;  %v4622_v17 = vpack.c.bf16 %v2037_v46, %v2033_v42  ;;  %v4492_v53 = vpack.c.bf16 %v2282_v14, %v2278_v13  ;;  %v2286_v46 = vld [vmem:[#allocation9 + $0x800] sm:$0xff]  ;;  %v2295_v14 = vld [vmem:[#allocation9 + $0x848] sm:$0xff]  ;;  %v2112_v59 = vld [vmem:[#allocation9 + $0x290] sm:$0xff] }
 0x25f   :  { %4475 = vmatprep.subr.bf16.mxu0 %v4474_v18  ;;  %v2032_v18 = vld [vmem:[#allocation9 + $0x10] sm:$0xff] }
 0x260   :  { %4349 = vmatpush1.bf16.msra.mxu1 %v4348_v19  ;;  %v2045_v19 = vld [vmem:[#allocation9 + $0x78] sm:$0xff] }
 0x261   :  { %4351 = vmatprep.subr.bf16.mxu1 %v4350_v23  ;;  %v4624_v23 = vpack.c.bf16 %v2036_v4, %v2032_v18  ;;  %v4626_v24 = vpack.c.bf16 %v2045_v19, %v2041_v41  ;;  %v2097_v4 = vld [vmem:[#allocation9 + $0x218] sm:$0xff] }
 0x262   :  { %4477 = vmatpush1.bf16.msra.mxu0 %v4476_v27  ;;  %v2053_v27 = vld [vmem:[#allocation9 + $0xb8] sm:$0xff] }
 0x263   :  { %4479 = vmatprep.subr.bf16.mxu0 %v4478_v25  ;;  %v4628_v25 = vpack.c.bf16 %v2044_v54, %v2040_v22  ;;  %v4630_v26 = vpack.c.bf16 %v2053_v27, %v2049_v21  ;;  %v2101_v41 = vld [vmem:[#allocation9 + $0x238] sm:$0xff]  ;;  %v2303_v22 = vld [vmem:[#allocation9 + $0x888] sm:$0xff]  ;;  %v2096_v27 = vld [vmem:[#allocation9 + $0x210] sm:$0xff] }
 0x264   :  { %4353 = vmatpush1.bf16.msra.mxu1 %v4352_v38  ;;  %v2052_v38 = vld [vmem:[#allocation9 + $0xb0] sm:$0xff]  ;;  %v2307_v54 = vld [vmem:[#allocation9 + $0x8a8] sm:$0xff]  ;;  %v4654_v21 = vpack.c.bf16 %v2101_v41, %v2097_v4 }
 0x265   :  { %4355 = vmatprep.subr.bf16.mxu1 %v4354_v30  ;;  %v4632_v30 = vpack.c.bf16 %v2052_v38, %v2048_v55  ;;  %v2105_v55 = vld [vmem:[#allocation9 + $0x258] sm:$0xff]  ;;  %v4502_v28 = vpack.c.bf16 %v2307_v54, %v2303_v22  ;;  %v2335_v41 = vld [vmem:[#allocation9 + $0x988] sm:$0xff] }
 0x266   :  { %4481 = vmatpush1.bf16.msra.mxu0 %v4480_v57  ;;  %v4636_v57 = vpack.c.bf16 %v2060_v35, %v2056_v31  ;;  %v2109_v38 = vld [vmem:[#allocation9 + $0x278] sm:$0xff]  ;;  %v2311_v31 = vld [vmem:[#allocation9 + $0x8c8] sm:$0xff] }
 0x267   :  { %4483 = vmatprep.subr.bf16.mxu0 %v4482_v32  ;;  %v2068_v32 = vld [vmem:[#allocation9 + $0x130] sm:$0xff]  ;;  %v2315_v35 = vld [vmem:[#allocation9 + $0x8e8] sm:$0xff]  ;;  %v2137_v54 = vld [vmem:[#allocation9 + $0x358] sm:$0xff] }
 0x268   :  { %4357 = vmatpush1.bf16.msra.mxu1 %v4356_v8  ;;  %v1107_v8 = vsub.s32 2, %v5524_v11 }
 0x269   :  { %4359 = vmatprep.subr.bf16.mxu1 %v4358_v3  ;;  %v4642_v3 = vpack.c.bf16 %v2077_v37, %v2073_v33  ;;  %v4506_v33 = vpack.c.bf16 %v2315_v35, %v2311_v31  ;;  %v2310_v37 = vld [vmem:[#allocation9 + $0x8c0] sm:$0xff]  ;;  %v2145_v35 = vld [vmem:[#allocation9 + $0x398] sm:$0xff] }
 0x26a   :  { %4485 = vmatpush1.bf16.msra.mxu0 %v4484_v60  ;;  %v1108_v60 = vrot.slane %v5717_v47, %v1107_v8 }
 0x26b   :  { %4487 = vmatprep.subr.bf16.mxu0 %v4486_v50  ;;  %v1112_v50 = vrot.slane %v5717_v47, %v1111_v34 }
 0x26c   :  { %4361 = vmatpush1.bf16.msra.mxu1 %v4360_v61  ;;  %v2080_v61 = vld [vmem:[#allocation9 + $0x190] sm:$0xff] }
 0x26d   :  { %4363 = vmatprep.subr.bf16.mxu1 %v4362_v1  ;;  %v2089_v1 = vld [vmem:[#allocation9 + $0x1d8] sm:$0xff]  ;;  %v4648_v13 = vpack.c.bf16 %v2084_v63, %v2080_v61  ;;  %v4510_v61 = vpack.c.bf16 %v2323_v44, %v2319_v43  ;;  %v2318_v63 = vld [vmem:[#allocation9 + $0x900] sm:$0xff] }
 0x26e   :  { %4489 = vmatpush1.bf16.msra.mxu0 %v4488_v9  ;;  %v2290_v9 = vld [vmem:[#allocation9 + $0x820] sm:$0xff]  ;;  %v4650_v47 = vpack.c.bf16 %v2093_v2, %v2089_v1  ;;  %v2327_v2 = vld [vmem:[#allocation9 + $0x948] sm:$0xff]  ;;  %v2153_v44 = vld [vmem:[#allocation9 + $0x3d8] sm:$0xff] }
 0x26f   :  { %4491 = vmatprep.subr.bf16.mxu0 %v4490_v48  ;;  %v4496_v18 = vpack.c.bf16 %v2290_v9, %v2286_v46  ;;  %v2120_v9 = vld [vmem:[#allocation9 + $0x2d0] sm:$0xff] }
 0x270   :  { %4365 = vmatpush1.bf16.msra.mxu1 %v4364_v15  ;;  %v2299_v15 = vld [vmem:[#allocation9 + $0x868] sm:$0xff] }
 0x271   :  { %4623 = vmatprep.subr.bf16.mxu1 %v4622_v17 }
 0x272   :  { %4493 = vmatpush1.bf16.msra.mxu0 %v4492_v53  ;;  %v4498_v53 = vpack.c.bf16 %v2299_v15, %v2295_v14  ;;  %v2129_v15 = vld [vmem:[#allocation9 + $0x318] sm:$0xff] }
 0x273   :  { %2016 = vmatmul.mubr.f32.vlgmr.msra.gmra.mrb[4].mxu1 %v5688_v49  ;;  %4495 = vmatprep.subr.bf16.mxu0 %v4494_v20  ;;  %v2069_v49 = vld [vmem:[#allocation9 + $0x138] sm:$0xff]  ;;  %v2294_v20 = vld [vmem:[#allocation9 + $0x840] sm:$0xff] }
 0x274   :  { %4625 = vmatpush1.bf16.msra.mxu1 %v4624_v23  ;;  %2912 = vmatprep.mubr.f32.mxu1 %v2023_v45  ;;  %v4638_v39 = vpack.c.bf16 %v2069_v49, %v2065_v0  ;;  %v2064_v45 = vld [vmem:[#allocation9 + $0x110] sm:$0xff]  ;;  %v2298_v23 = vld [vmem:[#allocation9 + $0x860] sm:$0xff]  ;;  %v4658_v0 = vpack.c.bf16 %v2109_v38, %v2105_v55  ;;  %v2343_v38 = vld [vmem:[#allocation9 + $0x9c8] sm:$0xff] }
 0x275   :  { %4627 = vmatprep.subr.bf16.mxu1 %v4626_v24  ;;  %v4640_v58 = vpack.c.bf16 %v2068_v32, %v2064_v45  ;;  %v4652_v24 = vpack.c.bf16 %v2092_v16, %v2088_v62  ;;  %v2104_v49 = vld [vmem:[#allocation9 + $0x250] sm:$0xff]  ;;  %v2113_v45 = vld [vmem:[#allocation9 + $0x298] sm:$0xff]  ;;  %v2326_v16 = vld [vmem:[#allocation9 + $0x940] sm:$0xff] }
 0x276   :  { %v2117_v32 = vld [vmem:[#allocation9 + $0x2b8] sm:$0xff] }
 0x277   :  { %v4662_v6 = vpack.c.bf16 %v2117_v32, %v2113_v45  ;;  %v2351_v32 = vld [vmem:[#allocation9 + $0xa08] sm:$0xff] }
 0x278   :  { %4629 = vmatpush1.bf16.msra.mxu1 %v4628_v25  ;;  %v2100_v25 = vld [vmem:[#allocation9 + $0x230] sm:$0xff] }
 0x279   :  { %4631 = vmatprep.subr.bf16.mxu1 %v4630_v26  ;;  %v4500_v26 = vpack.c.bf16 %v2298_v23, %v2294_v20  ;;  %v2128_v23 = vld [vmem:[#allocation9 + $0x310] sm:$0xff] }
 0x27c   :  { %4633 = vmatpush1.bf16.msra.mxu1 %v4632_v30  ;;  %v2306_v30 = vld [vmem:[#allocation9 + $0x8a0] sm:$0xff] }
 0x27d   :  { %4635 = vmatprep.subr.bf16.mxu1 %v4634_v56  ;;  %v4656_v56 = vpack.c.bf16 %v2100_v25, %v2096_v27  ;;  %v2334_v25 = vld [vmem:[#allocation9 + $0x980] sm:$0xff] }
 0x280   :  { %4637 = vmatpush1.bf16.msra.mxu1 %v4636_v57  ;;  %v2108_v57 = vld [vmem:[#allocation9 + $0x270] sm:$0xff] }
 0x281   :  { %4639 = vmatprep.subr.bf16.mxu1 %v4638_v39  ;;  %v4504_v39 = vpack.c.bf16 %v2306_v30, %v2302_v29  ;;  %v2136_v30 = vld [vmem:[#allocation9 + $0x350] sm:$0xff] }
 0x284   :  { %4641 = vmatpush1.bf16.msra.mxu1 %v4640_v58  ;;  %v2314_v58 = vld [vmem:[#allocation9 + $0x8e0] sm:$0xff] }
 0x285   :  { %4643 = vmatprep.subr.bf16.mxu1 %v4642_v3  ;;  %v4660_v3 = vpack.c.bf16 %v2108_v57, %v2104_v49  ;;  %v2342_v57 = vld [vmem:[#allocation9 + $0x9c0] sm:$0xff] }
 0x286   :  { %v1591_v40 = vpop.f32.mrb[2].mxu1 }
 0x287   :  { %v5751_v10 = vadd.f32 %v1591_v40, %v1108_v60  ;;  %v1593_v42 = vpop.f32.mrb[3].mxu1  ;;  %v2116_v60 = vld [vmem:[#allocation9 + $0x2b0] sm:$0xff]  ;;  %v2322_v40 = vld [vmem:[#allocation9 + $0x920] sm:$0xff] }
 0x288   :  { %v5753_v48 = vadd.f32 %v1593_v42, %v1112_v50  ;;  %4645 = vmatpush1.bf16.msra.mxu1 %v4644_v51  ;;  %v4508_v50 = vpack.c.bf16 %v2314_v58, %v2310_v37  ;;  %v2121_v51 = vld [vmem:[#allocation9 + $0x2d8] sm:$0xff]  ;;  %v4664_v1 = vpack.c.bf16 %v2116_v60, %v2112_v59  ;;  %v2331_v42 = vld [vmem:[#allocation9 + $0x968] sm:$0xff]  ;;  %v4512_v14 = vpack.c.bf16 %v2322_v40, %v2318_v63  ;;  %v2144_v58 = vld [vmem:[#allocation9 + $0x390] sm:$0xff] }
 0x289   :  { %4647 = vmatprep.subr.bf16.mxu1 %v4646_v52  ;;  %v2024_v19 = vmax.f32 %v5751_v10, 0.0  ;;  %v2125_v52 = vld [vmem:[#allocation9 + $0x2f8] sm:$0xff]  ;;  %v4514_v62 = vpack.c.bf16 %v2331_v42, %v2327_v2  ;;  %v2350_v60 = vld [vmem:[#allocation9 + $0xa00] sm:$0xff]  ;;  %v2152_v40 = vld [vmem:[#allocation9 + $0x3d0] sm:$0xff] }
 0x28a   :  { %v2025_v17 = vmax.f32 %v5753_v48, 0.0  ;;  %v4666_v46 = vpack.c.bf16 %v2125_v52, %v2121_v51  ;;  %v2359_v52 = vld [vmem:[#allocation9 + $0xa48] sm:$0xff]  ;;  %v2161_v42 = vld [vmem:[#allocation9 + $0x418] sm:$0xff]  ;;  %v2506_v10 = vld [vmem:[#allocation9 + $0xee0] sm:$0xff] }
 0x28b   :  { %v2395_v48 = vld [vmem:[#allocation9 + $0xb68] sm:$0xff] }
 0x28c   :  { %2699 = vmatprep.mubr.f32.mxu0 %v2025_v17  ;;  %4649 = vmatpush1.bf16.msra.mxu1 %v4648_v13  ;;  %v2124_v13 = vld [vmem:[#allocation9 + $0x2f0] sm:$0xff] }
 0x28d   :  { %2700 = vmatmul.mubr.f32.vlgmr.msra.gmra.mrb[4].mxu0 %v2024_v19  ;;  %4651 = vmatprep.subr.bf16.mxu1 %v4650_v47  ;;  %v2133_v47 = vld [vmem:[#allocation9 + $0x338] sm:$0xff]  ;;  %v4668_v4 = vpack.c.bf16 %v2124_v13, %v2120_v9  ;;  %v2358_v13 = vld [vmem:[#allocation9 + $0xa40] sm:$0xff] }
 0x28e   :  { %4497 = vmatpush1.bf16.msra.mxu0 %v4496_v18  ;;  %v2330_v18 = vld [vmem:[#allocation9 + $0x960] sm:$0xff]  ;;  %v4670_v20 = vpack.c.bf16 %v2133_v47, %v2129_v15  ;;  %v2367_v47 = vld [vmem:[#allocation9 + $0xa88] sm:$0xff] }
 0x28f   :  { %4499 = vmatprep.subr.bf16.mxu0 %v4498_v53  ;;  %v2339_v53 = vld [vmem:[#allocation9 + $0x9a8] sm:$0xff]  ;;  %v4516_v22 = vpack.c.bf16 %v2330_v18, %v2326_v16  ;;  %v2160_v18 = vld [vmem:[#allocation9 + $0x410] sm:$0xff] }
 0x290   :  { %4653 = vmatpush1.bf16.msra.mxu1 %v4652_v24  ;;  %v2132_v24 = vld [vmem:[#allocation9 + $0x330] sm:$0xff]  ;;  %v4518_v27 = vpack.c.bf16 %v2339_v53, %v2335_v41  ;;  %v2169_v53 = vld [vmem:[#allocation9 + $0x458] sm:$0xff] }
 0x291   :  { %4655 = vmatprep.subr.bf16.mxu1 %v4654_v21  ;;  %v2141_v21 = vld [vmem:[#allocation9 + $0x378] sm:$0xff]  ;;  %v4672_v55 = vpack.c.bf16 %v2132_v24, %v2128_v23  ;;  %v2366_v24 = vld [vmem:[#allocation9 + $0xa80] sm:$0xff] }
 0x292   :  { %4501 = vmatpush1.bf16.msra.mxu0 %v4500_v26  ;;  %v2338_v26 = vld [vmem:[#allocation9 + $0x9a0] sm:$0xff]  ;;  %v4674_v29 = vpack.c.bf16 %v2141_v21, %v2137_v54  ;;  %v2375_v21 = vld [vmem:[#allocation9 + $0xac8] sm:$0xff] }
 0x293   :  { %4503 = vmatprep.subr.bf16.mxu0 %v4502_v28  ;;  %v2347_v28 = vld [vmem:[#allocation9 + $0x9e8] sm:$0xff]  ;;  %v4520_v31 = vpack.c.bf16 %v2338_v26, %v2334_v25  ;;  %v2168_v26 = vld [vmem:[#allocation9 + $0x450] sm:$0xff] }
 0x294   :  { %4657 = vmatpush1.bf16.msra.mxu1 %v4656_v56  ;;  %v2140_v56 = vld [vmem:[#allocation9 + $0x370] sm:$0xff]  ;;  %v4522_v49 = vpack.c.bf16 %v2347_v28, %v2343_v38  ;;  %v2177_v28 = vld [vmem:[#allocation9 + $0x498] sm:$0xff] }
 0x295   :  { %4659 = vmatprep.subr.bf16.mxu1 %v4658_v0  ;;  %v2149_v0 = vld [vmem:[#allocation9 + $0x3b8] sm:$0xff]  ;;  %v4676_v45 = vpack.c.bf16 %v2140_v56, %v2136_v30  ;;  %v2374_v56 = vld [vmem:[#allocation9 + $0xac0] sm:$0xff] }
 0x296   :  { %4505 = vmatpush1.bf16.msra.mxu0 %v4504_v39  ;;  %v2346_v39 = vld [vmem:[#allocation9 + $0x9e0] sm:$0xff]  ;;  %v4678_v37 = vpack.c.bf16 %v2149_v0, %v2145_v35  ;;  %v2383_v0 = vld [vmem:[#allocation9 + $0xb08] sm:$0xff] }
 0x297   :  { %4507 = vmatprep.subr.bf16.mxu0 %v4506_v33  ;;  %v2355_v33 = vld [vmem:[#allocation9 + $0xa28] sm:$0xff]  ;;  %v4524_v43 = vpack.c.bf16 %v2346_v39, %v2342_v57  ;;  %v2176_v39 = vld [vmem:[#allocation9 + $0x490] sm:$0xff] }
 0x298   :  { %4661 = vmatpush1.bf16.msra.mxu1 %v4660_v3  ;;  %v2148_v3 = vld [vmem:[#allocation9 + $0x3b0] sm:$0xff]  ;;  %v4526_v59 = vpack.c.bf16 %v2355_v33, %v2351_v32  ;;  %v2185_v33 = vld [vmem:[#allocation9 + $0x4d8] sm:$0xff] }
 0x299   :  { %4663 = vmatprep.subr.bf16.mxu1 %v4662_v6  ;;  %v2157_v6 = vld [vmem:[#allocation9 + $0x3f8] sm:$0xff]  ;;  %v4680_v51 = vpack.c.bf16 %v2148_v3, %v2144_v58  ;;  %v2386_v58 = vld [vmem:[#allocation9 + $0xb20] sm:$0xff] }
 0x29a   :  { %4509 = vmatpush1.bf16.msra.mxu0 %v4508_v50  ;;  %v2354_v50 = vld [vmem:[#allocation9 + $0xa20] sm:$0xff]  ;;  %v4682_v63 = vpack.c.bf16 %v2157_v6, %v2153_v44  ;;  %v2184_v44 = vld [vmem:[#allocation9 + $0x4d0] sm:$0xff] }
 0x29b   :  { %4511 = vmatprep.subr.bf16.mxu0 %v4510_v61  ;;  %v2363_v61 = vld [vmem:[#allocation9 + $0xa68] sm:$0xff]  ;;  %v4528_v2 = vpack.c.bf16 %v2354_v50, %v2350_v60  ;;  %v2188_v6 = vld [vmem:[#allocation9 + $0x4f0] sm:$0xff]  ;;  %v2193_v60 = vld [vmem:[#allocation9 + $0x518] sm:$0xff] }
 0x29c   :  { %4665 = vmatpush1.bf16.msra.mxu1 %v4664_v1  ;;  %v2156_v1 = vld [vmem:[#allocation9 + $0x3f0] sm:$0xff]  ;;  %v4530_v9 = vpack.c.bf16 %v2363_v61, %v2359_v52  ;;  %v2197_v50 = vld [vmem:[#allocation9 + $0x538] sm:$0xff]  ;;  %v2390_v52 = vld [vmem:[#allocation9 + $0xb40] sm:$0xff] }
 0x29d   :  { %4667 = vmatprep.subr.bf16.mxu1 %v4666_v46  ;;  %v2165_v46 = vld [vmem:[#allocation9 + $0x438] sm:$0xff]  ;;  %v4684_v15 = vpack.c.bf16 %v2156_v1, %v2152_v40  ;;  %v2394_v61 = vld [vmem:[#allocation9 + $0xb60] sm:$0xff]  ;;  %v2399_v40 = vld [vmem:[#allocation9 + $0xb88] sm:$0xff] }
 0x29e   :  { %4513 = vmatpush1.bf16.msra.mxu0 %v4512_v14  ;;  %v2362_v14 = vld [vmem:[#allocation9 + $0xa60] sm:$0xff]  ;;  %v4686_v16 = vpack.c.bf16 %v2165_v46, %v2161_v42  ;;  %v2403_v1 = vld [vmem:[#allocation9 + $0xba8] sm:$0xff]  ;;  %v2192_v42 = vld [vmem:[#allocation9 + $0x510] sm:$0xff] }
 0x29f   :  { %4515 = vmatprep.subr.bf16.mxu0 %v4514_v62  ;;  %v2371_v62 = vld [vmem:[#allocation9 + $0xaa8] sm:$0xff]  ;;  %v4532_v41 = vpack.c.bf16 %v2362_v14, %v2358_v13  ;;  %v2196_v46 = vld [vmem:[#allocation9 + $0x530] sm:$0xff]  ;;  %v2201_v13 = vld [vmem:[#allocation9 + $0x558] sm:$0xff] }
 0x2a0   :  { %4669 = vmatpush1.bf16.msra.mxu1 %v4668_v4  ;;  %v2164_v4 = vld [vmem:[#allocation9 + $0x430] sm:$0xff]  ;;  %v4534_v23 = vpack.c.bf16 %v2371_v62, %v2367_v47  ;;  %v2205_v14 = vld [vmem:[#allocation9 + $0x578] sm:$0xff]  ;;  %v2398_v47 = vld [vmem:[#allocation9 + $0xb80] sm:$0xff] }
 0x2a1   :  { %4671 = vmatprep.subr.bf16.mxu1 %v4670_v20  ;;  %v2173_v20 = vld [vmem:[#allocation9 + $0x478] sm:$0xff]  ;;  %v4688_v54 = vpack.c.bf16 %v2164_v4, %v2160_v18  ;;  %v2402_v62 = vld [vmem:[#allocation9 + $0xba0] sm:$0xff]  ;;  %v2407_v18 = vld [vmem:[#allocation9 + $0xbc8] sm:$0xff] }
 0x2a2   :  { %4517 = vmatpush1.bf16.msra.mxu0 %v4516_v22  ;;  %v2370_v22 = vld [vmem:[#allocation9 + $0xaa0] sm:$0xff]  ;;  %v4690_v25 = vpack.c.bf16 %v2173_v20, %v2169_v53  ;;  %v2411_v4 = vld [vmem:[#allocation9 + $0xbe8] sm:$0xff]  ;;  %v4706_v53 = vpack.c.bf16 %v2205_v14, %v2201_v13  ;;  %v2200_v20 = vld [vmem:[#allocation9 + $0x550] sm:$0xff] }
 0x2a3   :  { %4519 = vmatprep.subr.bf16.mxu0 %v4518_v27  ;;  %v2379_v27 = vld [vmem:[#allocation9 + $0xae8] sm:$0xff]  ;;  %v4536_v38 = vpack.c.bf16 %v2370_v22, %v2366_v24  ;;  %v4552_v24 = vpack.c.bf16 %v2402_v62, %v2398_v47  ;;  %v1119_v22 = vsub.s32 5, %v5524_v11  ;;  %v2237_v13 = vld [vmem:[#allocation9 + $0x678] sm:$0xff]  ;;  %v2232_v62 = vld [vmem:[#allocation9 + $0x650] sm:$0xff] }
 0x2a4   :  { %4673 = vmatpush1.bf16.msra.mxu1 %v4672_v55  ;;  %v2172_v55 = vld [vmem:[#allocation9 + $0x470] sm:$0xff]  ;;  %v4538_v30 = vpack.c.bf16 %v2379_v27, %v2375_v21  ;;  %v2213_v21 = vld [vmem:[#allocation9 + $0x5b8] sm:$0xff]  ;;  %v4554_v27 = vpack.c.bf16 %v2411_v4, %v2407_v18  ;;  %v2431_v14 = vld [vmem:[#allocation9 + $0xc88] sm:$0xff] }
 0x2a5   :  { %4675 = vmatprep.subr.bf16.mxu1 %v4674_v29  ;;  %v2181_v29 = vld [vmem:[#allocation9 + $0x4b8] sm:$0xff]  ;;  %v4692_v35 = vpack.c.bf16 %v2172_v55, %v2168_v26  ;;  %v2410_v26 = vld [vmem:[#allocation9 + $0xbe0] sm:$0xff] }
 0x2a6   :  { %4521 = vmatpush1.bf16.msra.mxu0 %v4520_v31  ;;  %v2378_v31 = vld [vmem:[#allocation9 + $0xae0] sm:$0xff]  ;;  %v4694_v57 = vpack.c.bf16 %v2181_v29, %v2177_v28  ;;  %v2419_v28 = vld [vmem:[#allocation9 + $0xc28] sm:$0xff]  ;;  %v5767_v29 = vld [vmem:[#allocation8] sm:$0xff] }
 0x2a7   :  { %4523 = vmatprep.subr.bf16.mxu0 %v4522_v49  ;;  %v2387_v49 = vld [vmem:[#allocation9 + $0xb28] sm:$0xff]  ;;  %v4540_v32 = vpack.c.bf16 %v2378_v31, %v2374_v56  ;;  %v2208_v31 = vld [vmem:[#allocation9 + $0x590] sm:$0xff] }
 0x2a8   :  { %4677 = vmatpush1.bf16.msra.mxu1 %v4676_v45  ;;  %v2180_v45 = vld [vmem:[#allocation9 + $0x4b0] sm:$0xff] }
 0x2a9   :  { %4679 = vmatprep.subr.bf16.mxu1 %v4678_v37  ;;  %v2382_v37 = vld [vmem:[#allocation9 + $0xb00] sm:$0xff]  ;;  %v4696_v3 = vpack.c.bf16 %v2180_v45, %v2176_v39  ;;  %v2221_v39 = vld [vmem:[#allocation9 + $0x5f8] sm:$0xff] }
 0x2aa   :  { %4525 = vmatpush1.bf16.msra.mxu0 %v4524_v43  ;;  %v2391_v43 = vld [vmem:[#allocation9 + $0xb48] sm:$0xff] }
 0x2ab   :  { %4527 = vmatprep.subr.bf16.mxu0 %v4526_v59  ;;  %v4544_v59 = vpack.c.bf16 %v2386_v58, %v2382_v37 }
 0x2ac   :  { %4681 = vmatpush1.bf16.msra.mxu1 %v4680_v51  ;;  %v4546_v51 = vpack.c.bf16 %v2395_v48, %v2391_v43  ;;  %v2225_v43 = vld [vmem:[#allocation9 + $0x618] sm:$0xff]  ;;  %v2414_v48 = vld [vmem:[#allocation9 + $0xc00] sm:$0xff] }
 0x2ad   :  { %4683 = vmatprep.subr.bf16.mxu1 %v4682_v63  ;;  %v4700_v63 = vpack.c.bf16 %v2188_v6, %v2184_v44  ;;  %v2229_v6 = vld [vmem:[#allocation9 + $0x638] sm:$0xff] }
 0x2ae   :  { %4529 = vmatpush1.bf16.msra.mxu0 %v4528_v2  ;;  %v4702_v2 = vpack.c.bf16 %v2197_v50, %v2193_v60  ;;  %v2427_v60 = vld [vmem:[#allocation9 + $0xc68] sm:$0xff] }
 0x2af   :  { %4531 = vmatprep.subr.bf16.mxu0 %v4530_v9  ;;  %v4548_v9 = vpack.c.bf16 %v2394_v61, %v2390_v52  ;;  %v2224_v52 = vld [vmem:[#allocation9 + $0x610] sm:$0xff] }
 0x2b0   :  { %4685 = vmatpush1.bf16.msra.mxu1 %v4684_v15  ;;  %v4550_v15 = vpack.c.bf16 %v2403_v1, %v2399_v40  ;;  %v2228_v61 = vld [vmem:[#allocation9 + $0x630] sm:$0xff]  ;;  %v4718_v1 = vpack.c.bf16 %v2229_v6, %v2225_v43  ;;  %v2455_v43 = vld [vmem:[#allocation9 + $0xd48] sm:$0xff] }
 0x2b1   :  { %4687 = vmatprep.subr.bf16.mxu1 %v4686_v16  ;;  %v4704_v16 = vpack.c.bf16 %v2196_v46, %v2192_v42  ;;  %v2422_v46 = vld [vmem:[#allocation9 + $0xc40] sm:$0xff]  ;;  %v4720_v47 = vpack.c.bf16 %v2228_v61, %v2224_v52  ;;  %v2256_v6 = vld [vmem:[#allocation9 + $0x710] sm:$0xff]  ;;  %v2265_v52 = vld [vmem:[#allocation9 + $0x758] sm:$0xff] }
 0x2b2   :  { %4533 = vmatpush1.bf16.msra.mxu0 %v4532_v41  ;;  %v1115_v41 = vsub.s32 4, %v5524_v11 }
 0x2b3   :  { %2913 = vmatmul.mubr.f32.vlgmr.msra.gmra.mrb[6].mxu1 %v2022_v5  ;;  %4535 = vmatprep.subr.bf16.mxu0 %v4534_v23  ;;  %v4542_v5 = vpack.c.bf16 %v2387_v49, %v2383_v0  ;;  %v2204_v23 = vld [vmem:[#allocation9 + $0x570] sm:$0xff]  ;;  %v1120_v0 = vrot.slane %v5767_v29, %v1119_v22  ;;  %v2439_v22 = vld [vmem:[#allocation9 + $0xcc8] sm:$0xff] }
 0x2b4   :  { %4689 = vmatpush1.bf16.msra.mxu1 %v4688_v54  ;;  %2983 = vmatprep.mubr.f32.mxu1 %v2025_v17  ;;  %v4698_v17 = vpack.c.bf16 %v2189_v36, %v2185_v33  ;;  %v2209_v54 = vld [vmem:[#allocation9 + $0x598] sm:$0xff]  ;;  %v4708_v55 = vpack.c.bf16 %v2204_v23, %v2200_v20  ;;  %v2216_v36 = vld [vmem:[#allocation9 + $0x5d0] sm:$0xff]  ;;  %v2430_v20 = vld [vmem:[#allocation9 + $0xc80] sm:$0xff] }
 0x2b5   :  { %4691 = vmatprep.subr.bf16.mxu1 %v4690_v25  ;;  %v2406_v25 = vld [vmem:[#allocation9 + $0xbc0] sm:$0xff]  ;;  %v4710_v56 = vpack.c.bf16 %v2213_v21, %v2209_v54  ;;  %v2443_v54 = vld [vmem:[#allocation9 + $0xce8] sm:$0xff] }
 0x2b6   :  { %4537 = vmatpush1.bf16.msra.mxu0 %v4536_v38  ;;  %v2415_v38 = vld [vmem:[#allocation9 + $0xc08] sm:$0xff]  ;;  %v4556_v49 = vpack.c.bf16 %v2410_v26, %v2406_v25  ;;  %v2434_v23 = vld [vmem:[#allocation9 + $0xca0] sm:$0xff]  ;;  %v2244_v25 = vld [vmem:[#allocation9 + $0x6b0] sm:$0xff] }
 0x2b7   :  { %4539 = vmatprep.subr.bf16.mxu0 %v4538_v30  ;;  %v1116_v30 = vrot.slane %v5767_v29, %v1115_v41  ;;  %v4558_v45 = vpack.c.bf16 %v2419_v28, %v2415_v38  ;;  %v2241_v41 = vld [vmem:[#allocation9 + $0x698] sm:$0xff]  ;;  %v4568_v26 = vpack.c.bf16 %v2434_v23, %v2430_v20  ;;  %v4570_v28 = vpack.c.bf16 %v2443_v54, %v2439_v22  ;;  %v2475_v20 = vld [vmem:[#allocation9 + $0xde8] sm:$0xff]  ;;  %v2276_v22 = vld [vmem:[#allocation9 + $0x7b0] sm:$0xff] }
 0x2b8   :  { %4693 = vmatpush1.bf16.msra.mxu1 %v4692_v35  ;;  %v2212_v35 = vld [vmem:[#allocation9 + $0x5b0] sm:$0xff]  ;;  %v2249_v38 = vld [vmem:[#allocation9 + $0x6d8] sm:$0xff] }
 0x2b9   :  { %4695 = vmatprep.subr.bf16.mxu1 %v4694_v57  ;;  %v2217_v57 = vld [vmem:[#allocation9 + $0x5d8] sm:$0xff]  ;;  %v4712_v33 = vpack.c.bf16 %v2212_v35, %v2208_v31  ;;  %v2447_v35 = vld [vmem:[#allocation9 + $0xd08] sm:$0xff] }
 0x2ba   :  { %4541 = vmatpush1.bf16.msra.mxu0 %v4540_v32  ;;  %v2253_v31 = vld [vmem:[#allocation9 + $0x6f8] sm:$0xff] }
 0x2bb   :  { %4543 = vmatprep.subr.bf16.mxu0 %v4542_v5  ;;  %v2220_v5 = vld [vmem:[#allocation9 + $0x5f0] sm:$0xff] }
 0x2bc   :  { %4697 = vmatpush1.bf16.msra.mxu1 %v4696_v3  ;;  %v4714_v3 = vpack.c.bf16 %v2221_v39, %v2217_v57  ;;  %v2248_v57 = vld [vmem:[#allocation9 + $0x6d0] sm:$0xff] }
 0x2bd   :  { %4699 = vmatprep.subr.bf16.mxu1 %v4698_v17  ;;  %v2418_v17 = vld [vmem:[#allocation9 + $0xc20] sm:$0xff]  ;;  %v2252_v39 = vld [vmem:[#allocation9 + $0x6f0] sm:$0xff] }
 0x2be   :  { %4545 = vmatpush1.bf16.msra.mxu0 %v4544_v59  ;;  %v2423_v59 = vld [vmem:[#allocation9 + $0xc48] sm:$0xff] }
 0x2bf   :  { %4547 = vmatprep.subr.bf16.mxu0 %v4546_v51  ;;  %v4716_v51 = vpack.c.bf16 %v2220_v5, %v2216_v36  ;;  %v4562_v42 = vpack.c.bf16 %v2427_v60, %v2423_v59  ;;  %v2446_v5 = vld [vmem:[#allocation9 + $0xd00] sm:$0xff]  ;;  %v2260_v59 = vld [vmem:[#allocation9 + $0x730] sm:$0xff] }
 0x2c0   :  { %4701 = vmatpush1.bf16.msra.mxu1 %v4700_v63  ;;  %v4560_v63 = vpack.c.bf16 %v2418_v17, %v2414_v48  ;;  %v2459_v48 = vld [vmem:[#allocation9 + $0xd68] sm:$0xff]  ;;  %v4732_v17 = vpack.c.bf16 %v2252_v39, %v2248_v57  ;;  %v2289_v57 = vld [vmem:[#allocation9 + $0x818] sm:$0xff] }
 0x2c1   :  { %4703 = vmatprep.subr.bf16.mxu1 %v4702_v2  ;;  %v2233_v2 = vld [vmem:[#allocation9 + $0x658] sm:$0xff]  ;;  %v4578_v61 = vpack.c.bf16 %v2459_v48, %v2455_v43  ;;  %v2288_v48 = vld [vmem:[#allocation9 + $0x810] sm:$0xff] }
 0x2c2   :  { %4549 = vmatpush1.bf16.msra.mxu0 %v4548_v9  ;;  %v2426_v9 = vld [vmem:[#allocation9 + $0xc60] sm:$0xff]  ;;  %v4722_v4 = vpack.c.bf16 %v2237_v13, %v2233_v2  ;;  %v2269_v2 = vld [vmem:[#allocation9 + $0x778] sm:$0xff]  ;;  %v2264_v13 = vld [vmem:[#allocation9 + $0x750] sm:$0xff] }
 0x2c3   :  { %4551 = vmatprep.subr.bf16.mxu0 %v4550_v15  ;;  %v2435_v15 = vld [vmem:[#allocation9 + $0xca8] sm:$0xff]  ;;  %v4564_v18 = vpack.c.bf16 %v2426_v9, %v2422_v46  ;;  %v4736_v9 = vpack.c.bf16 %v2260_v59, %v2256_v6  ;;  %v2297_v6 = vld [vmem:[#allocation9 + $0x858] sm:$0xff] }
 0x2c4   :  { %4705 = vmatpush1.bf16.msra.mxu1 %v4704_v16  ;;  %v2236_v16 = vld [vmem:[#allocation9 + $0x670] sm:$0xff]  ;;  %v2467_v46 = vld [vmem:[#allocation9 + $0xda8] sm:$0xff] }
 0x2c5   :  { %4707 = vmatprep.subr.bf16.mxu1 %v4706_v53  ;;  %v4566_v53 = vpack.c.bf16 %v2435_v15, %v2431_v14  ;;  %v4724_v21 = vpack.c.bf16 %v2236_v16, %v2232_v62  ;;  %v2268_v14 = vld [vmem:[#allocation9 + $0x770] sm:$0xff]  ;;  %v2273_v62 = vld [vmem:[#allocation9 + $0x798] sm:$0xff] }
 0x2c6   :  { %4553 = vmatpush1.bf16.msra.mxu0 %v4552_v24  ;;  %v2245_v24 = vld [vmem:[#allocation9 + $0x6b8] sm:$0xff]  ;;  %v4740_v23 = vpack.c.bf16 %v2268_v14, %v2264_v13 }
 0x2c7   :  { %4555 = vmatprep.subr.bf16.mxu0 %v4554_v27  ;;  %v2240_v27 = vld [vmem:[#allocation9 + $0x690] sm:$0xff]  ;;  %v2309_v14 = vld [vmem:[#allocation9 + $0x8b8] sm:$0xff] }
 0x2c8   :  { %v1804_v32 = vpop.f32.mrb[2].mxu0  ;;  %4709 = vmatpush1.bf16.msra.mxu1 %v4708_v55  ;;  %v4726_v55 = vpack.c.bf16 %v2245_v24, %v2241_v41  ;;  %v2277_v41 = vld [vmem:[#allocation9 + $0x7b8] sm:$0xff]  ;;  %v2272_v24 = vld [vmem:[#allocation9 + $0x790] sm:$0xff] }
 0x2c9   :  { %v5771_v37 = vadd.f32 %v1804_v32, %v1116_v30  ;;  %v1806_v58 = vpop.f32.mrb[3].mxu0  ;;  %4711 = vmatprep.subr.bf16.mxu1 %v4710_v56  ;;  %v2438_v30 = vld [vmem:[#allocation9 + $0xcc0] sm:$0xff]  ;;  %v4730_v32 = vpack.c.bf16 %v2253_v31, %v2249_v38  ;;  %v2285_v38 = vld [vmem:[#allocation9 + $0x7f8] sm:$0xff]  ;;  %v2280_v31 = vld [vmem:[#allocation9 + $0x7d0] sm:$0xff] }
 0x2ca   :  { %v5773_v44 = vadd.f32 %v1806_v58, %v1120_v0  ;;  %4557 = vmatpush1.bf16.msra.mxu0 %v4556_v49  ;;  %v2442_v56 = vld [vmem:[#allocation9 + $0xce0] sm:$0xff]  ;;  %v2451_v0 = vld [vmem:[#allocation9 + $0xd28] sm:$0xff]  ;;  %v4728_v49 = vpack.c.bf16 %v2244_v25, %v2240_v27  ;;  %v2281_v27 = vld [vmem:[#allocation9 + $0x7d8] sm:$0xff] }
 0x2cb   :  { %4559 = vmatprep.subr.bf16.mxu0 %v4558_v45  ;;  %v2026_v40 = vmax.f32 %v5771_v37, 0.0  ;;  %v4572_v45 = vpack.c.bf16 %v2442_v56, %v2438_v30  ;;  %v4574_v36 = vpack.c.bf16 %v2451_v0, %v2447_v35  ;;  %v2450_v58 = vld [vmem:[#allocation9 + $0xd20] sm:$0xff]  ;;  %v2483_v30 = vld [vmem:[#allocation9 + $0xe28] sm:$0xff]  ;;  %v4744_v56 = vpack.c.bf16 %v2276_v22, %v2272_v24  ;;  %v2284_v35 = vld [vmem:[#allocation9 + $0x7f0] sm:$0xff] }
 0x2cc   :  { %v2027_v50 = vmax.f32 %v5773_v44, 0.0  ;;  %4713 = vmatpush1.bf16.msra.mxu1 %v4712_v33  ;;  %v2257_v33 = vld [vmem:[#allocation9 + $0x718] sm:$0xff]  ;;  %v4576_v60 = vpack.c.bf16 %v2450_v58, %v2446_v5  ;;  %v2491_v5 = vld [vmem:[#allocation9 + $0xe68] sm:$0xff]  ;;  %v4748_v58 = vpack.c.bf16 %v2284_v35, %v2280_v31  ;;  %v2514_v31 = vld [vmem:[#allocation9 + $0xf20] sm:$0xff] }
 0x2cd   :  { %4715 = vmatprep.subr.bf16.mxu1 %v4714_v3  ;;  %v2261_v3 = vld [vmem:[#allocation9 + $0x738] sm:$0xff]  ;;  %v2519_v35 = vld [vmem:[#allocation9 + $0xf48] sm:$0xff] }
 0x2ce   :  { %2770 = vmatprep.mubr.f32.mxu0 %v2027_v50  ;;  %v2317_v22 = vld [vmem:[#allocation9 + $0x8f8] sm:$0xff] }
 0x2cf   :  { %2771 = vmatmul.mubr.f32.vlgmr.msra.gmra.mrb[4].mxu0 %v2026_v40 }
 0x2d0   :  { %4717 = vmatpush1.bf16.msra.mxu1 %v4716_v51  ;;  %4561 = vmatpush1.bf16.msra.mxu0 %v4560_v63  ;;  %v4734_v51 = vpack.c.bf16 %v2261_v3, %v2257_v33  ;;  %v2454_v63 = vld [vmem:[#allocation9 + $0xd40] sm:$0xff]  ;;  %v2293_v33 = vld [vmem:[#allocation9 + $0x838] sm:$0xff] }
 0x2d1   :  { %4719 = vmatprep.subr.bf16.mxu1 %v4718_v1  ;;  %4563 = vmatprep.subr.bf16.mxu0 %v4562_v42  ;;  %v2458_v1 = vld [vmem:[#allocation9 + $0xd60] sm:$0xff]  ;;  %v2463_v42 = vld [vmem:[#allocation9 + $0xd88] sm:$0xff]  ;;  %v4750_v43 = vpack.c.bf16 %v2293_v33, %v2289_v57 }
 0x2d2   :  { %v4580_v15 = vpack.c.bf16 %v2458_v1, %v2454_v63  ;;  %v4582_v16 = vpack.c.bf16 %v2467_v46, %v2463_v42  ;;  %v2499_v63 = vld [vmem:[#allocation9 + $0xea8] sm:$0xff]  ;;  %v2296_v42 = vld [vmem:[#allocation9 + $0x850] sm:$0xff] }
 0x2d3   :  { %v2300_v46 = vld [vmem:[#allocation9 + $0x870] sm:$0xff] }
 0x2d4   :  { %4721 = vmatpush1.bf16.msra.mxu1 %v4720_v47  ;;  %4565 = vmatpush1.bf16.msra.mxu0 %v4564_v18  ;;  %v4738_v47 = vpack.c.bf16 %v2269_v2, %v2265_v52  ;;  %v2462_v18 = vld [vmem:[#allocation9 + $0xd80] sm:$0xff] }
 0x2d5   :  { %4723 = vmatprep.subr.bf16.mxu1 %v4722_v4  ;;  %4567 = vmatprep.subr.bf16.mxu0 %v4566_v53  ;;  %v2466_v4 = vld [vmem:[#allocation9 + $0xda0] sm:$0xff]  ;;  %v2471_v53 = vld [vmem:[#allocation9 + $0xdc8] sm:$0xff] }
 0x2d6   :  { %v4584_v54 = vpack.c.bf16 %v2466_v4, %v2462_v18  ;;  %v4586_v25 = vpack.c.bf16 %v2475_v20, %v2471_v53  ;;  %v2490_v52 = vld [vmem:[#allocation9 + $0xe60] sm:$0xff]  ;;  %v2507_v18 = vld [vmem:[#allocation9 + $0xee8] sm:$0xff]  ;;  %v4756_v4 = vpack.c.bf16 %v2300_v46, %v2296_v42  ;;  %v2304_v53 = vld [vmem:[#allocation9 + $0x890] sm:$0xff] }
 0x2d7   :  { %v2308_v20 = vld [vmem:[#allocation9 + $0x8b0] sm:$0xff]  ;;  %v2535_v42 = vld [vmem:[#allocation9 + $0xfc8] sm:$0xff] }
 0x2d8   :  { %4725 = vmatpush1.bf16.msra.mxu1 %v4724_v21  ;;  %4569 = vmatpush1.bf16.msra.mxu0 %v4568_v26  ;;  %v4742_v21 = vpack.c.bf16 %v2277_v41, %v2273_v62  ;;  %v2470_v26 = vld [vmem:[#allocation9 + $0xdc0] sm:$0xff]  ;;  %v2539_v46 = vld [vmem:[#allocation9 + $0xfe8] sm:$0xff] }
 0x2d9   :  { %4727 = vmatprep.subr.bf16.mxu1 %v4726_v55  ;;  %4571 = vmatprep.subr.bf16.mxu0 %v4570_v28  ;;  %v2474_v55 = vld [vmem:[#allocation9 + $0xde0] sm:$0xff]  ;;  %v2479_v28 = vld [vmem:[#allocation9 + $0xe08] sm:$0xff] }
 0x2da   :  { %v4588_v0 = vpack.c.bf16 %v2474_v55, %v2470_v26  ;;  %v4590_v39 = vpack.c.bf16 %v2483_v30, %v2479_v28  ;;  %v2498_v62 = vld [vmem:[#allocation9 + $0xea0] sm:$0xff]  ;;  %v2316_v26 = vld [vmem:[#allocation9 + $0x8f0] sm:$0xff]  ;;  %v2321_v55 = vld [vmem:[#allocation9 + $0x918] sm:$0xff] }
 0x2db   :  { %v2325_v28 = vld [vmem:[#allocation9 + $0x938] sm:$0xff] }
 0x2dc   :  { %4729 = vmatpush1.bf16.msra.mxu1 %v4728_v49  ;;  %4573 = vmatpush1.bf16.msra.mxu0 %v4572_v45  ;;  %v4746_v49 = vpack.c.bf16 %v2285_v38, %v2281_v27  ;;  %v2478_v45 = vld [vmem:[#allocation9 + $0xe00] sm:$0xff]  ;;  %v2515_v27 = vld [vmem:[#allocation9 + $0xf28] sm:$0xff]  ;;  %v4766_v57 = vpack.c.bf16 %v2325_v28, %v2321_v55  ;;  %v2361_v55 = vld [vmem:[#allocation9 + $0xa58] sm:$0xff] }
 0x2dd   :  { %4731 = vmatprep.subr.bf16.mxu1 %v4730_v32  ;;  %4575 = vmatprep.subr.bf16.mxu0 %v4574_v36  ;;  %v2482_v32 = vld [vmem:[#allocation9 + $0xe20] sm:$0xff]  ;;  %v2487_v36 = vld [vmem:[#allocation9 + $0xe48] sm:$0xff] }
 0x2de   :  { %v4592_v3 = vpack.c.bf16 %v2482_v32, %v2478_v45  ;;  %v4594_v59 = vpack.c.bf16 %v2491_v5, %v2487_v36  ;;  %v2324_v45 = vld [vmem:[#allocation9 + $0x930] sm:$0xff]  ;;  %v2329_v32 = vld [vmem:[#allocation9 + $0x958] sm:$0xff] }
 0x2df   :  { %v2333_v36 = vld [vmem:[#allocation9 + $0x978] sm:$0xff] }
 0x2e0   :  { %4733 = vmatpush1.bf16.msra.mxu1 %v4732_v17  ;;  %4577 = vmatpush1.bf16.msra.mxu0 %v4576_v60  ;;  %v2292_v17 = vld [vmem:[#allocation9 + $0x830] sm:$0xff]  ;;  %v2301_v60 = vld [vmem:[#allocation9 + $0x878] sm:$0xff] }
 0x2e1   :  { %4735 = vmatprep.subr.bf16.mxu1 %v4734_v51  ;;  %4579 = vmatprep.subr.bf16.mxu0 %v4578_v61  ;;  %v2486_v51 = vld [vmem:[#allocation9 + $0xe40] sm:$0xff]  ;;  %v2495_v61 = vld [vmem:[#allocation9 + $0xe88] sm:$0xff]  ;;  %v4752_v1 = vpack.c.bf16 %v2292_v17, %v2288_v48  ;;  %v4754_v2 = vpack.c.bf16 %v2301_v60, %v2297_v6  ;;  %v4770_v6 = vpack.c.bf16 %v2333_v36, %v2329_v32  ;;  %v2332_v60 = vld [vmem:[#allocation9 + $0x970] sm:$0xff] }
 0x2e2   :  { %v4596_v13 = vpack.c.bf16 %v2490_v52, %v2486_v51  ;;  %v2531_v48 = vld [vmem:[#allocation9 + $0xfa8] sm:$0xff]  ;;  %v2337_v51 = vld [vmem:[#allocation9 + $0x998] sm:$0xff] }
 0x2e3   :  { %v2377_v32 = vld [vmem:[#allocation9 + $0xad8] sm:$0xff] }
 0x2e4   :  { %4737 = vmatpush1.bf16.msra.mxu1 %v4736_v9  ;;  %4581 = vmatpush1.bf16.msra.mxu0 %v4580_v15  ;;  %v2305_v9 = vld [vmem:[#allocation9 + $0x898] sm:$0xff]  ;;  %v4598_v15 = vpack.c.bf16 %v2499_v63, %v2495_v61 }
 0x2e5   :  { %4739 = vmatprep.subr.bf16.mxu1 %v4738_v47  ;;  %4583 = vmatprep.subr.bf16.mxu0 %v4582_v16  ;;  %v2494_v47 = vld [vmem:[#allocation9 + $0xe80] sm:$0xff]  ;;  %v2503_v16 = vld [vmem:[#allocation9 + $0xec8] sm:$0xff]  ;;  %v4758_v41 = vpack.c.bf16 %v2309_v14, %v2305_v9  ;;  %v2341_v61 = vld [vmem:[#allocation9 + $0x9b8] sm:$0xff] }
 0x2e6   :  { %v4600_v24 = vpack.c.bf16 %v2498_v62, %v2494_v47  ;;  %v2336_v14 = vld [vmem:[#allocation9 + $0x990] sm:$0xff]  ;;  %v2345_v47 = vld [vmem:[#allocation9 + $0x9d8] sm:$0xff] }
 0x2e8   :  { %4741 = vmatpush1.bf16.msra.mxu1 %v4740_v23  ;;  %4585 = vmatpush1.bf16.msra.mxu0 %v4584_v54  ;;  %v2313_v23 = vld [vmem:[#allocation9 + $0x8d8] sm:$0xff]  ;;  %v4602_v54 = vpack.c.bf16 %v2507_v18, %v2503_v16  ;;  %v4618_v18 = vpack.c.bf16 %v2539_v46, %v2535_v42 }
 0x2e9   :  { %4743 = vmatprep.subr.bf16.mxu1 %v4742_v21  ;;  %4587 = vmatprep.subr.bf16.mxu0 %v4586_v25  ;;  %v2502_v21 = vld [vmem:[#allocation9 + $0xec0] sm:$0xff]  ;;  %v4760_v25 = vpack.c.bf16 %v2308_v20, %v2304_v53  ;;  %v4762_v44 = vpack.c.bf16 %v2317_v22, %v2313_v23  ;;  %v2349_v16 = vld [vmem:[#allocation9 + $0x9f8] sm:$0xff]  ;;  %v3137_v53 = vld [vmem:[#allocation12 + $0x8] sm:$0xff] }
 0x2ea   :  { %v4604_v38 = vpack.c.bf16 %v2506_v10, %v2502_v21  ;;  %v3139_v20 = vld [vmem:[#allocation12 + $0x18] sm:$0xff]  ;;  %v2344_v22 = vld [vmem:[#allocation9 + $0x9d0] sm:$0xff] }
 0x2eb   :  { %v2353_v10 = vld [vmem:[#allocation9 + $0xa18] sm:$0xff] }
 0x2ec   :  { %4745 = vmatpush1.bf16.msra.mxu1 %v4744_v56  ;;  %4589 = vmatpush1.bf16.msra.mxu0 %v4588_v0  ;;  %v2510_v56 = vld [vmem:[#allocation9 + $0xf00] sm:$0xff]  ;;  %v2523_v0 = vld [vmem:[#allocation9 + $0xf68] sm:$0xff]  ;;  %v2401_v42 = vld [vmem:[#allocation9 + $0xb98] sm:$0xff] }
 0x2ed   :  { %4747 = vmatprep.subr.bf16.mxu1 %v4746_v49  ;;  %4591 = vmatprep.subr.bf16.mxu0 %v4590_v39  ;;  %v2320_v39 = vld [vmem:[#allocation9 + $0x910] sm:$0xff]  ;;  %v4608_v33 = vpack.c.bf16 %v2514_v31, %v2510_v56  ;;  %v4610_v5 = vpack.c.bf16 %v2523_v0, %v2519_v35  ;;  %v2369_v35 = vld [vmem:[#allocation9 + $0xa98] sm:$0xff] }
 0x2ee   :  { %v4768_v17 = vpack.c.bf16 %v2324_v45, %v2320_v39  ;;  %v2360_v56 = vld [vmem:[#allocation9 + $0xa50] sm:$0xff]  ;;  %v2373_v0 = vld [vmem:[#allocation9 + $0xab8] sm:$0xff] }
 0x2ef   :  { %v2364_v31 = vld [vmem:[#allocation9 + $0xa70] sm:$0xff]  ;;  %v2405_v46 = vld [vmem:[#allocation9 + $0xbb8] sm:$0xff] }
 0x2f0   :  { %4749 = vmatpush1.bf16.msra.mxu1 %v4748_v58  ;;  %4593 = vmatpush1.bf16.msra.mxu0 %v4592_v3  ;;  %v2518_v58 = vld [vmem:[#allocation9 + $0xf40] sm:$0xff]  ;;  %v2368_v39 = vld [vmem:[#allocation9 + $0xa90] sm:$0xff] }
 0x2f1   :  { %4751 = vmatprep.subr.bf16.mxu1 %v4750_v43  ;;  %4595 = vmatprep.subr.bf16.mxu0 %v4594_v59  ;;  %v2522_v3 = vld [vmem:[#allocation9 + $0xf60] sm:$0xff]  ;;  %v2527_v43 = vld [vmem:[#allocation9 + $0xf88] sm:$0xff]  ;;  %v2328_v59 = vld [vmem:[#allocation9 + $0x950] sm:$0xff] }
 0x2f2   :  { %v4612_v52 = vpack.c.bf16 %v2522_v3, %v2518_v58  ;;  %v4614_v63 = vpack.c.bf16 %v2531_v48, %v2527_v43  ;;  %v4772_v9 = vpack.c.bf16 %v2332_v60, %v2328_v59  ;;  %v2372_v45 = vld [vmem:[#allocation9 + $0xab0] sm:$0xff]  ;;  %v2385_v43 = vld [vmem:[#allocation9 + $0xb18] sm:$0xff] }
 0x2f3   :  { %2984 = vmatmul.mubr.f32.vlgmr.msra.gmra.mrb[6].mxu1 %v2024_v19  ;;  %v2511_v19 = vld [vmem:[#allocation9 + $0xf08] sm:$0xff]  ;;  %v4792_v36 = vpack.c.bf16 %v2372_v45, %v2368_v39  ;;  %v2376_v58 = vld [vmem:[#allocation9 + $0xad0] sm:$0xff]  ;;  %v2389_v48 = vld [vmem:[#allocation9 + $0xb38] sm:$0xff] }
 0x2f4   :  { %4753 = vmatpush1.bf16.msra.mxu1 %v4752_v1  ;;  %3054 = vmatprep.mubr.f32.mxu1 %v2027_v50  ;;  %v2312_v50 = vld [vmem:[#allocation9 + $0x8d0] sm:$0xff]  ;;  %v4606_v30 = vpack.c.bf16 %v2515_v27, %v2511_v19  ;;  %v2526_v1 = vld [vmem:[#allocation9 + $0xf80] sm:$0xff]  ;;  %v2357_v19 = vld [vmem:[#allocation9 + $0xa38] sm:$0xff]  ;;  %v4878_v27 = vpack.c.bf16 %v3139_v20, %v3137_v53 }
 0x2f5   :  { %4755 = vmatprep.subr.bf16.mxu1 %v4754_v2  ;;  %4597 = vmatpush1.bf16.msra.mxu0 %v4596_v13  ;;  %v4764_v49 = vpack.c.bf16 %v2316_v26, %v2312_v50  ;;  %v2530_v2 = vld [vmem:[#allocation9 + $0xfa0] sm:$0xff]  ;;  %v4774_v13 = vpack.c.bf16 %v2341_v61, %v2337_v51  ;;  %v2352_v50 = vld [vmem:[#allocation9 + $0xa10] sm:$0xff]  ;;  %v2393_v51 = vld [vmem:[#allocation9 + $0xb58] sm:$0xff] }
 0x2f6   :  { %4599 = vmatprep.subr.bf16.mxu0 %v4598_v15  ;;  %v2340_v15 = vld [vmem:[#allocation9 + $0x9b0] sm:$0xff]  ;;  %v4616_v62 = vpack.c.bf16 %v2530_v2, %v2526_v1  ;;  %v2417_v53 = vld [vmem:[#allocation9 + $0xc18] sm:$0xff] }
 0x2f7   :  { %v4776_v23 = vpack.c.bf16 %v2340_v15, %v2336_v14  ;;  %v2356_v26 = vld [vmem:[#allocation9 + $0xa30] sm:$0xff]  ;;  %v2421_v20 = vld [vmem:[#allocation9 + $0xc38] sm:$0xff] }
 0x2f8   :  { %4757 = vmatpush1.bf16.msra.mxu1 %v4756_v4  ;;  %v2534_v4 = vld [vmem:[#allocation9 + $0xfc0] sm:$0xff]  ;;  %v4784_v28 = vpack.c.bf16 %v2356_v26, %v2352_v50  ;;  %v2380_v3 = vld [vmem:[#allocation9 + $0xaf0] sm:$0xff]  ;;  %v2433_v50 = vld [vmem:[#allocation9 + $0xc98] sm:$0xff] }
 0x2f9   :  { %4759 = vmatprep.subr.bf16.mxu1 %v4758_v41  ;;  %4601 = vmatpush1.bf16.msra.mxu0 %v4600_v24  ;;  %v2538_v41 = vld [vmem:[#allocation9 + $0xfe0] sm:$0xff]  ;;  %v4778_v24 = vpack.c.bf16 %v2349_v16, %v2345_v47  ;;  %v2384_v59 = vld [vmem:[#allocation9 + $0xb10] sm:$0xff]  ;;  %v2409_v47 = vld [vmem:[#allocation9 + $0xbd8] sm:$0xff] }
 0x2fa   :  { %4603 = vmatprep.subr.bf16.mxu0 %v4602_v54  ;;  %v2348_v54 = vld [vmem:[#allocation9 + $0x9f0] sm:$0xff]  ;;  %v4620_v21 = vpack.c.bf16 %v2538_v41, %v2534_v4  ;;  %v2437_v26 = vld [vmem:[#allocation9 + $0xcb8] sm:$0xff] }
 0x2fb   :  { %v2388_v60 = vld [vmem:[#allocation9 + $0xb30] sm:$0xff]  ;;  %v2449_v39 = vld [vmem:[#allocation9 + $0xd18] sm:$0xff] }
 0x2fc   :  { %4761 = vmatpush1.bf16.msra.mxu1 %v4760_v25  ;;  %v4780_v25 = vpack.c.bf16 %v2348_v54, %v2344_v22  ;;  %v4800_v61 = vpack.c.bf16 %v2388_v60, %v2384_v59  ;;  %v2392_v1 = vld [vmem:[#allocation9 + $0xb50] sm:$0xff]  ;;  %v2453_v45 = vld [vmem:[#allocation9 + $0xd38] sm:$0xff] }
 0x2fd   :  { %4763 = vmatprep.subr.bf16.mxu1 %v4762_v44  ;;  %4605 = vmatpush1.bf16.msra.mxu0 %v4604_v38  ;;  %v4782_v44 = vpack.c.bf16 %v2357_v19, %v2353_v10  ;;  %v2365_v38 = vld [vmem:[#allocation9 + $0xa78] sm:$0xff]  ;;  %v2396_v2 = vld [vmem:[#allocation9 + $0xb70] sm:$0xff]  ;;  %v4830_v37 = vpack.c.bf16 %v2453_v45, %v2449_v39 }
 0x2fe   :  { %4607 = vmatprep.subr.bf16.mxu0 %v4606_v30  ;;  %v4786_v30 = vpack.c.bf16 %v2365_v38, %v2361_v55  ;;  %v2400_v14 = vld [vmem:[#allocation9 + $0xb90] sm:$0xff]  ;;  %v2429_v10 = vld [vmem:[#allocation9 + $0xc78] sm:$0xff]  ;;  %v4822_v38 = vpack.c.bf16 %v2437_v26, %v2433_v50 }
 0x2ff   :  { %v2404_v15 = vld [vmem:[#allocation9 + $0xbb0] sm:$0xff]  ;;  %v2465_v59 = vld [vmem:[#allocation9 + $0xd98] sm:$0xff] }
 0x300   :  { %4765 = vmatpush1.bf16.msra.mxu1 %v4764_v49  ;;  %v4788_v49 = vpack.c.bf16 %v2364_v31, %v2360_v56  ;;  %v4808_v16 = vpack.c.bf16 %v2404_v15, %v2400_v14  ;;  %v2408_v4 = vld [vmem:[#allocation9 + $0xbd0] sm:$0xff]  ;;  %v2441_v56 = vld [vmem:[#allocation9 + $0xcd8] sm:$0xff]  ;;  %v3136_v15 = vld [vmem:[#allocation12] sm:$0xff] }
 0x301   :  { %4767 = vmatprep.subr.bf16.mxu1 %v4766_v57  ;;  %4609 = vmatpush1.bf16.msra.mxu0 %v4608_v33  ;;  %v4790_v57 = vpack.c.bf16 %v2373_v0, %v2369_v35  ;;  %v2381_v33 = vld [vmem:[#allocation9 + $0xaf8] sm:$0xff]  ;;  %v2412_v41 = vld [vmem:[#allocation9 + $0xbf0] sm:$0xff] }
 0x302   :  { %4611 = vmatprep.subr.bf16.mxu0 %v4610_v5  ;;  %v4794_v5 = vpack.c.bf16 %v2381_v33, %v2377_v32  ;;  %v2416_v22 = vld [vmem:[#allocation9 + $0xc10] sm:$0xff]  ;;  %v2445_v31 = vld [vmem:[#allocation9 + $0xcf8] sm:$0xff] }
 0x303   :  { %v2420_v54 = vld [vmem:[#allocation9 + $0xc30] sm:$0xff]  ;;  %v4826_v0 = vpack.c.bf16 %v2445_v31, %v2441_v56  ;;  %v2469_v60 = vld [vmem:[#allocation9 + $0xdb8] sm:$0xff]  ;;  %v3144_v31 = vld [vmem:[#allocation12 + $0x40] sm:$0xff] }
 0x304   :  { %4769 = vmatpush1.bf16.msra.mxu1 %v4768_v17  ;;  %v4796_v17 = vpack.c.bf16 %v2380_v3, %v2376_v58  ;;  %v4816_v19 = vpack.c.bf16 %v2420_v54, %v2416_v22  ;;  %v2452_v33 = vld [vmem:[#allocation9 + $0xd30] sm:$0xff]  ;;  %v1123_v58 = vsub.s32 6, %v5524_v11  ;;  %v2477_v14 = vld [vmem:[#allocation9 + $0xdf8] sm:$0xff] }
 0x305   :  { %4771 = vmatprep.subr.bf16.mxu1 %v4770_v6  ;;  %4613 = vmatpush1.bf16.msra.mxu0 %v4612_v52  ;;  %v4798_v6 = vpack.c.bf16 %v2389_v48, %v2385_v43  ;;  %v2397_v52 = vld [vmem:[#allocation9 + $0xb78] sm:$0xff]  ;;  %v1127_v43 = vsub.s32 7, %v5524_v11  ;;  %v2480_v26 = vld [vmem:[#allocation9 + $0xe10] sm:$0xff]  ;;  %v3433_v11 = vld [vmem:[%s5930_s7 + $0x68] sm:$0xff] }
 0x306   :  { %4615 = vmatprep.subr.bf16.mxu0 %v4614_v63  ;;  %v4802_v63 = vpack.c.bf16 %v2397_v52, %v2393_v51  ;;  %v1124_v51 = vrot.slane %v5767_v29, %v1123_v58  ;;  %v2488_v45 = vld [vmem:[#allocation9 + $0xe50] sm:$0xff] }
 0x307   :  { %v1128_v52 = vrot.slane %v5767_v29, %v1127_v43  ;;  %v2472_v29 = vld [vmem:[#allocation9 + $0xdd0] sm:$0xff] }
 0x308   :  { %4773 = vmatpush1.bf16.msra.mxu1 %v4772_v9  ;;  %v4804_v9 = vpack.c.bf16 %v2396_v2, %v2392_v1  ;;  %v2464_v1 = vld [vmem:[#allocation9 + $0xd90] sm:$0xff] }
 0x309   :  { %4775 = vmatprep.subr.bf16.mxu1 %v4774_v13  ;;  %4617 = vmatpush1.bf16.msra.mxu0 %v4616_v62  ;;  %v4806_v13 = vpack.c.bf16 %v2405_v46, %v2401_v42  ;;  %v2413_v62 = vld [vmem:[#allocation9 + $0xbf8] sm:$0xff]  ;;  %v2468_v2 = vld [vmem:[#allocation9 + $0xdb0] sm:$0xff] }
 0x30a   :  { %4619 = vmatprep.subr.bf16.mxu0 %v4618_v18  ;;  %v4810_v18 = vpack.c.bf16 %v2413_v62, %v2409_v47  ;;  %v2473_v46 = vld [vmem:[#allocation9 + $0xdd8] sm:$0xff]  ;;  %v3153_v43 = vld [vmem:[#allocation12 + $0x88] sm:$0xff] }
 0x30b   :  { %v3138_v47 = vld [vmem:[#allocation12 + $0x10] sm:$0xff] }
 0x30c   :  { %4777 = vmatpush1.bf16.msra.mxu1 %v4776_v23  ;;  %v4812_v23 = vpack.c.bf16 %v2412_v41, %v2408_v4  ;;  %v3143_v4 = vld [vmem:[#allocation12 + $0x38] sm:$0xff]  ;;  %v2476_v41 = vld [vmem:[#allocation9 + $0xdf0] sm:$0xff]  ;;  %v4880_v22 = vpack.c.bf16 %v3138_v47, %v3136_v15 }
 0x30d   :  { %4779 = vmatprep.subr.bf16.mxu1 %v4778_v24  ;;  %4621 = vmatpush1.bf16.msra.mxu0 %v4620_v21  ;;  %v4814_v24 = vpack.c.bf16 %v2421_v20, %v2417_v53  ;;  %v2425_v21 = vld [vmem:[#allocation9 + $0xc58] sm:$0xff]  ;;  %v4842_v20 = vpack.c.bf16 %v2477_v14, %v2473_v46  ;;  %v2504_v14 = vld [vmem:[#allocation9 + $0xed0] sm:$0xff] }
 0x30e   :  { %4879 = vmatprep.subr.bf16.mxu0 %v4878_v27  ;;  %v4818_v27 = vpack.c.bf16 %v2429_v10, %v2425_v21  ;;  %v3140_v10 = vld [vmem:[#allocation12 + $0x20] sm:$0xff]  ;;  %v3150_v58 = vld [vmem:[#allocation12 + $0x70] sm:$0xff]  ;;  %v3159_v46 = vld [vmem:[#allocation12 + $0xb8] sm:$0xff] }
 0x30f   :  { %v2508_v15 = vld [vmem:[#allocation9 + $0xef0] sm:$0xff]  ;;  %v2513_v47 = vld [vmem:[#allocation9 + $0xf18] sm:$0xff] }
 0x310   :  { %4781 = vmatpush1.bf16.msra.mxu1 %v4780_v25  ;;  %v2424_v25 = vld [vmem:[#allocation9 + $0xc50] sm:$0xff] }
 0x311   :  { %4783 = vmatprep.subr.bf16.mxu1 %v4782_v44  ;;  %v2428_v44 = vld [vmem:[#allocation9 + $0xc70] sm:$0xff] }
 0x312   :  { %v4820_v55 = vpack.c.bf16 %v2428_v44, %v2424_v25  ;;  %v3145_v25 = vld [vmem:[#allocation12 + $0x48] sm:$0xff]  ;;  %v3147_v44 = vld [vmem:[#allocation12 + $0x58] sm:$0xff] }
 0x313   :  { %v4886_v56 = vpack.c.bf16 %v3147_v44, %v3145_v25  ;;  %v3160_v25 = vld [vmem:[#allocation12 + $0xc0] sm:$0xff]  ;;  %v3162_v44 = vld [vmem:[#allocation12 + $0xd0] sm:$0xff] }
 0x314   :  { %4785 = vmatpush1.bf16.msra.mxu1 %v4784_v28  ;;  %v2432_v28 = vld [vmem:[#allocation9 + $0xc90] sm:$0xff] }
 0x315   :  { %4787 = vmatprep.subr.bf16.mxu1 %v4786_v30  ;;  %v2436_v30 = vld [vmem:[#allocation9 + $0xcb0] sm:$0xff] }
 0x316   :  { %v4824_v35 = vpack.c.bf16 %v2436_v30, %v2432_v28  ;;  %v2493_v28 = vld [vmem:[#allocation9 + $0xe78] sm:$0xff] }
 0x318   :  { %4789 = vmatpush1.bf16.msra.mxu1 %v4788_v49  ;;  %v2440_v49 = vld [vmem:[#allocation9 + $0xcd0] sm:$0xff] }
 0x319   :  { %4791 = vmatprep.subr.bf16.mxu1 %v4790_v57  ;;  %v2444_v57 = vld [vmem:[#allocation9 + $0xcf0] sm:$0xff] }
 0x31a   :  { %v4828_v32 = vpack.c.bf16 %v2444_v57, %v2440_v49  ;;  %v3149_v49 = vld [vmem:[#allocation12 + $0x68] sm:$0xff]  ;;  %v3151_v57 = vld [vmem:[#allocation12 + $0x78] sm:$0xff] }
 0x31c   :  { %4793 = vmatpush1.bf16.msra.mxu1 %v4792_v36  ;;  %v2457_v36 = vld [vmem:[#allocation9 + $0xd58] sm:$0xff] }
 0x31d   :  { %4795 = vmatprep.subr.bf16.mxu1 %v4794_v5  ;;  %v2461_v5 = vld [vmem:[#allocation9 + $0xd78] sm:$0xff] }
 0x31e   :  { %v4834_v48 = vpack.c.bf16 %v2461_v5, %v2457_v36  ;;  %v4890_v36 = vpack.c.bf16 %v3151_v57, %v3149_v49  ;;  %v3148_v5 = vld [vmem:[#allocation12 + $0x60] sm:$0xff]  ;;  %v3166_v57 = vld [vmem:[#allocation12 + $0xf0] sm:$0xff] }
 0x31f   :  { %v3164_v49 = vld [vmem:[#allocation12 + $0xe0] sm:$0xff] }
 0x320   :  { %4797 = vmatpush1.bf16.msra.mxu1 %v4796_v17  ;;  %v2456_v17 = vld [vmem:[#allocation9 + $0xd50] sm:$0xff] }
 0x321   :  { %4799 = vmatprep.subr.bf16.mxu1 %v4798_v6  ;;  %v2460_v6 = vld [vmem:[#allocation9 + $0xd70] sm:$0xff] }
 0x324   :  { %4801 = vmatpush1.bf16.msra.mxu1 %v4800_v61  ;;  %v4836_v61 = vpack.c.bf16 %v2460_v6, %v2456_v17  ;;  %v2496_v6 = vld [vmem:[#allocation9 + $0xe90] sm:$0xff] }
 0x325   :  { %4803 = vmatprep.subr.bf16.mxu1 %v4802_v63  ;;  %v4838_v63 = vpack.c.bf16 %v2469_v60, %v2465_v59  ;;  %v2500_v59 = vld [vmem:[#allocation9 + $0xeb0] sm:$0xff]  ;;  %v2505_v60 = vld [vmem:[#allocation9 + $0xed8] sm:$0xff] }
 0x328   :  { %4805 = vmatpush1.bf16.msra.mxu1 %v4804_v9 }
 0x329   :  { %4807 = vmatprep.subr.bf16.mxu1 %v4806_v13 }
 0x32c   :  { %4809 = vmatpush1.bf16.msra.mxu1 %v4808_v16  ;;  %v4840_v16 = vpack.c.bf16 %v2468_v2, %v2464_v1  ;;  %v3154_v1 = vld [vmem:[#allocation12 + $0x90] sm:$0xff]  ;;  %v4856_v2 = vpack.c.bf16 %v2500_v59, %v2496_v6  ;;  %v3173_v6 = vld [vmem:[#allocation12 + $0x128] sm:$0xff]  ;;  %v3175_v59 = vld [vmem:[#allocation12 + $0x138] sm:$0xff] }
 0x32d   :  { %4811 = vmatprep.subr.bf16.mxu1 %v4810_v18  ;;  %v3141_v18 = vld [vmem:[#allocation12 + $0x28] sm:$0xff] }
 0x32e   :  { %v4882_v21 = vpack.c.bf16 %v3143_v4, %v3141_v18  ;;  %v3156_v4 = vld [vmem:[#allocation12 + $0xa0] sm:$0xff] }
 0x330   :  { %4813 = vmatpush1.bf16.msra.mxu1 %v4812_v23  ;;  %v2481_v23 = vld [vmem:[#allocation9 + $0xe18] sm:$0xff] }
 0x331   :  { %4815 = vmatprep.subr.bf16.mxu1 %v4814_v24  ;;  %v2485_v24 = vld [vmem:[#allocation9 + $0xe38] sm:$0xff] }
 0x332   :  { %v4846_v50 = vpack.c.bf16 %v2485_v24, %v2481_v23  ;;  %v2512_v24 = vld [vmem:[#allocation9 + $0xf10] sm:$0xff] }
 0x333   :  { %3055 = vmatmul.mubr.f32.vlgmr.msra.gmra.mrb[6].mxu1 %v2026_v40  ;;  %v2448_v40 = vld [vmem:[#allocation9 + $0xd10] sm:$0xff] }
 0x334   :  { %4817 = vmatpush1.bf16.msra.mxu1 %v4816_v19  ;;  %v4832_v3 = vpack.c.bf16 %v2452_v33, %v2448_v40  ;;  %v3142_v19 = vld [vmem:[#allocation12 + $0x30] sm:$0xff] }
 0x335   :  { %4819 = vmatprep.subr.bf16.mxu1 %v4818_v27  ;;  %v4844_v27 = vpack.c.bf16 %v2476_v41, %v2472_v29  ;;  %v4884_v30 = vpack.c.bf16 %v3142_v19, %v3140_v10  ;;  %v2501_v40 = vld [vmem:[#allocation9 + $0xeb8] sm:$0xff]  ;;  %v4860_v41 = vpack.c.bf16 %v2508_v15, %v2504_v14 }
 0x336   :  { %v3158_v29 = vld [vmem:[#allocation12 + $0xb0] sm:$0xff] }
 0x337   :  { %v2525_v10 = vld [vmem:[#allocation9 + $0xf78] sm:$0xff]  ;;  %v4900_v19 = vpack.c.bf16 %v3158_v29, %v3156_v4 }
 0x338   :  { %4821 = vmatpush1.bf16.msra.mxu1 %v4820_v55  ;;  %v2484_v55 = vld [vmem:[#allocation9 + $0xe30] sm:$0xff] }
 0x339   :  { %4823 = vmatprep.subr.bf16.mxu1 %v4822_v38  ;;  %v2489_v38 = vld [vmem:[#allocation9 + $0xe58] sm:$0xff] }
 0x33a   :  { %v4850_v39 = vpack.c.bf16 %v2493_v28, %v2489_v38  ;;  %v2520_v28 = vld [vmem:[#allocation9 + $0xf50] sm:$0xff] }
 0x33c   :  { %4825 = vmatpush1.bf16.msra.mxu1 %v4824_v35  ;;  %v3146_v35 = vld [vmem:[#allocation12 + $0x50] sm:$0xff] }
 0x33d   :  { %4827 = vmatprep.subr.bf16.mxu1 %v4826_v0  ;;  %v4848_v0 = vpack.c.bf16 %v2484_v55, %v2480_v26  ;;  %v4888_v33 = vpack.c.bf16 %v3146_v35, %v3144_v31  ;;  %v3165_v26 = vld [vmem:[#allocation12 + $0xe8] sm:$0xff]  ;;  %v3167_v55 = vld [vmem:[#allocation12 + $0xf8] sm:$0xff]  ;;  %v4904_v35 = vpack.c.bf16 %v3162_v44, %v3160_v25 }
 0x33e   :  { %v2533_v31 = vld [vmem:[#allocation9 + $0xfb8] sm:$0xff] }
 0x340   :  { %4829 = vmatpush1.bf16.msra.mxu1 %v4828_v32  ;;  %v2492_v32 = vld [vmem:[#allocation9 + $0xe70] sm:$0xff] }
 0x341   :  { %4831 = vmatprep.subr.bf16.mxu1 %v4830_v37  ;;  %v2497_v37 = vld [vmem:[#allocation9 + $0xe98] sm:$0xff] }
 0x342   :  { %v4854_v17 = vpack.c.bf16 %v2501_v40, %v2497_v37  ;;  %v2528_v40 = vld [vmem:[#allocation9 + $0xf90] sm:$0xff] }
 0x344   :  { %4833 = vmatpush1.bf16.msra.mxu1 %v4832_v3  ;;  %v4852_v3 = vpack.c.bf16 %v2492_v32, %v2488_v45  ;;  %v3169_v45 = vld [vmem:[#allocation12 + $0x108] sm:$0xff]  ;;  %v3171_v32 = vld [vmem:[#allocation12 + $0x118] sm:$0xff] }
 0x345   :  { %4835 = vmatprep.subr.bf16.mxu1 %v4834_v48  ;;  %v3155_v48 = vld [vmem:[#allocation12 + $0x98] sm:$0xff] }
 0x346   :  { %v2017_v42 = vpop.f32.mrb[4].mxu1 }
 0x347   :  { %v5791_v9 = vadd.f32 %v2017_v42, %v1124_v51  ;;  %v2019_v13 = vpop.f32.mrb[5].mxu1  ;;  %v2509_v51 = vld [vmem:[#allocation9 + $0xef8] sm:$0xff]  ;;  %v3157_v42 = vld [vmem:[#allocation12 + $0xa8] sm:$0xff] }
 0x348   :  { %v5047_v62 = vadd.f32 %v2019_v13, %v1128_v52  ;;  %4837 = vmatpush1.bf16.msra.mxu1 %v4836_v61  ;;  %v4892_v52 = vpack.c.bf16 %v3150_v58, %v3148_v5  ;;  %v4894_v61 = vpack.c.bf16 %v3155_v48, %v3153_v43  ;;  %v4858_v13 = vpack.c.bf16 %v2509_v51, %v2505_v60  ;;  %v2541_v5 = vld [vmem:[#allocation9 + $0xff8] sm:$0xff]  ;;  %v3168_v43 = vld [vmem:[#allocation12 + $0x100] sm:$0xff]  ;;  %v2536_v51 = vld [vmem:[#allocation9 + $0xfd0] sm:$0xff] }
 0x349   :  { %4839 = vmatprep.subr.bf16.mxu1 %v4838_v63  ;;  %v2028_v54 = vmax.f32 %v5791_v9, 0.0  ;;  %v3152_v63 = vld [vmem:[#allocation12 + $0x80] sm:$0xff]  ;;  %v4898_v18 = vpack.c.bf16 %v3159_v46, %v3157_v42  ;;  %v4908_v58 = vpack.c.bf16 %v3166_v57, %v3164_v49  ;;  %v3170_v48 = vld [vmem:[#allocation12 + $0x110] sm:$0xff]  ;;  %v3177_v46 = vld [vmem:[#allocation12 + $0x148] sm:$0xff] }
 0x34a   :  { %v2029_v53 = vmax.f32 %v5047_v62, 0.0  ;;  %v2517_v62 = vld [vmem:[#allocation9 + $0xf38] sm:$0xff]  ;;  %v3188_v9 = vld [vmem:[#allocation12 + $0x1a0] sm:$0xff] }
 0x34b   :  { %v4862_v23 = vpack.c.bf16 %v2517_v62, %v2513_v47  ;;  %v3176_v47 = vld [vmem:[#allocation12 + $0x140] sm:$0xff]  ;;  %v3178_v62 = vld [vmem:[#allocation12 + $0x150] sm:$0xff] }
 0x34c   :  { %2841 = vmatprep.mubr.f32.mxu0 %v2029_v53  ;;  %4841 = vmatpush1.bf16.msra.mxu1 %v4840_v16  ;;  %v4896_v16 = vpack.c.bf16 %v3154_v1, %v3152_v63  ;;  %v4914_v63 = vpack.c.bf16 %v3175_v59, %v3173_v6  ;;  %v3172_v1 = vld [vmem:[#allocation12 + $0x120] sm:$0xff]  ;;  %v4920_v4 = vpack.c.bf16 %v3178_v62, %v3176_v47  ;;  %v3198_v57 = vld [vmem:[#allocation12 + $0x1f0] sm:$0xff]  ;;  %v3422_v6 = vld [vmem:[%s5930_s7 + $0x10] sm:$0xff] }
 0x34d   :  { %3125 = vmatprep.mubr.f32.mxu1 %v2029_v53  ;;  %2842 = vmatmul.mubr.f32.vlgmr.msra.gmra.mrb[4].mxu0 %v2028_v54  ;;  %v3161_v53 = vld [vmem:[#allocation12 + $0xc8] sm:$0xff]  ;;  %v3196_v49 = vld [vmem:[#allocation12 + $0x1e0] sm:$0xff]  ;;  %v3423_v59 = vld [vmem:[%s5930_s7 + $0x18] sm:$0xff] }
 0x34e   :  { %4843 = vmatprep.subr.bf16.mxu1 %v4842_v20  ;;  %4881 = vmatpush1.bf16.msra.mxu0 %v4880_v22  ;;  %v3163_v20 = vld [vmem:[#allocation12 + $0xd8] sm:$0xff]  ;;  %v2516_v22 = vld [vmem:[#allocation9 + $0xf30] sm:$0xff]  ;;  %v3445_v62 = vld [vmem:[%s5930_s7 + $0xc8] sm:$0xff] }
 0x34f   :  { %4883 = vmatprep.subr.bf16.mxu0 %v4882_v21  ;;  %v2521_v21 = vld [vmem:[#allocation9 + $0xf58] sm:$0xff] }
 0x350   :  { %4845 = vmatpush1.bf16.msra.mxu1 %v4844_v27  ;;  %v4902_v27 = vpack.c.bf16 %v3163_v20, %v3161_v53  ;;  %v4866_v38 = vpack.c.bf16 %v2525_v10, %v2521_v21  ;;  %v3182_v53 = vld [vmem:[#allocation12 + $0x170] sm:$0xff]  ;;  %v3185_v20 = vld [vmem:[#allocation12 + $0x188] sm:$0xff]  ;;  %v3184_v21 = vld [vmem:[#allocation12 + $0x180] sm:$0xff] }
 0x351   :  { %4847 = vmatprep.subr.bf16.mxu1 %v4846_v50  ;;  %v4864_v50 = vpack.c.bf16 %v2516_v22, %v2512_v24  ;;  %v3186_v10 = vld [vmem:[#allocation12 + $0x190] sm:$0xff]  ;;  %v3444_v47 = vld [vmem:[%s5930_s7 + $0xc0] sm:$0xff] }
 0x352   :  { %4885 = vmatpush1.bf16.msra.mxu0 %v4884_v30  ;;  %v2524_v30 = vld [vmem:[#allocation9 + $0xf70] sm:$0xff]  ;;  %v4928_v25 = vpack.c.bf16 %v3186_v10, %v3184_v21  ;;  %v3448_v21 = vld [vmem:[%s5930_s7 + $0xe0] sm:$0xff]  ;;  %v3449_v10 = vld [vmem:[%s5930_s7 + $0xe8] sm:$0xff] }
 0x353   :  { %4887 = vmatprep.subr.bf16.mxu0 %v4886_v56  ;;  %v2529_v56 = vld [vmem:[#allocation9 + $0xf98] sm:$0xff] }
 0x354   :  { %4849 = vmatpush1.bf16.msra.mxu1 %v4848_v0  ;;  %v4906_v0 = vpack.c.bf16 %v3167_v55, %v3165_v26  ;;  %v4870_v37 = vpack.c.bf16 %v2533_v31, %v2529_v56  ;;  %v3195_v26 = vld [vmem:[#allocation12 + $0x1d8] sm:$0xff]  ;;  %v3197_v31 = vld [vmem:[#allocation12 + $0x1e8] sm:$0xff] }
 0x355   :  { %4851 = vmatprep.subr.bf16.mxu1 %v4850_v39  ;;  %v4868_v39 = vpack.c.bf16 %v2524_v30, %v2520_v28  ;;  %v3192_v28 = vld [vmem:[#allocation12 + $0x1c0] sm:$0xff]  ;;  %v3194_v30 = vld [vmem:[#allocation12 + $0x1d0] sm:$0xff] }
 0x356   :  { %4889 = vmatpush1.bf16.msra.mxu0 %v4888_v33  ;;  %v2532_v33 = vld [vmem:[#allocation9 + $0xfb0] sm:$0xff]  ;;  %v4936_v56 = vpack.c.bf16 %v3194_v30, %v3192_v28 }
 0x357   :  { %4891 = vmatprep.subr.bf16.mxu0 %v4890_v36  ;;  %v2537_v36 = vld [vmem:[#allocation9 + $0xfd8] sm:$0xff]  ;;  %v3205_v30 = vld [vmem:[#allocation12 + $0x228] sm:$0xff] }
 0x358   :  { %4853 = vmatpush1.bf16.msra.mxu1 %v4852_v3  ;;  %v4910_v3 = vpack.c.bf16 %v3171_v32, %v3169_v45  ;;  %v4874_v60 = vpack.c.bf16 %v2541_v5, %v2537_v36  ;;  %v3201_v45 = vld [vmem:[#allocation12 + $0x208] sm:$0xff]  ;;  %v3203_v32 = vld [vmem:[#allocation12 + $0x218] sm:$0xff] }
 0x359   :  { %4855 = vmatprep.subr.bf16.mxu1 %v4854_v17  ;;  %v4872_v17 = vpack.c.bf16 %v2532_v33, %v2528_v40  ;;  %v3436_v40 = vld [vmem:[%s5930_s7 + $0x80] sm:$0xff]  ;;  %v3437_v33 = vld [vmem:[%s5930_s7 + $0x88] sm:$0xff] }
 0x35a   :  { %4893 = vmatpush1.bf16.msra.mxu0 %v4892_v52  ;;  %v2540_v52 = vld [vmem:[#allocation9 + $0xff0] sm:$0xff]  ;;  %v3420_v36 = vld [vmem:[%s5930_s7] sm:$0xff]  ;;  %v5006_v5 = vpack.c.bf16 %v3437_v33, %v3436_v40  ;;  %v3208_v33 = vld [vmem:[#allocation12 + $0x240] sm:$0xff] }
 0x35b   :  { %4895 = vmatprep.subr.bf16.mxu0 %v4894_v61  ;;  %v4912_v61 = vpack.c.bf16 %v3170_v48, %v3168_v43  ;;  %v4876_v42 = vpack.c.bf16 %v2540_v52, %v2536_v51  ;;  %v3439_v43 = vld [vmem:[%s5930_s7 + $0x98] sm:$0xff]  ;;  %v3441_v51 = vld [vmem:[%s5930_s7 + $0xa8] sm:$0xff]  ;;  %v5012_v52 = vpack.c.bf16 %v3423_v59, %v3422_v6  ;;  %v3217_v6 = vld [vmem:[#allocation12 + $0x288] sm:$0xff] }
 0x35c   :  { %4857 = vmatpush1.bf16.msra.mxu1 %v4856_v2  ;;  %v3174_v2 = vld [vmem:[#allocation12 + $0x130] sm:$0xff]  ;;  %v3219_v59 = vld [vmem:[#allocation12 + $0x298] sm:$0xff] }
 0x35d   :  { %4859 = vmatprep.subr.bf16.mxu1 %v4858_v13  ;;  %v3179_v13 = vld [vmem:[#allocation12 + $0x158] sm:$0xff]  ;;  %v4916_v14 = vpack.c.bf16 %v3174_v2, %v3172_v1  ;;  %v3425_v1 = vld [vmem:[%s5930_s7 + $0x28] sm:$0xff]  ;;  %v3442_v2 = vld [vmem:[%s5930_s7 + $0xb0] sm:$0xff] }
 0x35e   :  { %4897 = vmatpush1.bf16.msra.mxu0 %v4896_v16  ;;  %v4918_v15 = vpack.c.bf16 %v3179_v13, %v3177_v46  ;;  %v3181_v16 = vld [vmem:[#allocation12 + $0x168] sm:$0xff] }
 0x35f   :  { %4899 = vmatprep.subr.bf16.mxu0 %v4898_v18  ;;  %v3183_v18 = vld [vmem:[#allocation12 + $0x178] sm:$0xff] }
 0x360   :  { %4861 = vmatpush1.bf16.msra.mxu1 %v4860_v41  ;;  %v4922_v29 = vpack.c.bf16 %v3183_v18, %v3181_v16  ;;  %v3180_v41 = vld [vmem:[#allocation12 + $0x160] sm:$0xff]  ;;  %v5022_v18 = vpack.c.bf16 %v3445_v62, %v3444_v47 }
 0x361   :  { %4863 = vmatprep.subr.bf16.mxu1 %v4862_v23  ;;  %v3187_v23 = vld [vmem:[#allocation12 + $0x198] sm:$0xff]  ;;  %v4924_v24 = vpack.c.bf16 %v3182_v53, %v3180_v41  ;;  %v3446_v41 = vld [vmem:[%s5930_s7 + $0xd0] sm:$0xff]  ;;  %v3447_v53 = vld [vmem:[%s5930_s7 + $0xd8] sm:$0xff] }
 0x362   :  { %4901 = vmatpush1.bf16.msra.mxu0 %v4900_v19  ;;  %v4926_v22 = vpack.c.bf16 %v3187_v23, %v3185_v20  ;;  %v3189_v19 = vld [vmem:[#allocation12 + $0x1a8] sm:$0xff]  ;;  %v5026_v23 = vpack.c.bf16 %v3447_v53, %v3446_v41 }
 0x363   :  { %4903 = vmatprep.subr.bf16.mxu0 %v4902_v27  ;;  %v3191_v27 = vld [vmem:[#allocation12 + $0x1b8] sm:$0xff] }
 0x364   :  { %4865 = vmatpush1.bf16.msra.mxu1 %v4864_v50  ;;  %v4930_v44 = vpack.c.bf16 %v3191_v27, %v3189_v19  ;;  %v3193_v50 = vld [vmem:[#allocation12 + $0x1c8] sm:$0xff]  ;;  %v5030_v27 = vpack.c.bf16 %v3449_v10, %v3448_v21 }
 0x365   :  { %4867 = vmatprep.subr.bf16.mxu1 %v4866_v38  ;;  %v4934_v38 = vpack.c.bf16 %v3195_v26, %v3193_v50 }
 0x366   :  { %4905 = vmatpush1.bf16.msra.mxu0 %v4904_v35  ;;  %v3199_v35 = vld [vmem:[#allocation12 + $0x1f8] sm:$0xff] }
 0x367   :  { %4907 = vmatprep.subr.bf16.mxu0 %v4906_v0  ;;  %v4938_v0 = vpack.c.bf16 %v3199_v35, %v3197_v31 }
 0x368   :  { %4869 = vmatpush1.bf16.msra.mxu1 %v4868_v39  ;;  %v4940_v39 = vpack.c.bf16 %v3198_v57, %v3196_v49  ;;  %v3204_v57 = vld [vmem:[#allocation12 + $0x220] sm:$0xff] }
 0x369   :  { %4871 = vmatprep.subr.bf16.mxu1 %v4870_v37  ;;  %v4942_v37 = vpack.c.bf16 %v3203_v32, %v3201_v45  ;;  %v3209_v45 = vld [vmem:[#allocation12 + $0x248] sm:$0xff]  ;;  %v3211_v32 = vld [vmem:[#allocation12 + $0x258] sm:$0xff] }
 0x36a   :  { %4909 = vmatpush1.bf16.msra.mxu0 %v4908_v58  ;;  %v3421_v58 = vld [vmem:[%s5930_s7 + $0x8] sm:$0xff]  ;;  %v4950_v40 = vpack.c.bf16 %v3211_v32, %v3209_v45  ;;  %v3245_v32 = vld [vmem:[#allocation12 + $0x368] sm:$0xff] }
 0x36b   :  { %4911 = vmatprep.subr.bf16.mxu0 %v4910_v3  ;;  %v3438_v3 = vld [vmem:[%s5930_s7 + $0x90] sm:$0xff]  ;;  %v5008_v48 = vpack.c.bf16 %v3421_v58, %v3420_v36  ;;  %v3210_v36 = vld [vmem:[#allocation12 + $0x250] sm:$0xff]  ;;  %v3215_v58 = vld [vmem:[#allocation12 + $0x278] sm:$0xff] }
 0x36c   :  { %4873 = vmatpush1.bf16.msra.mxu1 %v4872_v17  ;;  %v5010_v17 = vpack.c.bf16 %v3439_v43, %v3438_v3  ;;  %v4952_v3 = vpack.c.bf16 %v3210_v36, %v3208_v33  ;;  %v3244_v33 = vld [vmem:[#allocation12 + $0x360] sm:$0xff]  ;;  %v3246_v36 = vld [vmem:[#allocation12 + $0x370] sm:$0xff] }
 0x36d   :  { %4875 = vmatprep.subr.bf16.mxu1 %v4874_v60  ;;  %v3440_v60 = vld [vmem:[%s5930_s7 + $0xa0] sm:$0xff] }
 0x36e   :  { %4913 = vmatpush1.bf16.msra.mxu0 %v4912_v61  ;;  %v5014_v61 = vpack.c.bf16 %v3441_v51, %v3440_v60  ;;  %v4958_v51 = vpack.c.bf16 %v3219_v59, %v3217_v6  ;;  %v3253_v6 = vld [vmem:[#allocation12 + $0x3a8] sm:$0xff]  ;;  %v3255_v59 = vld [vmem:[#allocation12 + $0x3b8] sm:$0xff] }
 0x36f   :  { %4915 = vmatprep.subr.bf16.mxu0 %v4914_v63  ;;  %v3424_v63 = vld [vmem:[%s5930_s7 + $0x20] sm:$0xff] }
 0x370   :  { %4877 = vmatpush1.bf16.msra.mxu1 %v4876_v42  ;;  %v3443_v42 = vld [vmem:[%s5930_s7 + $0xb8] sm:$0xff]  ;;  %v5016_v46 = vpack.c.bf16 %v3425_v1, %v3424_v63  ;;  %v3221_v63 = vld [vmem:[#allocation12 + $0x2a8] sm:$0xff]  ;;  %v3223_v1 = vld [vmem:[#allocation12 + $0x2b8] sm:$0xff] }
 0x371   :  { %5007 = vmatprep.subr.bf16.mxu1 %v5006_v5  ;;  %v5018_v13 = vpack.c.bf16 %v3443_v42, %v3442_v2  ;;  %v3213_v5 = vld [vmem:[#allocation12 + $0x268] sm:$0xff]  ;;  %v4962_v42 = vpack.c.bf16 %v3223_v1, %v3221_v63  ;;  %v3259_v1 = vld [vmem:[#allocation12 + $0x3d8] sm:$0xff] }
 0x372   :  { %4917 = vmatpush1.bf16.msra.mxu0 %v4916_v14  ;;  %v3426_v14 = vld [vmem:[%s5930_s7 + $0x30] sm:$0xff]  ;;  %v4954_v43 = vpack.c.bf16 %v3215_v58, %v3213_v5  ;;  %v3251_v58 = vld [vmem:[#allocation12 + $0x398] sm:$0xff] }
 0x373   :  { %3126 = vmatmul.mubr.f32.vlgmr.msra.gmra.mrb[6].mxu1 %v2028_v54  ;;  %4919 = vmatprep.subr.bf16.mxu0 %v4918_v15  ;;  %v3190_v54 = vld [vmem:[#allocation12 + $0x1b0] sm:$0xff]  ;;  %v3249_v5 = vld [vmem:[#allocation12 + $0x388] sm:$0xff] }
 0x374   :  { %v4932_v55 = vpack.c.bf16 %v3190_v54, %v3188_v9  ;;  %5009 = vmatpush3.bf16.msra.mxu1 %v5008_v48  ;;  %v3427_v15 = vld [vmem:[%s5930_s7 + $0x38] sm:$0xff]  ;;  %v3212_v48 = vld [vmem:[#allocation12 + $0x260] sm:$0xff]  ;;  %v3257_v63 = vld [vmem:[#allocation12 + $0x3c8] sm:$0xff] }
 0x375   :  { %5011 = vmatprep.subr.bf16.mxu1 %v5010_v17  ;;  %v5020_v16 = vpack.c.bf16 %v3427_v15, %v3426_v14  ;;  %v3214_v17 = vld [vmem:[#allocation12 + $0x270] sm:$0xff]  ;;  %v3225_v14 = vld [vmem:[#allocation12 + $0x2c8] sm:$0xff]  ;;  %v3227_v15 = vld [vmem:[#allocation12 + $0x2d8] sm:$0xff] }
 0x376   :  { %4921 = vmatpush1.bf16.msra.mxu0 %v4920_v4  ;;  %v3428_v4 = vld [vmem:[%s5930_s7 + $0x40] sm:$0xff]  ;;  %v4956_v60 = vpack.c.bf16 %v3214_v17, %v3212_v48  ;;  %v4966_v62 = vpack.c.bf16 %v3227_v15, %v3225_v14  ;;  %v3248_v48 = vld [vmem:[#allocation12 + $0x380] sm:$0xff]  ;;  %v3250_v17 = vld [vmem:[#allocation12 + $0x390] sm:$0xff] }
 0x377   :  { %4923 = vmatprep.subr.bf16.mxu0 %v4922_v29  ;;  %v3429_v29 = vld [vmem:[%s5930_s7 + $0x48] sm:$0xff]  ;;  %v3261_v14 = vld [vmem:[#allocation12 + $0x3e8] sm:$0xff]  ;;  %v3263_v15 = vld [vmem:[#allocation12 + $0x3f8] sm:$0xff] }
 0x378   :  { %5013 = vmatpush3.bf16.msra.mxu1 %v5012_v52  ;;  %v5024_v20 = vpack.c.bf16 %v3429_v29, %v3428_v4  ;;  %v3216_v52 = vld [vmem:[#allocation12 + $0x280] sm:$0xff]  ;;  %v3229_v4 = vld [vmem:[#allocation12 + $0x2e8] sm:$0xff]  ;;  %v3231_v29 = vld [vmem:[#allocation12 + $0x2f8] sm:$0xff] }
 0x379   :  { %5015 = vmatprep.subr.bf16.mxu1 %v5014_v61  ;;  %v3218_v61 = vld [vmem:[#allocation12 + $0x290] sm:$0xff]  ;;  %v4970_v53 = vpack.c.bf16 %v3231_v29, %v3229_v4 }
 0x37a   :  { %4925 = vmatpush1.bf16.msra.mxu0 %v4924_v24  ;;  %v3430_v24 = vld [vmem:[%s5930_s7 + $0x50] sm:$0xff]  ;;  %v4960_v2 = vpack.c.bf16 %v3218_v61, %v3216_v52  ;;  %v3252_v52 = vld [vmem:[#allocation12 + $0x3a0] sm:$0xff]  ;;  %v3254_v61 = vld [vmem:[#allocation12 + $0x3b0] sm:$0xff] }
 0x37b   :  { %4927 = vmatprep.subr.bf16.mxu0 %v4926_v22  ;;  %v3431_v22 = vld [vmem:[%s5930_s7 + $0x58] sm:$0xff] }
 0x37c   :  { %5017 = vmatpush3.bf16.msra.mxu1 %v5016_v46  ;;  %v5028_v19 = vpack.c.bf16 %v3431_v22, %v3430_v24  ;;  %v3220_v46 = vld [vmem:[#allocation12 + $0x2a0] sm:$0xff]  ;;  %v3233_v24 = vld [vmem:[#allocation12 + $0x308] sm:$0xff]  ;;  %v3235_v22 = vld [vmem:[#allocation12 + $0x318] sm:$0xff] }
 0x37d   :  { %5019 = vmatprep.subr.bf16.mxu1 %v5018_v13  ;;  %v3222_v13 = vld [vmem:[#allocation12 + $0x2b0] sm:$0xff]  ;;  %v4974_v10 = vpack.c.bf16 %v3235_v22, %v3233_v24  ;;  %v3434_v22 = vld [vmem:[%s5930_s7 + $0x70] sm:$0xff] }
 0x37e   :  { %4929 = vmatpush1.bf16.msra.mxu0 %v4928_v25  ;;  %v5876_v25 = vld [vmem:[#allocation11] sm:$0xf]  ;;  %v4964_v47 = vpack.c.bf16 %v3222_v13, %v3220_v46  ;;  %v3256_v46 = vld [vmem:[#allocation12 + $0x3c0] sm:$0xff]  ;;  %v3258_v13 = vld [vmem:[#allocation12 + $0x3d0] sm:$0xff] }
 0x37f   :  { %4931 = vmatprep.subr.bf16.mxu0 %v4930_v44  ;;  %v2547_v44 = vrot.slane %v5876_v25, %v5715_v12  ;;  %v2551_v9 = vrot.slane %v5876_v25, %v5720_v7  ;;  %v3262_v4 = vld [vmem:[#allocation12 + $0x3f0] sm:$0xff] }
 0x380   :  { %5021 = vmatpush3.bf16.msra.mxu1 %v5020_v16  ;;  %v3224_v16 = vld [vmem:[#allocation12 + $0x2c0] sm:$0xff] }
 0x381   :  { %5023 = vmatprep.subr.bf16.mxu1 %v5022_v18  ;;  %v3226_v18 = vld [vmem:[#allocation12 + $0x2d0] sm:$0xff] }
 0x382   :  { %4933 = vmatpush1.bf16.msra.mxu0 %v4932_v55  ;;  %v3200_v55 = vld [vmem:[#allocation12 + $0x200] sm:$0xff]  ;;  %v4968_v41 = vpack.c.bf16 %v3226_v18, %v3224_v16  ;;  %v5002_v16 = vpack.c.bf16 %v3263_v15, %v3261_v14 }
 0x383   :  { %4935 = vmatprep.subr.bf16.mxu0 %v4934_v38  ;;  %v3202_v38 = vld [vmem:[#allocation12 + $0x210] sm:$0xff]  ;;  %v3260_v18 = vld [vmem:[#allocation12 + $0x3e0] sm:$0xff] }
 0x384   :  { %5025 = vmatpush3.bf16.msra.mxu1 %v5024_v20  ;;  %v4944_v35 = vpack.c.bf16 %v3202_v38, %v3200_v55  ;;  %v3228_v20 = vld [vmem:[#allocation12 + $0x2e0] sm:$0xff]  ;;  %v3238_v38 = vld [vmem:[#allocation12 + $0x330] sm:$0xff]  ;;  %v5004_v29 = vpack.c.bf16 %v3262_v4, %v3260_v18 }
 0x385   :  { %5027 = vmatprep.subr.bf16.mxu1 %v5026_v23  ;;  %v3230_v23 = vld [vmem:[#allocation12 + $0x2f0] sm:$0xff]  ;;  %v3236_v55 = vld [vmem:[#allocation12 + $0x320] sm:$0xff] }
 0x386   :  { %4937 = vmatpush1.bf16.msra.mxu0 %v4936_v56  ;;  %v3207_v56 = vld [vmem:[#allocation12 + $0x238] sm:$0xff]  ;;  %v4972_v21 = vpack.c.bf16 %v3230_v23, %v3228_v20  ;;  %v3451_v23 = vld [vmem:[%s5930_s7 + $0xf8] sm:$0xff] }
 0x387   :  { %4939 = vmatprep.subr.bf16.mxu0 %v4938_v0  ;;  %v4946_v49 = vpack.c.bf16 %v3207_v56, %v3205_v30  ;;  %v3241_v30 = vld [vmem:[#allocation12 + $0x348] sm:$0xff]  ;;  %v3243_v56 = vld [vmem:[#allocation12 + $0x358] sm:$0xff] }
 0x388   :  { %5029 = vmatpush3.bf16.msra.mxu1 %v5028_v19  ;;  %v3232_v19 = vld [vmem:[#allocation12 + $0x300] sm:$0xff]  ;;  %v3432_v20 = vld [vmem:[%s5930_s7 + $0x60] sm:$0xff] }
 0x389   :  { %5031 = vmatprep.subr.bf16.mxu1 %v5030_v27  ;;  %v3234_v27 = vld [vmem:[#allocation12 + $0x310] sm:$0xff] }
 0x38a   :  { %4941 = vmatpush1.bf16.msra.mxu0 %v4940_v39  ;;  %v3206_v39 = vld [vmem:[#allocation12 + $0x230] sm:$0xff] }
 0x38b   :  { %4943 = vmatprep.subr.bf16.mxu0 %v4942_v37  ;;  %v4948_v37 = vpack.c.bf16 %v3206_v39, %v3204_v57  ;;  %v3240_v57 = vld [vmem:[#allocation12 + $0x340] sm:$0xff]  ;;  %v3242_v39 = vld [vmem:[#allocation12 + $0x350] sm:$0xff] }
 0x420   :  { %v2843_v54 = vpop.f32.mrb[4].mxu0 }
 0x421   :  { %v5048_v50 = vadd.f32 %v2843_v54, %v2547_v44  ;;  %v2845_v26 = vpop.f32.mrb[5].mxu0  ;;  %v3237_v44 = vld [vmem:[#allocation12 + $0x328] sm:$0xff]  ;;  %v2559_v54 = vrot.slane %v5876_v25, %v1111_v34  ;;  %v4984_v34 = vpack.c.bf16 %v3242_v39, %v3240_v57 }
 0x422   :  { %v5049_v28 = vadd.f32 %v2845_v26, %v2551_v9  ;;  %v3239_v9 = vld [vmem:[#allocation12 + $0x338] sm:$0xff] }
 0x423   :  { %v3132_v0 = vmax.f32 %v5048_v50, 0.0  ;;  %v4976_v50 = vpack.c.bf16 %v3234_v27, %v3232_v19  ;;  %v4978_v26 = vpack.c.bf16 %v3239_v9, %v3237_v44  ;;  %v3264_v19 = vld [vmem:[#allocation14] sm:$0x3] }
 0x424   :  { %v3133_v31 = vmax.f32 %v5049_v28, 0.0  ;;  %v3269_v27 = vrot.slane %v3264_v19, %v5715_v12  ;;  %v3273_v44 = vrot.slane %v3264_v19, %v5720_v7 }
 0x426   :  { %3340 = vmatprep.mubr.f32.mxu0 %v3133_v31 }
 0x427   :  { %3341 = vmatmul.mubr.f32.vlgmr.msra.gmra.mrb[6].mxu0 %v3132_v0  ;;  %v4980_v0 = vpack.c.bf16 %v3238_v38, %v3236_v55 }
 0x428   :  { %4945 = vmatpush1.bf16.msra.mxu0 %v4944_v35 }
 0x429   :  { %4947 = vmatprep.subr.bf16.mxu0 %v4946_v49  ;;  %v4982_v49 = vpack.c.bf16 %v3243_v56, %v3241_v30  ;;  %v3562_v56 = vld [vmem:[#allocation15] ss:$0 sm:$0xff] }
 0x42c   :  { %4949 = vmatpush1.bf16.msra.mxu0 %v4948_v37  ;;  %v3247_v37 = vld [vmem:[#allocation12 + $0x378] sm:$0xff] }
 0x42d   :  { %4951 = vmatprep.subr.bf16.mxu0 %v4950_v40  ;;  %v4986_v40 = vpack.c.bf16 %v3247_v37, %v3245_v32 }
 0x430   :  { %4953 = vmatpush1.bf16.msra.mxu0 %v4952_v3  ;;  %v4988_v3 = vpack.c.bf16 %v3246_v36, %v3244_v33 }
 0x431   :  { %4955 = vmatprep.subr.bf16.mxu0 %v4954_v43  ;;  %v4990_v43 = vpack.c.bf16 %v3251_v58, %v3249_v5 }
 0x434   :  { %4957 = vmatpush1.bf16.msra.mxu0 %v4956_v60  ;;  %v4992_v60 = vpack.c.bf16 %v3250_v17, %v3248_v48 }
 0x435   :  { %4959 = vmatprep.subr.bf16.mxu0 %v4958_v51  ;;  %v4994_v51 = vpack.c.bf16 %v3255_v59, %v3253_v6 }
 0x438   :  { %4961 = vmatpush1.bf16.msra.mxu0 %v4960_v2  ;;  %v4996_v2 = vpack.c.bf16 %v3254_v61, %v3252_v52 }
 0x439   :  { %4963 = vmatprep.subr.bf16.mxu0 %v4962_v42  ;;  %v4998_v42 = vpack.c.bf16 %v3259_v1, %v3257_v63 }
 0x43c   :  { %4965 = vmatpush1.bf16.msra.mxu0 %v4964_v47  ;;  %v5000_v47 = vpack.c.bf16 %v3258_v13, %v3256_v46 }
 0x43d   :  { %4967 = vmatprep.subr.bf16.mxu0 %v4966_v62  ;;  %v2555_v62 = vrot.slane %v5876_v25, %v1107_v8  ;;  %v5032_v8 = vpack.c.bf16 %v3433_v11, %v3432_v20  ;;  %v3450_v25 = vld [vmem:[%s5930_s7 + $0xf0] sm:$0xff] }
 0x43e   :  { %v5034_v24 = vpack.c.bf16 %v3451_v23, %v3450_v25 }
 0x43f   :  { %5033 = vmatpush3.bf16.msra.mxu1 %v5032_v8 }
 0x440   :  { %4969 = vmatpush1.bf16.msra.mxu0 %v4968_v41  ;;  %5035 = vmatprep.subr.bf16.mxu1 %v5034_v24 }
 0x441   :  { %4971 = vmatprep.subr.bf16.mxu0 %v4970_v53 }
 0x444   :  { %4973 = vmatpush1.bf16.msra.mxu0 %v4972_v21  ;;  %v3435_v21 = vld [vmem:[%s5930_s7 + $0x78] sm:$0xff]  ;;  %s5334_s7 = smov [#allocation17]  }
 0x445   :  { %4975 = vmatprep.subr.bf16.mxu0 %v4974_v10  ;;  %v5036_v10 = vpack.c.bf16 %v3435_v21, %v3434_v22  ;;  %s3549_s19 = sshll.u32 %s5334_s7, 4  ;;  %s3550_s19 = int_to_ptr.vmem [resolvable:$true] %s3549_s19 }
 0x446   :  { %v3127_v28 = vpop.f32.mrb[6].mxu1  ;;  %s5282_s20 = scalar_lea.vmem %s3550_s19, 32  ;;  %p5287_p9 = scmp.lt.s32.totalorder %s3550_s19, %s3550_s19 }
 0x447   :  { %v3129_v31 = vpop.f32.mrb[7].mxu1  ;;  %v5050_v41 = vadd.f32 %v3127_v28, %v2555_v62  ;;  %5037 = vmatpush3.bf16.msra.mxu1 %v5036_v10  ;;  %p5283_p8 = scmp.ne.s32.totalorder %s3550_s19, %s5282_s20  ;;  %p5288_p10 = scmp.lt.s32.totalorder %s5282_s20, %s5282_s20 }
 0x448   :  { %v5051_v35 = vadd.f32 %v3129_v31, %v2559_v54  ;;  %4977 = vmatpush1.bf16.msra.mxu0 %v4976_v50 }
 0x449   :  { %4979 = vmatprep.subr.bf16.mxu0 %v4978_v26  ;;  %v3134_v53 = vmax.f32 %v5050_v41, 0.0  ;;  %p5289_p11 = por %p5288_p10, %p5287_p9 }
 0x44a   :  { %v3135_v45 = vmax.f32 %v5051_v35, 0.0 }
 0x44b   :  { %p5290_p12 = pnand %p5289_p11, %p5283_p8 }
 0x44c   :  { %4981 = vmatpush1.bf16.msra.mxu0 %v4980_v0  ;;  %3411 = vmatprep.mubr.f32.mxu0 %v3135_v45 }
 0x44d   :  { %4983 = vmatprep.subr.bf16.mxu0 %v4982_v49 }
 0x450   :  { %4985 = vmatpush1.bf16.msra.mxu0 %v4984_v34 }
 0x451   :  { %4987 = vmatprep.subr.bf16.mxu0 %v4986_v40 }
 0x454   :  { %4989 = vmatpush1.bf16.msra.mxu0 %v4988_v3 }
 0x455   :  { %4991 = vmatprep.subr.bf16.mxu0 %v4990_v43 }
 0x458   :  { %4993 = vmatpush1.bf16.msra.mxu0 %v4992_v60 }
 0x459   :  { %4995 = vmatprep.subr.bf16.mxu0 %v4994_v51 }
 0x45c   :  { %4997 = vmatpush1.bf16.msra.mxu0 %v4996_v2 }
 0x45d   :  { %4999 = vmatprep.subr.bf16.mxu0 %v4998_v42 }
 0x460   :  { %5001 = vmatpush1.bf16.msra.mxu0 %v5000_v47 }
 0x461   :  { %5003 = vmatprep.subr.bf16.mxu0 %v5002_v16 }
 0x464   :  { %5005 = vmatpush1.bf16.msra.mxu0 %v5004_v29 }
 0x467   :  { %3412 = vmatmul.mubr.f32.vlgmr.msra.gmra.mrb[6].mxu0 %v3134_v53 }
 0x53a   :  { %v3413_v9 = vpop.f32.mrb[6].mxu0 }
 0x53b   :  { %v5052_v54 = vadd.f32 %v3413_v9, %v3269_v27  ;;  %v3415_v50 = vpop.f32.mrb[7].mxu0 }
 0x53c   :  { %v5053_v26 = vadd.f32 %v3415_v50, %v3273_v44 }
 0x53d   :  { %v3418_v38 = vmax.f32 %v5052_v54, 0.0 }
 0x53e   :  { %v3419_v55 = vmax.f32 %v5053_v26, 0.0 }
 0x540   :  { %3523 = vmatprep.mubr.f32.mxu1 %v3419_v55 }
 0x541   :  { %3524 = vmatmul.mubr.f32.vlgmr.msra.gmra.mrb[8].mxu1 %v3418_v38 }
 0x614   :  { %v3595_v28 = vpop.f32.mrb[8].mxu1 }
 0x615   :  { %v3596_v30 = vpop.f32.mrb[9].mxu1 }
 0x616   :  { %v3597_v31 = vadd.f32 %v3596_v30, %v3595_v28 }
 0x618   :  { %v3526_v35 = vadd.f32 %v3597_v31, %v3562_v56 }
 0x61a   :  { %v3530_v0 = vsel %vm3529_vm4, %v3526_v35, -inf }
 0x61b   :  { %3531 = vmax.xlane.f32.xlu0 %v3530_v0 }
 0x6a8   :  { %v3532_v12 = vpop.xlane.xlu0 %3531 }
 0x6a9   :  { %v3533_v49 = vsub.f32 %v3526_v35, %v3532_v12 }
 0x6ab   :  { %v3534_v7 = vmul.f32 1.442695, %v3533_v49 }
 0x6ad   :  { %5101 = vpow2.f32 %v3534_v7 }
 0x6b7   :  { %v5102_v57 = vpop.eup %5101 }
 0x6b8   :  { %v3536_v39 = vsel %vm3529_vm4, %v5102_v57, 0.0 }
 0x6b9   :  { %3537 = vadd.xlane.f32.xlu0 %v3536_v39 }
 0x746   :  { %v3538_v45 = vpop.xlane.xlu0 %3537 }
 0x747   :  { %5103 = vlog2.f32 %v3538_v45 }
 0x751   :  { %v5104_v32 = vpop.eup %5103 }
 0x752   :  { %v3540_v37 = vmul.f32 0.6931472, %v5104_v32 }
 0x754   :  { %v3541_v34 = vsub.f32 %v3533_v49, %v3540_v37 }
 0x756   :  { %3542 = vst.msk [vmem:[#allocation17] sm:$0x3] %vm3529_vm4, %v3541_v34 }
 0x757   :  { %5293 = shalt.err (!%p5290_p12)
}
 0x758   :  { %s5294_s25 = scalar_lea.hbm %s5932_s9, 32 }
 0x759   :  { %p5295_p13 = scmp.ne.s32.totalorder %s5932_s9, %s5294_s25  ;;  %p5298_p0 = scmp.lt.u32.totalorder %s5294_s25, %s5932_s9 }
 0x75b   :  { %p5300_p1 = pnand %p5298_p0, %p5295_p13 }
 0x75d   :  { %5303 = shalt.err (!%p5300_p1)
}
 0x75e   :  { %3552 = dma.vmem_to_hbm [thread:$0]  %s3550_s19, 32, %s5932_s9, [#allocation5]  }
 0x75f   :  { %5314 = dma.done.wait [#allocation5], 32  }
 0x760   :  { %5315 = vsyncadd [#allocation5], 4294967264 }
 0x761   :  { %3556 = vsyncpa [#allocation4], 1 }
 0x762   :  { %3557 = vsyncpa [#allocation7], 1 }
 0x763   :  { %3558 = vsyncpa [#allocation10], 1 }
 0x764   :  { %3559 = vsyncpa [#allocation13], 1 }
 0x765   :  { %3560 = vsyncpa [#allocation16], 1 }
 0x766   :  { %3561 = vsyncpa [#allocation5], 1 }

</bundles_post_ra>
